<compile_context>
chip_gen: v7x
topology: tpu7x:2x2x1
jax: 0.10.0
libtpu: 0.0.40
codegen_flags: <defaults>
</compile_context>

<pallas_src>
import numpy as np

import jax
import jax.numpy as jnp
from jax.experimental import pallas as pl
from jax.experimental.pallas import tpu as pltpu

_BF = jnp.bfloat16
_F32 = jnp.float32
_EPS = 1e-5

# Tap order used everywhere (weights, masks, 1/4-res shift matrices): k = (dy+1)*3 + (dx+1).
_TAPS = tuple((dy, dx) for dy in (-1, 0, 1) for dx in (-1, 0, 1))

# Column order of the packed per-channel parameter table (one DMA for all biases / BN params).
_PCOL_NAMES = tuple(
    ["d1_b", "d2_b", "bt_b", "u1_b", "u2_b"]
    + ["%s_%s" % (blk, p) for blk in ("d1r", "d2r", "btr", "u1r")
       for p in ("b1", "g1", "be1", "b2", "g2", "be2")])
_PCOL = {name: i for i, name in enumerate(_PCOL_NAMES)}


# ---------------------------------------------------------------------------
# Host-precomputed constants (only tiny ones remain; no full/half-res M x M matrices).
# ---------------------------------------------------------------------------
def _tap_masks(n, h, w):
    """(9, 1, M) f32 masks: mask[k,0,p]==1 iff pixel p shifted by tap k stays in-bounds."""
    m = n * h * w
    p = np.arange(m)
    x = p % w
    y = (p // w) % h
    out = np.zeros((9, 1, m), np.float32)
    for k, (dy, dx) in enumerate(_TAPS):
        ok = (y + dy >= 0) & (y + dy < h) & (x + dx >= 0) & (x + dx < w)
        out[k, 0, :] = ok
    return out


def _shift_mats(n, h, w):
    """T[k] (M,M): right-multiplying a (C,M) activation by T[k] yields the 3x3-conv tap-k
    shifted activation with zero padding=1.  Only used at 1/4 resolution (M tiny)."""
    m = n * h * w
    nn, yy, xx = np.meshgrid(np.arange(n), np.arange(h), np.arange(w), indexing="ij")
    r_out = (nn * h + yy) * w + xx
    mats = []
    for dy, dx in _TAPS:
        ys, xs = yy + dy, xx + dx
        ok = (ys >= 0) & (ys < h) & (xs >= 0) & (xs < w)
        r_in = (nn * h + np.clip(ys, 0, h - 1)) * w + np.clip(xs, 0, w - 1)
        t = np.zeros((m, m), np.float32)
        t[r_in[ok], r_out[ok]] = 1.0
        mats.append(t)
    return np.stack(mats)


def _pool_mat(n, h, w):
    """(M_in, M_out): right-multiply to average-pool 2x2 / stride 2."""
    hh, wh = h // 2, w // 2
    p = np.zeros((n * h * w, n * hh * wh), np.float32)
    for b in range(n):
        for y in range(hh):
            for x in range(wh):
                ro = (b * hh + y) * wh + x
                for dy in range(2):
                    for dx in range(2):
                        ri = (b * h + 2 * y + dy) * w + 2 * x + dx
                        p[ri, ro] = 0.25
    return p


def _upsample_mats(n, h, w):
    """U[j] (M_in, M_out): scatter matrices for ConvTranspose2d(k=2, s=2), tap j=(ky,kx)."""
    mi, mo = n * h * w, n * (2 * h) * (2 * w)
    mats = []
    for ky in range(2):
        for kx in range(2):
            u = np.zeros((mi, mo), np.float32)
            for b in range(n):
                for y in range(h):
                    for x in range(w):
                        ri = (b * h + y) * w + x
                        ro = (b * 2 * h + 2 * y + ky) * (2 * w) + 2 * x + kx
                        u[ri, ro] = 1.0
            mats.append(u)
    return np.stack(mats)


def make_consts(n, h, w, dtype=_BF):
    h1, w1 = h // 2, w // 2
    h2, w2 = h // 4, w // 4
    return dict(
        mask0=jnp.asarray(_tap_masks(n, h, w)),             # (9, 1, M0) f32
        mask1=jnp.asarray(_tap_masks(n, h1, w1)),           # (9, 1, M1) f32
        s2=jnp.asarray(_shift_mats(n, h2, w2), dtype),      # (9, M2, M2) bf16 (tiny)
        pool0=jnp.asarray(_pool_mat(n, h, w), dtype),       # (M0, M1) bf16
        pool1=jnp.asarray(_pool_mat(n, h1, w1), dtype),     # (M1, M2) bf16
        ups=jnp.asarray(_upsample_mats(n, h2, w2), dtype),  # (4, M2, M1) bf16
    )


# ---------------------------------------------------------------------------
# Kernel (single pallas_call; activations live as (channels, N*H*W) -> lane-dense pixels)
# ---------------------------------------------------------------------------
def _make_kernel(c1, c2, co_pad, w0, w1):
    offs0 = [dy * w0 + dx for dy, dx in _TAPS]   # flat-pixel offsets, full resolution
    offs1 = [dy * w1 + dx for dy, dx in _TAPS]   # flat-pixel offsets, half resolution

    def kernel(x_ref, mask0_ref, mask1_ref, s2_ref, pool0_ref, pool1_ref, ups_ref,
               trow_ref, ptab_ref,
               d1_w, d1r_w1, d1r_w2,
               d2_w, d2r_w1, d2r_w2,
               bt_w, btr_w1, btr_w2,
               u1r_w1, u1r_w2,
               u1_w, u2_w,
               out_ref):

        def pcol(name, c):
            # packed per-channel params: leading-dim index (proven pattern) + row slice.
            return ptab_ref[_PCOL[name]][0:c, :]            # (c, 1) f32

        def silu(v):
            # exact x*sigmoid(x) with a single EUP op: sigmoid(x) = 0.5*tanh(0.5x)+0.5
            return v * (0.5 * jnp.tanh(0.5 * v) + 0.5)

        def batchnorm(y, gamma, beta):
            # Training-mode BatchNorm2d: per-channel stats over all N*H*W lanes, biased var.
            m = y.shape[1]
            mean = jnp.sum(y, axis=1, keepdims=True) * (1.0 / m)
            cen = y - mean
            var = jnp.sum(cen * cen, axis=1, keepdims=True) * (1.0 / m)
            return cen * jax.lax.rsqrt(var + _EPS) * gamma + beta

        def tree_sum(parts):
            # pairwise accumulation: shorter dependency chain than a serial 9-deep add.
            while len(parts) > 1:
                nxt = [parts[i] + parts[i + 1] for i in range(0, len(parts) - 1, 2)]
                if len(parts) % 2:
                    nxt.append(parts[-1])
                parts = nxt
            return parts[0]

        def conv3x3_roll(a, mask_ref, w_ref, offs):
            # a: (Cin, M) f32.  Tap shift = lane roll + boundary mask; weight matmul on MXU.
            m = a.shape[1]
            parts = []
            for k, off in enumerate(offs):
                if off == 0:                                 # centre tap: no shift, mask == 1
                    sh = a.astype(_BF)
                else:
                    rolled = pltpu.roll(a, (-off) % m, axis=1)   # rolled[p] = a[p + off]
                    sh = (rolled * mask_ref[k]).astype(_BF)
                parts.append(jnp.dot(w_ref[k], sh, preferred_element_type=_F32))
            return tree_sum(parts)

        def conv3x3_mat(a, s_ref, w_ref):
            # 1/4-res path only: keep tiny 0/1 shift matrices (M2 < vreg lane width).
            a_bf = a.astype(_BF)
            parts = []
            for k in range(9):
                sh = jnp.dot(a_bf, s_ref[k], preferred_element_type=_F32).astype(_BF)
                parts.append(jnp.dot(w_ref[k], sh, preferred_element_type=_F32))
            return tree_sum(parts)

        def res_block(a, conv1, conv2, blk, c):
            # PyTorch ResidualBlock: act(bn1(conv1(x))) -> bn2(conv2(.)) -> act(. + x)
            hdn = silu(batchnorm(conv1(a) + pcol(blk + "_b1", c),
                                 pcol(blk + "_g1", c), pcol(blk + "_be1", c)))
            hdn = batchnorm(conv2(hdn) + pcol(blk + "_b2", c),
                            pcol(blk + "_g2", c), pcol(blk + "_be2", c))
            return silu(hdn + a)

        conv_l0 = lambda v, wr: conv3x3_roll(v, mask0_ref, wr, offs0)
        conv_l1 = lambda v, wr: conv3x3_roll(v, mask1_ref, wr, offs1)
        conv_l2 = lambda v, wr: conv3x3_mat(v, s2_ref, wr)

        x = x_ref[...]                                        # (cin, M0) f32

        # ---- down1 (full res) ----
        e1 = silu(conv_l0(x, d1_w) + pcol("d1_b", c1))
        e1 = res_block(e1, lambda v: conv_l0(v, d1r_w1),
                       lambda v: conv_l0(v, d1r_w2), "d1r", c1)        # (c1, M0)
        p1 = jnp.dot(e1.astype(_BF), pool0_ref[...], preferred_element_type=_F32)

        # ---- down2 (1/2 res) ----
        e2 = silu(conv_l1(p1, d2_w) + pcol("d2_b", c2))
        e2 = res_block(e2, lambda v: conv_l1(v, d2r_w1),
                       lambda v: conv_l1(v, d2r_w2), "d2r", c2)        # (c2, M1)
        p2 = jnp.dot(e2.astype(_BF), pool1_ref[...], preferred_element_type=_F32)

        # ---- bottleneck (1/4 res) + t_embed (fused) ----
        b = silu(conv_l2(p2, bt_w) + pcol("bt_b", c2))
        b = res_block(b, lambda v: conv_l2(v, btr_w1),
                      lambda v: conv_l2(v, btr_w2), "btr", c2)         # (c2, M2)
        b = b + trow_ref[...]                                          # + t_embed per image

        # ---- up1: ConvTranspose2d(k=2, s=2) via 4 scatter matmuls, SiLU, ResBlock ----
        b_bf = b.astype(_BF)
        taps = []
        for j in range(4):
            t = jnp.dot(u1_w[j], b_bf, preferred_element_type=_F32).astype(_BF)
            taps.append(jnp.dot(t, ups_ref[j], preferred_element_type=_F32))
        up = silu(tree_sum(taps) + pcol("u1_b", c1))
        d1 = res_block(up, lambda v: conv_l1(v, u1r_w1),
                       lambda v: conv_l1(v, u1r_w2), "u1r", c1)        # (c1, M1)

        # TODO(synk): reference `d1 = d1 + e2` has mismatched channel counts (base vs 2*base)
        # and would raise in PyTorch; add against e2's first `base` channels instead.
        d1 = d1 + e2[:c1, :]

        # ---- up2: 1x1 conv; (co_pad, M1) sublane- and lane-dense output store ----
        out = jnp.dot(u2_w[...], d1.astype(_BF), preferred_element_type=_F32)
        out_ref[...] = (out + pcol("u2_b", co_pad)).astype(out_ref.dtype)

    return kernel


# ---------------------------------------------------------------------------
# pallas_call wrapper
# ---------------------------------------------------------------------------
def _zero_map(nd):
    return lambda i: (0,) * nd


def advanced_unet_forward(params, consts, x_nchw, t_embed):
    n, cin, h, w = x_nchw.shape
    assert h % 4 == 0 and w % 4 == 0
    c1 = params["d1_w"].shape[0]
    c2 = params["d2_w"].shape[0]
    h1, w1 = h // 2, w // 2
    h2, w2 = h // 4, w // 4
    m0, m1, m2 = n * h * w, n * h1 * w1, n * h2 * w2
    co_pad = max(8, -(-cin // 8) * 8)          # pad 1x1-conv out-channels -> dense store

    def conv_taps(wt):  # (Cout, Cin, 3, 3) -> (9, Cout, Cin) bf16, tap order = _TAPS
        co, ci = wt.shape[0], wt.shape[1]
        return jnp.transpose(wt, (2, 3, 0, 1)).reshape(9, co, ci).astype(_BF)

    # ---- packed per-channel parameter table: (n_cols, Cmax, 1) f32 (single DMA) ----
    vecs = {
        "d1_b": params["d1_b"], "d2_b": params["d2_b"], "bt_b": params["bt_b"],
        "u1_b": params["u1_b"], "u2_b": params["u2_b"],
    }
    for blk, key in (("d1r", "d1_rb"), ("d2r", "d2_rb"), ("btr", "bt_rb"), ("u1r", "u1_rb")):
        rb = params[key]
        vecs[blk + "_b1"] = rb["conv1_b"]; vecs[blk + "_g1"] = rb["bn1_g"]
        vecs[blk + "_be1"] = rb["bn1_b"]
        vecs[blk + "_b2"] = rb["conv2_b"]; vecs[blk + "_g2"] = rb["bn2_g"]
        vecs[blk + "_be2"] = rb["bn2_b"]
    cmax = max(co_pad, max(int(v.shape[0]) for v in vecs.values()))
    ptab = jnp.stack(
        [jnp.pad(vecs[name].astype(_F32), (0, cmax - int(vecs[name].shape[0]))).reshape(cmax, 1)
         for name in _PCOL_NAMES], axis=0)                      # (29, cmax, 1)

    flat_inputs = [
        jnp.transpose(x_nchw, (1, 0, 2, 3)).reshape(cin, m0).astype(_F32),
        consts["mask0"], consts["mask1"], consts["s2"],
        consts["pool0"], consts["pool1"], consts["ups"],
        jnp.repeat(t_embed.astype(_F32), h2 * w2).reshape(1, m2),
        ptab,
        conv_taps(params["d1_w"]),
        conv_taps(params["d1_rb"]["conv1_w"]), conv_taps(params["d1_rb"]["conv2_w"]),
        conv_taps(params["d2_w"]),
        conv_taps(params["d2_rb"]["conv1_w"]), conv_taps(params["d2_rb"]["conv2_w"]),
        conv_taps(params["bt_w"]),
        conv_taps(params["bt_rb"]["conv1_w"]), conv_taps(params["bt_rb"]["conv2_w"]),
        conv_taps(params["u1_rb"]["conv1_w"]), conv_taps(params["u1_rb"]["conv2_w"]),
        # ConvTranspose2d weight (Cin, Cout, 2, 2) -> (4, Cout, Cin) bf16
        jnp.transpose(params["u1_w"], (2, 3, 1, 0)).reshape(4, c1, c2).astype(_BF),
        # final 1x1 conv, zero-padded to co_pad output rows for a sublane-dense store
        jnp.pad(params["u2_w"][:, :, 0, 0], ((0, co_pad - cin), (0, 0))).astype(_BF),
    ]

    kernel = _make_kernel(c1, c2, co_pad, w, w1)
    out_pad = pl.pallas_call(
        kernel,
        grid=(1,),
        in_specs=[pl.BlockSpec(a.shape, _zero_map(a.ndim)) for a in flat_inputs],
        out_specs=pl.BlockSpec((co_pad, m1), _zero_map(2)),
        out_shape=jax.ShapeDtypeStruct((co_pad, m1), _F32),
        compiler_params=pltpu.CompilerParams(
            dimension_semantics=("arbitrary",),
            # Actual resident footprint is ~3 MiB (double-buffered constants + weights);
            # 16 MiB leaves generous headroom and stays inside every generation's default
            # scoped-VMEM limit (does not crowd v7x's 64 MiB physical VMEM).
            vmem_limit_bytes=16 * 1024 * 1024,
        ),
    )(*flat_inputs)
    out = out_pad[:cin]
    return jnp.transpose(out.reshape(cin, n, h1, w1), (1, 0, 2, 3))    # -> NCHW


# ---------------------------------------------------------------------------
# Parameter init (deterministic, shapes taken from the PyTorch module __init__)
# ---------------------------------------------------------------------------
def init_params(key, in_channels=3, base=16):
    def conv_p(k, cout, cin, ksz):
        k1, k2 = jax.random.split(k)
        fan = cin * ksz * ksz
        wmat = jax.random.normal(k1, (cout, cin, ksz, ksz), jnp.float32) / jnp.sqrt(fan)
        bvec = jax.random.normal(k2, (cout,), jnp.float32) * 0.01
        return wmat, bvec

    def rb_p(k, c):
        k1, k2 = jax.random.split(k)
        w1, b1 = conv_p(k1, c, c, 3)
        w2, b2 = conv_p(k2, c, c, 3)
        return dict(conv1_w=w1, conv1_b=b1, bn1_g=jnp.ones((c,), jnp.float32),
                    bn1_b=jnp.zeros((c,), jnp.float32),
                    conv2_w=w2, conv2_b=b2, bn2_g=jnp.ones((c,), jnp.float32),
                    bn2_b=jnp.zeros((c,), jnp.float32))

    keys = jax.random.split(key, 9)
    c1, c2 = base, base * 2
    p = {}
    p["d1_w"], p["d1_b"] = conv_p(keys[0], c1, in_channels, 3)
    p["d1_rb"] = rb_p(keys[1], c1)
    p["d2_w"], p["d2_b"] = conv_p(keys[2], c2, c1, 3)
    p["d2_rb"] = rb_p(keys[3], c2)
    p["bt_w"], p["bt_b"] = conv_p(keys[4], c2, c2, 3)
    p["bt_rb"] = rb_p(keys[5], c2)
    k1, k2 = jax.random.split(keys[6])
    p["u1_w"] = jax.random.normal(k1, (c2, c1, 2, 2), jnp.float32) / jnp.sqrt(c2 * 4)
    p["u1_b"] = jax.random.normal(k2, (c1,), jnp.float32) * 0.01
    p["u1_rb"] = rb_p(keys[7], c1)
    p["u2_w"], p["u2_b"] = conv_p(keys[8], in_channels, c1, 1)
    return p


if __name__ == "__main__":
    IN_C, BASE, N, H, W = 3, 16, 2, 16, 16
    key = jax.random.PRNGKey(0)
    kp, kx, kt = jax.random.split(key, 3)
    params = init_params(kp, in_channels=IN_C, base=BASE)
    consts = make_consts(N, H, W)
    x = jax.random.normal(kx, (N, IN_C, H, W), jnp.float32)
    t_embed = jax.random.normal(kt, (N,), jnp.float32)

    fwd = jax.jit(advanced_unet_forward)
    out = fwd(params, consts, x, t_embed)
    jax.block_until_ready(out)
    assert out.shape == (N, IN_C, H // 2, W // 2), out.shape
    assert bool(jnp.all(jnp.isfinite(out)))
    print("KERNEL_OK")
</pallas_src>

<mosaic_0001>
module attributes {stable_mosaic.version = 11 : i64} {
  func.func @kernel(%arg0: i32, %arg1: memref<3x512xf32, #tpu.memory_space<vmem>>, %arg2: memref<9x1x512xf32, #tpu.memory_space<vmem>>, %arg3: memref<9x1x128xf32, #tpu.memory_space<vmem>>, %arg4: memref<9x32x32xbf16, #tpu.memory_space<vmem>>, %arg5: memref<512x128xbf16, #tpu.memory_space<vmem>>, %arg6: memref<128x32xbf16, #tpu.memory_space<vmem>>, %arg7: memref<4x32x128xbf16, #tpu.memory_space<vmem>>, %arg8: memref<1x32xf32, #tpu.memory_space<vmem>>, %arg9: memref<29x32x1xf32, #tpu.memory_space<vmem>>, %arg10: memref<9x16x3xbf16, #tpu.memory_space<vmem>>, %arg11: memref<9x16x16xbf16, #tpu.memory_space<vmem>>, %arg12: memref<9x16x16xbf16, #tpu.memory_space<vmem>>, %arg13: memref<9x32x16xbf16, #tpu.memory_space<vmem>>, %arg14: memref<9x32x32xbf16, #tpu.memory_space<vmem>>, %arg15: memref<9x32x32xbf16, #tpu.memory_space<vmem>>, %arg16: memref<9x32x32xbf16, #tpu.memory_space<vmem>>, %arg17: memref<9x32x32xbf16, #tpu.memory_space<vmem>>, %arg18: memref<9x32x32xbf16, #tpu.memory_space<vmem>>, %arg19: memref<9x16x16xbf16, #tpu.memory_space<vmem>>, %arg20: memref<9x16x16xbf16, #tpu.memory_space<vmem>>, %arg21: memref<4x16x32xbf16, #tpu.memory_space<vmem>>, %arg22: memref<8x16xbf16, #tpu.memory_space<vmem>>, %arg23: memref<8x128xf32, #tpu.memory_space<vmem>>) attributes {dimension_semantics = [#tpu.dimension_semantics<arbitrary>], iteration_bounds = array<i64: 1>, scalar_prefetch = 0 : i64, scratch_operands = 0 : i64, tpu.core_type = #tpu.core_type<tc>, window_params = [{pipeline_mode = #tpu.pipeline_mode<synchronous>, transform_indices = @transform_0, window_bounds = array<i64: 3, 512>}, {pipeline_mode = #tpu.pipeline_mode<synchronous>, transform_indices = @transform_1, window_bounds = array<i64: 9, 1, 512>}, {pipeline_mode = #tpu.pipeline_mode<synchronous>, transform_indices = @transform_2, window_bounds = array<i64: 9, 1, 128>}, {pipeline_mode = #tpu.pipeline_mode<synchronous>, transform_indices = @transform_3, window_bounds = array<i64: 9, 32, 32>}, {pipeline_mode = #tpu.pipeline_mode<synchronous>, transform_indices = @transform_4, window_bounds = array<i64: 512, 128>}, {pipeline_mode = #tpu.pipeline_mode<synchronous>, transform_indices = @transform_5, window_bounds = array<i64: 128, 32>}, {pipeline_mode = #tpu.pipeline_mode<synchronous>, transform_indices = @transform_6, window_bounds = array<i64: 4, 32, 128>}, {pipeline_mode = #tpu.pipeline_mode<synchronous>, transform_indices = @transform_7, window_bounds = array<i64: 1, 32>}, {pipeline_mode = #tpu.pipeline_mode<synchronous>, transform_indices = @transform_8, window_bounds = array<i64: 29, 32, 1>}, {pipeline_mode = #tpu.pipeline_mode<synchronous>, transform_indices = @transform_9, window_bounds = array<i64: 9, 16, 3>}, {pipeline_mode = #tpu.pipeline_mode<synchronous>, transform_indices = @transform_10, window_bounds = array<i64: 9, 16, 16>}, {pipeline_mode = #tpu.pipeline_mode<synchronous>, transform_indices = @transform_11, window_bounds = array<i64: 9, 16, 16>}, {pipeline_mode = #tpu.pipeline_mode<synchronous>, transform_indices = @transform_12, window_bounds = array<i64: 9, 32, 16>}, {pipeline_mode = #tpu.pipeline_mode<synchronous>, transform_indices = @transform_13, window_bounds = array<i64: 9, 32, 32>}, {pipeline_mode = #tpu.pipeline_mode<synchronous>, transform_indices = @transform_14, window_bounds = array<i64: 9, 32, 32>}, {pipeline_mode = #tpu.pipeline_mode<synchronous>, transform_indices = @transform_15, window_bounds = array<i64: 9, 32, 32>}, {pipeline_mode = #tpu.pipeline_mode<synchronous>, transform_indices = @transform_16, window_bounds = array<i64: 9, 32, 32>}, {pipeline_mode = #tpu.pipeline_mode<synchronous>, transform_indices = @transform_17, window_bounds = array<i64: 9, 32, 32>}, {pipeline_mode = #tpu.pipeline_mode<synchronous>, transform_indices = @transform_18, window_bounds = array<i64: 9, 16, 16>}, {pipeline_mode = #tpu.pipeline_mode<synchronous>, transform_indices = @transform_19, window_bounds = array<i64: 9, 16, 16>}, {pipeline_mode = #tpu.pipeline_mode<synchronous>, transform_indices = @transform_20, window_bounds = array<i64: 4, 16, 32>}, {pipeline_mode = #tpu.pipeline_mode<synchronous>, transform_indices = @transform_21, window_bounds = array<i64: 8, 16>}, {pipeline_mode = #tpu.pipeline_mode<synchronous>, transform_indices = @transform_22, window_bounds = array<i64: 8, 128>}]} {
    %c0 = arith.constant 0 : index
    %c0_0 = arith.constant 0 : index
    %0 = vector.load %arg1[%c0, %c0_0] : memref<3x512xf32, #tpu.memory_space<vmem>>, vector<3x512xf32>
    %c17_i32 = arith.constant 17 : i32
    %1 = tpu.dynamic_rotate %0 by %c17_i32 dim 1 : vector<3x512xf32>, i32 -> vector<3x512xf32>
    %c0_1 = arith.constant 0 : index
    %c0_2 = arith.constant 0 : index
    %c0_3 = arith.constant 0 : index
    %2 = vector.load %arg2[%c0_1, %c0_2, %c0_3] : memref<9x1x512xf32, #tpu.memory_space<vmem>>, vector<1x1x512xf32>
    %3 = vector.shape_cast %2 : vector<1x1x512xf32> to vector<1x512xf32>
    %4 = vector.broadcast %3 : vector<1x512xf32> to vector<3x512xf32>
    %5 = arith.mulf %1, %4 : vector<3x512xf32>
    %6 = arith.truncf %5 : vector<3x512xf32> to vector<3x512xbf16>
    %c0_4 = arith.constant 0 : index
    %c0_5 = arith.constant 0 : index
    %c0_6 = arith.constant 0 : index
    %7 = vector.load %arg10[%c0_4, %c0_5, %c0_6] : memref<9x16x3xbf16, #tpu.memory_space<vmem>>, vector<1x16x3xbf16>
    %8 = vector.shape_cast %7 : vector<1x16x3xbf16> to vector<16x3xbf16>
    %cst = arith.constant dense<0.000000e+00> : vector<16x512xf32>
    %9 = tpu.matmul %8, %6, %cst {dimension_numbers = #tpu.dot_dimension_numbers<[1], [0], [0], [1], [0, 0, 1, 1], [], []>} : vector<16x3xbf16>, vector<3x512xbf16>, vector<16x512xf32> -> vector<16x512xf32>
    %c16_i32 = arith.constant 16 : i32
    %10 = tpu.dynamic_rotate %0 by %c16_i32 dim 1 : vector<3x512xf32>, i32 -> vector<3x512xf32>
    %c1 = arith.constant 1 : index
    %c0_7 = arith.constant 0 : index
    %c0_8 = arith.constant 0 : index
    %11 = vector.load %arg2[%c1, %c0_7, %c0_8] : memref<9x1x512xf32, #tpu.memory_space<vmem>>, vector<1x1x512xf32>
    %12 = vector.shape_cast %11 : vector<1x1x512xf32> to vector<1x512xf32>
    %13 = vector.broadcast %12 : vector<1x512xf32> to vector<3x512xf32>
    %14 = arith.mulf %10, %13 : vector<3x512xf32>
    %15 = arith.truncf %14 : vector<3x512xf32> to vector<3x512xbf16>
    %c1_9 = arith.constant 1 : index
    %c0_10 = arith.constant 0 : index
    %c0_11 = arith.constant 0 : index
    %16 = vector.load %arg10[%c1_9, %c0_10, %c0_11] : memref<9x16x3xbf16, #tpu.memory_space<vmem>>, vector<1x16x3xbf16>
    %17 = vector.shape_cast %16 : vector<1x16x3xbf16> to vector<16x3xbf16>
    %cst_12 = arith.constant dense<0.000000e+00> : vector<16x512xf32>
    %18 = tpu.matmul %17, %15, %cst_12 {dimension_numbers = #tpu.dot_dimension_numbers<[1], [0], [0], [1], [0, 0, 1, 1], [], []>} : vector<16x3xbf16>, vector<3x512xbf16>, vector<16x512xf32> -> vector<16x512xf32>
    %c15_i32 = arith.constant 15 : i32
    %19 = tpu.dynamic_rotate %0 by %c15_i32 dim 1 : vector<3x512xf32>, i32 -> vector<3x512xf32>
    %c2 = arith.constant 2 : index
    %c0_13 = arith.constant 0 : index
    %c0_14 = arith.constant 0 : index
    %20 = vector.load %arg2[%c2, %c0_13, %c0_14] : memref<9x1x512xf32, #tpu.memory_space<vmem>>, vector<1x1x512xf32>
    %21 = vector.shape_cast %20 : vector<1x1x512xf32> to vector<1x512xf32>
    %22 = vector.broadcast %21 : vector<1x512xf32> to vector<3x512xf32>
    %23 = arith.mulf %19, %22 : vector<3x512xf32>
    %24 = arith.truncf %23 : vector<3x512xf32> to vector<3x512xbf16>
    %c2_15 = arith.constant 2 : index
    %c0_16 = arith.constant 0 : index
    %c0_17 = arith.constant 0 : index
    %25 = vector.load %arg10[%c2_15, %c0_16, %c0_17] : memref<9x16x3xbf16, #tpu.memory_space<vmem>>, vector<1x16x3xbf16>
    %26 = vector.shape_cast %25 : vector<1x16x3xbf16> to vector<16x3xbf16>
    %cst_18 = arith.constant dense<0.000000e+00> : vector<16x512xf32>
    %27 = tpu.matmul %26, %24, %cst_18 {dimension_numbers = #tpu.dot_dimension_numbers<[1], [0], [0], [1], [0, 0, 1, 1], [], []>} : vector<16x3xbf16>, vector<3x512xbf16>, vector<16x512xf32> -> vector<16x512xf32>
    %c1_i32 = arith.constant 1 : i32
    %28 = tpu.dynamic_rotate %0 by %c1_i32 dim 1 : vector<3x512xf32>, i32 -> vector<3x512xf32>
    %c3 = arith.constant 3 : index
    %c0_19 = arith.constant 0 : index
    %c0_20 = arith.constant 0 : index
    %29 = vector.load %arg2[%c3, %c0_19, %c0_20] : memref<9x1x512xf32, #tpu.memory_space<vmem>>, vector<1x1x512xf32>
    %30 = vector.shape_cast %29 : vector<1x1x512xf32> to vector<1x512xf32>
    %31 = vector.broadcast %30 : vector<1x512xf32> to vector<3x512xf32>
    %32 = arith.mulf %28, %31 : vector<3x512xf32>
    %33 = arith.truncf %32 : vector<3x512xf32> to vector<3x512xbf16>
    %c3_21 = arith.constant 3 : index
    %c0_22 = arith.constant 0 : index
    %c0_23 = arith.constant 0 : index
    %34 = vector.load %arg10[%c3_21, %c0_22, %c0_23] : memref<9x16x3xbf16, #tpu.memory_space<vmem>>, vector<1x16x3xbf16>
    %35 = vector.shape_cast %34 : vector<1x16x3xbf16> to vector<16x3xbf16>
    %cst_24 = arith.constant dense<0.000000e+00> : vector<16x512xf32>
    %36 = tpu.matmul %35, %33, %cst_24 {dimension_numbers = #tpu.dot_dimension_numbers<[1], [0], [0], [1], [0, 0, 1, 1], [], []>} : vector<16x3xbf16>, vector<3x512xbf16>, vector<16x512xf32> -> vector<16x512xf32>
    %37 = arith.truncf %0 : vector<3x512xf32> to vector<3x512xbf16>
    %c4 = arith.constant 4 : index
    %c0_25 = arith.constant 0 : index
    %c0_26 = arith.constant 0 : index
    %38 = vector.load %arg10[%c4, %c0_25, %c0_26] : memref<9x16x3xbf16, #tpu.memory_space<vmem>>, vector<1x16x3xbf16>
    %39 = vector.shape_cast %38 : vector<1x16x3xbf16> to vector<16x3xbf16>
    %cst_27 = arith.constant dense<0.000000e+00> : vector<16x512xf32>
    %40 = tpu.matmul %39, %37, %cst_27 {dimension_numbers = #tpu.dot_dimension_numbers<[1], [0], [0], [1], [0, 0, 1, 1], [], []>} : vector<16x3xbf16>, vector<3x512xbf16>, vector<16x512xf32> -> vector<16x512xf32>
    %c511_i32 = arith.constant 511 : i32
    %41 = tpu.dynamic_rotate %0 by %c511_i32 dim 1 : vector<3x512xf32>, i32 -> vector<3x512xf32>
    %c5 = arith.constant 5 : index
    %c0_28 = arith.constant 0 : index
    %c0_29 = arith.constant 0 : index
    %42 = vector.load %arg2[%c5, %c0_28, %c0_29] : memref<9x1x512xf32, #tpu.memory_space<vmem>>, vector<1x1x512xf32>
    %43 = vector.shape_cast %42 : vector<1x1x512xf32> to vector<1x512xf32>
    %44 = vector.broadcast %43 : vector<1x512xf32> to vector<3x512xf32>
    %45 = arith.mulf %41, %44 : vector<3x512xf32>
    %46 = arith.truncf %45 : vector<3x512xf32> to vector<3x512xbf16>
    %c5_30 = arith.constant 5 : index
    %c0_31 = arith.constant 0 : index
    %c0_32 = arith.constant 0 : index
    %47 = vector.load %arg10[%c5_30, %c0_31, %c0_32] : memref<9x16x3xbf16, #tpu.memory_space<vmem>>, vector<1x16x3xbf16>
    %48 = vector.shape_cast %47 : vector<1x16x3xbf16> to vector<16x3xbf16>
    %cst_33 = arith.constant dense<0.000000e+00> : vector<16x512xf32>
    %49 = tpu.matmul %48, %46, %cst_33 {dimension_numbers = #tpu.dot_dimension_numbers<[1], [0], [0], [1], [0, 0, 1, 1], [], []>} : vector<16x3xbf16>, vector<3x512xbf16>, vector<16x512xf32> -> vector<16x512xf32>
    %c497_i32 = arith.constant 497 : i32
    %50 = tpu.dynamic_rotate %0 by %c497_i32 dim 1 : vector<3x512xf32>, i32 -> vector<3x512xf32>
    %c6 = arith.constant 6 : index
    %c0_34 = arith.constant 0 : index
    %c0_35 = arith.constant 0 : index
    %51 = vector.load %arg2[%c6, %c0_34, %c0_35] : memref<9x1x512xf32, #tpu.memory_space<vmem>>, vector<1x1x512xf32>
    %52 = vector.shape_cast %51 : vector<1x1x512xf32> to vector<1x512xf32>
    %53 = vector.broadcast %52 : vector<1x512xf32> to vector<3x512xf32>
    %54 = arith.mulf %50, %53 : vector<3x512xf32>
    %55 = arith.truncf %54 : vector<3x512xf32> to vector<3x512xbf16>
    %c6_36 = arith.constant 6 : index
    %c0_37 = arith.constant 0 : index
    %c0_38 = arith.constant 0 : index
    %56 = vector.load %arg10[%c6_36, %c0_37, %c0_38] : memref<9x16x3xbf16, #tpu.memory_space<vmem>>, vector<1x16x3xbf16>
    %57 = vector.shape_cast %56 : vector<1x16x3xbf16> to vector<16x3xbf16>
    %cst_39 = arith.constant dense<0.000000e+00> : vector<16x512xf32>
    %58 = tpu.matmul %57, %55, %cst_39 {dimension_numbers = #tpu.dot_dimension_numbers<[1], [0], [0], [1], [0, 0, 1, 1], [], []>} : vector<16x3xbf16>, vector<3x512xbf16>, vector<16x512xf32> -> vector<16x512xf32>
    %c496_i32 = arith.constant 496 : i32
    %59 = tpu.dynamic_rotate %0 by %c496_i32 dim 1 : vector<3x512xf32>, i32 -> vector<3x512xf32>
    %c7 = arith.constant 7 : index
    %c0_40 = arith.constant 0 : index
    %c0_41 = arith.constant 0 : index
    %60 = vector.load %arg2[%c7, %c0_40, %c0_41] : memref<9x1x512xf32, #tpu.memory_space<vmem>>, vector<1x1x512xf32>
    %61 = vector.shape_cast %60 : vector<1x1x512xf32> to vector<1x512xf32>
    %62 = vector.broadcast %61 : vector<1x512xf32> to vector<3x512xf32>
    %63 = arith.mulf %59, %62 : vector<3x512xf32>
    %64 = arith.truncf %63 : vector<3x512xf32> to vector<3x512xbf16>
    %c7_42 = arith.constant 7 : index
    %c0_43 = arith.constant 0 : index
    %c0_44 = arith.constant 0 : index
    %65 = vector.load %arg10[%c7_42, %c0_43, %c0_44] : memref<9x16x3xbf16, #tpu.memory_space<vmem>>, vector<1x16x3xbf16>
    %66 = vector.shape_cast %65 : vector<1x16x3xbf16> to vector<16x3xbf16>
    %cst_45 = arith.constant dense<0.000000e+00> : vector<16x512xf32>
    %67 = tpu.matmul %66, %64, %cst_45 {dimension_numbers = #tpu.dot_dimension_numbers<[1], [0], [0], [1], [0, 0, 1, 1], [], []>} : vector<16x3xbf16>, vector<3x512xbf16>, vector<16x512xf32> -> vector<16x512xf32>
    %c495_i32 = arith.constant 495 : i32
    %68 = tpu.dynamic_rotate %0 by %c495_i32 dim 1 : vector<3x512xf32>, i32 -> vector<3x512xf32>
    %c8 = arith.constant 8 : index
    %c0_46 = arith.constant 0 : index
    %c0_47 = arith.constant 0 : index
    %69 = vector.load %arg2[%c8, %c0_46, %c0_47] : memref<9x1x512xf32, #tpu.memory_space<vmem>>, vector<1x1x512xf32>
    %70 = vector.shape_cast %69 : vector<1x1x512xf32> to vector<1x512xf32>
    %71 = vector.broadcast %70 : vector<1x512xf32> to vector<3x512xf32>
    %72 = arith.mulf %68, %71 : vector<3x512xf32>
    %73 = arith.truncf %72 : vector<3x512xf32> to vector<3x512xbf16>
    %c8_48 = arith.constant 8 : index
    %c0_49 = arith.constant 0 : index
    %c0_50 = arith.constant 0 : index
    %74 = vector.load %arg10[%c8_48, %c0_49, %c0_50] : memref<9x16x3xbf16, #tpu.memory_space<vmem>>, vector<1x16x3xbf16>
    %75 = vector.shape_cast %74 : vector<1x16x3xbf16> to vector<16x3xbf16>
    %cst_51 = arith.constant dense<0.000000e+00> : vector<16x512xf32>
    %76 = tpu.matmul %75, %73, %cst_51 {dimension_numbers = #tpu.dot_dimension_numbers<[1], [0], [0], [1], [0, 0, 1, 1], [], []>} : vector<16x3xbf16>, vector<3x512xbf16>, vector<16x512xf32> -> vector<16x512xf32>
    %77 = arith.addf %9, %18 : vector<16x512xf32>
    %78 = arith.addf %27, %36 : vector<16x512xf32>
    %79 = arith.addf %40, %49 : vector<16x512xf32>
    %80 = arith.addf %58, %67 : vector<16x512xf32>
    %81 = arith.addf %77, %78 : vector<16x512xf32>
    %82 = arith.addf %79, %80 : vector<16x512xf32>
    %83 = arith.addf %81, %82 : vector<16x512xf32>
    %84 = arith.addf %83, %76 : vector<16x512xf32>
    %c0_52 = arith.constant 0 : index
    %c0_53 = arith.constant 0 : index
    %c0_54 = arith.constant 0 : index
    %85 = vector.load %arg9[%c0_52, %c0_53, %c0_54] : memref<29x32x1xf32, #tpu.memory_space<vmem>>, vector<1x32x1xf32>
    %86 = vector.shape_cast %85 : vector<1x32x1xf32> to vector<32x1xf32>
    %87 = vector.extract_strided_slice %86 {offsets = [0, 0], sizes = [16, 1], strides = [1, 1]} : vector<32x1xf32> to vector<16x1xf32>
    %88 = vector.broadcast %87 : vector<16x1xf32> to vector<16x512xf32>
    %89 = arith.addf %84, %88 : vector<16x512xf32>
    %cst_55 = arith.constant 5.000000e-01 : f32
    %90 = vector.broadcast %cst_55 : f32 to vector<16x512xf32>
    %91 = arith.mulf %90, %89 : vector<16x512xf32>
    %92 = math.tanh %91 : vector<16x512xf32>
    %cst_56 = arith.constant 5.000000e-01 : f32
    %93 = vector.broadcast %cst_56 : f32 to vector<16x512xf32>
    %94 = arith.mulf %93, %92 : vector<16x512xf32>
    %cst_57 = arith.constant 5.000000e-01 : f32
    %95 = vector.broadcast %cst_57 : f32 to vector<16x512xf32>
    %96 = arith.addf %94, %95 : vector<16x512xf32>
    %97 = arith.mulf %89, %96 : vector<16x512xf32>
    %c17_i32_58 = arith.constant 17 : i32
    %98 = tpu.dynamic_rotate %97 by %c17_i32_58 dim 1 : vector<16x512xf32>, i32 -> vector<16x512xf32>
    %c0_59 = arith.constant 0 : index
    %c0_60 = arith.constant 0 : index
    %c0_61 = arith.constant 0 : index
    %99 = vector.load %arg2[%c0_59, %c0_60, %c0_61] : memref<9x1x512xf32, #tpu.memory_space<vmem>>, vector<1x1x512xf32>
    %100 = vector.shape_cast %99 : vector<1x1x512xf32> to vector<1x512xf32>
    %101 = vector.broadcast %100 : vector<1x512xf32> to vector<16x512xf32>
    %102 = arith.mulf %98, %101 : vector<16x512xf32>
    %103 = arith.truncf %102 : vector<16x512xf32> to vector<16x512xbf16>
    %c0_62 = arith.constant 0 : index
    %c0_63 = arith.constant 0 : index
    %c0_64 = arith.constant 0 : index
    %104 = vector.load %arg11[%c0_62, %c0_63, %c0_64] : memref<9x16x16xbf16, #tpu.memory_space<vmem>>, vector<1x16x16xbf16>
    %105 = vector.shape_cast %104 : vector<1x16x16xbf16> to vector<16x16xbf16>
    %cst_65 = arith.constant dense<0.000000e+00> : vector<16x512xf32>
    %106 = tpu.matmul %105, %103, %cst_65 {dimension_numbers = #tpu.dot_dimension_numbers<[1], [0], [0], [1], [0, 0, 1, 1], [], []>} : vector<16x16xbf16>, vector<16x512xbf16>, vector<16x512xf32> -> vector<16x512xf32>
    %c16_i32_66 = arith.constant 16 : i32
    %107 = tpu.dynamic_rotate %97 by %c16_i32_66 dim 1 : vector<16x512xf32>, i32 -> vector<16x512xf32>
    %c1_67 = arith.constant 1 : index
    %c0_68 = arith.constant 0 : index
    %c0_69 = arith.constant 0 : index
    %108 = vector.load %arg2[%c1_67, %c0_68, %c0_69] : memref<9x1x512xf32, #tpu.memory_space<vmem>>, vector<1x1x512xf32>
    %109 = vector.shape_cast %108 : vector<1x1x512xf32> to vector<1x512xf32>
    %110 = vector.broadcast %109 : vector<1x512xf32> to vector<16x512xf32>
    %111 = arith.mulf %107, %110 : vector<16x512xf32>
    %112 = arith.truncf %111 : vector<16x512xf32> to vector<16x512xbf16>
    %c1_70 = arith.constant 1 : index
    %c0_71 = arith.constant 0 : index
    %c0_72 = arith.constant 0 : index
    %113 = vector.load %arg11[%c1_70, %c0_71, %c0_72] : memref<9x16x16xbf16, #tpu.memory_space<vmem>>, vector<1x16x16xbf16>
    %114 = vector.shape_cast %113 : vector<1x16x16xbf16> to vector<16x16xbf16>
    %cst_73 = arith.constant dense<0.000000e+00> : vector<16x512xf32>
    %115 = tpu.matmul %114, %112, %cst_73 {dimension_numbers = #tpu.dot_dimension_numbers<[1], [0], [0], [1], [0, 0, 1, 1], [], []>} : vector<16x16xbf16>, vector<16x512xbf16>, vector<16x512xf32> -> vector<16x512xf32>
    %c15_i32_74 = arith.constant 15 : i32
    %116 = tpu.dynamic_rotate %97 by %c15_i32_74 dim 1 : vector<16x512xf32>, i32 -> vector<16x512xf32>
    %c2_75 = arith.constant 2 : index
    %c0_76 = arith.constant 0 : index
    %c0_77 = arith.constant 0 : index
    %117 = vector.load %arg2[%c2_75, %c0_76, %c0_77] : memref<9x1x512xf32, #tpu.memory_space<vmem>>, vector<1x1x512xf32>
    %118 = vector.shape_cast %117 : vector<1x1x512xf32> to vector<1x512xf32>
    %119 = vector.broadcast %118 : vector<1x512xf32> to vector<16x512xf32>
    %120 = arith.mulf %116, %119 : vector<16x512xf32>
    %121 = arith.truncf %120 : vector<16x512xf32> to vector<16x512xbf16>
    %c2_78 = arith.constant 2 : index
    %c0_79 = arith.constant 0 : index
    %c0_80 = arith.constant 0 : index
    %122 = vector.load %arg11[%c2_78, %c0_79, %c0_80] : memref<9x16x16xbf16, #tpu.memory_space<vmem>>, vector<1x16x16xbf16>
    %123 = vector.shape_cast %122 : vector<1x16x16xbf16> to vector<16x16xbf16>
    %cst_81 = arith.constant dense<0.000000e+00> : vector<16x512xf32>
    %124 = tpu.matmul %123, %121, %cst_81 {dimension_numbers = #tpu.dot_dimension_numbers<[1], [0], [0], [1], [0, 0, 1, 1], [], []>} : vector<16x16xbf16>, vector<16x512xbf16>, vector<16x512xf32> -> vector<16x512xf32>
    %c1_i32_82 = arith.constant 1 : i32
    %125 = tpu.dynamic_rotate %97 by %c1_i32_82 dim 1 : vector<16x512xf32>, i32 -> vector<16x512xf32>
    %c3_83 = arith.constant 3 : index
    %c0_84 = arith.constant 0 : index
    %c0_85 = arith.constant 0 : index
    %126 = vector.load %arg2[%c3_83, %c0_84, %c0_85] : memref<9x1x512xf32, #tpu.memory_space<vmem>>, vector<1x1x512xf32>
    %127 = vector.shape_cast %126 : vector<1x1x512xf32> to vector<1x512xf32>
    %128 = vector.broadcast %127 : vector<1x512xf32> to vector<16x512xf32>
    %129 = arith.mulf %125, %128 : vector<16x512xf32>
    %130 = arith.truncf %129 : vector<16x512xf32> to vector<16x512xbf16>
    %c3_86 = arith.constant 3 : index
    %c0_87 = arith.constant 0 : index
    %c0_88 = arith.constant 0 : index
    %131 = vector.load %arg11[%c3_86, %c0_87, %c0_88] : memref<9x16x16xbf16, #tpu.memory_space<vmem>>, vector<1x16x16xbf16>
    %132 = vector.shape_cast %131 : vector<1x16x16xbf16> to vector<16x16xbf16>
    %cst_89 = arith.constant dense<0.000000e+00> : vector<16x512xf32>
    %133 = tpu.matmul %132, %130, %cst_89 {dimension_numbers = #tpu.dot_dimension_numbers<[1], [0], [0], [1], [0, 0, 1, 1], [], []>} : vector<16x16xbf16>, vector<16x512xbf16>, vector<16x512xf32> -> vector<16x512xf32>
    %134 = arith.truncf %97 : vector<16x512xf32> to vector<16x512xbf16>
    %c4_90 = arith.constant 4 : index
    %c0_91 = arith.constant 0 : index
    %c0_92 = arith.constant 0 : index
    %135 = vector.load %arg11[%c4_90, %c0_91, %c0_92] : memref<9x16x16xbf16, #tpu.memory_space<vmem>>, vector<1x16x16xbf16>
    %136 = vector.shape_cast %135 : vector<1x16x16xbf16> to vector<16x16xbf16>
    %cst_93 = arith.constant dense<0.000000e+00> : vector<16x512xf32>
    %137 = tpu.matmul %136, %134, %cst_93 {dimension_numbers = #tpu.dot_dimension_numbers<[1], [0], [0], [1], [0, 0, 1, 1], [], []>} : vector<16x16xbf16>, vector<16x512xbf16>, vector<16x512xf32> -> vector<16x512xf32>
    %c511_i32_94 = arith.constant 511 : i32
    %138 = tpu.dynamic_rotate %97 by %c511_i32_94 dim 1 : vector<16x512xf32>, i32 -> vector<16x512xf32>
    %c5_95 = arith.constant 5 : index
    %c0_96 = arith.constant 0 : index
    %c0_97 = arith.constant 0 : index
    %139 = vector.load %arg2[%c5_95, %c0_96, %c0_97] : memref<9x1x512xf32, #tpu.memory_space<vmem>>, vector<1x1x512xf32>
    %140 = vector.shape_cast %139 : vector<1x1x512xf32> to vector<1x512xf32>
    %141 = vector.broadcast %140 : vector<1x512xf32> to vector<16x512xf32>
    %142 = arith.mulf %138, %141 : vector<16x512xf32>
    %143 = arith.truncf %142 : vector<16x512xf32> to vector<16x512xbf16>
    %c5_98 = arith.constant 5 : index
    %c0_99 = arith.constant 0 : index
    %c0_100 = arith.constant 0 : index
    %144 = vector.load %arg11[%c5_98, %c0_99, %c0_100] : memref<9x16x16xbf16, #tpu.memory_space<vmem>>, vector<1x16x16xbf16>
    %145 = vector.shape_cast %144 : vector<1x16x16xbf16> to vector<16x16xbf16>
    %cst_101 = arith.constant dense<0.000000e+00> : vector<16x512xf32>
    %146 = tpu.matmul %145, %143, %cst_101 {dimension_numbers = #tpu.dot_dimension_numbers<[1], [0], [0], [1], [0, 0, 1, 1], [], []>} : vector<16x16xbf16>, vector<16x512xbf16>, vector<16x512xf32> -> vector<16x512xf32>
    %c497_i32_102 = arith.constant 497 : i32
    %147 = tpu.dynamic_rotate %97 by %c497_i32_102 dim 1 : vector<16x512xf32>, i32 -> vector<16x512xf32>
    %c6_103 = arith.constant 6 : index
    %c0_104 = arith.constant 0 : index
    %c0_105 = arith.constant 0 : index
    %148 = vector.load %arg2[%c6_103, %c0_104, %c0_105] : memref<9x1x512xf32, #tpu.memory_space<vmem>>, vector<1x1x512xf32>
    %149 = vector.shape_cast %148 : vector<1x1x512xf32> to vector<1x512xf32>
    %150 = vector.broadcast %149 : vector<1x512xf32> to vector<16x512xf32>
    %151 = arith.mulf %147, %150 : vector<16x512xf32>
    %152 = arith.truncf %151 : vector<16x512xf32> to vector<16x512xbf16>
    %c6_106 = arith.constant 6 : index
    %c0_107 = arith.constant 0 : index
    %c0_108 = arith.constant 0 : index
    %153 = vector.load %arg11[%c6_106, %c0_107, %c0_108] : memref<9x16x16xbf16, #tpu.memory_space<vmem>>, vector<1x16x16xbf16>
    %154 = vector.shape_cast %153 : vector<1x16x16xbf16> to vector<16x16xbf16>
    %cst_109 = arith.constant dense<0.000000e+00> : vector<16x512xf32>
    %155 = tpu.matmul %154, %152, %cst_109 {dimension_numbers = #tpu.dot_dimension_numbers<[1], [0], [0], [1], [0, 0, 1, 1], [], []>} : vector<16x16xbf16>, vector<16x512xbf16>, vector<16x512xf32> -> vector<16x512xf32>
    %c496_i32_110 = arith.constant 496 : i32
    %156 = tpu.dynamic_rotate %97 by %c496_i32_110 dim 1 : vector<16x512xf32>, i32 -> vector<16x512xf32>
    %c7_111 = arith.constant 7 : index
    %c0_112 = arith.constant 0 : index
    %c0_113 = arith.constant 0 : index
    %157 = vector.load %arg2[%c7_111, %c0_112, %c0_113] : memref<9x1x512xf32, #tpu.memory_space<vmem>>, vector<1x1x512xf32>
    %158 = vector.shape_cast %157 : vector<1x1x512xf32> to vector<1x512xf32>
    %159 = vector.broadcast %158 : vector<1x512xf32> to vector<16x512xf32>
    %160 = arith.mulf %156, %159 : vector<16x512xf32>
    %161 = arith.truncf %160 : vector<16x512xf32> to vector<16x512xbf16>
    %c7_114 = arith.constant 7 : index
    %c0_115 = arith.constant 0 : index
    %c0_116 = arith.constant 0 : index
    %162 = vector.load %arg11[%c7_114, %c0_115, %c0_116] : memref<9x16x16xbf16, #tpu.memory_space<vmem>>, vector<1x16x16xbf16>
    %163 = vector.shape_cast %162 : vector<1x16x16xbf16> to vector<16x16xbf16>
    %cst_117 = arith.constant dense<0.000000e+00> : vector<16x512xf32>
    %164 = tpu.matmul %163, %161, %cst_117 {dimension_numbers = #tpu.dot_dimension_numbers<[1], [0], [0], [1], [0, 0, 1, 1], [], []>} : vector<16x16xbf16>, vector<16x512xbf16>, vector<16x512xf32> -> vector<16x512xf32>
    %c495_i32_118 = arith.constant 495 : i32
    %165 = tpu.dynamic_rotate %97 by %c495_i32_118 dim 1 : vector<16x512xf32>, i32 -> vector<16x512xf32>
    %c8_119 = arith.constant 8 : index
    %c0_120 = arith.constant 0 : index
    %c0_121 = arith.constant 0 : index
    %166 = vector.load %arg2[%c8_119, %c0_120, %c0_121] : memref<9x1x512xf32, #tpu.memory_space<vmem>>, vector<1x1x512xf32>
    %167 = vector.shape_cast %166 : vector<1x1x512xf32> to vector<1x512xf32>
    %168 = vector.broadcast %167 : vector<1x512xf32> to vector<16x512xf32>
    %169 = arith.mulf %165, %168 : vector<16x512xf32>
    %170 = arith.truncf %169 : vector<16x512xf32> to vector<16x512xbf16>
    %c8_122 = arith.constant 8 : index
    %c0_123 = arith.constant 0 : index
    %c0_124 = arith.constant 0 : index
    %171 = vector.load %arg11[%c8_122, %c0_123, %c0_124] : memref<9x16x16xbf16, #tpu.memory_space<vmem>>, vector<1x16x16xbf16>
    %172 = vector.shape_cast %171 : vector<1x16x16xbf16> to vector<16x16xbf16>
    %cst_125 = arith.constant dense<0.000000e+00> : vector<16x512xf32>
    %173 = tpu.matmul %172, %170, %cst_125 {dimension_numbers = #tpu.dot_dimension_numbers<[1], [0], [0], [1], [0, 0, 1, 1], [], []>} : vector<16x16xbf16>, vector<16x512xbf16>, vector<16x512xf32> -> vector<16x512xf32>
    %174 = arith.addf %106, %115 : vector<16x512xf32>
    %175 = arith.addf %124, %133 : vector<16x512xf32>
    %176 = arith.addf %137, %146 : vector<16x512xf32>
    %177 = arith.addf %155, %164 : vector<16x512xf32>
    %178 = arith.addf %174, %175 : vector<16x512xf32>
    %179 = arith.addf %176, %177 : vector<16x512xf32>
    %180 = arith.addf %178, %179 : vector<16x512xf32>
    %181 = arith.addf %180, %173 : vector<16x512xf32>
    %c5_126 = arith.constant 5 : index
    %c0_127 = arith.constant 0 : index
    %c0_128 = arith.constant 0 : index
    %182 = vector.load %arg9[%c5_126, %c0_127, %c0_128] : memref<29x32x1xf32, #tpu.memory_space<vmem>>, vector<1x32x1xf32>
    %183 = vector.shape_cast %182 : vector<1x32x1xf32> to vector<32x1xf32>
    %184 = vector.extract_strided_slice %183 {offsets = [0, 0], sizes = [16, 1], strides = [1, 1]} : vector<32x1xf32> to vector<16x1xf32>
    %185 = vector.broadcast %184 : vector<16x1xf32> to vector<16x512xf32>
    %186 = arith.addf %181, %185 : vector<16x512xf32>
    %c6_129 = arith.constant 6 : index
    %c0_130 = arith.constant 0 : index
    %c0_131 = arith.constant 0 : index
    %187 = vector.load %arg9[%c6_129, %c0_130, %c0_131] : memref<29x32x1xf32, #tpu.memory_space<vmem>>, vector<1x32x1xf32>
    %188 = vector.shape_cast %187 : vector<1x32x1xf32> to vector<32x1xf32>
    %189 = vector.extract_strided_slice %188 {offsets = [0, 0], sizes = [16, 1], strides = [1, 1]} : vector<32x1xf32> to vector<16x1xf32>
    %c7_132 = arith.constant 7 : index
    %c0_133 = arith.constant 0 : index
    %c0_134 = arith.constant 0 : index
    %190 = vector.load %arg9[%c7_132, %c0_133, %c0_134] : memref<29x32x1xf32, #tpu.memory_space<vmem>>, vector<1x32x1xf32>
    %191 = vector.shape_cast %190 : vector<1x32x1xf32> to vector<32x1xf32>
    %192 = vector.extract_strided_slice %191 {offsets = [0, 0], sizes = [16, 1], strides = [1, 1]} : vector<32x1xf32> to vector<16x1xf32>
    %cst_135 = arith.constant dense<0.000000e+00> : vector<16xf32>
    %193 = vector.multi_reduction <add>, %186, %cst_135 [1] : vector<16x512xf32> to vector<16xf32>
    %194 = vector.shape_cast %193 : vector<16xf32> to vector<16x1xf32>
    %cst_136 = arith.constant 0.001953125 : f32
    %195 = vector.broadcast %cst_136 : f32 to vector<16x1xf32>
    %196 = arith.mulf %194, %195 : vector<16x1xf32>
    %197 = vector.broadcast %196 : vector<16x1xf32> to vector<16x512xf32>
    %198 = arith.subf %186, %197 : vector<16x512xf32>
    %199 = arith.mulf %198, %198 : vector<16x512xf32>
    %cst_137 = arith.constant dense<0.000000e+00> : vector<16xf32>
    %200 = vector.multi_reduction <add>, %199, %cst_137 [1] : vector<16x512xf32> to vector<16xf32>
    %201 = vector.shape_cast %200 : vector<16xf32> to vector<16x1xf32>
    %cst_138 = arith.constant 0.001953125 : f32
    %202 = vector.broadcast %cst_138 : f32 to vector<16x1xf32>
    %203 = arith.mulf %201, %202 : vector<16x1xf32>
    %cst_139 = arith.constant 9.99999974E-6 : f32
    %204 = vector.broadcast %cst_139 : f32 to vector<16x1xf32>
    %205 = arith.addf %203, %204 : vector<16x1xf32>
    %206 = math.rsqrt %205 : vector<16x1xf32>
    %207 = vector.broadcast %206 : vector<16x1xf32> to vector<16x512xf32>
    %208 = arith.mulf %198, %207 : vector<16x512xf32>
    %209 = vector.broadcast %189 : vector<16x1xf32> to vector<16x512xf32>
    %210 = arith.mulf %208, %209 : vector<16x512xf32>
    %211 = vector.broadcast %192 : vector<16x1xf32> to vector<16x512xf32>
    %212 = arith.addf %210, %211 : vector<16x512xf32>
    %cst_140 = arith.constant 5.000000e-01 : f32
    %213 = vector.broadcast %cst_140 : f32 to vector<16x512xf32>
    %214 = arith.mulf %213, %212 : vector<16x512xf32>
    %215 = math.tanh %214 : vector<16x512xf32>
    %cst_141 = arith.constant 5.000000e-01 : f32
    %216 = vector.broadcast %cst_141 : f32 to vector<16x512xf32>
    %217 = arith.mulf %216, %215 : vector<16x512xf32>
    %cst_142 = arith.constant 5.000000e-01 : f32
    %218 = vector.broadcast %cst_142 : f32 to vector<16x512xf32>
    %219 = arith.addf %217, %218 : vector<16x512xf32>
    %220 = arith.mulf %212, %219 : vector<16x512xf32>
    %c17_i32_143 = arith.constant 17 : i32
    %221 = tpu.dynamic_rotate %220 by %c17_i32_143 dim 1 : vector<16x512xf32>, i32 -> vector<16x512xf32>
    %c0_144 = arith.constant 0 : index
    %c0_145 = arith.constant 0 : index
    %c0_146 = arith.constant 0 : index
    %222 = vector.load %arg2[%c0_144, %c0_145, %c0_146] : memref<9x1x512xf32, #tpu.memory_space<vmem>>, vector<1x1x512xf32>
    %223 = vector.shape_cast %222 : vector<1x1x512xf32> to vector<1x512xf32>
    %224 = vector.broadcast %223 : vector<1x512xf32> to vector<16x512xf32>
    %225 = arith.mulf %221, %224 : vector<16x512xf32>
    %226 = arith.truncf %225 : vector<16x512xf32> to vector<16x512xbf16>
    %c0_147 = arith.constant 0 : index
    %c0_148 = arith.constant 0 : index
    %c0_149 = arith.constant 0 : index
    %227 = vector.load %arg12[%c0_147, %c0_148, %c0_149] : memref<9x16x16xbf16, #tpu.memory_space<vmem>>, vector<1x16x16xbf16>
    %228 = vector.shape_cast %227 : vector<1x16x16xbf16> to vector<16x16xbf16>
    %cst_150 = arith.constant dense<0.000000e+00> : vector<16x512xf32>
    %229 = tpu.matmul %228, %226, %cst_150 {dimension_numbers = #tpu.dot_dimension_numbers<[1], [0], [0], [1], [0, 0, 1, 1], [], []>} : vector<16x16xbf16>, vector<16x512xbf16>, vector<16x512xf32> -> vector<16x512xf32>
    %c16_i32_151 = arith.constant 16 : i32
    %230 = tpu.dynamic_rotate %220 by %c16_i32_151 dim 1 : vector<16x512xf32>, i32 -> vector<16x512xf32>
    %c1_152 = arith.constant 1 : index
    %c0_153 = arith.constant 0 : index
    %c0_154 = arith.constant 0 : index
    %231 = vector.load %arg2[%c1_152, %c0_153, %c0_154] : memref<9x1x512xf32, #tpu.memory_space<vmem>>, vector<1x1x512xf32>
    %232 = vector.shape_cast %231 : vector<1x1x512xf32> to vector<1x512xf32>
    %233 = vector.broadcast %232 : vector<1x512xf32> to vector<16x512xf32>
    %234 = arith.mulf %230, %233 : vector<16x512xf32>
    %235 = arith.truncf %234 : vector<16x512xf32> to vector<16x512xbf16>
    %c1_155 = arith.constant 1 : index
    %c0_156 = arith.constant 0 : index
    %c0_157 = arith.constant 0 : index
    %236 = vector.load %arg12[%c1_155, %c0_156, %c0_157] : memref<9x16x16xbf16, #tpu.memory_space<vmem>>, vector<1x16x16xbf16>
    %237 = vector.shape_cast %236 : vector<1x16x16xbf16> to vector<16x16xbf16>
    %cst_158 = arith.constant dense<0.000000e+00> : vector<16x512xf32>
    %238 = tpu.matmul %237, %235, %cst_158 {dimension_numbers = #tpu.dot_dimension_numbers<[1], [0], [0], [1], [0, 0, 1, 1], [], []>} : vector<16x16xbf16>, vector<16x512xbf16>, vector<16x512xf32> -> vector<16x512xf32>
    %c15_i32_159 = arith.constant 15 : i32
    %239 = tpu.dynamic_rotate %220 by %c15_i32_159 dim 1 : vector<16x512xf32>, i32 -> vector<16x512xf32>
    %c2_160 = arith.constant 2 : index
    %c0_161 = arith.constant 0 : index
    %c0_162 = arith.constant 0 : index
    %240 = vector.load %arg2[%c2_160, %c0_161, %c0_162] : memref<9x1x512xf32, #tpu.memory_space<vmem>>, vector<1x1x512xf32>
    %241 = vector.shape_cast %240 : vector<1x1x512xf32> to vector<1x512xf32>
    %242 = vector.broadcast %241 : vector<1x512xf32> to vector<16x512xf32>
    %243 = arith.mulf %239, %242 : vector<16x512xf32>
    %244 = arith.truncf %243 : vector<16x512xf32> to vector<16x512xbf16>
    %c2_163 = arith.constant 2 : index
    %c0_164 = arith.constant 0 : index
    %c0_165 = arith.constant 0 : index
    %245 = vector.load %arg12[%c2_163, %c0_164, %c0_165] : memref<9x16x16xbf16, #tpu.memory_space<vmem>>, vector<1x16x16xbf16>
    %246 = vector.shape_cast %245 : vector<1x16x16xbf16> to vector<16x16xbf16>
    %cst_166 = arith.constant dense<0.000000e+00> : vector<16x512xf32>
    %247 = tpu.matmul %246, %244, %cst_166 {dimension_numbers = #tpu.dot_dimension_numbers<[1], [0], [0], [1], [0, 0, 1, 1], [], []>} : vector<16x16xbf16>, vector<16x512xbf16>, vector<16x512xf32> -> vector<16x512xf32>
    %c1_i32_167 = arith.constant 1 : i32
    %248 = tpu.dynamic_rotate %220 by %c1_i32_167 dim 1 : vector<16x512xf32>, i32 -> vector<16x512xf32>
    %c3_168 = arith.constant 3 : index
    %c0_169 = arith.constant 0 : index
    %c0_170 = arith.constant 0 : index
    %249 = vector.load %arg2[%c3_168, %c0_169, %c0_170] : memref<9x1x512xf32, #tpu.memory_space<vmem>>, vector<1x1x512xf32>
    %250 = vector.shape_cast %249 : vector<1x1x512xf32> to vector<1x512xf32>
    %251 = vector.broadcast %250 : vector<1x512xf32> to vector<16x512xf32>
    %252 = arith.mulf %248, %251 : vector<16x512xf32>
    %253 = arith.truncf %252 : vector<16x512xf32> to vector<16x512xbf16>
    %c3_171 = arith.constant 3 : index
    %c0_172 = arith.constant 0 : index
    %c0_173 = arith.constant 0 : index
    %254 = vector.load %arg12[%c3_171, %c0_172, %c0_173] : memref<9x16x16xbf16, #tpu.memory_space<vmem>>, vector<1x16x16xbf16>
    %255 = vector.shape_cast %254 : vector<1x16x16xbf16> to vector<16x16xbf16>
    %cst_174 = arith.constant dense<0.000000e+00> : vector<16x512xf32>
    %256 = tpu.matmul %255, %253, %cst_174 {dimension_numbers = #tpu.dot_dimension_numbers<[1], [0], [0], [1], [0, 0, 1, 1], [], []>} : vector<16x16xbf16>, vector<16x512xbf16>, vector<16x512xf32> -> vector<16x512xf32>
    %257 = arith.truncf %220 : vector<16x512xf32> to vector<16x512xbf16>
    %c4_175 = arith.constant 4 : index
    %c0_176 = arith.constant 0 : index
    %c0_177 = arith.constant 0 : index
    %258 = vector.load %arg12[%c4_175, %c0_176, %c0_177] : memref<9x16x16xbf16, #tpu.memory_space<vmem>>, vector<1x16x16xbf16>
    %259 = vector.shape_cast %258 : vector<1x16x16xbf16> to vector<16x16xbf16>
    %cst_178 = arith.constant dense<0.000000e+00> : vector<16x512xf32>
    %260 = tpu.matmul %259, %257, %cst_178 {dimension_numbers = #tpu.dot_dimension_numbers<[1], [0], [0], [1], [0, 0, 1, 1], [], []>} : vector<16x16xbf16>, vector<16x512xbf16>, vector<16x512xf32> -> vector<16x512xf32>
    %c511_i32_179 = arith.constant 511 : i32
    %261 = tpu.dynamic_rotate %220 by %c511_i32_179 dim 1 : vector<16x512xf32>, i32 -> vector<16x512xf32>
    %c5_180 = arith.constant 5 : index
    %c0_181 = arith.constant 0 : index
    %c0_182 = arith.constant 0 : index
    %262 = vector.load %arg2[%c5_180, %c0_181, %c0_182] : memref<9x1x512xf32, #tpu.memory_space<vmem>>, vector<1x1x512xf32>
    %263 = vector.shape_cast %262 : vector<1x1x512xf32> to vector<1x512xf32>
    %264 = vector.broadcast %263 : vector<1x512xf32> to vector<16x512xf32>
    %265 = arith.mulf %261, %264 : vector<16x512xf32>
    %266 = arith.truncf %265 : vector<16x512xf32> to vector<16x512xbf16>
    %c5_183 = arith.constant 5 : index
    %c0_184 = arith.constant 0 : index
    %c0_185 = arith.constant 0 : index
    %267 = vector.load %arg12[%c5_183, %c0_184, %c0_185] : memref<9x16x16xbf16, #tpu.memory_space<vmem>>, vector<1x16x16xbf16>
    %268 = vector.shape_cast %267 : vector<1x16x16xbf16> to vector<16x16xbf16>
    %cst_186 = arith.constant dense<0.000000e+00> : vector<16x512xf32>
    %269 = tpu.matmul %268, %266, %cst_186 {dimension_numbers = #tpu.dot_dimension_numbers<[1], [0], [0], [1], [0, 0, 1, 1], [], []>} : vector<16x16xbf16>, vector<16x512xbf16>, vector<16x512xf32> -> vector<16x512xf32>
    %c497_i32_187 = arith.constant 497 : i32
    %270 = tpu.dynamic_rotate %220 by %c497_i32_187 dim 1 : vector<16x512xf32>, i32 -> vector<16x512xf32>
    %c6_188 = arith.constant 6 : index
    %c0_189 = arith.constant 0 : index
    %c0_190 = arith.constant 0 : index
    %271 = vector.load %arg2[%c6_188, %c0_189, %c0_190] : memref<9x1x512xf32, #tpu.memory_space<vmem>>, vector<1x1x512xf32>
    %272 = vector.shape_cast %271 : vector<1x1x512xf32> to vector<1x512xf32>
    %273 = vector.broadcast %272 : vector<1x512xf32> to vector<16x512xf32>
    %274 = arith.mulf %270, %273 : vector<16x512xf32>
    %275 = arith.truncf %274 : vector<16x512xf32> to vector<16x512xbf16>
    %c6_191 = arith.constant 6 : index
    %c0_192 = arith.constant 0 : index
    %c0_193 = arith.constant 0 : index
    %276 = vector.load %arg12[%c6_191, %c0_192, %c0_193] : memref<9x16x16xbf16, #tpu.memory_space<vmem>>, vector<1x16x16xbf16>
    %277 = vector.shape_cast %276 : vector<1x16x16xbf16> to vector<16x16xbf16>
    %cst_194 = arith.constant dense<0.000000e+00> : vector<16x512xf32>
    %278 = tpu.matmul %277, %275, %cst_194 {dimension_numbers = #tpu.dot_dimension_numbers<[1], [0], [0], [1], [0, 0, 1, 1], [], []>} : vector<16x16xbf16>, vector<16x512xbf16>, vector<16x512xf32> -> vector<16x512xf32>
    %c496_i32_195 = arith.constant 496 : i32
    %279 = tpu.dynamic_rotate %220 by %c496_i32_195 dim 1 : vector<16x512xf32>, i32 -> vector<16x512xf32>
    %c7_196 = arith.constant 7 : index
    %c0_197 = arith.constant 0 : index
    %c0_198 = arith.constant 0 : index
    %280 = vector.load %arg2[%c7_196, %c0_197, %c0_198] : memref<9x1x512xf32, #tpu.memory_space<vmem>>, vector<1x1x512xf32>
    %281 = vector.shape_cast %280 : vector<1x1x512xf32> to vector<1x512xf32>
    %282 = vector.broadcast %281 : vector<1x512xf32> to vector<16x512xf32>
    %283 = arith.mulf %279, %282 : vector<16x512xf32>
    %284 = arith.truncf %283 : vector<16x512xf32> to vector<16x512xbf16>
    %c7_199 = arith.constant 7 : index
    %c0_200 = arith.constant 0 : index
    %c0_201 = arith.constant 0 : index
    %285 = vector.load %arg12[%c7_199, %c0_200, %c0_201] : memref<9x16x16xbf16, #tpu.memory_space<vmem>>, vector<1x16x16xbf16>
    %286 = vector.shape_cast %285 : vector<1x16x16xbf16> to vector<16x16xbf16>
    %cst_202 = arith.constant dense<0.000000e+00> : vector<16x512xf32>
    %287 = tpu.matmul %286, %284, %cst_202 {dimension_numbers = #tpu.dot_dimension_numbers<[1], [0], [0], [1], [0, 0, 1, 1], [], []>} : vector<16x16xbf16>, vector<16x512xbf16>, vector<16x512xf32> -> vector<16x512xf32>
    %c495_i32_203 = arith.constant 495 : i32
    %288 = tpu.dynamic_rotate %220 by %c495_i32_203 dim 1 : vector<16x512xf32>, i32 -> vector<16x512xf32>
    %c8_204 = arith.constant 8 : index
    %c0_205 = arith.constant 0 : index
    %c0_206 = arith.constant 0 : index
    %289 = vector.load %arg2[%c8_204, %c0_205, %c0_206] : memref<9x1x512xf32, #tpu.memory_space<vmem>>, vector<1x1x512xf32>
    %290 = vector.shape_cast %289 : vector<1x1x512xf32> to vector<1x512xf32>
    %291 = vector.broadcast %290 : vector<1x512xf32> to vector<16x512xf32>
    %292 = arith.mulf %288, %291 : vector<16x512xf32>
    %293 = arith.truncf %292 : vector<16x512xf32> to vector<16x512xbf16>
    %c8_207 = arith.constant 8 : index
    %c0_208 = arith.constant 0 : index
    %c0_209 = arith.constant 0 : index
    %294 = vector.load %arg12[%c8_207, %c0_208, %c0_209] : memref<9x16x16xbf16, #tpu.memory_space<vmem>>, vector<1x16x16xbf16>
    %295 = vector.shape_cast %294 : vector<1x16x16xbf16> to vector<16x16xbf16>
    %cst_210 = arith.constant dense<0.000000e+00> : vector<16x512xf32>
    %296 = tpu.matmul %295, %293, %cst_210 {dimension_numbers = #tpu.dot_dimension_numbers<[1], [0], [0], [1], [0, 0, 1, 1], [], []>} : vector<16x16xbf16>, vector<16x512xbf16>, vector<16x512xf32> -> vector<16x512xf32>
    %297 = arith.addf %229, %238 : vector<16x512xf32>
    %298 = arith.addf %247, %256 : vector<16x512xf32>
    %299 = arith.addf %260, %269 : vector<16x512xf32>
    %300 = arith.addf %278, %287 : vector<16x512xf32>
    %301 = arith.addf %297, %298 : vector<16x512xf32>
    %302 = arith.addf %299, %300 : vector<16x512xf32>
    %303 = arith.addf %301, %302 : vector<16x512xf32>
    %304 = arith.addf %303, %296 : vector<16x512xf32>
    %c8_211 = arith.constant 8 : index
    %c0_212 = arith.constant 0 : index
    %c0_213 = arith.constant 0 : index
    %305 = vector.load %arg9[%c8_211, %c0_212, %c0_213] : memref<29x32x1xf32, #tpu.memory_space<vmem>>, vector<1x32x1xf32>
    %306 = vector.shape_cast %305 : vector<1x32x1xf32> to vector<32x1xf32>
    %307 = vector.extract_strided_slice %306 {offsets = [0, 0], sizes = [16, 1], strides = [1, 1]} : vector<32x1xf32> to vector<16x1xf32>
    %308 = vector.broadcast %307 : vector<16x1xf32> to vector<16x512xf32>
    %309 = arith.addf %304, %308 : vector<16x512xf32>
    %c9 = arith.constant 9 : index
    %c0_214 = arith.constant 0 : index
    %c0_215 = arith.constant 0 : index
    %310 = vector.load %arg9[%c9, %c0_214, %c0_215] : memref<29x32x1xf32, #tpu.memory_space<vmem>>, vector<1x32x1xf32>
    %311 = vector.shape_cast %310 : vector<1x32x1xf32> to vector<32x1xf32>
    %312 = vector.extract_strided_slice %311 {offsets = [0, 0], sizes = [16, 1], strides = [1, 1]} : vector<32x1xf32> to vector<16x1xf32>
    %c10 = arith.constant 10 : index
    %c0_216 = arith.constant 0 : index
    %c0_217 = arith.constant 0 : index
    %313 = vector.load %arg9[%c10, %c0_216, %c0_217] : memref<29x32x1xf32, #tpu.memory_space<vmem>>, vector<1x32x1xf32>
    %314 = vector.shape_cast %313 : vector<1x32x1xf32> to vector<32x1xf32>
    %315 = vector.extract_strided_slice %314 {offsets = [0, 0], sizes = [16, 1], strides = [1, 1]} : vector<32x1xf32> to vector<16x1xf32>
    %cst_218 = arith.constant dense<0.000000e+00> : vector<16xf32>
    %316 = vector.multi_reduction <add>, %309, %cst_218 [1] : vector<16x512xf32> to vector<16xf32>
    %317 = vector.shape_cast %316 : vector<16xf32> to vector<16x1xf32>
    %cst_219 = arith.constant 0.001953125 : f32
    %318 = vector.broadcast %cst_219 : f32 to vector<16x1xf32>
    %319 = arith.mulf %317, %318 : vector<16x1xf32>
    %320 = vector.broadcast %319 : vector<16x1xf32> to vector<16x512xf32>
    %321 = arith.subf %309, %320 : vector<16x512xf32>
    %322 = arith.mulf %321, %321 : vector<16x512xf32>
    %cst_220 = arith.constant dense<0.000000e+00> : vector<16xf32>
    %323 = vector.multi_reduction <add>, %322, %cst_220 [1] : vector<16x512xf32> to vector<16xf32>
    %324 = vector.shape_cast %323 : vector<16xf32> to vector<16x1xf32>
    %cst_221 = arith.constant 0.001953125 : f32
    %325 = vector.broadcast %cst_221 : f32 to vector<16x1xf32>
    %326 = arith.mulf %324, %325 : vector<16x1xf32>
    %cst_222 = arith.constant 9.99999974E-6 : f32
    %327 = vector.broadcast %cst_222 : f32 to vector<16x1xf32>
    %328 = arith.addf %326, %327 : vector<16x1xf32>
    %329 = math.rsqrt %328 : vector<16x1xf32>
    %330 = vector.broadcast %329 : vector<16x1xf32> to vector<16x512xf32>
    %331 = arith.mulf %321, %330 : vector<16x512xf32>
    %332 = vector.broadcast %312 : vector<16x1xf32> to vector<16x512xf32>
    %333 = arith.mulf %331, %332 : vector<16x512xf32>
    %334 = vector.broadcast %315 : vector<16x1xf32> to vector<16x512xf32>
    %335 = arith.addf %333, %334 : vector<16x512xf32>
    %336 = arith.addf %335, %97 : vector<16x512xf32>
    %cst_223 = arith.constant 5.000000e-01 : f32
    %337 = vector.broadcast %cst_223 : f32 to vector<16x512xf32>
    %338 = arith.mulf %337, %336 : vector<16x512xf32>
    %339 = math.tanh %338 : vector<16x512xf32>
    %cst_224 = arith.constant 5.000000e-01 : f32
    %340 = vector.broadcast %cst_224 : f32 to vector<16x512xf32>
    %341 = arith.mulf %340, %339 : vector<16x512xf32>
    %cst_225 = arith.constant 5.000000e-01 : f32
    %342 = vector.broadcast %cst_225 : f32 to vector<16x512xf32>
    %343 = arith.addf %341, %342 : vector<16x512xf32>
    %344 = arith.mulf %336, %343 : vector<16x512xf32>
    %345 = arith.truncf %344 : vector<16x512xf32> to vector<16x512xbf16>
    %c0_226 = arith.constant 0 : index
    %c0_227 = arith.constant 0 : index
    %346 = vector.load %arg5[%c0_226, %c0_227] : memref<512x128xbf16, #tpu.memory_space<vmem>>, vector<512x128xbf16>
    %cst_228 = arith.constant dense<0.000000e+00> : vector<16x128xf32>
    %347 = tpu.matmul %345, %346, %cst_228 {dimension_numbers = #tpu.dot_dimension_numbers<[1], [0], [0], [1], [0, 0, 1, 1], [], []>} : vector<16x512xbf16>, vector<512x128xbf16>, vector<16x128xf32> -> vector<16x128xf32>
    %c9_i32 = arith.constant 9 : i32
    %348 = tpu.dynamic_rotate %347 by %c9_i32 dim 1 : vector<16x128xf32>, i32 -> vector<16x128xf32>
    %c0_229 = arith.constant 0 : index
    %c0_230 = arith.constant 0 : index
    %c0_231 = arith.constant 0 : index
    %349 = vector.load %arg3[%c0_229, %c0_230, %c0_231] : memref<9x1x128xf32, #tpu.memory_space<vmem>>, vector<1x1x128xf32>
    %350 = vector.shape_cast %349 : vector<1x1x128xf32> to vector<1x128xf32>
    %351 = vector.broadcast %350 : vector<1x128xf32> to vector<16x128xf32>
    %352 = arith.mulf %348, %351 : vector<16x128xf32>
    %353 = arith.truncf %352 : vector<16x128xf32> to vector<16x128xbf16>
    %c0_232 = arith.constant 0 : index
    %c0_233 = arith.constant 0 : index
    %c0_234 = arith.constant 0 : index
    %354 = vector.load %arg13[%c0_232, %c0_233, %c0_234] : memref<9x32x16xbf16, #tpu.memory_space<vmem>>, vector<1x32x16xbf16>
    %355 = vector.shape_cast %354 : vector<1x32x16xbf16> to vector<32x16xbf16>
    %cst_235 = arith.constant dense<0.000000e+00> : vector<32x128xf32>
    %356 = tpu.matmul %355, %353, %cst_235 {dimension_numbers = #tpu.dot_dimension_numbers<[1], [0], [0], [1], [0, 0, 1, 1], [], []>} : vector<32x16xbf16>, vector<16x128xbf16>, vector<32x128xf32> -> vector<32x128xf32>
    %c8_i32 = arith.constant 8 : i32
    %357 = tpu.dynamic_rotate %347 by %c8_i32 dim 1 : vector<16x128xf32>, i32 -> vector<16x128xf32>
    %c1_236 = arith.constant 1 : index
    %c0_237 = arith.constant 0 : index
    %c0_238 = arith.constant 0 : index
    %358 = vector.load %arg3[%c1_236, %c0_237, %c0_238] : memref<9x1x128xf32, #tpu.memory_space<vmem>>, vector<1x1x128xf32>
    %359 = vector.shape_cast %358 : vector<1x1x128xf32> to vector<1x128xf32>
    %360 = vector.broadcast %359 : vector<1x128xf32> to vector<16x128xf32>
    %361 = arith.mulf %357, %360 : vector<16x128xf32>
    %362 = arith.truncf %361 : vector<16x128xf32> to vector<16x128xbf16>
    %c1_239 = arith.constant 1 : index
    %c0_240 = arith.constant 0 : index
    %c0_241 = arith.constant 0 : index
    %363 = vector.load %arg13[%c1_239, %c0_240, %c0_241] : memref<9x32x16xbf16, #tpu.memory_space<vmem>>, vector<1x32x16xbf16>
    %364 = vector.shape_cast %363 : vector<1x32x16xbf16> to vector<32x16xbf16>
    %cst_242 = arith.constant dense<0.000000e+00> : vector<32x128xf32>
    %365 = tpu.matmul %364, %362, %cst_242 {dimension_numbers = #tpu.dot_dimension_numbers<[1], [0], [0], [1], [0, 0, 1, 1], [], []>} : vector<32x16xbf16>, vector<16x128xbf16>, vector<32x128xf32> -> vector<32x128xf32>
    %c7_i32 = arith.constant 7 : i32
    %366 = tpu.dynamic_rotate %347 by %c7_i32 dim 1 : vector<16x128xf32>, i32 -> vector<16x128xf32>
    %c2_243 = arith.constant 2 : index
    %c0_244 = arith.constant 0 : index
    %c0_245 = arith.constant 0 : index
    %367 = vector.load %arg3[%c2_243, %c0_244, %c0_245] : memref<9x1x128xf32, #tpu.memory_space<vmem>>, vector<1x1x128xf32>
    %368 = vector.shape_cast %367 : vector<1x1x128xf32> to vector<1x128xf32>
    %369 = vector.broadcast %368 : vector<1x128xf32> to vector<16x128xf32>
    %370 = arith.mulf %366, %369 : vector<16x128xf32>
    %371 = arith.truncf %370 : vector<16x128xf32> to vector<16x128xbf16>
    %c2_246 = arith.constant 2 : index
    %c0_247 = arith.constant 0 : index
    %c0_248 = arith.constant 0 : index
    %372 = vector.load %arg13[%c2_246, %c0_247, %c0_248] : memref<9x32x16xbf16, #tpu.memory_space<vmem>>, vector<1x32x16xbf16>
    %373 = vector.shape_cast %372 : vector<1x32x16xbf16> to vector<32x16xbf16>
    %cst_249 = arith.constant dense<0.000000e+00> : vector<32x128xf32>
    %374 = tpu.matmul %373, %371, %cst_249 {dimension_numbers = #tpu.dot_dimension_numbers<[1], [0], [0], [1], [0, 0, 1, 1], [], []>} : vector<32x16xbf16>, vector<16x128xbf16>, vector<32x128xf32> -> vector<32x128xf32>
    %c1_i32_250 = arith.constant 1 : i32
    %375 = tpu.dynamic_rotate %347 by %c1_i32_250 dim 1 : vector<16x128xf32>, i32 -> vector<16x128xf32>
    %c3_251 = arith.constant 3 : index
    %c0_252 = arith.constant 0 : index
    %c0_253 = arith.constant 0 : index
    %376 = vector.load %arg3[%c3_251, %c0_252, %c0_253] : memref<9x1x128xf32, #tpu.memory_space<vmem>>, vector<1x1x128xf32>
    %377 = vector.shape_cast %376 : vector<1x1x128xf32> to vector<1x128xf32>
    %378 = vector.broadcast %377 : vector<1x128xf32> to vector<16x128xf32>
    %379 = arith.mulf %375, %378 : vector<16x128xf32>
    %380 = arith.truncf %379 : vector<16x128xf32> to vector<16x128xbf16>
    %c3_254 = arith.constant 3 : index
    %c0_255 = arith.constant 0 : index
    %c0_256 = arith.constant 0 : index
    %381 = vector.load %arg13[%c3_254, %c0_255, %c0_256] : memref<9x32x16xbf16, #tpu.memory_space<vmem>>, vector<1x32x16xbf16>
    %382 = vector.shape_cast %381 : vector<1x32x16xbf16> to vector<32x16xbf16>
    %cst_257 = arith.constant dense<0.000000e+00> : vector<32x128xf32>
    %383 = tpu.matmul %382, %380, %cst_257 {dimension_numbers = #tpu.dot_dimension_numbers<[1], [0], [0], [1], [0, 0, 1, 1], [], []>} : vector<32x16xbf16>, vector<16x128xbf16>, vector<32x128xf32> -> vector<32x128xf32>
    %384 = arith.truncf %347 : vector<16x128xf32> to vector<16x128xbf16>
    %c4_258 = arith.constant 4 : index
    %c0_259 = arith.constant 0 : index
    %c0_260 = arith.constant 0 : index
    %385 = vector.load %arg13[%c4_258, %c0_259, %c0_260] : memref<9x32x16xbf16, #tpu.memory_space<vmem>>, vector<1x32x16xbf16>
    %386 = vector.shape_cast %385 : vector<1x32x16xbf16> to vector<32x16xbf16>
    %cst_261 = arith.constant dense<0.000000e+00> : vector<32x128xf32>
    %387 = tpu.matmul %386, %384, %cst_261 {dimension_numbers = #tpu.dot_dimension_numbers<[1], [0], [0], [1], [0, 0, 1, 1], [], []>} : vector<32x16xbf16>, vector<16x128xbf16>, vector<32x128xf32> -> vector<32x128xf32>
    %c127_i32 = arith.constant 127 : i32
    %388 = tpu.dynamic_rotate %347 by %c127_i32 dim 1 : vector<16x128xf32>, i32 -> vector<16x128xf32>
    %c5_262 = arith.constant 5 : index
    %c0_263 = arith.constant 0 : index
    %c0_264 = arith.constant 0 : index
    %389 = vector.load %arg3[%c5_262, %c0_263, %c0_264] : memref<9x1x128xf32, #tpu.memory_space<vmem>>, vector<1x1x128xf32>
    %390 = vector.shape_cast %389 : vector<1x1x128xf32> to vector<1x128xf32>
    %391 = vector.broadcast %390 : vector<1x128xf32> to vector<16x128xf32>
    %392 = arith.mulf %388, %391 : vector<16x128xf32>
    %393 = arith.truncf %392 : vector<16x128xf32> to vector<16x128xbf16>
    %c5_265 = arith.constant 5 : index
    %c0_266 = arith.constant 0 : index
    %c0_267 = arith.constant 0 : index
    %394 = vector.load %arg13[%c5_265, %c0_266, %c0_267] : memref<9x32x16xbf16, #tpu.memory_space<vmem>>, vector<1x32x16xbf16>
    %395 = vector.shape_cast %394 : vector<1x32x16xbf16> to vector<32x16xbf16>
    %cst_268 = arith.constant dense<0.000000e+00> : vector<32x128xf32>
    %396 = tpu.matmul %395, %393, %cst_268 {dimension_numbers = #tpu.dot_dimension_numbers<[1], [0], [0], [1], [0, 0, 1, 1], [], []>} : vector<32x16xbf16>, vector<16x128xbf16>, vector<32x128xf32> -> vector<32x128xf32>
    %c121_i32 = arith.constant 121 : i32
    %397 = tpu.dynamic_rotate %347 by %c121_i32 dim 1 : vector<16x128xf32>, i32 -> vector<16x128xf32>
    %c6_269 = arith.constant 6 : index
    %c0_270 = arith.constant 0 : index
    %c0_271 = arith.constant 0 : index
    %398 = vector.load %arg3[%c6_269, %c0_270, %c0_271] : memref<9x1x128xf32, #tpu.memory_space<vmem>>, vector<1x1x128xf32>
    %399 = vector.shape_cast %398 : vector<1x1x128xf32> to vector<1x128xf32>
    %400 = vector.broadcast %399 : vector<1x128xf32> to vector<16x128xf32>
    %401 = arith.mulf %397, %400 : vector<16x128xf32>
    %402 = arith.truncf %401 : vector<16x128xf32> to vector<16x128xbf16>
    %c6_272 = arith.constant 6 : index
    %c0_273 = arith.constant 0 : index
    %c0_274 = arith.constant 0 : index
    %403 = vector.load %arg13[%c6_272, %c0_273, %c0_274] : memref<9x32x16xbf16, #tpu.memory_space<vmem>>, vector<1x32x16xbf16>
    %404 = vector.shape_cast %403 : vector<1x32x16xbf16> to vector<32x16xbf16>
    %cst_275 = arith.constant dense<0.000000e+00> : vector<32x128xf32>
    %405 = tpu.matmul %404, %402, %cst_275 {dimension_numbers = #tpu.dot_dimension_numbers<[1], [0], [0], [1], [0, 0, 1, 1], [], []>} : vector<32x16xbf16>, vector<16x128xbf16>, vector<32x128xf32> -> vector<32x128xf32>
    %c120_i32 = arith.constant 120 : i32
    %406 = tpu.dynamic_rotate %347 by %c120_i32 dim 1 : vector<16x128xf32>, i32 -> vector<16x128xf32>
    %c7_276 = arith.constant 7 : index
    %c0_277 = arith.constant 0 : index
    %c0_278 = arith.constant 0 : index
    %407 = vector.load %arg3[%c7_276, %c0_277, %c0_278] : memref<9x1x128xf32, #tpu.memory_space<vmem>>, vector<1x1x128xf32>
    %408 = vector.shape_cast %407 : vector<1x1x128xf32> to vector<1x128xf32>
    %409 = vector.broadcast %408 : vector<1x128xf32> to vector<16x128xf32>
    %410 = arith.mulf %406, %409 : vector<16x128xf32>
    %411 = arith.truncf %410 : vector<16x128xf32> to vector<16x128xbf16>
    %c7_279 = arith.constant 7 : index
    %c0_280 = arith.constant 0 : index
    %c0_281 = arith.constant 0 : index
    %412 = vector.load %arg13[%c7_279, %c0_280, %c0_281] : memref<9x32x16xbf16, #tpu.memory_space<vmem>>, vector<1x32x16xbf16>
    %413 = vector.shape_cast %412 : vector<1x32x16xbf16> to vector<32x16xbf16>
    %cst_282 = arith.constant dense<0.000000e+00> : vector<32x128xf32>
    %414 = tpu.matmul %413, %411, %cst_282 {dimension_numbers = #tpu.dot_dimension_numbers<[1], [0], [0], [1], [0, 0, 1, 1], [], []>} : vector<32x16xbf16>, vector<16x128xbf16>, vector<32x128xf32> -> vector<32x128xf32>
    %c119_i32 = arith.constant 119 : i32
    %415 = tpu.dynamic_rotate %347 by %c119_i32 dim 1 : vector<16x128xf32>, i32 -> vector<16x128xf32>
    %c8_283 = arith.constant 8 : index
    %c0_284 = arith.constant 0 : index
    %c0_285 = arith.constant 0 : index
    %416 = vector.load %arg3[%c8_283, %c0_284, %c0_285] : memref<9x1x128xf32, #tpu.memory_space<vmem>>, vector<1x1x128xf32>
    %417 = vector.shape_cast %416 : vector<1x1x128xf32> to vector<1x128xf32>
    %418 = vector.broadcast %417 : vector<1x128xf32> to vector<16x128xf32>
    %419 = arith.mulf %415, %418 : vector<16x128xf32>
    %420 = arith.truncf %419 : vector<16x128xf32> to vector<16x128xbf16>
    %c8_286 = arith.constant 8 : index
    %c0_287 = arith.constant 0 : index
    %c0_288 = arith.constant 0 : index
    %421 = vector.load %arg13[%c8_286, %c0_287, %c0_288] : memref<9x32x16xbf16, #tpu.memory_space<vmem>>, vector<1x32x16xbf16>
    %422 = vector.shape_cast %421 : vector<1x32x16xbf16> to vector<32x16xbf16>
    %cst_289 = arith.constant dense<0.000000e+00> : vector<32x128xf32>
    %423 = tpu.matmul %422, %420, %cst_289 {dimension_numbers = #tpu.dot_dimension_numbers<[1], [0], [0], [1], [0, 0, 1, 1], [], []>} : vector<32x16xbf16>, vector<16x128xbf16>, vector<32x128xf32> -> vector<32x128xf32>
    %424 = arith.addf %356, %365 : vector<32x128xf32>
    %425 = arith.addf %374, %383 : vector<32x128xf32>
    %426 = arith.addf %387, %396 : vector<32x128xf32>
    %427 = arith.addf %405, %414 : vector<32x128xf32>
    %428 = arith.addf %424, %425 : vector<32x128xf32>
    %429 = arith.addf %426, %427 : vector<32x128xf32>
    %430 = arith.addf %428, %429 : vector<32x128xf32>
    %431 = arith.addf %430, %423 : vector<32x128xf32>
    %c1_290 = arith.constant 1 : index
    %c0_291 = arith.constant 0 : index
    %c0_292 = arith.constant 0 : index
    %432 = vector.load %arg9[%c1_290, %c0_291, %c0_292] : memref<29x32x1xf32, #tpu.memory_space<vmem>>, vector<1x32x1xf32>
    %433 = vector.shape_cast %432 : vector<1x32x1xf32> to vector<32x1xf32>
    %434 = vector.broadcast %433 : vector<32x1xf32> to vector<32x128xf32>
    %435 = arith.addf %431, %434 : vector<32x128xf32>
    %cst_293 = arith.constant 5.000000e-01 : f32
    %436 = vector.broadcast %cst_293 : f32 to vector<32x128xf32>
    %437 = arith.mulf %436, %435 : vector<32x128xf32>
    %438 = math.tanh %437 : vector<32x128xf32>
    %cst_294 = arith.constant 5.000000e-01 : f32
    %439 = vector.broadcast %cst_294 : f32 to vector<32x128xf32>
    %440 = arith.mulf %439, %438 : vector<32x128xf32>
    %cst_295 = arith.constant 5.000000e-01 : f32
    %441 = vector.broadcast %cst_295 : f32 to vector<32x128xf32>
    %442 = arith.addf %440, %441 : vector<32x128xf32>
    %443 = arith.mulf %435, %442 : vector<32x128xf32>
    %c9_i32_296 = arith.constant 9 : i32
    %444 = tpu.dynamic_rotate %443 by %c9_i32_296 dim 1 : vector<32x128xf32>, i32 -> vector<32x128xf32>
    %c0_297 = arith.constant 0 : index
    %c0_298 = arith.constant 0 : index
    %c0_299 = arith.constant 0 : index
    %445 = vector.load %arg3[%c0_297, %c0_298, %c0_299] : memref<9x1x128xf32, #tpu.memory_space<vmem>>, vector<1x1x128xf32>
    %446 = vector.shape_cast %445 : vector<1x1x128xf32> to vector<1x128xf32>
    %447 = vector.broadcast %446 : vector<1x128xf32> to vector<32x128xf32>
    %448 = arith.mulf %444, %447 : vector<32x128xf32>
    %449 = arith.truncf %448 : vector<32x128xf32> to vector<32x128xbf16>
    %c0_300 = arith.constant 0 : index
    %c0_301 = arith.constant 0 : index
    %c0_302 = arith.constant 0 : index
    %450 = vector.load %arg14[%c0_300, %c0_301, %c0_302] : memref<9x32x32xbf16, #tpu.memory_space<vmem>>, vector<1x32x32xbf16>
    %451 = vector.shape_cast %450 : vector<1x32x32xbf16> to vector<32x32xbf16>
    %cst_303 = arith.constant dense<0.000000e+00> : vector<32x128xf32>
    %452 = tpu.matmul %451, %449, %cst_303 {dimension_numbers = #tpu.dot_dimension_numbers<[1], [0], [0], [1], [0, 0, 1, 1], [], []>} : vector<32x32xbf16>, vector<32x128xbf16>, vector<32x128xf32> -> vector<32x128xf32>
    %c8_i32_304 = arith.constant 8 : i32
    %453 = tpu.dynamic_rotate %443 by %c8_i32_304 dim 1 : vector<32x128xf32>, i32 -> vector<32x128xf32>
    %c1_305 = arith.constant 1 : index
    %c0_306 = arith.constant 0 : index
    %c0_307 = arith.constant 0 : index
    %454 = vector.load %arg3[%c1_305, %c0_306, %c0_307] : memref<9x1x128xf32, #tpu.memory_space<vmem>>, vector<1x1x128xf32>
    %455 = vector.shape_cast %454 : vector<1x1x128xf32> to vector<1x128xf32>
    %456 = vector.broadcast %455 : vector<1x128xf32> to vector<32x128xf32>
    %457 = arith.mulf %453, %456 : vector<32x128xf32>
    %458 = arith.truncf %457 : vector<32x128xf32> to vector<32x128xbf16>
    %c1_308 = arith.constant 1 : index
    %c0_309 = arith.constant 0 : index
    %c0_310 = arith.constant 0 : index
    %459 = vector.load %arg14[%c1_308, %c0_309, %c0_310] : memref<9x32x32xbf16, #tpu.memory_space<vmem>>, vector<1x32x32xbf16>
    %460 = vector.shape_cast %459 : vector<1x32x32xbf16> to vector<32x32xbf16>
    %cst_311 = arith.constant dense<0.000000e+00> : vector<32x128xf32>
    %461 = tpu.matmul %460, %458, %cst_311 {dimension_numbers = #tpu.dot_dimension_numbers<[1], [0], [0], [1], [0, 0, 1, 1], [], []>} : vector<32x32xbf16>, vector<32x128xbf16>, vector<32x128xf32> -> vector<32x128xf32>
    %c7_i32_312 = arith.constant 7 : i32
    %462 = tpu.dynamic_rotate %443 by %c7_i32_312 dim 1 : vector<32x128xf32>, i32 -> vector<32x128xf32>
    %c2_313 = arith.constant 2 : index
    %c0_314 = arith.constant 0 : index
    %c0_315 = arith.constant 0 : index
    %463 = vector.load %arg3[%c2_313, %c0_314, %c0_315] : memref<9x1x128xf32, #tpu.memory_space<vmem>>, vector<1x1x128xf32>
    %464 = vector.shape_cast %463 : vector<1x1x128xf32> to vector<1x128xf32>
    %465 = vector.broadcast %464 : vector<1x128xf32> to vector<32x128xf32>
    %466 = arith.mulf %462, %465 : vector<32x128xf32>
    %467 = arith.truncf %466 : vector<32x128xf32> to vector<32x128xbf16>
    %c2_316 = arith.constant 2 : index
    %c0_317 = arith.constant 0 : index
    %c0_318 = arith.constant 0 : index
    %468 = vector.load %arg14[%c2_316, %c0_317, %c0_318] : memref<9x32x32xbf16, #tpu.memory_space<vmem>>, vector<1x32x32xbf16>
    %469 = vector.shape_cast %468 : vector<1x32x32xbf16> to vector<32x32xbf16>
    %cst_319 = arith.constant dense<0.000000e+00> : vector<32x128xf32>
    %470 = tpu.matmul %469, %467, %cst_319 {dimension_numbers = #tpu.dot_dimension_numbers<[1], [0], [0], [1], [0, 0, 1, 1], [], []>} : vector<32x32xbf16>, vector<32x128xbf16>, vector<32x128xf32> -> vector<32x128xf32>
    %c1_i32_320 = arith.constant 1 : i32
    %471 = tpu.dynamic_rotate %443 by %c1_i32_320 dim 1 : vector<32x128xf32>, i32 -> vector<32x128xf32>
    %c3_321 = arith.constant 3 : index
    %c0_322 = arith.constant 0 : index
    %c0_323 = arith.constant 0 : index
    %472 = vector.load %arg3[%c3_321, %c0_322, %c0_323] : memref<9x1x128xf32, #tpu.memory_space<vmem>>, vector<1x1x128xf32>
    %473 = vector.shape_cast %472 : vector<1x1x128xf32> to vector<1x128xf32>
    %474 = vector.broadcast %473 : vector<1x128xf32> to vector<32x128xf32>
    %475 = arith.mulf %471, %474 : vector<32x128xf32>
    %476 = arith.truncf %475 : vector<32x128xf32> to vector<32x128xbf16>
    %c3_324 = arith.constant 3 : index
    %c0_325 = arith.constant 0 : index
    %c0_326 = arith.constant 0 : index
    %477 = vector.load %arg14[%c3_324, %c0_325, %c0_326] : memref<9x32x32xbf16, #tpu.memory_space<vmem>>, vector<1x32x32xbf16>
    %478 = vector.shape_cast %477 : vector<1x32x32xbf16> to vector<32x32xbf16>
    %cst_327 = arith.constant dense<0.000000e+00> : vector<32x128xf32>
    %479 = tpu.matmul %478, %476, %cst_327 {dimension_numbers = #tpu.dot_dimension_numbers<[1], [0], [0], [1], [0, 0, 1, 1], [], []>} : vector<32x32xbf16>, vector<32x128xbf16>, vector<32x128xf32> -> vector<32x128xf32>
    %480 = arith.truncf %443 : vector<32x128xf32> to vector<32x128xbf16>
    %c4_328 = arith.constant 4 : index
    %c0_329 = arith.constant 0 : index
    %c0_330 = arith.constant 0 : index
    %481 = vector.load %arg14[%c4_328, %c0_329, %c0_330] : memref<9x32x32xbf16, #tpu.memory_space<vmem>>, vector<1x32x32xbf16>
    %482 = vector.shape_cast %481 : vector<1x32x32xbf16> to vector<32x32xbf16>
    %cst_331 = arith.constant dense<0.000000e+00> : vector<32x128xf32>
    %483 = tpu.matmul %482, %480, %cst_331 {dimension_numbers = #tpu.dot_dimension_numbers<[1], [0], [0], [1], [0, 0, 1, 1], [], []>} : vector<32x32xbf16>, vector<32x128xbf16>, vector<32x128xf32> -> vector<32x128xf32>
    %c127_i32_332 = arith.constant 127 : i32
    %484 = tpu.dynamic_rotate %443 by %c127_i32_332 dim 1 : vector<32x128xf32>, i32 -> vector<32x128xf32>
    %c5_333 = arith.constant 5 : index
    %c0_334 = arith.constant 0 : index
    %c0_335 = arith.constant 0 : index
    %485 = vector.load %arg3[%c5_333, %c0_334, %c0_335] : memref<9x1x128xf32, #tpu.memory_space<vmem>>, vector<1x1x128xf32>
    %486 = vector.shape_cast %485 : vector<1x1x128xf32> to vector<1x128xf32>
    %487 = vector.broadcast %486 : vector<1x128xf32> to vector<32x128xf32>
    %488 = arith.mulf %484, %487 : vector<32x128xf32>
    %489 = arith.truncf %488 : vector<32x128xf32> to vector<32x128xbf16>
    %c5_336 = arith.constant 5 : index
    %c0_337 = arith.constant 0 : index
    %c0_338 = arith.constant 0 : index
    %490 = vector.load %arg14[%c5_336, %c0_337, %c0_338] : memref<9x32x32xbf16, #tpu.memory_space<vmem>>, vector<1x32x32xbf16>
    %491 = vector.shape_cast %490 : vector<1x32x32xbf16> to vector<32x32xbf16>
    %cst_339 = arith.constant dense<0.000000e+00> : vector<32x128xf32>
    %492 = tpu.matmul %491, %489, %cst_339 {dimension_numbers = #tpu.dot_dimension_numbers<[1], [0], [0], [1], [0, 0, 1, 1], [], []>} : vector<32x32xbf16>, vector<32x128xbf16>, vector<32x128xf32> -> vector<32x128xf32>
    %c121_i32_340 = arith.constant 121 : i32
    %493 = tpu.dynamic_rotate %443 by %c121_i32_340 dim 1 : vector<32x128xf32>, i32 -> vector<32x128xf32>
    %c6_341 = arith.constant 6 : index
    %c0_342 = arith.constant 0 : index
    %c0_343 = arith.constant 0 : index
    %494 = vector.load %arg3[%c6_341, %c0_342, %c0_343] : memref<9x1x128xf32, #tpu.memory_space<vmem>>, vector<1x1x128xf32>
    %495 = vector.shape_cast %494 : vector<1x1x128xf32> to vector<1x128xf32>
    %496 = vector.broadcast %495 : vector<1x128xf32> to vector<32x128xf32>
    %497 = arith.mulf %493, %496 : vector<32x128xf32>
    %498 = arith.truncf %497 : vector<32x128xf32> to vector<32x128xbf16>
    %c6_344 = arith.constant 6 : index
    %c0_345 = arith.constant 0 : index
    %c0_346 = arith.constant 0 : index
    %499 = vector.load %arg14[%c6_344, %c0_345, %c0_346] : memref<9x32x32xbf16, #tpu.memory_space<vmem>>, vector<1x32x32xbf16>
    %500 = vector.shape_cast %499 : vector<1x32x32xbf16> to vector<32x32xbf16>
    %cst_347 = arith.constant dense<0.000000e+00> : vector<32x128xf32>
    %501 = tpu.matmul %500, %498, %cst_347 {dimension_numbers = #tpu.dot_dimension_numbers<[1], [0], [0], [1], [0, 0, 1, 1], [], []>} : vector<32x32xbf16>, vector<32x128xbf16>, vector<32x128xf32> -> vector<32x128xf32>
    %c120_i32_348 = arith.constant 120 : i32
    %502 = tpu.dynamic_rotate %443 by %c120_i32_348 dim 1 : vector<32x128xf32>, i32 -> vector<32x128xf32>
    %c7_349 = arith.constant 7 : index
    %c0_350 = arith.constant 0 : index
    %c0_351 = arith.constant 0 : index
    %503 = vector.load %arg3[%c7_349, %c0_350, %c0_351] : memref<9x1x128xf32, #tpu.memory_space<vmem>>, vector<1x1x128xf32>
    %504 = vector.shape_cast %503 : vector<1x1x128xf32> to vector<1x128xf32>
    %505 = vector.broadcast %504 : vector<1x128xf32> to vector<32x128xf32>
    %506 = arith.mulf %502, %505 : vector<32x128xf32>
    %507 = arith.truncf %506 : vector<32x128xf32> to vector<32x128xbf16>
    %c7_352 = arith.constant 7 : index
    %c0_353 = arith.constant 0 : index
    %c0_354 = arith.constant 0 : index
    %508 = vector.load %arg14[%c7_352, %c0_353, %c0_354] : memref<9x32x32xbf16, #tpu.memory_space<vmem>>, vector<1x32x32xbf16>
    %509 = vector.shape_cast %508 : vector<1x32x32xbf16> to vector<32x32xbf16>
    %cst_355 = arith.constant dense<0.000000e+00> : vector<32x128xf32>
    %510 = tpu.matmul %509, %507, %cst_355 {dimension_numbers = #tpu.dot_dimension_numbers<[1], [0], [0], [1], [0, 0, 1, 1], [], []>} : vector<32x32xbf16>, vector<32x128xbf16>, vector<32x128xf32> -> vector<32x128xf32>
    %c119_i32_356 = arith.constant 119 : i32
    %511 = tpu.dynamic_rotate %443 by %c119_i32_356 dim 1 : vector<32x128xf32>, i32 -> vector<32x128xf32>
    %c8_357 = arith.constant 8 : index
    %c0_358 = arith.constant 0 : index
    %c0_359 = arith.constant 0 : index
    %512 = vector.load %arg3[%c8_357, %c0_358, %c0_359] : memref<9x1x128xf32, #tpu.memory_space<vmem>>, vector<1x1x128xf32>
    %513 = vector.shape_cast %512 : vector<1x1x128xf32> to vector<1x128xf32>
    %514 = vector.broadcast %513 : vector<1x128xf32> to vector<32x128xf32>
    %515 = arith.mulf %511, %514 : vector<32x128xf32>
    %516 = arith.truncf %515 : vector<32x128xf32> to vector<32x128xbf16>
    %c8_360 = arith.constant 8 : index
    %c0_361 = arith.constant 0 : index
    %c0_362 = arith.constant 0 : index
    %517 = vector.load %arg14[%c8_360, %c0_361, %c0_362] : memref<9x32x32xbf16, #tpu.memory_space<vmem>>, vector<1x32x32xbf16>
    %518 = vector.shape_cast %517 : vector<1x32x32xbf16> to vector<32x32xbf16>
    %cst_363 = arith.constant dense<0.000000e+00> : vector<32x128xf32>
    %519 = tpu.matmul %518, %516, %cst_363 {dimension_numbers = #tpu.dot_dimension_numbers<[1], [0], [0], [1], [0, 0, 1, 1], [], []>} : vector<32x32xbf16>, vector<32x128xbf16>, vector<32x128xf32> -> vector<32x128xf32>
    %520 = arith.addf %452, %461 : vector<32x128xf32>
    %521 = arith.addf %470, %479 : vector<32x128xf32>
    %522 = arith.addf %483, %492 : vector<32x128xf32>
    %523 = arith.addf %501, %510 : vector<32x128xf32>
    %524 = arith.addf %520, %521 : vector<32x128xf32>
    %525 = arith.addf %522, %523 : vector<32x128xf32>
    %526 = arith.addf %524, %525 : vector<32x128xf32>
    %527 = arith.addf %526, %519 : vector<32x128xf32>
    %c11 = arith.constant 11 : index
    %c0_364 = arith.constant 0 : index
    %c0_365 = arith.constant 0 : index
    %528 = vector.load %arg9[%c11, %c0_364, %c0_365] : memref<29x32x1xf32, #tpu.memory_space<vmem>>, vector<1x32x1xf32>
    %529 = vector.shape_cast %528 : vector<1x32x1xf32> to vector<32x1xf32>
    %530 = vector.broadcast %529 : vector<32x1xf32> to vector<32x128xf32>
    %531 = arith.addf %527, %530 : vector<32x128xf32>
    %c12 = arith.constant 12 : index
    %c0_366 = arith.constant 0 : index
    %c0_367 = arith.constant 0 : index
    %532 = vector.load %arg9[%c12, %c0_366, %c0_367] : memref<29x32x1xf32, #tpu.memory_space<vmem>>, vector<1x32x1xf32>
    %533 = vector.shape_cast %532 : vector<1x32x1xf32> to vector<32x1xf32>
    %c13 = arith.constant 13 : index
    %c0_368 = arith.constant 0 : index
    %c0_369 = arith.constant 0 : index
    %534 = vector.load %arg9[%c13, %c0_368, %c0_369] : memref<29x32x1xf32, #tpu.memory_space<vmem>>, vector<1x32x1xf32>
    %535 = vector.shape_cast %534 : vector<1x32x1xf32> to vector<32x1xf32>
    %cst_370 = arith.constant dense<0.000000e+00> : vector<32xf32>
    %536 = vector.multi_reduction <add>, %531, %cst_370 [1] : vector<32x128xf32> to vector<32xf32>
    %537 = vector.shape_cast %536 : vector<32xf32> to vector<32x1xf32>
    %cst_371 = arith.constant 7.812500e-03 : f32
    %538 = vector.broadcast %cst_371 : f32 to vector<32x1xf32>
    %539 = arith.mulf %537, %538 : vector<32x1xf32>
    %540 = vector.broadcast %539 : vector<32x1xf32> to vector<32x128xf32>
    %541 = arith.subf %531, %540 : vector<32x128xf32>
    %542 = arith.mulf %541, %541 : vector<32x128xf32>
    %cst_372 = arith.constant dense<0.000000e+00> : vector<32xf32>
    %543 = vector.multi_reduction <add>, %542, %cst_372 [1] : vector<32x128xf32> to vector<32xf32>
    %544 = vector.shape_cast %543 : vector<32xf32> to vector<32x1xf32>
    %cst_373 = arith.constant 7.812500e-03 : f32
    %545 = vector.broadcast %cst_373 : f32 to vector<32x1xf32>
    %546 = arith.mulf %544, %545 : vector<32x1xf32>
    %cst_374 = arith.constant 9.99999974E-6 : f32
    %547 = vector.broadcast %cst_374 : f32 to vector<32x1xf32>
    %548 = arith.addf %546, %547 : vector<32x1xf32>
    %549 = math.rsqrt %548 : vector<32x1xf32>
    %550 = vector.broadcast %549 : vector<32x1xf32> to vector<32x128xf32>
    %551 = arith.mulf %541, %550 : vector<32x128xf32>
    %552 = vector.broadcast %533 : vector<32x1xf32> to vector<32x128xf32>
    %553 = arith.mulf %551, %552 : vector<32x128xf32>
    %554 = vector.broadcast %535 : vector<32x1xf32> to vector<32x128xf32>
    %555 = arith.addf %553, %554 : vector<32x128xf32>
    %cst_375 = arith.constant 5.000000e-01 : f32
    %556 = vector.broadcast %cst_375 : f32 to vector<32x128xf32>
    %557 = arith.mulf %556, %555 : vector<32x128xf32>
    %558 = math.tanh %557 : vector<32x128xf32>
    %cst_376 = arith.constant 5.000000e-01 : f32
    %559 = vector.broadcast %cst_376 : f32 to vector<32x128xf32>
    %560 = arith.mulf %559, %558 : vector<32x128xf32>
    %cst_377 = arith.constant 5.000000e-01 : f32
    %561 = vector.broadcast %cst_377 : f32 to vector<32x128xf32>
    %562 = arith.addf %560, %561 : vector<32x128xf32>
    %563 = arith.mulf %555, %562 : vector<32x128xf32>
    %c9_i32_378 = arith.constant 9 : i32
    %564 = tpu.dynamic_rotate %563 by %c9_i32_378 dim 1 : vector<32x128xf32>, i32 -> vector<32x128xf32>
    %c0_379 = arith.constant 0 : index
    %c0_380 = arith.constant 0 : index
    %c0_381 = arith.constant 0 : index
    %565 = vector.load %arg3[%c0_379, %c0_380, %c0_381] : memref<9x1x128xf32, #tpu.memory_space<vmem>>, vector<1x1x128xf32>
    %566 = vector.shape_cast %565 : vector<1x1x128xf32> to vector<1x128xf32>
    %567 = vector.broadcast %566 : vector<1x128xf32> to vector<32x128xf32>
    %568 = arith.mulf %564, %567 : vector<32x128xf32>
    %569 = arith.truncf %568 : vector<32x128xf32> to vector<32x128xbf16>
    %c0_382 = arith.constant 0 : index
    %c0_383 = arith.constant 0 : index
    %c0_384 = arith.constant 0 : index
    %570 = vector.load %arg15[%c0_382, %c0_383, %c0_384] : memref<9x32x32xbf16, #tpu.memory_space<vmem>>, vector<1x32x32xbf16>
    %571 = vector.shape_cast %570 : vector<1x32x32xbf16> to vector<32x32xbf16>
    %cst_385 = arith.constant dense<0.000000e+00> : vector<32x128xf32>
    %572 = tpu.matmul %571, %569, %cst_385 {dimension_numbers = #tpu.dot_dimension_numbers<[1], [0], [0], [1], [0, 0, 1, 1], [], []>} : vector<32x32xbf16>, vector<32x128xbf16>, vector<32x128xf32> -> vector<32x128xf32>
    %c8_i32_386 = arith.constant 8 : i32
    %573 = tpu.dynamic_rotate %563 by %c8_i32_386 dim 1 : vector<32x128xf32>, i32 -> vector<32x128xf32>
    %c1_387 = arith.constant 1 : index
    %c0_388 = arith.constant 0 : index
    %c0_389 = arith.constant 0 : index
    %574 = vector.load %arg3[%c1_387, %c0_388, %c0_389] : memref<9x1x128xf32, #tpu.memory_space<vmem>>, vector<1x1x128xf32>
    %575 = vector.shape_cast %574 : vector<1x1x128xf32> to vector<1x128xf32>
    %576 = vector.broadcast %575 : vector<1x128xf32> to vector<32x128xf32>
    %577 = arith.mulf %573, %576 : vector<32x128xf32>
    %578 = arith.truncf %577 : vector<32x128xf32> to vector<32x128xbf16>
    %c1_390 = arith.constant 1 : index
    %c0_391 = arith.constant 0 : index
    %c0_392 = arith.constant 0 : index
    %579 = vector.load %arg15[%c1_390, %c0_391, %c0_392] : memref<9x32x32xbf16, #tpu.memory_space<vmem>>, vector<1x32x32xbf16>
    %580 = vector.shape_cast %579 : vector<1x32x32xbf16> to vector<32x32xbf16>
    %cst_393 = arith.constant dense<0.000000e+00> : vector<32x128xf32>
    %581 = tpu.matmul %580, %578, %cst_393 {dimension_numbers = #tpu.dot_dimension_numbers<[1], [0], [0], [1], [0, 0, 1, 1], [], []>} : vector<32x32xbf16>, vector<32x128xbf16>, vector<32x128xf32> -> vector<32x128xf32>
    %c7_i32_394 = arith.constant 7 : i32
    %582 = tpu.dynamic_rotate %563 by %c7_i32_394 dim 1 : vector<32x128xf32>, i32 -> vector<32x128xf32>
    %c2_395 = arith.constant 2 : index
    %c0_396 = arith.constant 0 : index
    %c0_397 = arith.constant 0 : index
    %583 = vector.load %arg3[%c2_395, %c0_396, %c0_397] : memref<9x1x128xf32, #tpu.memory_space<vmem>>, vector<1x1x128xf32>
    %584 = vector.shape_cast %583 : vector<1x1x128xf32> to vector<1x128xf32>
    %585 = vector.broadcast %584 : vector<1x128xf32> to vector<32x128xf32>
    %586 = arith.mulf %582, %585 : vector<32x128xf32>
    %587 = arith.truncf %586 : vector<32x128xf32> to vector<32x128xbf16>
    %c2_398 = arith.constant 2 : index
    %c0_399 = arith.constant 0 : index
    %c0_400 = arith.constant 0 : index
    %588 = vector.load %arg15[%c2_398, %c0_399, %c0_400] : memref<9x32x32xbf16, #tpu.memory_space<vmem>>, vector<1x32x32xbf16>
    %589 = vector.shape_cast %588 : vector<1x32x32xbf16> to vector<32x32xbf16>
    %cst_401 = arith.constant dense<0.000000e+00> : vector<32x128xf32>
    %590 = tpu.matmul %589, %587, %cst_401 {dimension_numbers = #tpu.dot_dimension_numbers<[1], [0], [0], [1], [0, 0, 1, 1], [], []>} : vector<32x32xbf16>, vector<32x128xbf16>, vector<32x128xf32> -> vector<32x128xf32>
    %c1_i32_402 = arith.constant 1 : i32
    %591 = tpu.dynamic_rotate %563 by %c1_i32_402 dim 1 : vector<32x128xf32>, i32 -> vector<32x128xf32>
    %c3_403 = arith.constant 3 : index
    %c0_404 = arith.constant 0 : index
    %c0_405 = arith.constant 0 : index
    %592 = vector.load %arg3[%c3_403, %c0_404, %c0_405] : memref<9x1x128xf32, #tpu.memory_space<vmem>>, vector<1x1x128xf32>
    %593 = vector.shape_cast %592 : vector<1x1x128xf32> to vector<1x128xf32>
    %594 = vector.broadcast %593 : vector<1x128xf32> to vector<32x128xf32>
    %595 = arith.mulf %591, %594 : vector<32x128xf32>
    %596 = arith.truncf %595 : vector<32x128xf32> to vector<32x128xbf16>
    %c3_406 = arith.constant 3 : index
    %c0_407 = arith.constant 0 : index
    %c0_408 = arith.constant 0 : index
    %597 = vector.load %arg15[%c3_406, %c0_407, %c0_408] : memref<9x32x32xbf16, #tpu.memory_space<vmem>>, vector<1x32x32xbf16>
    %598 = vector.shape_cast %597 : vector<1x32x32xbf16> to vector<32x32xbf16>
    %cst_409 = arith.constant dense<0.000000e+00> : vector<32x128xf32>
    %599 = tpu.matmul %598, %596, %cst_409 {dimension_numbers = #tpu.dot_dimension_numbers<[1], [0], [0], [1], [0, 0, 1, 1], [], []>} : vector<32x32xbf16>, vector<32x128xbf16>, vector<32x128xf32> -> vector<32x128xf32>
    %600 = arith.truncf %563 : vector<32x128xf32> to vector<32x128xbf16>
    %c4_410 = arith.constant 4 : index
    %c0_411 = arith.constant 0 : index
    %c0_412 = arith.constant 0 : index
    %601 = vector.load %arg15[%c4_410, %c0_411, %c0_412] : memref<9x32x32xbf16, #tpu.memory_space<vmem>>, vector<1x32x32xbf16>
    %602 = vector.shape_cast %601 : vector<1x32x32xbf16> to vector<32x32xbf16>
    %cst_413 = arith.constant dense<0.000000e+00> : vector<32x128xf32>
    %603 = tpu.matmul %602, %600, %cst_413 {dimension_numbers = #tpu.dot_dimension_numbers<[1], [0], [0], [1], [0, 0, 1, 1], [], []>} : vector<32x32xbf16>, vector<32x128xbf16>, vector<32x128xf32> -> vector<32x128xf32>
    %c127_i32_414 = arith.constant 127 : i32
    %604 = tpu.dynamic_rotate %563 by %c127_i32_414 dim 1 : vector<32x128xf32>, i32 -> vector<32x128xf32>
    %c5_415 = arith.constant 5 : index
    %c0_416 = arith.constant 0 : index
    %c0_417 = arith.constant 0 : index
    %605 = vector.load %arg3[%c5_415, %c0_416, %c0_417] : memref<9x1x128xf32, #tpu.memory_space<vmem>>, vector<1x1x128xf32>
    %606 = vector.shape_cast %605 : vector<1x1x128xf32> to vector<1x128xf32>
    %607 = vector.broadcast %606 : vector<1x128xf32> to vector<32x128xf32>
    %608 = arith.mulf %604, %607 : vector<32x128xf32>
    %609 = arith.truncf %608 : vector<32x128xf32> to vector<32x128xbf16>
    %c5_418 = arith.constant 5 : index
    %c0_419 = arith.constant 0 : index
    %c0_420 = arith.constant 0 : index
    %610 = vector.load %arg15[%c5_418, %c0_419, %c0_420] : memref<9x32x32xbf16, #tpu.memory_space<vmem>>, vector<1x32x32xbf16>
    %611 = vector.shape_cast %610 : vector<1x32x32xbf16> to vector<32x32xbf16>
    %cst_421 = arith.constant dense<0.000000e+00> : vector<32x128xf32>
    %612 = tpu.matmul %611, %609, %cst_421 {dimension_numbers = #tpu.dot_dimension_numbers<[1], [0], [0], [1], [0, 0, 1, 1], [], []>} : vector<32x32xbf16>, vector<32x128xbf16>, vector<32x128xf32> -> vector<32x128xf32>
    %c121_i32_422 = arith.constant 121 : i32
    %613 = tpu.dynamic_rotate %563 by %c121_i32_422 dim 1 : vector<32x128xf32>, i32 -> vector<32x128xf32>
    %c6_423 = arith.constant 6 : index
    %c0_424 = arith.constant 0 : index
    %c0_425 = arith.constant 0 : index
    %614 = vector.load %arg3[%c6_423, %c0_424, %c0_425] : memref<9x1x128xf32, #tpu.memory_space<vmem>>, vector<1x1x128xf32>
    %615 = vector.shape_cast %614 : vector<1x1x128xf32> to vector<1x128xf32>
    %616 = vector.broadcast %615 : vector<1x128xf32> to vector<32x128xf32>
    %617 = arith.mulf %613, %616 : vector<32x128xf32>
    %618 = arith.truncf %617 : vector<32x128xf32> to vector<32x128xbf16>
    %c6_426 = arith.constant 6 : index
    %c0_427 = arith.constant 0 : index
    %c0_428 = arith.constant 0 : index
    %619 = vector.load %arg15[%c6_426, %c0_427, %c0_428] : memref<9x32x32xbf16, #tpu.memory_space<vmem>>, vector<1x32x32xbf16>
    %620 = vector.shape_cast %619 : vector<1x32x32xbf16> to vector<32x32xbf16>
    %cst_429 = arith.constant dense<0.000000e+00> : vector<32x128xf32>
    %621 = tpu.matmul %620, %618, %cst_429 {dimension_numbers = #tpu.dot_dimension_numbers<[1], [0], [0], [1], [0, 0, 1, 1], [], []>} : vector<32x32xbf16>, vector<32x128xbf16>, vector<32x128xf32> -> vector<32x128xf32>
    %c120_i32_430 = arith.constant 120 : i32
    %622 = tpu.dynamic_rotate %563 by %c120_i32_430 dim 1 : vector<32x128xf32>, i32 -> vector<32x128xf32>
    %c7_431 = arith.constant 7 : index
    %c0_432 = arith.constant 0 : index
    %c0_433 = arith.constant 0 : index
    %623 = vector.load %arg3[%c7_431, %c0_432, %c0_433] : memref<9x1x128xf32, #tpu.memory_space<vmem>>, vector<1x1x128xf32>
    %624 = vector.shape_cast %623 : vector<1x1x128xf32> to vector<1x128xf32>
    %625 = vector.broadcast %624 : vector<1x128xf32> to vector<32x128xf32>
    %626 = arith.mulf %622, %625 : vector<32x128xf32>
    %627 = arith.truncf %626 : vector<32x128xf32> to vector<32x128xbf16>
    %c7_434 = arith.constant 7 : index
    %c0_435 = arith.constant 0 : index
    %c0_436 = arith.constant 0 : index
    %628 = vector.load %arg15[%c7_434, %c0_435, %c0_436] : memref<9x32x32xbf16, #tpu.memory_space<vmem>>, vector<1x32x32xbf16>
    %629 = vector.shape_cast %628 : vector<1x32x32xbf16> to vector<32x32xbf16>
    %cst_437 = arith.constant dense<0.000000e+00> : vector<32x128xf32>
    %630 = tpu.matmul %629, %627, %cst_437 {dimension_numbers = #tpu.dot_dimension_numbers<[1], [0], [0], [1], [0, 0, 1, 1], [], []>} : vector<32x32xbf16>, vector<32x128xbf16>, vector<32x128xf32> -> vector<32x128xf32>
    %c119_i32_438 = arith.constant 119 : i32
    %631 = tpu.dynamic_rotate %563 by %c119_i32_438 dim 1 : vector<32x128xf32>, i32 -> vector<32x128xf32>
    %c8_439 = arith.constant 8 : index
    %c0_440 = arith.constant 0 : index
    %c0_441 = arith.constant 0 : index
    %632 = vector.load %arg3[%c8_439, %c0_440, %c0_441] : memref<9x1x128xf32, #tpu.memory_space<vmem>>, vector<1x1x128xf32>
    %633 = vector.shape_cast %632 : vector<1x1x128xf32> to vector<1x128xf32>
    %634 = vector.broadcast %633 : vector<1x128xf32> to vector<32x128xf32>
    %635 = arith.mulf %631, %634 : vector<32x128xf32>
    %636 = arith.truncf %635 : vector<32x128xf32> to vector<32x128xbf16>
    %c8_442 = arith.constant 8 : index
    %c0_443 = arith.constant 0 : index
    %c0_444 = arith.constant 0 : index
    %637 = vector.load %arg15[%c8_442, %c0_443, %c0_444] : memref<9x32x32xbf16, #tpu.memory_space<vmem>>, vector<1x32x32xbf16>
    %638 = vector.shape_cast %637 : vector<1x32x32xbf16> to vector<32x32xbf16>
    %cst_445 = arith.constant dense<0.000000e+00> : vector<32x128xf32>
    %639 = tpu.matmul %638, %636, %cst_445 {dimension_numbers = #tpu.dot_dimension_numbers<[1], [0], [0], [1], [0, 0, 1, 1], [], []>} : vector<32x32xbf16>, vector<32x128xbf16>, vector<32x128xf32> -> vector<32x128xf32>
    %640 = arith.addf %572, %581 : vector<32x128xf32>
    %641 = arith.addf %590, %599 : vector<32x128xf32>
    %642 = arith.addf %603, %612 : vector<32x128xf32>
    %643 = arith.addf %621, %630 : vector<32x128xf32>
    %644 = arith.addf %640, %641 : vector<32x128xf32>
    %645 = arith.addf %642, %643 : vector<32x128xf32>
    %646 = arith.addf %644, %645 : vector<32x128xf32>
    %647 = arith.addf %646, %639 : vector<32x128xf32>
    %c14 = arith.constant 14 : index
    %c0_446 = arith.constant 0 : index
    %c0_447 = arith.constant 0 : index
    %648 = vector.load %arg9[%c14, %c0_446, %c0_447] : memref<29x32x1xf32, #tpu.memory_space<vmem>>, vector<1x32x1xf32>
    %649 = vector.shape_cast %648 : vector<1x32x1xf32> to vector<32x1xf32>
    %650 = vector.broadcast %649 : vector<32x1xf32> to vector<32x128xf32>
    %651 = arith.addf %647, %650 : vector<32x128xf32>
    %c15 = arith.constant 15 : index
    %c0_448 = arith.constant 0 : index
    %c0_449 = arith.constant 0 : index
    %652 = vector.load %arg9[%c15, %c0_448, %c0_449] : memref<29x32x1xf32, #tpu.memory_space<vmem>>, vector<1x32x1xf32>
    %653 = vector.shape_cast %652 : vector<1x32x1xf32> to vector<32x1xf32>
    %c16 = arith.constant 16 : index
    %c0_450 = arith.constant 0 : index
    %c0_451 = arith.constant 0 : index
    %654 = vector.load %arg9[%c16, %c0_450, %c0_451] : memref<29x32x1xf32, #tpu.memory_space<vmem>>, vector<1x32x1xf32>
    %655 = vector.shape_cast %654 : vector<1x32x1xf32> to vector<32x1xf32>
    %cst_452 = arith.constant dense<0.000000e+00> : vector<32xf32>
    %656 = vector.multi_reduction <add>, %651, %cst_452 [1] : vector<32x128xf32> to vector<32xf32>
    %657 = vector.shape_cast %656 : vector<32xf32> to vector<32x1xf32>
    %cst_453 = arith.constant 7.812500e-03 : f32
    %658 = vector.broadcast %cst_453 : f32 to vector<32x1xf32>
    %659 = arith.mulf %657, %658 : vector<32x1xf32>
    %660 = vector.broadcast %659 : vector<32x1xf32> to vector<32x128xf32>
    %661 = arith.subf %651, %660 : vector<32x128xf32>
    %662 = arith.mulf %661, %661 : vector<32x128xf32>
    %cst_454 = arith.constant dense<0.000000e+00> : vector<32xf32>
    %663 = vector.multi_reduction <add>, %662, %cst_454 [1] : vector<32x128xf32> to vector<32xf32>
    %664 = vector.shape_cast %663 : vector<32xf32> to vector<32x1xf32>
    %cst_455 = arith.constant 7.812500e-03 : f32
    %665 = vector.broadcast %cst_455 : f32 to vector<32x1xf32>
    %666 = arith.mulf %664, %665 : vector<32x1xf32>
    %cst_456 = arith.constant 9.99999974E-6 : f32
    %667 = vector.broadcast %cst_456 : f32 to vector<32x1xf32>
    %668 = arith.addf %666, %667 : vector<32x1xf32>
    %669 = math.rsqrt %668 : vector<32x1xf32>
    %670 = vector.broadcast %669 : vector<32x1xf32> to vector<32x128xf32>
    %671 = arith.mulf %661, %670 : vector<32x128xf32>
    %672 = vector.broadcast %653 : vector<32x1xf32> to vector<32x128xf32>
    %673 = arith.mulf %671, %672 : vector<32x128xf32>
    %674 = vector.broadcast %655 : vector<32x1xf32> to vector<32x128xf32>
    %675 = arith.addf %673, %674 : vector<32x128xf32>
    %676 = arith.addf %675, %443 : vector<32x128xf32>
    %cst_457 = arith.constant 5.000000e-01 : f32
    %677 = vector.broadcast %cst_457 : f32 to vector<32x128xf32>
    %678 = arith.mulf %677, %676 : vector<32x128xf32>
    %679 = math.tanh %678 : vector<32x128xf32>
    %cst_458 = arith.constant 5.000000e-01 : f32
    %680 = vector.broadcast %cst_458 : f32 to vector<32x128xf32>
    %681 = arith.mulf %680, %679 : vector<32x128xf32>
    %cst_459 = arith.constant 5.000000e-01 : f32
    %682 = vector.broadcast %cst_459 : f32 to vector<32x128xf32>
    %683 = arith.addf %681, %682 : vector<32x128xf32>
    %684 = arith.mulf %676, %683 : vector<32x128xf32>
    %685 = arith.truncf %684 : vector<32x128xf32> to vector<32x128xbf16>
    %c0_460 = arith.constant 0 : index
    %c0_461 = arith.constant 0 : index
    %686 = vector.load %arg6[%c0_460, %c0_461] : memref<128x32xbf16, #tpu.memory_space<vmem>>, vector<128x32xbf16>
    %cst_462 = arith.constant dense<0.000000e+00> : vector<32x32xf32>
    %687 = tpu.matmul %685, %686, %cst_462 {dimension_numbers = #tpu.dot_dimension_numbers<[1], [0], [0], [1], [0, 0, 1, 1], [], []>} : vector<32x128xbf16>, vector<128x32xbf16>, vector<32x32xf32> -> vector<32x32xf32>
    %688 = arith.truncf %687 : vector<32x32xf32> to vector<32x32xbf16>
    %c0_463 = arith.constant 0 : index
    %c0_464 = arith.constant 0 : index
    %c0_465 = arith.constant 0 : index
    %689 = vector.load %arg4[%c0_463, %c0_464, %c0_465] : memref<9x32x32xbf16, #tpu.memory_space<vmem>>, vector<1x32x32xbf16>
    %690 = vector.shape_cast %689 : vector<1x32x32xbf16> to vector<32x32xbf16>
    %cst_466 = arith.constant dense<0.000000e+00> : vector<32x32xf32>
    %691 = tpu.matmul %688, %690, %cst_466 {dimension_numbers = #tpu.dot_dimension_numbers<[1], [0], [0], [1], [0, 0, 1, 1], [], []>} : vector<32x32xbf16>, vector<32x32xbf16>, vector<32x32xf32> -> vector<32x32xf32>
    %692 = arith.truncf %691 : vector<32x32xf32> to vector<32x32xbf16>
    %c0_467 = arith.constant 0 : index
    %c0_468 = arith.constant 0 : index
    %c0_469 = arith.constant 0 : index
    %693 = vector.load %arg16[%c0_467, %c0_468, %c0_469] : memref<9x32x32xbf16, #tpu.memory_space<vmem>>, vector<1x32x32xbf16>
    %694 = vector.shape_cast %693 : vector<1x32x32xbf16> to vector<32x32xbf16>
    %cst_470 = arith.constant dense<0.000000e+00> : vector<32x32xf32>
    %695 = tpu.matmul %694, %692, %cst_470 {dimension_numbers = #tpu.dot_dimension_numbers<[1], [0], [0], [1], [0, 0, 1, 1], [], []>} : vector<32x32xbf16>, vector<32x32xbf16>, vector<32x32xf32> -> vector<32x32xf32>
    %c1_471 = arith.constant 1 : index
    %c0_472 = arith.constant 0 : index
    %c0_473 = arith.constant 0 : index
    %696 = vector.load %arg4[%c1_471, %c0_472, %c0_473] : memref<9x32x32xbf16, #tpu.memory_space<vmem>>, vector<1x32x32xbf16>
    %697 = vector.shape_cast %696 : vector<1x32x32xbf16> to vector<32x32xbf16>
    %cst_474 = arith.constant dense<0.000000e+00> : vector<32x32xf32>
    %698 = tpu.matmul %688, %697, %cst_474 {dimension_numbers = #tpu.dot_dimension_numbers<[1], [0], [0], [1], [0, 0, 1, 1], [], []>} : vector<32x32xbf16>, vector<32x32xbf16>, vector<32x32xf32> -> vector<32x32xf32>
    %699 = arith.truncf %698 : vector<32x32xf32> to vector<32x32xbf16>
    %c1_475 = arith.constant 1 : index
    %c0_476 = arith.constant 0 : index
    %c0_477 = arith.constant 0 : index
    %700 = vector.load %arg16[%c1_475, %c0_476, %c0_477] : memref<9x32x32xbf16, #tpu.memory_space<vmem>>, vector<1x32x32xbf16>
    %701 = vector.shape_cast %700 : vector<1x32x32xbf16> to vector<32x32xbf16>
    %cst_478 = arith.constant dense<0.000000e+00> : vector<32x32xf32>
    %702 = tpu.matmul %701, %699, %cst_478 {dimension_numbers = #tpu.dot_dimension_numbers<[1], [0], [0], [1], [0, 0, 1, 1], [], []>} : vector<32x32xbf16>, vector<32x32xbf16>, vector<32x32xf32> -> vector<32x32xf32>
    %c2_479 = arith.constant 2 : index
    %c0_480 = arith.constant 0 : index
    %c0_481 = arith.constant 0 : index
    %703 = vector.load %arg4[%c2_479, %c0_480, %c0_481] : memref<9x32x32xbf16, #tpu.memory_space<vmem>>, vector<1x32x32xbf16>
    %704 = vector.shape_cast %703 : vector<1x32x32xbf16> to vector<32x32xbf16>
    %cst_482 = arith.constant dense<0.000000e+00> : vector<32x32xf32>
    %705 = tpu.matmul %688, %704, %cst_482 {dimension_numbers = #tpu.dot_dimension_numbers<[1], [0], [0], [1], [0, 0, 1, 1], [], []>} : vector<32x32xbf16>, vector<32x32xbf16>, vector<32x32xf32> -> vector<32x32xf32>
    %706 = arith.truncf %705 : vector<32x32xf32> to vector<32x32xbf16>
    %c2_483 = arith.constant 2 : index
    %c0_484 = arith.constant 0 : index
    %c0_485 = arith.constant 0 : index
    %707 = vector.load %arg16[%c2_483, %c0_484, %c0_485] : memref<9x32x32xbf16, #tpu.memory_space<vmem>>, vector<1x32x32xbf16>
    %708 = vector.shape_cast %707 : vector<1x32x32xbf16> to vector<32x32xbf16>
    %cst_486 = arith.constant dense<0.000000e+00> : vector<32x32xf32>
    %709 = tpu.matmul %708, %706, %cst_486 {dimension_numbers = #tpu.dot_dimension_numbers<[1], [0], [0], [1], [0, 0, 1, 1], [], []>} : vector<32x32xbf16>, vector<32x32xbf16>, vector<32x32xf32> -> vector<32x32xf32>
    %c3_487 = arith.constant 3 : index
    %c0_488 = arith.constant 0 : index
    %c0_489 = arith.constant 0 : index
    %710 = vector.load %arg4[%c3_487, %c0_488, %c0_489] : memref<9x32x32xbf16, #tpu.memory_space<vmem>>, vector<1x32x32xbf16>
    %711 = vector.shape_cast %710 : vector<1x32x32xbf16> to vector<32x32xbf16>
    %cst_490 = arith.constant dense<0.000000e+00> : vector<32x32xf32>
    %712 = tpu.matmul %688, %711, %cst_490 {dimension_numbers = #tpu.dot_dimension_numbers<[1], [0], [0], [1], [0, 0, 1, 1], [], []>} : vector<32x32xbf16>, vector<32x32xbf16>, vector<32x32xf32> -> vector<32x32xf32>
    %713 = arith.truncf %712 : vector<32x32xf32> to vector<32x32xbf16>
    %c3_491 = arith.constant 3 : index
    %c0_492 = arith.constant 0 : index
    %c0_493 = arith.constant 0 : index
    %714 = vector.load %arg16[%c3_491, %c0_492, %c0_493] : memref<9x32x32xbf16, #tpu.memory_space<vmem>>, vector<1x32x32xbf16>
    %715 = vector.shape_cast %714 : vector<1x32x32xbf16> to vector<32x32xbf16>
    %cst_494 = arith.constant dense<0.000000e+00> : vector<32x32xf32>
    %716 = tpu.matmul %715, %713, %cst_494 {dimension_numbers = #tpu.dot_dimension_numbers<[1], [0], [0], [1], [0, 0, 1, 1], [], []>} : vector<32x32xbf16>, vector<32x32xbf16>, vector<32x32xf32> -> vector<32x32xf32>
    %c4_495 = arith.constant 4 : index
    %c0_496 = arith.constant 0 : index
    %c0_497 = arith.constant 0 : index
    %717 = vector.load %arg4[%c4_495, %c0_496, %c0_497] : memref<9x32x32xbf16, #tpu.memory_space<vmem>>, vector<1x32x32xbf16>
    %718 = vector.shape_cast %717 : vector<1x32x32xbf16> to vector<32x32xbf16>
    %cst_498 = arith.constant dense<0.000000e+00> : vector<32x32xf32>
    %719 = tpu.matmul %688, %718, %cst_498 {dimension_numbers = #tpu.dot_dimension_numbers<[1], [0], [0], [1], [0, 0, 1, 1], [], []>} : vector<32x32xbf16>, vector<32x32xbf16>, vector<32x32xf32> -> vector<32x32xf32>
    %720 = arith.truncf %719 : vector<32x32xf32> to vector<32x32xbf16>
    %c4_499 = arith.constant 4 : index
    %c0_500 = arith.constant 0 : index
    %c0_501 = arith.constant 0 : index
    %721 = vector.load %arg16[%c4_499, %c0_500, %c0_501] : memref<9x32x32xbf16, #tpu.memory_space<vmem>>, vector<1x32x32xbf16>
    %722 = vector.shape_cast %721 : vector<1x32x32xbf16> to vector<32x32xbf16>
    %cst_502 = arith.constant dense<0.000000e+00> : vector<32x32xf32>
    %723 = tpu.matmul %722, %720, %cst_502 {dimension_numbers = #tpu.dot_dimension_numbers<[1], [0], [0], [1], [0, 0, 1, 1], [], []>} : vector<32x32xbf16>, vector<32x32xbf16>, vector<32x32xf32> -> vector<32x32xf32>
    %c5_503 = arith.constant 5 : index
    %c0_504 = arith.constant 0 : index
    %c0_505 = arith.constant 0 : index
    %724 = vector.load %arg4[%c5_503, %c0_504, %c0_505] : memref<9x32x32xbf16, #tpu.memory_space<vmem>>, vector<1x32x32xbf16>
    %725 = vector.shape_cast %724 : vector<1x32x32xbf16> to vector<32x32xbf16>
    %cst_506 = arith.constant dense<0.000000e+00> : vector<32x32xf32>
    %726 = tpu.matmul %688, %725, %cst_506 {dimension_numbers = #tpu.dot_dimension_numbers<[1], [0], [0], [1], [0, 0, 1, 1], [], []>} : vector<32x32xbf16>, vector<32x32xbf16>, vector<32x32xf32> -> vector<32x32xf32>
    %727 = arith.truncf %726 : vector<32x32xf32> to vector<32x32xbf16>
    %c5_507 = arith.constant 5 : index
    %c0_508 = arith.constant 0 : index
    %c0_509 = arith.constant 0 : index
    %728 = vector.load %arg16[%c5_507, %c0_508, %c0_509] : memref<9x32x32xbf16, #tpu.memory_space<vmem>>, vector<1x32x32xbf16>
    %729 = vector.shape_cast %728 : vector<1x32x32xbf16> to vector<32x32xbf16>
    %cst_510 = arith.constant dense<0.000000e+00> : vector<32x32xf32>
    %730 = tpu.matmul %729, %727, %cst_510 {dimension_numbers = #tpu.dot_dimension_numbers<[1], [0], [0], [1], [0, 0, 1, 1], [], []>} : vector<32x32xbf16>, vector<32x32xbf16>, vector<32x32xf32> -> vector<32x32xf32>
    %c6_511 = arith.constant 6 : index
    %c0_512 = arith.constant 0 : index
    %c0_513 = arith.constant 0 : index
    %731 = vector.load %arg4[%c6_511, %c0_512, %c0_513] : memref<9x32x32xbf16, #tpu.memory_space<vmem>>, vector<1x32x32xbf16>
    %732 = vector.shape_cast %731 : vector<1x32x32xbf16> to vector<32x32xbf16>
    %cst_514 = arith.constant dense<0.000000e+00> : vector<32x32xf32>
    %733 = tpu.matmul %688, %732, %cst_514 {dimension_numbers = #tpu.dot_dimension_numbers<[1], [0], [0], [1], [0, 0, 1, 1], [], []>} : vector<32x32xbf16>, vector<32x32xbf16>, vector<32x32xf32> -> vector<32x32xf32>
    %734 = arith.truncf %733 : vector<32x32xf32> to vector<32x32xbf16>
    %c6_515 = arith.constant 6 : index
    %c0_516 = arith.constant 0 : index
    %c0_517 = arith.constant 0 : index
    %735 = vector.load %arg16[%c6_515, %c0_516, %c0_517] : memref<9x32x32xbf16, #tpu.memory_space<vmem>>, vector<1x32x32xbf16>
    %736 = vector.shape_cast %735 : vector<1x32x32xbf16> to vector<32x32xbf16>
    %cst_518 = arith.constant dense<0.000000e+00> : vector<32x32xf32>
    %737 = tpu.matmul %736, %734, %cst_518 {dimension_numbers = #tpu.dot_dimension_numbers<[1], [0], [0], [1], [0, 0, 1, 1], [], []>} : vector<32x32xbf16>, vector<32x32xbf16>, vector<32x32xf32> -> vector<32x32xf32>
    %c7_519 = arith.constant 7 : index
    %c0_520 = arith.constant 0 : index
    %c0_521 = arith.constant 0 : index
    %738 = vector.load %arg4[%c7_519, %c0_520, %c0_521] : memref<9x32x32xbf16, #tpu.memory_space<vmem>>, vector<1x32x32xbf16>
    %739 = vector.shape_cast %738 : vector<1x32x32xbf16> to vector<32x32xbf16>
    %cst_522 = arith.constant dense<0.000000e+00> : vector<32x32xf32>
    %740 = tpu.matmul %688, %739, %cst_522 {dimension_numbers = #tpu.dot_dimension_numbers<[1], [0], [0], [1], [0, 0, 1, 1], [], []>} : vector<32x32xbf16>, vector<32x32xbf16>, vector<32x32xf32> -> vector<32x32xf32>
    %741 = arith.truncf %740 : vector<32x32xf32> to vector<32x32xbf16>
    %c7_523 = arith.constant 7 : index
    %c0_524 = arith.constant 0 : index
    %c0_525 = arith.constant 0 : index
    %742 = vector.load %arg16[%c7_523, %c0_524, %c0_525] : memref<9x32x32xbf16, #tpu.memory_space<vmem>>, vector<1x32x32xbf16>
    %743 = vector.shape_cast %742 : vector<1x32x32xbf16> to vector<32x32xbf16>
    %cst_526 = arith.constant dense<0.000000e+00> : vector<32x32xf32>
    %744 = tpu.matmul %743, %741, %cst_526 {dimension_numbers = #tpu.dot_dimension_numbers<[1], [0], [0], [1], [0, 0, 1, 1], [], []>} : vector<32x32xbf16>, vector<32x32xbf16>, vector<32x32xf32> -> vector<32x32xf32>
    %c8_527 = arith.constant 8 : index
    %c0_528 = arith.constant 0 : index
    %c0_529 = arith.constant 0 : index
    %745 = vector.load %arg4[%c8_527, %c0_528, %c0_529] : memref<9x32x32xbf16, #tpu.memory_space<vmem>>, vector<1x32x32xbf16>
    %746 = vector.shape_cast %745 : vector<1x32x32xbf16> to vector<32x32xbf16>
    %cst_530 = arith.constant dense<0.000000e+00> : vector<32x32xf32>
    %747 = tpu.matmul %688, %746, %cst_530 {dimension_numbers = #tpu.dot_dimension_numbers<[1], [0], [0], [1], [0, 0, 1, 1], [], []>} : vector<32x32xbf16>, vector<32x32xbf16>, vector<32x32xf32> -> vector<32x32xf32>
    %748 = arith.truncf %747 : vector<32x32xf32> to vector<32x32xbf16>
    %c8_531 = arith.constant 8 : index
    %c0_532 = arith.constant 0 : index
    %c0_533 = arith.constant 0 : index
    %749 = vector.load %arg16[%c8_531, %c0_532, %c0_533] : memref<9x32x32xbf16, #tpu.memory_space<vmem>>, vector<1x32x32xbf16>
    %750 = vector.shape_cast %749 : vector<1x32x32xbf16> to vector<32x32xbf16>
    %cst_534 = arith.constant dense<0.000000e+00> : vector<32x32xf32>
    %751 = tpu.matmul %750, %748, %cst_534 {dimension_numbers = #tpu.dot_dimension_numbers<[1], [0], [0], [1], [0, 0, 1, 1], [], []>} : vector<32x32xbf16>, vector<32x32xbf16>, vector<32x32xf32> -> vector<32x32xf32>
    %752 = arith.addf %695, %702 : vector<32x32xf32>
    %753 = arith.addf %709, %716 : vector<32x32xf32>
    %754 = arith.addf %723, %730 : vector<32x32xf32>
    %755 = arith.addf %737, %744 : vector<32x32xf32>
    %756 = arith.addf %752, %753 : vector<32x32xf32>
    %757 = arith.addf %754, %755 : vector<32x32xf32>
    %758 = arith.addf %756, %757 : vector<32x32xf32>
    %759 = arith.addf %758, %751 : vector<32x32xf32>
    %c2_535 = arith.constant 2 : index
    %c0_536 = arith.constant 0 : index
    %c0_537 = arith.constant 0 : index
    %760 = vector.load %arg9[%c2_535, %c0_536, %c0_537] : memref<29x32x1xf32, #tpu.memory_space<vmem>>, vector<1x32x1xf32>
    %761 = vector.shape_cast %760 : vector<1x32x1xf32> to vector<32x1xf32>
    %762 = vector.broadcast %761 : vector<32x1xf32> to vector<32x32xf32>
    %763 = arith.addf %759, %762 : vector<32x32xf32>
    %cst_538 = arith.constant 5.000000e-01 : f32
    %764 = vector.broadcast %cst_538 : f32 to vector<32x32xf32>
    %765 = arith.mulf %764, %763 : vector<32x32xf32>
    %766 = math.tanh %765 : vector<32x32xf32>
    %cst_539 = arith.constant 5.000000e-01 : f32
    %767 = vector.broadcast %cst_539 : f32 to vector<32x32xf32>
    %768 = arith.mulf %767, %766 : vector<32x32xf32>
    %cst_540 = arith.constant 5.000000e-01 : f32
    %769 = vector.broadcast %cst_540 : f32 to vector<32x32xf32>
    %770 = arith.addf %768, %769 : vector<32x32xf32>
    %771 = arith.mulf %763, %770 : vector<32x32xf32>
    %772 = arith.truncf %771 : vector<32x32xf32> to vector<32x32xbf16>
    %c0_541 = arith.constant 0 : index
    %c0_542 = arith.constant 0 : index
    %c0_543 = arith.constant 0 : index
    %773 = vector.load %arg4[%c0_541, %c0_542, %c0_543] : memref<9x32x32xbf16, #tpu.memory_space<vmem>>, vector<1x32x32xbf16>
    %774 = vector.shape_cast %773 : vector<1x32x32xbf16> to vector<32x32xbf16>
    %cst_544 = arith.constant dense<0.000000e+00> : vector<32x32xf32>
    %775 = tpu.matmul %772, %774, %cst_544 {dimension_numbers = #tpu.dot_dimension_numbers<[1], [0], [0], [1], [0, 0, 1, 1], [], []>} : vector<32x32xbf16>, vector<32x32xbf16>, vector<32x32xf32> -> vector<32x32xf32>
    %776 = arith.truncf %775 : vector<32x32xf32> to vector<32x32xbf16>
    %c0_545 = arith.constant 0 : index
    %c0_546 = arith.constant 0 : index
    %c0_547 = arith.constant 0 : index
    %777 = vector.load %arg17[%c0_545, %c0_546, %c0_547] : memref<9x32x32xbf16, #tpu.memory_space<vmem>>, vector<1x32x32xbf16>
    %778 = vector.shape_cast %777 : vector<1x32x32xbf16> to vector<32x32xbf16>
    %cst_548 = arith.constant dense<0.000000e+00> : vector<32x32xf32>
    %779 = tpu.matmul %778, %776, %cst_548 {dimension_numbers = #tpu.dot_dimension_numbers<[1], [0], [0], [1], [0, 0, 1, 1], [], []>} : vector<32x32xbf16>, vector<32x32xbf16>, vector<32x32xf32> -> vector<32x32xf32>
    %c1_549 = arith.constant 1 : index
    %c0_550 = arith.constant 0 : index
    %c0_551 = arith.constant 0 : index
    %780 = vector.load %arg4[%c1_549, %c0_550, %c0_551] : memref<9x32x32xbf16, #tpu.memory_space<vmem>>, vector<1x32x32xbf16>
    %781 = vector.shape_cast %780 : vector<1x32x32xbf16> to vector<32x32xbf16>
    %cst_552 = arith.constant dense<0.000000e+00> : vector<32x32xf32>
    %782 = tpu.matmul %772, %781, %cst_552 {dimension_numbers = #tpu.dot_dimension_numbers<[1], [0], [0], [1], [0, 0, 1, 1], [], []>} : vector<32x32xbf16>, vector<32x32xbf16>, vector<32x32xf32> -> vector<32x32xf32>
    %783 = arith.truncf %782 : vector<32x32xf32> to vector<32x32xbf16>
    %c1_553 = arith.constant 1 : index
    %c0_554 = arith.constant 0 : index
    %c0_555 = arith.constant 0 : index
    %784 = vector.load %arg17[%c1_553, %c0_554, %c0_555] : memref<9x32x32xbf16, #tpu.memory_space<vmem>>, vector<1x32x32xbf16>
    %785 = vector.shape_cast %784 : vector<1x32x32xbf16> to vector<32x32xbf16>
    %cst_556 = arith.constant dense<0.000000e+00> : vector<32x32xf32>
    %786 = tpu.matmul %785, %783, %cst_556 {dimension_numbers = #tpu.dot_dimension_numbers<[1], [0], [0], [1], [0, 0, 1, 1], [], []>} : vector<32x32xbf16>, vector<32x32xbf16>, vector<32x32xf32> -> vector<32x32xf32>
    %c2_557 = arith.constant 2 : index
    %c0_558 = arith.constant 0 : index
    %c0_559 = arith.constant 0 : index
    %787 = vector.load %arg4[%c2_557, %c0_558, %c0_559] : memref<9x32x32xbf16, #tpu.memory_space<vmem>>, vector<1x32x32xbf16>
    %788 = vector.shape_cast %787 : vector<1x32x32xbf16> to vector<32x32xbf16>
    %cst_560 = arith.constant dense<0.000000e+00> : vector<32x32xf32>
    %789 = tpu.matmul %772, %788, %cst_560 {dimension_numbers = #tpu.dot_dimension_numbers<[1], [0], [0], [1], [0, 0, 1, 1], [], []>} : vector<32x32xbf16>, vector<32x32xbf16>, vector<32x32xf32> -> vector<32x32xf32>
    %790 = arith.truncf %789 : vector<32x32xf32> to vector<32x32xbf16>
    %c2_561 = arith.constant 2 : index
    %c0_562 = arith.constant 0 : index
    %c0_563 = arith.constant 0 : index
    %791 = vector.load %arg17[%c2_561, %c0_562, %c0_563] : memref<9x32x32xbf16, #tpu.memory_space<vmem>>, vector<1x32x32xbf16>
    %792 = vector.shape_cast %791 : vector<1x32x32xbf16> to vector<32x32xbf16>
    %cst_564 = arith.constant dense<0.000000e+00> : vector<32x32xf32>
    %793 = tpu.matmul %792, %790, %cst_564 {dimension_numbers = #tpu.dot_dimension_numbers<[1], [0], [0], [1], [0, 0, 1, 1], [], []>} : vector<32x32xbf16>, vector<32x32xbf16>, vector<32x32xf32> -> vector<32x32xf32>
    %c3_565 = arith.constant 3 : index
    %c0_566 = arith.constant 0 : index
    %c0_567 = arith.constant 0 : index
    %794 = vector.load %arg4[%c3_565, %c0_566, %c0_567] : memref<9x32x32xbf16, #tpu.memory_space<vmem>>, vector<1x32x32xbf16>
    %795 = vector.shape_cast %794 : vector<1x32x32xbf16> to vector<32x32xbf16>
    %cst_568 = arith.constant dense<0.000000e+00> : vector<32x32xf32>
    %796 = tpu.matmul %772, %795, %cst_568 {dimension_numbers = #tpu.dot_dimension_numbers<[1], [0], [0], [1], [0, 0, 1, 1], [], []>} : vector<32x32xbf16>, vector<32x32xbf16>, vector<32x32xf32> -> vector<32x32xf32>
    %797 = arith.truncf %796 : vector<32x32xf32> to vector<32x32xbf16>
    %c3_569 = arith.constant 3 : index
    %c0_570 = arith.constant 0 : index
    %c0_571 = arith.constant 0 : index
    %798 = vector.load %arg17[%c3_569, %c0_570, %c0_571] : memref<9x32x32xbf16, #tpu.memory_space<vmem>>, vector<1x32x32xbf16>
    %799 = vector.shape_cast %798 : vector<1x32x32xbf16> to vector<32x32xbf16>
    %cst_572 = arith.constant dense<0.000000e+00> : vector<32x32xf32>
    %800 = tpu.matmul %799, %797, %cst_572 {dimension_numbers = #tpu.dot_dimension_numbers<[1], [0], [0], [1], [0, 0, 1, 1], [], []>} : vector<32x32xbf16>, vector<32x32xbf16>, vector<32x32xf32> -> vector<32x32xf32>
    %c4_573 = arith.constant 4 : index
    %c0_574 = arith.constant 0 : index
    %c0_575 = arith.constant 0 : index
    %801 = vector.load %arg4[%c4_573, %c0_574, %c0_575] : memref<9x32x32xbf16, #tpu.memory_space<vmem>>, vector<1x32x32xbf16>
    %802 = vector.shape_cast %801 : vector<1x32x32xbf16> to vector<32x32xbf16>
    %cst_576 = arith.constant dense<0.000000e+00> : vector<32x32xf32>
    %803 = tpu.matmul %772, %802, %cst_576 {dimension_numbers = #tpu.dot_dimension_numbers<[1], [0], [0], [1], [0, 0, 1, 1], [], []>} : vector<32x32xbf16>, vector<32x32xbf16>, vector<32x32xf32> -> vector<32x32xf32>
    %804 = arith.truncf %803 : vector<32x32xf32> to vector<32x32xbf16>
    %c4_577 = arith.constant 4 : index
    %c0_578 = arith.constant 0 : index
    %c0_579 = arith.constant 0 : index
    %805 = vector.load %arg17[%c4_577, %c0_578, %c0_579] : memref<9x32x32xbf16, #tpu.memory_space<vmem>>, vector<1x32x32xbf16>
    %806 = vector.shape_cast %805 : vector<1x32x32xbf16> to vector<32x32xbf16>
    %cst_580 = arith.constant dense<0.000000e+00> : vector<32x32xf32>
    %807 = tpu.matmul %806, %804, %cst_580 {dimension_numbers = #tpu.dot_dimension_numbers<[1], [0], [0], [1], [0, 0, 1, 1], [], []>} : vector<32x32xbf16>, vector<32x32xbf16>, vector<32x32xf32> -> vector<32x32xf32>
    %c5_581 = arith.constant 5 : index
    %c0_582 = arith.constant 0 : index
    %c0_583 = arith.constant 0 : index
    %808 = vector.load %arg4[%c5_581, %c0_582, %c0_583] : memref<9x32x32xbf16, #tpu.memory_space<vmem>>, vector<1x32x32xbf16>
    %809 = vector.shape_cast %808 : vector<1x32x32xbf16> to vector<32x32xbf16>
    %cst_584 = arith.constant dense<0.000000e+00> : vector<32x32xf32>
    %810 = tpu.matmul %772, %809, %cst_584 {dimension_numbers = #tpu.dot_dimension_numbers<[1], [0], [0], [1], [0, 0, 1, 1], [], []>} : vector<32x32xbf16>, vector<32x32xbf16>, vector<32x32xf32> -> vector<32x32xf32>
    %811 = arith.truncf %810 : vector<32x32xf32> to vector<32x32xbf16>
    %c5_585 = arith.constant 5 : index
    %c0_586 = arith.constant 0 : index
    %c0_587 = arith.constant 0 : index
    %812 = vector.load %arg17[%c5_585, %c0_586, %c0_587] : memref<9x32x32xbf16, #tpu.memory_space<vmem>>, vector<1x32x32xbf16>
    %813 = vector.shape_cast %812 : vector<1x32x32xbf16> to vector<32x32xbf16>
    %cst_588 = arith.constant dense<0.000000e+00> : vector<32x32xf32>
    %814 = tpu.matmul %813, %811, %cst_588 {dimension_numbers = #tpu.dot_dimension_numbers<[1], [0], [0], [1], [0, 0, 1, 1], [], []>} : vector<32x32xbf16>, vector<32x32xbf16>, vector<32x32xf32> -> vector<32x32xf32>
    %c6_589 = arith.constant 6 : index
    %c0_590 = arith.constant 0 : index
    %c0_591 = arith.constant 0 : index
    %815 = vector.load %arg4[%c6_589, %c0_590, %c0_591] : memref<9x32x32xbf16, #tpu.memory_space<vmem>>, vector<1x32x32xbf16>
    %816 = vector.shape_cast %815 : vector<1x32x32xbf16> to vector<32x32xbf16>
    %cst_592 = arith.constant dense<0.000000e+00> : vector<32x32xf32>
    %817 = tpu.matmul %772, %816, %cst_592 {dimension_numbers = #tpu.dot_dimension_numbers<[1], [0], [0], [1], [0, 0, 1, 1], [], []>} : vector<32x32xbf16>, vector<32x32xbf16>, vector<32x32xf32> -> vector<32x32xf32>
    %818 = arith.truncf %817 : vector<32x32xf32> to vector<32x32xbf16>
    %c6_593 = arith.constant 6 : index
    %c0_594 = arith.constant 0 : index
    %c0_595 = arith.constant 0 : index
    %819 = vector.load %arg17[%c6_593, %c0_594, %c0_595] : memref<9x32x32xbf16, #tpu.memory_space<vmem>>, vector<1x32x32xbf16>
    %820 = vector.shape_cast %819 : vector<1x32x32xbf16> to vector<32x32xbf16>
    %cst_596 = arith.constant dense<0.000000e+00> : vector<32x32xf32>
    %821 = tpu.matmul %820, %818, %cst_596 {dimension_numbers = #tpu.dot_dimension_numbers<[1], [0], [0], [1], [0, 0, 1, 1], [], []>} : vector<32x32xbf16>, vector<32x32xbf16>, vector<32x32xf32> -> vector<32x32xf32>
    %c7_597 = arith.constant 7 : index
    %c0_598 = arith.constant 0 : index
    %c0_599 = arith.constant 0 : index
    %822 = vector.load %arg4[%c7_597, %c0_598, %c0_599] : memref<9x32x32xbf16, #tpu.memory_space<vmem>>, vector<1x32x32xbf16>
    %823 = vector.shape_cast %822 : vector<1x32x32xbf16> to vector<32x32xbf16>
    %cst_600 = arith.constant dense<0.000000e+00> : vector<32x32xf32>
    %824 = tpu.matmul %772, %823, %cst_600 {dimension_numbers = #tpu.dot_dimension_numbers<[1], [0], [0], [1], [0, 0, 1, 1], [], []>} : vector<32x32xbf16>, vector<32x32xbf16>, vector<32x32xf32> -> vector<32x32xf32>
    %825 = arith.truncf %824 : vector<32x32xf32> to vector<32x32xbf16>
    %c7_601 = arith.constant 7 : index
    %c0_602 = arith.constant 0 : index
    %c0_603 = arith.constant 0 : index
    %826 = vector.load %arg17[%c7_601, %c0_602, %c0_603] : memref<9x32x32xbf16, #tpu.memory_space<vmem>>, vector<1x32x32xbf16>
    %827 = vector.shape_cast %826 : vector<1x32x32xbf16> to vector<32x32xbf16>
    %cst_604 = arith.constant dense<0.000000e+00> : vector<32x32xf32>
    %828 = tpu.matmul %827, %825, %cst_604 {dimension_numbers = #tpu.dot_dimension_numbers<[1], [0], [0], [1], [0, 0, 1, 1], [], []>} : vector<32x32xbf16>, vector<32x32xbf16>, vector<32x32xf32> -> vector<32x32xf32>
    %c8_605 = arith.constant 8 : index
    %c0_606 = arith.constant 0 : index
    %c0_607 = arith.constant 0 : index
    %829 = vector.load %arg4[%c8_605, %c0_606, %c0_607] : memref<9x32x32xbf16, #tpu.memory_space<vmem>>, vector<1x32x32xbf16>
    %830 = vector.shape_cast %829 : vector<1x32x32xbf16> to vector<32x32xbf16>
    %cst_608 = arith.constant dense<0.000000e+00> : vector<32x32xf32>
    %831 = tpu.matmul %772, %830, %cst_608 {dimension_numbers = #tpu.dot_dimension_numbers<[1], [0], [0], [1], [0, 0, 1, 1], [], []>} : vector<32x32xbf16>, vector<32x32xbf16>, vector<32x32xf32> -> vector<32x32xf32>
    %832 = arith.truncf %831 : vector<32x32xf32> to vector<32x32xbf16>
    %c8_609 = arith.constant 8 : index
    %c0_610 = arith.constant 0 : index
    %c0_611 = arith.constant 0 : index
    %833 = vector.load %arg17[%c8_609, %c0_610, %c0_611] : memref<9x32x32xbf16, #tpu.memory_space<vmem>>, vector<1x32x32xbf16>
    %834 = vector.shape_cast %833 : vector<1x32x32xbf16> to vector<32x32xbf16>
    %cst_612 = arith.constant dense<0.000000e+00> : vector<32x32xf32>
    %835 = tpu.matmul %834, %832, %cst_612 {dimension_numbers = #tpu.dot_dimension_numbers<[1], [0], [0], [1], [0, 0, 1, 1], [], []>} : vector<32x32xbf16>, vector<32x32xbf16>, vector<32x32xf32> -> vector<32x32xf32>
    %836 = arith.addf %779, %786 : vector<32x32xf32>
    %837 = arith.addf %793, %800 : vector<32x32xf32>
    %838 = arith.addf %807, %814 : vector<32x32xf32>
    %839 = arith.addf %821, %828 : vector<32x32xf32>
    %840 = arith.addf %836, %837 : vector<32x32xf32>
    %841 = arith.addf %838, %839 : vector<32x32xf32>
    %842 = arith.addf %840, %841 : vector<32x32xf32>
    %843 = arith.addf %842, %835 : vector<32x32xf32>
    %c17 = arith.constant 17 : index
    %c0_613 = arith.constant 0 : index
    %c0_614 = arith.constant 0 : index
    %844 = vector.load %arg9[%c17, %c0_613, %c0_614] : memref<29x32x1xf32, #tpu.memory_space<vmem>>, vector<1x32x1xf32>
    %845 = vector.shape_cast %844 : vector<1x32x1xf32> to vector<32x1xf32>
    %846 = vector.broadcast %845 : vector<32x1xf32> to vector<32x32xf32>
    %847 = arith.addf %843, %846 : vector<32x32xf32>
    %c18 = arith.constant 18 : index
    %c0_615 = arith.constant 0 : index
    %c0_616 = arith.constant 0 : index
    %848 = vector.load %arg9[%c18, %c0_615, %c0_616] : memref<29x32x1xf32, #tpu.memory_space<vmem>>, vector<1x32x1xf32>
    %849 = vector.shape_cast %848 : vector<1x32x1xf32> to vector<32x1xf32>
    %c19 = arith.constant 19 : index
    %c0_617 = arith.constant 0 : index
    %c0_618 = arith.constant 0 : index
    %850 = vector.load %arg9[%c19, %c0_617, %c0_618] : memref<29x32x1xf32, #tpu.memory_space<vmem>>, vector<1x32x1xf32>
    %851 = vector.shape_cast %850 : vector<1x32x1xf32> to vector<32x1xf32>
    %cst_619 = arith.constant dense<0.000000e+00> : vector<32xf32>
    %852 = vector.multi_reduction <add>, %847, %cst_619 [1] : vector<32x32xf32> to vector<32xf32>
    %853 = vector.shape_cast %852 : vector<32xf32> to vector<32x1xf32>
    %cst_620 = arith.constant 3.125000e-02 : f32
    %854 = vector.broadcast %cst_620 : f32 to vector<32x1xf32>
    %855 = arith.mulf %853, %854 : vector<32x1xf32>
    %856 = vector.broadcast %855 : vector<32x1xf32> to vector<32x32xf32>
    %857 = arith.subf %847, %856 : vector<32x32xf32>
    %858 = arith.mulf %857, %857 : vector<32x32xf32>
    %cst_621 = arith.constant dense<0.000000e+00> : vector<32xf32>
    %859 = vector.multi_reduction <add>, %858, %cst_621 [1] : vector<32x32xf32> to vector<32xf32>
    %860 = vector.shape_cast %859 : vector<32xf32> to vector<32x1xf32>
    %cst_622 = arith.constant 3.125000e-02 : f32
    %861 = vector.broadcast %cst_622 : f32 to vector<32x1xf32>
    %862 = arith.mulf %860, %861 : vector<32x1xf32>
    %cst_623 = arith.constant 9.99999974E-6 : f32
    %863 = vector.broadcast %cst_623 : f32 to vector<32x1xf32>
    %864 = arith.addf %862, %863 : vector<32x1xf32>
    %865 = math.rsqrt %864 : vector<32x1xf32>
    %866 = vector.broadcast %865 : vector<32x1xf32> to vector<32x32xf32>
    %867 = arith.mulf %857, %866 : vector<32x32xf32>
    %868 = vector.broadcast %849 : vector<32x1xf32> to vector<32x32xf32>
    %869 = arith.mulf %867, %868 : vector<32x32xf32>
    %870 = vector.broadcast %851 : vector<32x1xf32> to vector<32x32xf32>
    %871 = arith.addf %869, %870 : vector<32x32xf32>
    %cst_624 = arith.constant 5.000000e-01 : f32
    %872 = vector.broadcast %cst_624 : f32 to vector<32x32xf32>
    %873 = arith.mulf %872, %871 : vector<32x32xf32>
    %874 = math.tanh %873 : vector<32x32xf32>
    %cst_625 = arith.constant 5.000000e-01 : f32
    %875 = vector.broadcast %cst_625 : f32 to vector<32x32xf32>
    %876 = arith.mulf %875, %874 : vector<32x32xf32>
    %cst_626 = arith.constant 5.000000e-01 : f32
    %877 = vector.broadcast %cst_626 : f32 to vector<32x32xf32>
    %878 = arith.addf %876, %877 : vector<32x32xf32>
    %879 = arith.mulf %871, %878 : vector<32x32xf32>
    %880 = arith.truncf %879 : vector<32x32xf32> to vector<32x32xbf16>
    %c0_627 = arith.constant 0 : index
    %c0_628 = arith.constant 0 : index
    %c0_629 = arith.constant 0 : index
    %881 = vector.load %arg4[%c0_627, %c0_628, %c0_629] : memref<9x32x32xbf16, #tpu.memory_space<vmem>>, vector<1x32x32xbf16>
    %882 = vector.shape_cast %881 : vector<1x32x32xbf16> to vector<32x32xbf16>
    %cst_630 = arith.constant dense<0.000000e+00> : vector<32x32xf32>
    %883 = tpu.matmul %880, %882, %cst_630 {dimension_numbers = #tpu.dot_dimension_numbers<[1], [0], [0], [1], [0, 0, 1, 1], [], []>} : vector<32x32xbf16>, vector<32x32xbf16>, vector<32x32xf32> -> vector<32x32xf32>
    %884 = arith.truncf %883 : vector<32x32xf32> to vector<32x32xbf16>
    %c0_631 = arith.constant 0 : index
    %c0_632 = arith.constant 0 : index
    %c0_633 = arith.constant 0 : index
    %885 = vector.load %arg18[%c0_631, %c0_632, %c0_633] : memref<9x32x32xbf16, #tpu.memory_space<vmem>>, vector<1x32x32xbf16>
    %886 = vector.shape_cast %885 : vector<1x32x32xbf16> to vector<32x32xbf16>
    %cst_634 = arith.constant dense<0.000000e+00> : vector<32x32xf32>
    %887 = tpu.matmul %886, %884, %cst_634 {dimension_numbers = #tpu.dot_dimension_numbers<[1], [0], [0], [1], [0, 0, 1, 1], [], []>} : vector<32x32xbf16>, vector<32x32xbf16>, vector<32x32xf32> -> vector<32x32xf32>
    %c1_635 = arith.constant 1 : index
    %c0_636 = arith.constant 0 : index
    %c0_637 = arith.constant 0 : index
    %888 = vector.load %arg4[%c1_635, %c0_636, %c0_637] : memref<9x32x32xbf16, #tpu.memory_space<vmem>>, vector<1x32x32xbf16>
    %889 = vector.shape_cast %888 : vector<1x32x32xbf16> to vector<32x32xbf16>
    %cst_638 = arith.constant dense<0.000000e+00> : vector<32x32xf32>
    %890 = tpu.matmul %880, %889, %cst_638 {dimension_numbers = #tpu.dot_dimension_numbers<[1], [0], [0], [1], [0, 0, 1, 1], [], []>} : vector<32x32xbf16>, vector<32x32xbf16>, vector<32x32xf32> -> vector<32x32xf32>
    %891 = arith.truncf %890 : vector<32x32xf32> to vector<32x32xbf16>
    %c1_639 = arith.constant 1 : index
    %c0_640 = arith.constant 0 : index
    %c0_641 = arith.constant 0 : index
    %892 = vector.load %arg18[%c1_639, %c0_640, %c0_641] : memref<9x32x32xbf16, #tpu.memory_space<vmem>>, vector<1x32x32xbf16>
    %893 = vector.shape_cast %892 : vector<1x32x32xbf16> to vector<32x32xbf16>
    %cst_642 = arith.constant dense<0.000000e+00> : vector<32x32xf32>
    %894 = tpu.matmul %893, %891, %cst_642 {dimension_numbers = #tpu.dot_dimension_numbers<[1], [0], [0], [1], [0, 0, 1, 1], [], []>} : vector<32x32xbf16>, vector<32x32xbf16>, vector<32x32xf32> -> vector<32x32xf32>
    %c2_643 = arith.constant 2 : index
    %c0_644 = arith.constant 0 : index
    %c0_645 = arith.constant 0 : index
    %895 = vector.load %arg4[%c2_643, %c0_644, %c0_645] : memref<9x32x32xbf16, #tpu.memory_space<vmem>>, vector<1x32x32xbf16>
    %896 = vector.shape_cast %895 : vector<1x32x32xbf16> to vector<32x32xbf16>
    %cst_646 = arith.constant dense<0.000000e+00> : vector<32x32xf32>
    %897 = tpu.matmul %880, %896, %cst_646 {dimension_numbers = #tpu.dot_dimension_numbers<[1], [0], [0], [1], [0, 0, 1, 1], [], []>} : vector<32x32xbf16>, vector<32x32xbf16>, vector<32x32xf32> -> vector<32x32xf32>
    %898 = arith.truncf %897 : vector<32x32xf32> to vector<32x32xbf16>
    %c2_647 = arith.constant 2 : index
    %c0_648 = arith.constant 0 : index
    %c0_649 = arith.constant 0 : index
    %899 = vector.load %arg18[%c2_647, %c0_648, %c0_649] : memref<9x32x32xbf16, #tpu.memory_space<vmem>>, vector<1x32x32xbf16>
    %900 = vector.shape_cast %899 : vector<1x32x32xbf16> to vector<32x32xbf16>
    %cst_650 = arith.constant dense<0.000000e+00> : vector<32x32xf32>
    %901 = tpu.matmul %900, %898, %cst_650 {dimension_numbers = #tpu.dot_dimension_numbers<[1], [0], [0], [1], [0, 0, 1, 1], [], []>} : vector<32x32xbf16>, vector<32x32xbf16>, vector<32x32xf32> -> vector<32x32xf32>
    %c3_651 = arith.constant 3 : index
    %c0_652 = arith.constant 0 : index
    %c0_653 = arith.constant 0 : index
    %902 = vector.load %arg4[%c3_651, %c0_652, %c0_653] : memref<9x32x32xbf16, #tpu.memory_space<vmem>>, vector<1x32x32xbf16>
    %903 = vector.shape_cast %902 : vector<1x32x32xbf16> to vector<32x32xbf16>
    %cst_654 = arith.constant dense<0.000000e+00> : vector<32x32xf32>
    %904 = tpu.matmul %880, %903, %cst_654 {dimension_numbers = #tpu.dot_dimension_numbers<[1], [0], [0], [1], [0, 0, 1, 1], [], []>} : vector<32x32xbf16>, vector<32x32xbf16>, vector<32x32xf32> -> vector<32x32xf32>
    %905 = arith.truncf %904 : vector<32x32xf32> to vector<32x32xbf16>
    %c3_655 = arith.constant 3 : index
    %c0_656 = arith.constant 0 : index
    %c0_657 = arith.constant 0 : index
    %906 = vector.load %arg18[%c3_655, %c0_656, %c0_657] : memref<9x32x32xbf16, #tpu.memory_space<vmem>>, vector<1x32x32xbf16>
    %907 = vector.shape_cast %906 : vector<1x32x32xbf16> to vector<32x32xbf16>
    %cst_658 = arith.constant dense<0.000000e+00> : vector<32x32xf32>
    %908 = tpu.matmul %907, %905, %cst_658 {dimension_numbers = #tpu.dot_dimension_numbers<[1], [0], [0], [1], [0, 0, 1, 1], [], []>} : vector<32x32xbf16>, vector<32x32xbf16>, vector<32x32xf32> -> vector<32x32xf32>
    %c4_659 = arith.constant 4 : index
    %c0_660 = arith.constant 0 : index
    %c0_661 = arith.constant 0 : index
    %909 = vector.load %arg4[%c4_659, %c0_660, %c0_661] : memref<9x32x32xbf16, #tpu.memory_space<vmem>>, vector<1x32x32xbf16>
    %910 = vector.shape_cast %909 : vector<1x32x32xbf16> to vector<32x32xbf16>
    %cst_662 = arith.constant dense<0.000000e+00> : vector<32x32xf32>
    %911 = tpu.matmul %880, %910, %cst_662 {dimension_numbers = #tpu.dot_dimension_numbers<[1], [0], [0], [1], [0, 0, 1, 1], [], []>} : vector<32x32xbf16>, vector<32x32xbf16>, vector<32x32xf32> -> vector<32x32xf32>
    %912 = arith.truncf %911 : vector<32x32xf32> to vector<32x32xbf16>
    %c4_663 = arith.constant 4 : index
    %c0_664 = arith.constant 0 : index
    %c0_665 = arith.constant 0 : index
    %913 = vector.load %arg18[%c4_663, %c0_664, %c0_665] : memref<9x32x32xbf16, #tpu.memory_space<vmem>>, vector<1x32x32xbf16>
    %914 = vector.shape_cast %913 : vector<1x32x32xbf16> to vector<32x32xbf16>
    %cst_666 = arith.constant dense<0.000000e+00> : vector<32x32xf32>
    %915 = tpu.matmul %914, %912, %cst_666 {dimension_numbers = #tpu.dot_dimension_numbers<[1], [0], [0], [1], [0, 0, 1, 1], [], []>} : vector<32x32xbf16>, vector<32x32xbf16>, vector<32x32xf32> -> vector<32x32xf32>
    %c5_667 = arith.constant 5 : index
    %c0_668 = arith.constant 0 : index
    %c0_669 = arith.constant 0 : index
    %916 = vector.load %arg4[%c5_667, %c0_668, %c0_669] : memref<9x32x32xbf16, #tpu.memory_space<vmem>>, vector<1x32x32xbf16>
    %917 = vector.shape_cast %916 : vector<1x32x32xbf16> to vector<32x32xbf16>
    %cst_670 = arith.constant dense<0.000000e+00> : vector<32x32xf32>
    %918 = tpu.matmul %880, %917, %cst_670 {dimension_numbers = #tpu.dot_dimension_numbers<[1], [0], [0], [1], [0, 0, 1, 1], [], []>} : vector<32x32xbf16>, vector<32x32xbf16>, vector<32x32xf32> -> vector<32x32xf32>
    %919 = arith.truncf %918 : vector<32x32xf32> to vector<32x32xbf16>
    %c5_671 = arith.constant 5 : index
    %c0_672 = arith.constant 0 : index
    %c0_673 = arith.constant 0 : index
    %920 = vector.load %arg18[%c5_671, %c0_672, %c0_673] : memref<9x32x32xbf16, #tpu.memory_space<vmem>>, vector<1x32x32xbf16>
    %921 = vector.shape_cast %920 : vector<1x32x32xbf16> to vector<32x32xbf16>
    %cst_674 = arith.constant dense<0.000000e+00> : vector<32x32xf32>
    %922 = tpu.matmul %921, %919, %cst_674 {dimension_numbers = #tpu.dot_dimension_numbers<[1], [0], [0], [1], [0, 0, 1, 1], [], []>} : vector<32x32xbf16>, vector<32x32xbf16>, vector<32x32xf32> -> vector<32x32xf32>
    %c6_675 = arith.constant 6 : index
    %c0_676 = arith.constant 0 : index
    %c0_677 = arith.constant 0 : index
    %923 = vector.load %arg4[%c6_675, %c0_676, %c0_677] : memref<9x32x32xbf16, #tpu.memory_space<vmem>>, vector<1x32x32xbf16>
    %924 = vector.shape_cast %923 : vector<1x32x32xbf16> to vector<32x32xbf16>
    %cst_678 = arith.constant dense<0.000000e+00> : vector<32x32xf32>
    %925 = tpu.matmul %880, %924, %cst_678 {dimension_numbers = #tpu.dot_dimension_numbers<[1], [0], [0], [1], [0, 0, 1, 1], [], []>} : vector<32x32xbf16>, vector<32x32xbf16>, vector<32x32xf32> -> vector<32x32xf32>
    %926 = arith.truncf %925 : vector<32x32xf32> to vector<32x32xbf16>
    %c6_679 = arith.constant 6 : index
    %c0_680 = arith.constant 0 : index
    %c0_681 = arith.constant 0 : index
    %927 = vector.load %arg18[%c6_679, %c0_680, %c0_681] : memref<9x32x32xbf16, #tpu.memory_space<vmem>>, vector<1x32x32xbf16>
    %928 = vector.shape_cast %927 : vector<1x32x32xbf16> to vector<32x32xbf16>
    %cst_682 = arith.constant dense<0.000000e+00> : vector<32x32xf32>
    %929 = tpu.matmul %928, %926, %cst_682 {dimension_numbers = #tpu.dot_dimension_numbers<[1], [0], [0], [1], [0, 0, 1, 1], [], []>} : vector<32x32xbf16>, vector<32x32xbf16>, vector<32x32xf32> -> vector<32x32xf32>
    %c7_683 = arith.constant 7 : index
    %c0_684 = arith.constant 0 : index
    %c0_685 = arith.constant 0 : index
    %930 = vector.load %arg4[%c7_683, %c0_684, %c0_685] : memref<9x32x32xbf16, #tpu.memory_space<vmem>>, vector<1x32x32xbf16>
    %931 = vector.shape_cast %930 : vector<1x32x32xbf16> to vector<32x32xbf16>
    %cst_686 = arith.constant dense<0.000000e+00> : vector<32x32xf32>
    %932 = tpu.matmul %880, %931, %cst_686 {dimension_numbers = #tpu.dot_dimension_numbers<[1], [0], [0], [1], [0, 0, 1, 1], [], []>} : vector<32x32xbf16>, vector<32x32xbf16>, vector<32x32xf32> -> vector<32x32xf32>
    %933 = arith.truncf %932 : vector<32x32xf32> to vector<32x32xbf16>
    %c7_687 = arith.constant 7 : index
    %c0_688 = arith.constant 0 : index
    %c0_689 = arith.constant 0 : index
    %934 = vector.load %arg18[%c7_687, %c0_688, %c0_689] : memref<9x32x32xbf16, #tpu.memory_space<vmem>>, vector<1x32x32xbf16>
    %935 = vector.shape_cast %934 : vector<1x32x32xbf16> to vector<32x32xbf16>
    %cst_690 = arith.constant dense<0.000000e+00> : vector<32x32xf32>
    %936 = tpu.matmul %935, %933, %cst_690 {dimension_numbers = #tpu.dot_dimension_numbers<[1], [0], [0], [1], [0, 0, 1, 1], [], []>} : vector<32x32xbf16>, vector<32x32xbf16>, vector<32x32xf32> -> vector<32x32xf32>
    %c8_691 = arith.constant 8 : index
    %c0_692 = arith.constant 0 : index
    %c0_693 = arith.constant 0 : index
    %937 = vector.load %arg4[%c8_691, %c0_692, %c0_693] : memref<9x32x32xbf16, #tpu.memory_space<vmem>>, vector<1x32x32xbf16>
    %938 = vector.shape_cast %937 : vector<1x32x32xbf16> to vector<32x32xbf16>
    %cst_694 = arith.constant dense<0.000000e+00> : vector<32x32xf32>
    %939 = tpu.matmul %880, %938, %cst_694 {dimension_numbers = #tpu.dot_dimension_numbers<[1], [0], [0], [1], [0, 0, 1, 1], [], []>} : vector<32x32xbf16>, vector<32x32xbf16>, vector<32x32xf32> -> vector<32x32xf32>
    %940 = arith.truncf %939 : vector<32x32xf32> to vector<32x32xbf16>
    %c8_695 = arith.constant 8 : index
    %c0_696 = arith.constant 0 : index
    %c0_697 = arith.constant 0 : index
    %941 = vector.load %arg18[%c8_695, %c0_696, %c0_697] : memref<9x32x32xbf16, #tpu.memory_space<vmem>>, vector<1x32x32xbf16>
    %942 = vector.shape_cast %941 : vector<1x32x32xbf16> to vector<32x32xbf16>
    %cst_698 = arith.constant dense<0.000000e+00> : vector<32x32xf32>
    %943 = tpu.matmul %942, %940, %cst_698 {dimension_numbers = #tpu.dot_dimension_numbers<[1], [0], [0], [1], [0, 0, 1, 1], [], []>} : vector<32x32xbf16>, vector<32x32xbf16>, vector<32x32xf32> -> vector<32x32xf32>
    %944 = arith.addf %887, %894 : vector<32x32xf32>
    %945 = arith.addf %901, %908 : vector<32x32xf32>
    %946 = arith.addf %915, %922 : vector<32x32xf32>
    %947 = arith.addf %929, %936 : vector<32x32xf32>
    %948 = arith.addf %944, %945 : vector<32x32xf32>
    %949 = arith.addf %946, %947 : vector<32x32xf32>
    %950 = arith.addf %948, %949 : vector<32x32xf32>
    %951 = arith.addf %950, %943 : vector<32x32xf32>
    %c20 = arith.constant 20 : index
    %c0_699 = arith.constant 0 : index
    %c0_700 = arith.constant 0 : index
    %952 = vector.load %arg9[%c20, %c0_699, %c0_700] : memref<29x32x1xf32, #tpu.memory_space<vmem>>, vector<1x32x1xf32>
    %953 = vector.shape_cast %952 : vector<1x32x1xf32> to vector<32x1xf32>
    %954 = vector.broadcast %953 : vector<32x1xf32> to vector<32x32xf32>
    %955 = arith.addf %951, %954 : vector<32x32xf32>
    %c21 = arith.constant 21 : index
    %c0_701 = arith.constant 0 : index
    %c0_702 = arith.constant 0 : index
    %956 = vector.load %arg9[%c21, %c0_701, %c0_702] : memref<29x32x1xf32, #tpu.memory_space<vmem>>, vector<1x32x1xf32>
    %957 = vector.shape_cast %956 : vector<1x32x1xf32> to vector<32x1xf32>
    %c22 = arith.constant 22 : index
    %c0_703 = arith.constant 0 : index
    %c0_704 = arith.constant 0 : index
    %958 = vector.load %arg9[%c22, %c0_703, %c0_704] : memref<29x32x1xf32, #tpu.memory_space<vmem>>, vector<1x32x1xf32>
    %959 = vector.shape_cast %958 : vector<1x32x1xf32> to vector<32x1xf32>
    %cst_705 = arith.constant dense<0.000000e+00> : vector<32xf32>
    %960 = vector.multi_reduction <add>, %955, %cst_705 [1] : vector<32x32xf32> to vector<32xf32>
    %961 = vector.shape_cast %960 : vector<32xf32> to vector<32x1xf32>
    %cst_706 = arith.constant 3.125000e-02 : f32
    %962 = vector.broadcast %cst_706 : f32 to vector<32x1xf32>
    %963 = arith.mulf %961, %962 : vector<32x1xf32>
    %964 = vector.broadcast %963 : vector<32x1xf32> to vector<32x32xf32>
    %965 = arith.subf %955, %964 : vector<32x32xf32>
    %966 = arith.mulf %965, %965 : vector<32x32xf32>
    %cst_707 = arith.constant dense<0.000000e+00> : vector<32xf32>
    %967 = vector.multi_reduction <add>, %966, %cst_707 [1] : vector<32x32xf32> to vector<32xf32>
    %968 = vector.shape_cast %967 : vector<32xf32> to vector<32x1xf32>
    %cst_708 = arith.constant 3.125000e-02 : f32
    %969 = vector.broadcast %cst_708 : f32 to vector<32x1xf32>
    %970 = arith.mulf %968, %969 : vector<32x1xf32>
    %cst_709 = arith.constant 9.99999974E-6 : f32
    %971 = vector.broadcast %cst_709 : f32 to vector<32x1xf32>
    %972 = arith.addf %970, %971 : vector<32x1xf32>
    %973 = math.rsqrt %972 : vector<32x1xf32>
    %974 = vector.broadcast %973 : vector<32x1xf32> to vector<32x32xf32>
    %975 = arith.mulf %965, %974 : vector<32x32xf32>
    %976 = vector.broadcast %957 : vector<32x1xf32> to vector<32x32xf32>
    %977 = arith.mulf %975, %976 : vector<32x32xf32>
    %978 = vector.broadcast %959 : vector<32x1xf32> to vector<32x32xf32>
    %979 = arith.addf %977, %978 : vector<32x32xf32>
    %980 = arith.addf %979, %771 : vector<32x32xf32>
    %cst_710 = arith.constant 5.000000e-01 : f32
    %981 = vector.broadcast %cst_710 : f32 to vector<32x32xf32>
    %982 = arith.mulf %981, %980 : vector<32x32xf32>
    %983 = math.tanh %982 : vector<32x32xf32>
    %cst_711 = arith.constant 5.000000e-01 : f32
    %984 = vector.broadcast %cst_711 : f32 to vector<32x32xf32>
    %985 = arith.mulf %984, %983 : vector<32x32xf32>
    %cst_712 = arith.constant 5.000000e-01 : f32
    %986 = vector.broadcast %cst_712 : f32 to vector<32x32xf32>
    %987 = arith.addf %985, %986 : vector<32x32xf32>
    %988 = arith.mulf %980, %987 : vector<32x32xf32>
    %c0_713 = arith.constant 0 : index
    %c0_714 = arith.constant 0 : index
    %989 = vector.load %arg8[%c0_713, %c0_714] : memref<1x32xf32, #tpu.memory_space<vmem>>, vector<1x32xf32>
    %990 = vector.broadcast %989 : vector<1x32xf32> to vector<32x32xf32>
    %991 = arith.addf %988, %990 : vector<32x32xf32>
    %992 = arith.truncf %991 : vector<32x32xf32> to vector<32x32xbf16>
    %c0_715 = arith.constant 0 : index
    %c0_716 = arith.constant 0 : index
    %c0_717 = arith.constant 0 : index
    %993 = vector.load %arg21[%c0_715, %c0_716, %c0_717] : memref<4x16x32xbf16, #tpu.memory_space<vmem>>, vector<1x16x32xbf16>
    %994 = vector.shape_cast %993 : vector<1x16x32xbf16> to vector<16x32xbf16>
    %cst_718 = arith.constant dense<0.000000e+00> : vector<16x32xf32>
    %995 = tpu.matmul %994, %992, %cst_718 {dimension_numbers = #tpu.dot_dimension_numbers<[1], [0], [0], [1], [0, 0, 1, 1], [], []>} : vector<16x32xbf16>, vector<32x32xbf16>, vector<16x32xf32> -> vector<16x32xf32>
    %996 = arith.truncf %995 : vector<16x32xf32> to vector<16x32xbf16>
    %c0_719 = arith.constant 0 : index
    %c0_720 = arith.constant 0 : index
    %c0_721 = arith.constant 0 : index
    %997 = vector.load %arg7[%c0_719, %c0_720, %c0_721] : memref<4x32x128xbf16, #tpu.memory_space<vmem>>, vector<1x32x128xbf16>
    %998 = vector.shape_cast %997 : vector<1x32x128xbf16> to vector<32x128xbf16>
    %cst_722 = arith.constant dense<0.000000e+00> : vector<16x128xf32>
    %999 = tpu.matmul %996, %998, %cst_722 {dimension_numbers = #tpu.dot_dimension_numbers<[1], [0], [0], [1], [0, 0, 1, 1], [], []>} : vector<16x32xbf16>, vector<32x128xbf16>, vector<16x128xf32> -> vector<16x128xf32>
    %c1_723 = arith.constant 1 : index
    %c0_724 = arith.constant 0 : index
    %c0_725 = arith.constant 0 : index
    %1000 = vector.load %arg21[%c1_723, %c0_724, %c0_725] : memref<4x16x32xbf16, #tpu.memory_space<vmem>>, vector<1x16x32xbf16>
    %1001 = vector.shape_cast %1000 : vector<1x16x32xbf16> to vector<16x32xbf16>
    %cst_726 = arith.constant dense<0.000000e+00> : vector<16x32xf32>
    %1002 = tpu.matmul %1001, %992, %cst_726 {dimension_numbers = #tpu.dot_dimension_numbers<[1], [0], [0], [1], [0, 0, 1, 1], [], []>} : vector<16x32xbf16>, vector<32x32xbf16>, vector<16x32xf32> -> vector<16x32xf32>
    %1003 = arith.truncf %1002 : vector<16x32xf32> to vector<16x32xbf16>
    %c1_727 = arith.constant 1 : index
    %c0_728 = arith.constant 0 : index
    %c0_729 = arith.constant 0 : index
    %1004 = vector.load %arg7[%c1_727, %c0_728, %c0_729] : memref<4x32x128xbf16, #tpu.memory_space<vmem>>, vector<1x32x128xbf16>
    %1005 = vector.shape_cast %1004 : vector<1x32x128xbf16> to vector<32x128xbf16>
    %cst_730 = arith.constant dense<0.000000e+00> : vector<16x128xf32>
    %1006 = tpu.matmul %1003, %1005, %cst_730 {dimension_numbers = #tpu.dot_dimension_numbers<[1], [0], [0], [1], [0, 0, 1, 1], [], []>} : vector<16x32xbf16>, vector<32x128xbf16>, vector<16x128xf32> -> vector<16x128xf32>
    %c2_731 = arith.constant 2 : index
    %c0_732 = arith.constant 0 : index
    %c0_733 = arith.constant 0 : index
    %1007 = vector.load %arg21[%c2_731, %c0_732, %c0_733] : memref<4x16x32xbf16, #tpu.memory_space<vmem>>, vector<1x16x32xbf16>
    %1008 = vector.shape_cast %1007 : vector<1x16x32xbf16> to vector<16x32xbf16>
    %cst_734 = arith.constant dense<0.000000e+00> : vector<16x32xf32>
    %1009 = tpu.matmul %1008, %992, %cst_734 {dimension_numbers = #tpu.dot_dimension_numbers<[1], [0], [0], [1], [0, 0, 1, 1], [], []>} : vector<16x32xbf16>, vector<32x32xbf16>, vector<16x32xf32> -> vector<16x32xf32>
    %1010 = arith.truncf %1009 : vector<16x32xf32> to vector<16x32xbf16>
    %c2_735 = arith.constant 2 : index
    %c0_736 = arith.constant 0 : index
    %c0_737 = arith.constant 0 : index
    %1011 = vector.load %arg7[%c2_735, %c0_736, %c0_737] : memref<4x32x128xbf16, #tpu.memory_space<vmem>>, vector<1x32x128xbf16>
    %1012 = vector.shape_cast %1011 : vector<1x32x128xbf16> to vector<32x128xbf16>
    %cst_738 = arith.constant dense<0.000000e+00> : vector<16x128xf32>
    %1013 = tpu.matmul %1010, %1012, %cst_738 {dimension_numbers = #tpu.dot_dimension_numbers<[1], [0], [0], [1], [0, 0, 1, 1], [], []>} : vector<16x32xbf16>, vector<32x128xbf16>, vector<16x128xf32> -> vector<16x128xf32>
    %c3_739 = arith.constant 3 : index
    %c0_740 = arith.constant 0 : index
    %c0_741 = arith.constant 0 : index
    %1014 = vector.load %arg21[%c3_739, %c0_740, %c0_741] : memref<4x16x32xbf16, #tpu.memory_space<vmem>>, vector<1x16x32xbf16>
    %1015 = vector.shape_cast %1014 : vector<1x16x32xbf16> to vector<16x32xbf16>
    %cst_742 = arith.constant dense<0.000000e+00> : vector<16x32xf32>
    %1016 = tpu.matmul %1015, %992, %cst_742 {dimension_numbers = #tpu.dot_dimension_numbers<[1], [0], [0], [1], [0, 0, 1, 1], [], []>} : vector<16x32xbf16>, vector<32x32xbf16>, vector<16x32xf32> -> vector<16x32xf32>
    %1017 = arith.truncf %1016 : vector<16x32xf32> to vector<16x32xbf16>
    %c3_743 = arith.constant 3 : index
    %c0_744 = arith.constant 0 : index
    %c0_745 = arith.constant 0 : index
    %1018 = vector.load %arg7[%c3_743, %c0_744, %c0_745] : memref<4x32x128xbf16, #tpu.memory_space<vmem>>, vector<1x32x128xbf16>
    %1019 = vector.shape_cast %1018 : vector<1x32x128xbf16> to vector<32x128xbf16>
    %cst_746 = arith.constant dense<0.000000e+00> : vector<16x128xf32>
    %1020 = tpu.matmul %1017, %1019, %cst_746 {dimension_numbers = #tpu.dot_dimension_numbers<[1], [0], [0], [1], [0, 0, 1, 1], [], []>} : vector<16x32xbf16>, vector<32x128xbf16>, vector<16x128xf32> -> vector<16x128xf32>
    %1021 = arith.addf %999, %1006 : vector<16x128xf32>
    %1022 = arith.addf %1013, %1020 : vector<16x128xf32>
    %1023 = arith.addf %1021, %1022 : vector<16x128xf32>
    %c3_747 = arith.constant 3 : index
    %c0_748 = arith.constant 0 : index
    %c0_749 = arith.constant 0 : index
    %1024 = vector.load %arg9[%c3_747, %c0_748, %c0_749] : memref<29x32x1xf32, #tpu.memory_space<vmem>>, vector<1x32x1xf32>
    %1025 = vector.shape_cast %1024 : vector<1x32x1xf32> to vector<32x1xf32>
    %1026 = vector.extract_strided_slice %1025 {offsets = [0, 0], sizes = [16, 1], strides = [1, 1]} : vector<32x1xf32> to vector<16x1xf32>
    %1027 = vector.broadcast %1026 : vector<16x1xf32> to vector<16x128xf32>
    %1028 = arith.addf %1023, %1027 : vector<16x128xf32>
    %cst_750 = arith.constant 5.000000e-01 : f32
    %1029 = vector.broadcast %cst_750 : f32 to vector<16x128xf32>
    %1030 = arith.mulf %1029, %1028 : vector<16x128xf32>
    %1031 = math.tanh %1030 : vector<16x128xf32>
    %cst_751 = arith.constant 5.000000e-01 : f32
    %1032 = vector.broadcast %cst_751 : f32 to vector<16x128xf32>
    %1033 = arith.mulf %1032, %1031 : vector<16x128xf32>
    %cst_752 = arith.constant 5.000000e-01 : f32
    %1034 = vector.broadcast %cst_752 : f32 to vector<16x128xf32>
    %1035 = arith.addf %1033, %1034 : vector<16x128xf32>
    %1036 = arith.mulf %1028, %1035 : vector<16x128xf32>
    %c9_i32_753 = arith.constant 9 : i32
    %1037 = tpu.dynamic_rotate %1036 by %c9_i32_753 dim 1 : vector<16x128xf32>, i32 -> vector<16x128xf32>
    %c0_754 = arith.constant 0 : index
    %c0_755 = arith.constant 0 : index
    %c0_756 = arith.constant 0 : index
    %1038 = vector.load %arg3[%c0_754, %c0_755, %c0_756] : memref<9x1x128xf32, #tpu.memory_space<vmem>>, vector<1x1x128xf32>
    %1039 = vector.shape_cast %1038 : vector<1x1x128xf32> to vector<1x128xf32>
    %1040 = vector.broadcast %1039 : vector<1x128xf32> to vector<16x128xf32>
    %1041 = arith.mulf %1037, %1040 : vector<16x128xf32>
    %1042 = arith.truncf %1041 : vector<16x128xf32> to vector<16x128xbf16>
    %c0_757 = arith.constant 0 : index
    %c0_758 = arith.constant 0 : index
    %c0_759 = arith.constant 0 : index
    %1043 = vector.load %arg19[%c0_757, %c0_758, %c0_759] : memref<9x16x16xbf16, #tpu.memory_space<vmem>>, vector<1x16x16xbf16>
    %1044 = vector.shape_cast %1043 : vector<1x16x16xbf16> to vector<16x16xbf16>
    %cst_760 = arith.constant dense<0.000000e+00> : vector<16x128xf32>
    %1045 = tpu.matmul %1044, %1042, %cst_760 {dimension_numbers = #tpu.dot_dimension_numbers<[1], [0], [0], [1], [0, 0, 1, 1], [], []>} : vector<16x16xbf16>, vector<16x128xbf16>, vector<16x128xf32> -> vector<16x128xf32>
    %c8_i32_761 = arith.constant 8 : i32
    %1046 = tpu.dynamic_rotate %1036 by %c8_i32_761 dim 1 : vector<16x128xf32>, i32 -> vector<16x128xf32>
    %c1_762 = arith.constant 1 : index
    %c0_763 = arith.constant 0 : index
    %c0_764 = arith.constant 0 : index
    %1047 = vector.load %arg3[%c1_762, %c0_763, %c0_764] : memref<9x1x128xf32, #tpu.memory_space<vmem>>, vector<1x1x128xf32>
    %1048 = vector.shape_cast %1047 : vector<1x1x128xf32> to vector<1x128xf32>
    %1049 = vector.broadcast %1048 : vector<1x128xf32> to vector<16x128xf32>
    %1050 = arith.mulf %1046, %1049 : vector<16x128xf32>
    %1051 = arith.truncf %1050 : vector<16x128xf32> to vector<16x128xbf16>
    %c1_765 = arith.constant 1 : index
    %c0_766 = arith.constant 0 : index
    %c0_767 = arith.constant 0 : index
    %1052 = vector.load %arg19[%c1_765, %c0_766, %c0_767] : memref<9x16x16xbf16, #tpu.memory_space<vmem>>, vector<1x16x16xbf16>
    %1053 = vector.shape_cast %1052 : vector<1x16x16xbf16> to vector<16x16xbf16>
    %cst_768 = arith.constant dense<0.000000e+00> : vector<16x128xf32>
    %1054 = tpu.matmul %1053, %1051, %cst_768 {dimension_numbers = #tpu.dot_dimension_numbers<[1], [0], [0], [1], [0, 0, 1, 1], [], []>} : vector<16x16xbf16>, vector<16x128xbf16>, vector<16x128xf32> -> vector<16x128xf32>
    %c7_i32_769 = arith.constant 7 : i32
    %1055 = tpu.dynamic_rotate %1036 by %c7_i32_769 dim 1 : vector<16x128xf32>, i32 -> vector<16x128xf32>
    %c2_770 = arith.constant 2 : index
    %c0_771 = arith.constant 0 : index
    %c0_772 = arith.constant 0 : index
    %1056 = vector.load %arg3[%c2_770, %c0_771, %c0_772] : memref<9x1x128xf32, #tpu.memory_space<vmem>>, vector<1x1x128xf32>
    %1057 = vector.shape_cast %1056 : vector<1x1x128xf32> to vector<1x128xf32>
    %1058 = vector.broadcast %1057 : vector<1x128xf32> to vector<16x128xf32>
    %1059 = arith.mulf %1055, %1058 : vector<16x128xf32>
    %1060 = arith.truncf %1059 : vector<16x128xf32> to vector<16x128xbf16>
    %c2_773 = arith.constant 2 : index
    %c0_774 = arith.constant 0 : index
    %c0_775 = arith.constant 0 : index
    %1061 = vector.load %arg19[%c2_773, %c0_774, %c0_775] : memref<9x16x16xbf16, #tpu.memory_space<vmem>>, vector<1x16x16xbf16>
    %1062 = vector.shape_cast %1061 : vector<1x16x16xbf16> to vector<16x16xbf16>
    %cst_776 = arith.constant dense<0.000000e+00> : vector<16x128xf32>
    %1063 = tpu.matmul %1062, %1060, %cst_776 {dimension_numbers = #tpu.dot_dimension_numbers<[1], [0], [0], [1], [0, 0, 1, 1], [], []>} : vector<16x16xbf16>, vector<16x128xbf16>, vector<16x128xf32> -> vector<16x128xf32>
    %c1_i32_777 = arith.constant 1 : i32
    %1064 = tpu.dynamic_rotate %1036 by %c1_i32_777 dim 1 : vector<16x128xf32>, i32 -> vector<16x128xf32>
    %c3_778 = arith.constant 3 : index
    %c0_779 = arith.constant 0 : index
    %c0_780 = arith.constant 0 : index
    %1065 = vector.load %arg3[%c3_778, %c0_779, %c0_780] : memref<9x1x128xf32, #tpu.memory_space<vmem>>, vector<1x1x128xf32>
    %1066 = vector.shape_cast %1065 : vector<1x1x128xf32> to vector<1x128xf32>
    %1067 = vector.broadcast %1066 : vector<1x128xf32> to vector<16x128xf32>
    %1068 = arith.mulf %1064, %1067 : vector<16x128xf32>
    %1069 = arith.truncf %1068 : vector<16x128xf32> to vector<16x128xbf16>
    %c3_781 = arith.constant 3 : index
    %c0_782 = arith.constant 0 : index
    %c0_783 = arith.constant 0 : index
    %1070 = vector.load %arg19[%c3_781, %c0_782, %c0_783] : memref<9x16x16xbf16, #tpu.memory_space<vmem>>, vector<1x16x16xbf16>
    %1071 = vector.shape_cast %1070 : vector<1x16x16xbf16> to vector<16x16xbf16>
    %cst_784 = arith.constant dense<0.000000e+00> : vector<16x128xf32>
    %1072 = tpu.matmul %1071, %1069, %cst_784 {dimension_numbers = #tpu.dot_dimension_numbers<[1], [0], [0], [1], [0, 0, 1, 1], [], []>} : vector<16x16xbf16>, vector<16x128xbf16>, vector<16x128xf32> -> vector<16x128xf32>
    %1073 = arith.truncf %1036 : vector<16x128xf32> to vector<16x128xbf16>
    %c4_785 = arith.constant 4 : index
    %c0_786 = arith.constant 0 : index
    %c0_787 = arith.constant 0 : index
    %1074 = vector.load %arg19[%c4_785, %c0_786, %c0_787] : memref<9x16x16xbf16, #tpu.memory_space<vmem>>, vector<1x16x16xbf16>
    %1075 = vector.shape_cast %1074 : vector<1x16x16xbf16> to vector<16x16xbf16>
    %cst_788 = arith.constant dense<0.000000e+00> : vector<16x128xf32>
    %1076 = tpu.matmul %1075, %1073, %cst_788 {dimension_numbers = #tpu.dot_dimension_numbers<[1], [0], [0], [1], [0, 0, 1, 1], [], []>} : vector<16x16xbf16>, vector<16x128xbf16>, vector<16x128xf32> -> vector<16x128xf32>
    %c127_i32_789 = arith.constant 127 : i32
    %1077 = tpu.dynamic_rotate %1036 by %c127_i32_789 dim 1 : vector<16x128xf32>, i32 -> vector<16x128xf32>
    %c5_790 = arith.constant 5 : index
    %c0_791 = arith.constant 0 : index
    %c0_792 = arith.constant 0 : index
    %1078 = vector.load %arg3[%c5_790, %c0_791, %c0_792] : memref<9x1x128xf32, #tpu.memory_space<vmem>>, vector<1x1x128xf32>
    %1079 = vector.shape_cast %1078 : vector<1x1x128xf32> to vector<1x128xf32>
    %1080 = vector.broadcast %1079 : vector<1x128xf32> to vector<16x128xf32>
    %1081 = arith.mulf %1077, %1080 : vector<16x128xf32>
    %1082 = arith.truncf %1081 : vector<16x128xf32> to vector<16x128xbf16>
    %c5_793 = arith.constant 5 : index
    %c0_794 = arith.constant 0 : index
    %c0_795 = arith.constant 0 : index
    %1083 = vector.load %arg19[%c5_793, %c0_794, %c0_795] : memref<9x16x16xbf16, #tpu.memory_space<vmem>>, vector<1x16x16xbf16>
    %1084 = vector.shape_cast %1083 : vector<1x16x16xbf16> to vector<16x16xbf16>
    %cst_796 = arith.constant dense<0.000000e+00> : vector<16x128xf32>
    %1085 = tpu.matmul %1084, %1082, %cst_796 {dimension_numbers = #tpu.dot_dimension_numbers<[1], [0], [0], [1], [0, 0, 1, 1], [], []>} : vector<16x16xbf16>, vector<16x128xbf16>, vector<16x128xf32> -> vector<16x128xf32>
    %c121_i32_797 = arith.constant 121 : i32
    %1086 = tpu.dynamic_rotate %1036 by %c121_i32_797 dim 1 : vector<16x128xf32>, i32 -> vector<16x128xf32>
    %c6_798 = arith.constant 6 : index
    %c0_799 = arith.constant 0 : index
    %c0_800 = arith.constant 0 : index
    %1087 = vector.load %arg3[%c6_798, %c0_799, %c0_800] : memref<9x1x128xf32, #tpu.memory_space<vmem>>, vector<1x1x128xf32>
    %1088 = vector.shape_cast %1087 : vector<1x1x128xf32> to vector<1x128xf32>
    %1089 = vector.broadcast %1088 : vector<1x128xf32> to vector<16x128xf32>
    %1090 = arith.mulf %1086, %1089 : vector<16x128xf32>
    %1091 = arith.truncf %1090 : vector<16x128xf32> to vector<16x128xbf16>
    %c6_801 = arith.constant 6 : index
    %c0_802 = arith.constant 0 : index
    %c0_803 = arith.constant 0 : index
    %1092 = vector.load %arg19[%c6_801, %c0_802, %c0_803] : memref<9x16x16xbf16, #tpu.memory_space<vmem>>, vector<1x16x16xbf16>
    %1093 = vector.shape_cast %1092 : vector<1x16x16xbf16> to vector<16x16xbf16>
    %cst_804 = arith.constant dense<0.000000e+00> : vector<16x128xf32>
    %1094 = tpu.matmul %1093, %1091, %cst_804 {dimension_numbers = #tpu.dot_dimension_numbers<[1], [0], [0], [1], [0, 0, 1, 1], [], []>} : vector<16x16xbf16>, vector<16x128xbf16>, vector<16x128xf32> -> vector<16x128xf32>
    %c120_i32_805 = arith.constant 120 : i32
    %1095 = tpu.dynamic_rotate %1036 by %c120_i32_805 dim 1 : vector<16x128xf32>, i32 -> vector<16x128xf32>
    %c7_806 = arith.constant 7 : index
    %c0_807 = arith.constant 0 : index
    %c0_808 = arith.constant 0 : index
    %1096 = vector.load %arg3[%c7_806, %c0_807, %c0_808] : memref<9x1x128xf32, #tpu.memory_space<vmem>>, vector<1x1x128xf32>
    %1097 = vector.shape_cast %1096 : vector<1x1x128xf32> to vector<1x128xf32>
    %1098 = vector.broadcast %1097 : vector<1x128xf32> to vector<16x128xf32>
    %1099 = arith.mulf %1095, %1098 : vector<16x128xf32>
    %1100 = arith.truncf %1099 : vector<16x128xf32> to vector<16x128xbf16>
    %c7_809 = arith.constant 7 : index
    %c0_810 = arith.constant 0 : index
    %c0_811 = arith.constant 0 : index
    %1101 = vector.load %arg19[%c7_809, %c0_810, %c0_811] : memref<9x16x16xbf16, #tpu.memory_space<vmem>>, vector<1x16x16xbf16>
    %1102 = vector.shape_cast %1101 : vector<1x16x16xbf16> to vector<16x16xbf16>
    %cst_812 = arith.constant dense<0.000000e+00> : vector<16x128xf32>
    %1103 = tpu.matmul %1102, %1100, %cst_812 {dimension_numbers = #tpu.dot_dimension_numbers<[1], [0], [0], [1], [0, 0, 1, 1], [], []>} : vector<16x16xbf16>, vector<16x128xbf16>, vector<16x128xf32> -> vector<16x128xf32>
    %c119_i32_813 = arith.constant 119 : i32
    %1104 = tpu.dynamic_rotate %1036 by %c119_i32_813 dim 1 : vector<16x128xf32>, i32 -> vector<16x128xf32>
    %c8_814 = arith.constant 8 : index
    %c0_815 = arith.constant 0 : index
    %c0_816 = arith.constant 0 : index
    %1105 = vector.load %arg3[%c8_814, %c0_815, %c0_816] : memref<9x1x128xf32, #tpu.memory_space<vmem>>, vector<1x1x128xf32>
    %1106 = vector.shape_cast %1105 : vector<1x1x128xf32> to vector<1x128xf32>
    %1107 = vector.broadcast %1106 : vector<1x128xf32> to vector<16x128xf32>
    %1108 = arith.mulf %1104, %1107 : vector<16x128xf32>
    %1109 = arith.truncf %1108 : vector<16x128xf32> to vector<16x128xbf16>
    %c8_817 = arith.constant 8 : index
    %c0_818 = arith.constant 0 : index
    %c0_819 = arith.constant 0 : index
    %1110 = vector.load %arg19[%c8_817, %c0_818, %c0_819] : memref<9x16x16xbf16, #tpu.memory_space<vmem>>, vector<1x16x16xbf16>
    %1111 = vector.shape_cast %1110 : vector<1x16x16xbf16> to vector<16x16xbf16>
    %cst_820 = arith.constant dense<0.000000e+00> : vector<16x128xf32>
    %1112 = tpu.matmul %1111, %1109, %cst_820 {dimension_numbers = #tpu.dot_dimension_numbers<[1], [0], [0], [1], [0, 0, 1, 1], [], []>} : vector<16x16xbf16>, vector<16x128xbf16>, vector<16x128xf32> -> vector<16x128xf32>
    %1113 = arith.addf %1045, %1054 : vector<16x128xf32>
    %1114 = arith.addf %1063, %1072 : vector<16x128xf32>
    %1115 = arith.addf %1076, %1085 : vector<16x128xf32>
    %1116 = arith.addf %1094, %1103 : vector<16x128xf32>
    %1117 = arith.addf %1113, %1114 : vector<16x128xf32>
    %1118 = arith.addf %1115, %1116 : vector<16x128xf32>
    %1119 = arith.addf %1117, %1118 : vector<16x128xf32>
    %1120 = arith.addf %1119, %1112 : vector<16x128xf32>
    %c23 = arith.constant 23 : index
    %c0_821 = arith.constant 0 : index
    %c0_822 = arith.constant 0 : index
    %1121 = vector.load %arg9[%c23, %c0_821, %c0_822] : memref<29x32x1xf32, #tpu.memory_space<vmem>>, vector<1x32x1xf32>
    %1122 = vector.shape_cast %1121 : vector<1x32x1xf32> to vector<32x1xf32>
    %1123 = vector.extract_strided_slice %1122 {offsets = [0, 0], sizes = [16, 1], strides = [1, 1]} : vector<32x1xf32> to vector<16x1xf32>
    %1124 = vector.broadcast %1123 : vector<16x1xf32> to vector<16x128xf32>
    %1125 = arith.addf %1120, %1124 : vector<16x128xf32>
    %c24 = arith.constant 24 : index
    %c0_823 = arith.constant 0 : index
    %c0_824 = arith.constant 0 : index
    %1126 = vector.load %arg9[%c24, %c0_823, %c0_824] : memref<29x32x1xf32, #tpu.memory_space<vmem>>, vector<1x32x1xf32>
    %1127 = vector.shape_cast %1126 : vector<1x32x1xf32> to vector<32x1xf32>
    %1128 = vector.extract_strided_slice %1127 {offsets = [0, 0], sizes = [16, 1], strides = [1, 1]} : vector<32x1xf32> to vector<16x1xf32>
    %c25 = arith.constant 25 : index
    %c0_825 = arith.constant 0 : index
    %c0_826 = arith.constant 0 : index
    %1129 = vector.load %arg9[%c25, %c0_825, %c0_826] : memref<29x32x1xf32, #tpu.memory_space<vmem>>, vector<1x32x1xf32>
    %1130 = vector.shape_cast %1129 : vector<1x32x1xf32> to vector<32x1xf32>
    %1131 = vector.extract_strided_slice %1130 {offsets = [0, 0], sizes = [16, 1], strides = [1, 1]} : vector<32x1xf32> to vector<16x1xf32>
    %cst_827 = arith.constant dense<0.000000e+00> : vector<16xf32>
    %1132 = vector.multi_reduction <add>, %1125, %cst_827 [1] : vector<16x128xf32> to vector<16xf32>
    %1133 = vector.shape_cast %1132 : vector<16xf32> to vector<16x1xf32>
    %cst_828 = arith.constant 7.812500e-03 : f32
    %1134 = vector.broadcast %cst_828 : f32 to vector<16x1xf32>
    %1135 = arith.mulf %1133, %1134 : vector<16x1xf32>
    %1136 = vector.broadcast %1135 : vector<16x1xf32> to vector<16x128xf32>
    %1137 = arith.subf %1125, %1136 : vector<16x128xf32>
    %1138 = arith.mulf %1137, %1137 : vector<16x128xf32>
    %cst_829 = arith.constant dense<0.000000e+00> : vector<16xf32>
    %1139 = vector.multi_reduction <add>, %1138, %cst_829 [1] : vector<16x128xf32> to vector<16xf32>
    %1140 = vector.shape_cast %1139 : vector<16xf32> to vector<16x1xf32>
    %cst_830 = arith.constant 7.812500e-03 : f32
    %1141 = vector.broadcast %cst_830 : f32 to vector<16x1xf32>
    %1142 = arith.mulf %1140, %1141 : vector<16x1xf32>
    %cst_831 = arith.constant 9.99999974E-6 : f32
    %1143 = vector.broadcast %cst_831 : f32 to vector<16x1xf32>
    %1144 = arith.addf %1142, %1143 : vector<16x1xf32>
    %1145 = math.rsqrt %1144 : vector<16x1xf32>
    %1146 = vector.broadcast %1145 : vector<16x1xf32> to vector<16x128xf32>
    %1147 = arith.mulf %1137, %1146 : vector<16x128xf32>
    %1148 = vector.broadcast %1128 : vector<16x1xf32> to vector<16x128xf32>
    %1149 = arith.mulf %1147, %1148 : vector<16x128xf32>
    %1150 = vector.broadcast %1131 : vector<16x1xf32> to vector<16x128xf32>
    %1151 = arith.addf %1149, %1150 : vector<16x128xf32>
    %cst_832 = arith.constant 5.000000e-01 : f32
    %1152 = vector.broadcast %cst_832 : f32 to vector<16x128xf32>
    %1153 = arith.mulf %1152, %1151 : vector<16x128xf32>
    %1154 = math.tanh %1153 : vector<16x128xf32>
    %cst_833 = arith.constant 5.000000e-01 : f32
    %1155 = vector.broadcast %cst_833 : f32 to vector<16x128xf32>
    %1156 = arith.mulf %1155, %1154 : vector<16x128xf32>
    %cst_834 = arith.constant 5.000000e-01 : f32
    %1157 = vector.broadcast %cst_834 : f32 to vector<16x128xf32>
    %1158 = arith.addf %1156, %1157 : vector<16x128xf32>
    %1159 = arith.mulf %1151, %1158 : vector<16x128xf32>
    %c9_i32_835 = arith.constant 9 : i32
    %1160 = tpu.dynamic_rotate %1159 by %c9_i32_835 dim 1 : vector<16x128xf32>, i32 -> vector<16x128xf32>
    %c0_836 = arith.constant 0 : index
    %c0_837 = arith.constant 0 : index
    %c0_838 = arith.constant 0 : index
    %1161 = vector.load %arg3[%c0_836, %c0_837, %c0_838] : memref<9x1x128xf32, #tpu.memory_space<vmem>>, vector<1x1x128xf32>
    %1162 = vector.shape_cast %1161 : vector<1x1x128xf32> to vector<1x128xf32>
    %1163 = vector.broadcast %1162 : vector<1x128xf32> to vector<16x128xf32>
    %1164 = arith.mulf %1160, %1163 : vector<16x128xf32>
    %1165 = arith.truncf %1164 : vector<16x128xf32> to vector<16x128xbf16>
    %c0_839 = arith.constant 0 : index
    %c0_840 = arith.constant 0 : index
    %c0_841 = arith.constant 0 : index
    %1166 = vector.load %arg20[%c0_839, %c0_840, %c0_841] : memref<9x16x16xbf16, #tpu.memory_space<vmem>>, vector<1x16x16xbf16>
    %1167 = vector.shape_cast %1166 : vector<1x16x16xbf16> to vector<16x16xbf16>
    %cst_842 = arith.constant dense<0.000000e+00> : vector<16x128xf32>
    %1168 = tpu.matmul %1167, %1165, %cst_842 {dimension_numbers = #tpu.dot_dimension_numbers<[1], [0], [0], [1], [0, 0, 1, 1], [], []>} : vector<16x16xbf16>, vector<16x128xbf16>, vector<16x128xf32> -> vector<16x128xf32>
    %c8_i32_843 = arith.constant 8 : i32
    %1169 = tpu.dynamic_rotate %1159 by %c8_i32_843 dim 1 : vector<16x128xf32>, i32 -> vector<16x128xf32>
    %c1_844 = arith.constant 1 : index
    %c0_845 = arith.constant 0 : index
    %c0_846 = arith.constant 0 : index
    %1170 = vector.load %arg3[%c1_844, %c0_845, %c0_846] : memref<9x1x128xf32, #tpu.memory_space<vmem>>, vector<1x1x128xf32>
    %1171 = vector.shape_cast %1170 : vector<1x1x128xf32> to vector<1x128xf32>
    %1172 = vector.broadcast %1171 : vector<1x128xf32> to vector<16x128xf32>
    %1173 = arith.mulf %1169, %1172 : vector<16x128xf32>
    %1174 = arith.truncf %1173 : vector<16x128xf32> to vector<16x128xbf16>
    %c1_847 = arith.constant 1 : index
    %c0_848 = arith.constant 0 : index
    %c0_849 = arith.constant 0 : index
    %1175 = vector.load %arg20[%c1_847, %c0_848, %c0_849] : memref<9x16x16xbf16, #tpu.memory_space<vmem>>, vector<1x16x16xbf16>
    %1176 = vector.shape_cast %1175 : vector<1x16x16xbf16> to vector<16x16xbf16>
    %cst_850 = arith.constant dense<0.000000e+00> : vector<16x128xf32>
    %1177 = tpu.matmul %1176, %1174, %cst_850 {dimension_numbers = #tpu.dot_dimension_numbers<[1], [0], [0], [1], [0, 0, 1, 1], [], []>} : vector<16x16xbf16>, vector<16x128xbf16>, vector<16x128xf32> -> vector<16x128xf32>
    %c7_i32_851 = arith.constant 7 : i32
    %1178 = tpu.dynamic_rotate %1159 by %c7_i32_851 dim 1 : vector<16x128xf32>, i32 -> vector<16x128xf32>
    %c2_852 = arith.constant 2 : index
    %c0_853 = arith.constant 0 : index
    %c0_854 = arith.constant 0 : index
    %1179 = vector.load %arg3[%c2_852, %c0_853, %c0_854] : memref<9x1x128xf32, #tpu.memory_space<vmem>>, vector<1x1x128xf32>
    %1180 = vector.shape_cast %1179 : vector<1x1x128xf32> to vector<1x128xf32>
    %1181 = vector.broadcast %1180 : vector<1x128xf32> to vector<16x128xf32>
    %1182 = arith.mulf %1178, %1181 : vector<16x128xf32>
    %1183 = arith.truncf %1182 : vector<16x128xf32> to vector<16x128xbf16>
    %c2_855 = arith.constant 2 : index
    %c0_856 = arith.constant 0 : index
    %c0_857 = arith.constant 0 : index
    %1184 = vector.load %arg20[%c2_855, %c0_856, %c0_857] : memref<9x16x16xbf16, #tpu.memory_space<vmem>>, vector<1x16x16xbf16>
    %1185 = vector.shape_cast %1184 : vector<1x16x16xbf16> to vector<16x16xbf16>
    %cst_858 = arith.constant dense<0.000000e+00> : vector<16x128xf32>
    %1186 = tpu.matmul %1185, %1183, %cst_858 {dimension_numbers = #tpu.dot_dimension_numbers<[1], [0], [0], [1], [0, 0, 1, 1], [], []>} : vector<16x16xbf16>, vector<16x128xbf16>, vector<16x128xf32> -> vector<16x128xf32>
    %c1_i32_859 = arith.constant 1 : i32
    %1187 = tpu.dynamic_rotate %1159 by %c1_i32_859 dim 1 : vector<16x128xf32>, i32 -> vector<16x128xf32>
    %c3_860 = arith.constant 3 : index
    %c0_861 = arith.constant 0 : index
    %c0_862 = arith.constant 0 : index
    %1188 = vector.load %arg3[%c3_860, %c0_861, %c0_862] : memref<9x1x128xf32, #tpu.memory_space<vmem>>, vector<1x1x128xf32>
    %1189 = vector.shape_cast %1188 : vector<1x1x128xf32> to vector<1x128xf32>
    %1190 = vector.broadcast %1189 : vector<1x128xf32> to vector<16x128xf32>
    %1191 = arith.mulf %1187, %1190 : vector<16x128xf32>
    %1192 = arith.truncf %1191 : vector<16x128xf32> to vector<16x128xbf16>
    %c3_863 = arith.constant 3 : index
    %c0_864 = arith.constant 0 : index
    %c0_865 = arith.constant 0 : index
    %1193 = vector.load %arg20[%c3_863, %c0_864, %c0_865] : memref<9x16x16xbf16, #tpu.memory_space<vmem>>, vector<1x16x16xbf16>
    %1194 = vector.shape_cast %1193 : vector<1x16x16xbf16> to vector<16x16xbf16>
    %cst_866 = arith.constant dense<0.000000e+00> : vector<16x128xf32>
    %1195 = tpu.matmul %1194, %1192, %cst_866 {dimension_numbers = #tpu.dot_dimension_numbers<[1], [0], [0], [1], [0, 0, 1, 1], [], []>} : vector<16x16xbf16>, vector<16x128xbf16>, vector<16x128xf32> -> vector<16x128xf32>
    %1196 = arith.truncf %1159 : vector<16x128xf32> to vector<16x128xbf16>
    %c4_867 = arith.constant 4 : index
    %c0_868 = arith.constant 0 : index
    %c0_869 = arith.constant 0 : index
    %1197 = vector.load %arg20[%c4_867, %c0_868, %c0_869] : memref<9x16x16xbf16, #tpu.memory_space<vmem>>, vector<1x16x16xbf16>
    %1198 = vector.shape_cast %1197 : vector<1x16x16xbf16> to vector<16x16xbf16>
    %cst_870 = arith.constant dense<0.000000e+00> : vector<16x128xf32>
    %1199 = tpu.matmul %1198, %1196, %cst_870 {dimension_numbers = #tpu.dot_dimension_numbers<[1], [0], [0], [1], [0, 0, 1, 1], [], []>} : vector<16x16xbf16>, vector<16x128xbf16>, vector<16x128xf32> -> vector<16x128xf32>
    %c127_i32_871 = arith.constant 127 : i32
    %1200 = tpu.dynamic_rotate %1159 by %c127_i32_871 dim 1 : vector<16x128xf32>, i32 -> vector<16x128xf32>
    %c5_872 = arith.constant 5 : index
    %c0_873 = arith.constant 0 : index
    %c0_874 = arith.constant 0 : index
    %1201 = vector.load %arg3[%c5_872, %c0_873, %c0_874] : memref<9x1x128xf32, #tpu.memory_space<vmem>>, vector<1x1x128xf32>
    %1202 = vector.shape_cast %1201 : vector<1x1x128xf32> to vector<1x128xf32>
    %1203 = vector.broadcast %1202 : vector<1x128xf32> to vector<16x128xf32>
    %1204 = arith.mulf %1200, %1203 : vector<16x128xf32>
    %1205 = arith.truncf %1204 : vector<16x128xf32> to vector<16x128xbf16>
    %c5_875 = arith.constant 5 : index
    %c0_876 = arith.constant 0 : index
    %c0_877 = arith.constant 0 : index
    %1206 = vector.load %arg20[%c5_875, %c0_876, %c0_877] : memref<9x16x16xbf16, #tpu.memory_space<vmem>>, vector<1x16x16xbf16>
    %1207 = vector.shape_cast %1206 : vector<1x16x16xbf16> to vector<16x16xbf16>
    %cst_878 = arith.constant dense<0.000000e+00> : vector<16x128xf32>
    %1208 = tpu.matmul %1207, %1205, %cst_878 {dimension_numbers = #tpu.dot_dimension_numbers<[1], [0], [0], [1], [0, 0, 1, 1], [], []>} : vector<16x16xbf16>, vector<16x128xbf16>, vector<16x128xf32> -> vector<16x128xf32>
    %c121_i32_879 = arith.constant 121 : i32
    %1209 = tpu.dynamic_rotate %1159 by %c121_i32_879 dim 1 : vector<16x128xf32>, i32 -> vector<16x128xf32>
    %c6_880 = arith.constant 6 : index
    %c0_881 = arith.constant 0 : index
    %c0_882 = arith.constant 0 : index
    %1210 = vector.load %arg3[%c6_880, %c0_881, %c0_882] : memref<9x1x128xf32, #tpu.memory_space<vmem>>, vector<1x1x128xf32>
    %1211 = vector.shape_cast %1210 : vector<1x1x128xf32> to vector<1x128xf32>
    %1212 = vector.broadcast %1211 : vector<1x128xf32> to vector<16x128xf32>
    %1213 = arith.mulf %1209, %1212 : vector<16x128xf32>
    %1214 = arith.truncf %1213 : vector<16x128xf32> to vector<16x128xbf16>
    %c6_883 = arith.constant 6 : index
    %c0_884 = arith.constant 0 : index
    %c0_885 = arith.constant 0 : index
    %1215 = vector.load %arg20[%c6_883, %c0_884, %c0_885] : memref<9x16x16xbf16, #tpu.memory_space<vmem>>, vector<1x16x16xbf16>
    %1216 = vector.shape_cast %1215 : vector<1x16x16xbf16> to vector<16x16xbf16>
    %cst_886 = arith.constant dense<0.000000e+00> : vector<16x128xf32>
    %1217 = tpu.matmul %1216, %1214, %cst_886 {dimension_numbers = #tpu.dot_dimension_numbers<[1], [0], [0], [1], [0, 0, 1, 1], [], []>} : vector<16x16xbf16>, vector<16x128xbf16>, vector<16x128xf32> -> vector<16x128xf32>
    %c120_i32_887 = arith.constant 120 : i32
    %1218 = tpu.dynamic_rotate %1159 by %c120_i32_887 dim 1 : vector<16x128xf32>, i32 -> vector<16x128xf32>
    %c7_888 = arith.constant 7 : index
    %c0_889 = arith.constant 0 : index
    %c0_890 = arith.constant 0 : index
    %1219 = vector.load %arg3[%c7_888, %c0_889, %c0_890] : memref<9x1x128xf32, #tpu.memory_space<vmem>>, vector<1x1x128xf32>
    %1220 = vector.shape_cast %1219 : vector<1x1x128xf32> to vector<1x128xf32>
    %1221 = vector.broadcast %1220 : vector<1x128xf32> to vector<16x128xf32>
    %1222 = arith.mulf %1218, %1221 : vector<16x128xf32>
    %1223 = arith.truncf %1222 : vector<16x128xf32> to vector<16x128xbf16>
    %c7_891 = arith.constant 7 : index
    %c0_892 = arith.constant 0 : index
    %c0_893 = arith.constant 0 : index
    %1224 = vector.load %arg20[%c7_891, %c0_892, %c0_893] : memref<9x16x16xbf16, #tpu.memory_space<vmem>>, vector<1x16x16xbf16>
    %1225 = vector.shape_cast %1224 : vector<1x16x16xbf16> to vector<16x16xbf16>
    %cst_894 = arith.constant dense<0.000000e+00> : vector<16x128xf32>
    %1226 = tpu.matmul %1225, %1223, %cst_894 {dimension_numbers = #tpu.dot_dimension_numbers<[1], [0], [0], [1], [0, 0, 1, 1], [], []>} : vector<16x16xbf16>, vector<16x128xbf16>, vector<16x128xf32> -> vector<16x128xf32>
    %c119_i32_895 = arith.constant 119 : i32
    %1227 = tpu.dynamic_rotate %1159 by %c119_i32_895 dim 1 : vector<16x128xf32>, i32 -> vector<16x128xf32>
    %c8_896 = arith.constant 8 : index
    %c0_897 = arith.constant 0 : index
    %c0_898 = arith.constant 0 : index
    %1228 = vector.load %arg3[%c8_896, %c0_897, %c0_898] : memref<9x1x128xf32, #tpu.memory_space<vmem>>, vector<1x1x128xf32>
    %1229 = vector.shape_cast %1228 : vector<1x1x128xf32> to vector<1x128xf32>
    %1230 = vector.broadcast %1229 : vector<1x128xf32> to vector<16x128xf32>
    %1231 = arith.mulf %1227, %1230 : vector<16x128xf32>
    %1232 = arith.truncf %1231 : vector<16x128xf32> to vector<16x128xbf16>
    %c8_899 = arith.constant 8 : index
    %c0_900 = arith.constant 0 : index
    %c0_901 = arith.constant 0 : index
    %1233 = vector.load %arg20[%c8_899, %c0_900, %c0_901] : memref<9x16x16xbf16, #tpu.memory_space<vmem>>, vector<1x16x16xbf16>
    %1234 = vector.shape_cast %1233 : vector<1x16x16xbf16> to vector<16x16xbf16>
    %cst_902 = arith.constant dense<0.000000e+00> : vector<16x128xf32>
    %1235 = tpu.matmul %1234, %1232, %cst_902 {dimension_numbers = #tpu.dot_dimension_numbers<[1], [0], [0], [1], [0, 0, 1, 1], [], []>} : vector<16x16xbf16>, vector<16x128xbf16>, vector<16x128xf32> -> vector<16x128xf32>
    %1236 = arith.addf %1168, %1177 : vector<16x128xf32>
    %1237 = arith.addf %1186, %1195 : vector<16x128xf32>
    %1238 = arith.addf %1199, %1208 : vector<16x128xf32>
    %1239 = arith.addf %1217, %1226 : vector<16x128xf32>
    %1240 = arith.addf %1236, %1237 : vector<16x128xf32>
    %1241 = arith.addf %1238, %1239 : vector<16x128xf32>
    %1242 = arith.addf %1240, %1241 : vector<16x128xf32>
    %1243 = arith.addf %1242, %1235 : vector<16x128xf32>
    %c26 = arith.constant 26 : index
    %c0_903 = arith.constant 0 : index
    %c0_904 = arith.constant 0 : index
    %1244 = vector.load %arg9[%c26, %c0_903, %c0_904] : memref<29x32x1xf32, #tpu.memory_space<vmem>>, vector<1x32x1xf32>
    %1245 = vector.shape_cast %1244 : vector<1x32x1xf32> to vector<32x1xf32>
    %1246 = vector.extract_strided_slice %1245 {offsets = [0, 0], sizes = [16, 1], strides = [1, 1]} : vector<32x1xf32> to vector<16x1xf32>
    %1247 = vector.broadcast %1246 : vector<16x1xf32> to vector<16x128xf32>
    %1248 = arith.addf %1243, %1247 : vector<16x128xf32>
    %c27 = arith.constant 27 : index
    %c0_905 = arith.constant 0 : index
    %c0_906 = arith.constant 0 : index
    %1249 = vector.load %arg9[%c27, %c0_905, %c0_906] : memref<29x32x1xf32, #tpu.memory_space<vmem>>, vector<1x32x1xf32>
    %1250 = vector.shape_cast %1249 : vector<1x32x1xf32> to vector<32x1xf32>
    %1251 = vector.extract_strided_slice %1250 {offsets = [0, 0], sizes = [16, 1], strides = [1, 1]} : vector<32x1xf32> to vector<16x1xf32>
    %c28 = arith.constant 28 : index
    %c0_907 = arith.constant 0 : index
    %c0_908 = arith.constant 0 : index
    %1252 = vector.load %arg9[%c28, %c0_907, %c0_908] : memref<29x32x1xf32, #tpu.memory_space<vmem>>, vector<1x32x1xf32>
    %1253 = vector.shape_cast %1252 : vector<1x32x1xf32> to vector<32x1xf32>
    %1254 = vector.extract_strided_slice %1253 {offsets = [0, 0], sizes = [16, 1], strides = [1, 1]} : vector<32x1xf32> to vector<16x1xf32>
    %cst_909 = arith.constant dense<0.000000e+00> : vector<16xf32>
    %1255 = vector.multi_reduction <add>, %1248, %cst_909 [1] : vector<16x128xf32> to vector<16xf32>
    %1256 = vector.shape_cast %1255 : vector<16xf32> to vector<16x1xf32>
    %cst_910 = arith.constant 7.812500e-03 : f32
    %1257 = vector.broadcast %cst_910 : f32 to vector<16x1xf32>
    %1258 = arith.mulf %1256, %1257 : vector<16x1xf32>
    %1259 = vector.broadcast %1258 : vector<16x1xf32> to vector<16x128xf32>
    %1260 = arith.subf %1248, %1259 : vector<16x128xf32>
    %1261 = arith.mulf %1260, %1260 : vector<16x128xf32>
    %cst_911 = arith.constant dense<0.000000e+00> : vector<16xf32>
    %1262 = vector.multi_reduction <add>, %1261, %cst_911 [1] : vector<16x128xf32> to vector<16xf32>
    %1263 = vector.shape_cast %1262 : vector<16xf32> to vector<16x1xf32>
    %cst_912 = arith.constant 7.812500e-03 : f32
    %1264 = vector.broadcast %cst_912 : f32 to vector<16x1xf32>
    %1265 = arith.mulf %1263, %1264 : vector<16x1xf32>
    %cst_913 = arith.constant 9.99999974E-6 : f32
    %1266 = vector.broadcast %cst_913 : f32 to vector<16x1xf32>
    %1267 = arith.addf %1265, %1266 : vector<16x1xf32>
    %1268 = math.rsqrt %1267 : vector<16x1xf32>
    %1269 = vector.broadcast %1268 : vector<16x1xf32> to vector<16x128xf32>
    %1270 = arith.mulf %1260, %1269 : vector<16x128xf32>
    %1271 = vector.broadcast %1251 : vector<16x1xf32> to vector<16x128xf32>
    %1272 = arith.mulf %1270, %1271 : vector<16x128xf32>
    %1273 = vector.broadcast %1254 : vector<16x1xf32> to vector<16x128xf32>
    %1274 = arith.addf %1272, %1273 : vector<16x128xf32>
    %1275 = arith.addf %1274, %1036 : vector<16x128xf32>
    %cst_914 = arith.constant 5.000000e-01 : f32
    %1276 = vector.broadcast %cst_914 : f32 to vector<16x128xf32>
    %1277 = arith.mulf %1276, %1275 : vector<16x128xf32>
    %1278 = math.tanh %1277 : vector<16x128xf32>
    %cst_915 = arith.constant 5.000000e-01 : f32
    %1279 = vector.broadcast %cst_915 : f32 to vector<16x128xf32>
    %1280 = arith.mulf %1279, %1278 : vector<16x128xf32>
    %cst_916 = arith.constant 5.000000e-01 : f32
    %1281 = vector.broadcast %cst_916 : f32 to vector<16x128xf32>
    %1282 = arith.addf %1280, %1281 : vector<16x128xf32>
    %1283 = arith.mulf %1275, %1282 : vector<16x128xf32>
    %1284 = vector.extract_strided_slice %684 {offsets = [0, 0], sizes = [16, 128], strides = [1, 1]} : vector<32x128xf32> to vector<16x128xf32>
    %1285 = arith.addf %1283, %1284 : vector<16x128xf32>
    %c0_917 = arith.constant 0 : index
    %c0_918 = arith.constant 0 : index
    %1286 = vector.load %arg22[%c0_917, %c0_918] : memref<8x16xbf16, #tpu.memory_space<vmem>>, vector<8x16xbf16>
    %1287 = arith.truncf %1285 : vector<16x128xf32> to vector<16x128xbf16>
    %cst_919 = arith.constant dense<0.000000e+00> : vector<8x128xf32>
    %1288 = tpu.matmul %1286, %1287, %cst_919 {dimension_numbers = #tpu.dot_dimension_numbers<[1], [0], [0], [1], [0, 0, 1, 1], [], []>} : vector<8x16xbf16>, vector<16x128xbf16>, vector<8x128xf32> -> vector<8x128xf32>
    %c4_920 = arith.constant 4 : index
    %c0_921 = arith.constant 0 : index
    %c0_922 = arith.constant 0 : index
    %1289 = vector.load %arg9[%c4_920, %c0_921, %c0_922] : memref<29x32x1xf32, #tpu.memory_space<vmem>>, vector<1x32x1xf32>
    %1290 = vector.shape_cast %1289 : vector<1x32x1xf32> to vector<32x1xf32>
    %1291 = vector.extract_strided_slice %1290 {offsets = [0, 0], sizes = [8, 1], strides = [1, 1]} : vector<32x1xf32> to vector<8x1xf32>
    %1292 = vector.broadcast %1291 : vector<8x1xf32> to vector<8x128xf32>
    %1293 = arith.addf %1288, %1292 : vector<8x128xf32>
    %c0_923 = arith.constant 0 : index
    %c0_924 = arith.constant 0 : index
    %1294 = vector.load %arg23[%c0_923, %c0_924] : memref<8x128xf32, #tpu.memory_space<vmem>>, vector<8x128xf32>
    tpu.vector_store %arg23[%c0_923, %c0_924], %1293 {strides = array<i32>} : memref<8x128xf32, #tpu.memory_space<vmem>>, vector<8x128xf32>,
    return
  }
  func.func @transform_0(%arg0: i32) -> (i32, i32) {
    %c0_i32 = arith.constant 0 : i32
    %c0_i32_0 = arith.constant 0 : i32
    %c0_i32_1 = arith.constant 0 : i32
    return %c0_i32, %c0_i32_0 : i32, i32
  }
  func.func @transform_1(%arg0: i32) -> (i32, i32, i32) {
    %c0_i32 = arith.constant 0 : i32
    %c0_i32_0 = arith.constant 0 : i32
    %c0_i32_1 = arith.constant 0 : i32
    %c0_i32_2 = arith.constant 0 : i32
    return %c0_i32, %c0_i32_0, %c0_i32_1 : i32, i32, i32
  }
  func.func @transform_2(%arg0: i32) -> (i32, i32, i32) {
    %c0_i32 = arith.constant 0 : i32
    %c0_i32_0 = arith.constant 0 : i32
    %c0_i32_1 = arith.constant 0 : i32
    %c0_i32_2 = arith.constant 0 : i32
    return %c0_i32, %c0_i32_0, %c0_i32_1 : i32, i32, i32
  }
  func.func @transform_3(%arg0: i32) -> (i32, i32, i32) {
    %c0_i32 = arith.constant 0 : i32
    %c0_i32_0 = arith.constant 0 : i32
    %c0_i32_1 = arith.constant 0 : i32
    %c0_i32_2 = arith.constant 0 : i32
    return %c0_i32, %c0_i32_0, %c0_i32_1 : i32, i32, i32
  }
  func.func @transform_4(%arg0: i32) -> (i32, i32) {
    %c0_i32 = arith.constant 0 : i32
    %c0_i32_0 = arith.constant 0 : i32
    %c0_i32_1 = arith.constant 0 : i32
    return %c0_i32, %c0_i32_0 : i32, i32
  }
  func.func @transform_5(%arg0: i32) -> (i32, i32) {
    %c0_i32 = arith.constant 0 : i32
    %c0_i32_0 = arith.constant 0 : i32
    %c0_i32_1 = arith.constant 0 : i32
    return %c0_i32, %c0_i32_0 : i32, i32
  }
  func.func @transform_6(%arg0: i32) -> (i32, i32, i32) {
    %c0_i32 = arith.constant 0 : i32
    %c0_i32_0 = arith.constant 0 : i32
    %c0_i32_1 = arith.constant 0 : i32
    %c0_i32_2 = arith.constant 0 : i32
    return %c0_i32, %c0_i32_0, %c0_i32_1 : i32, i32, i32
  }
  func.func @transform_7(%arg0: i32) -> (i32, i32) {
    %c0_i32 = arith.constant 0 : i32
    %c0_i32_0 = arith.constant 0 : i32
    %c0_i32_1 = arith.constant 0 : i32
    return %c0_i32, %c0_i32_0 : i32, i32
  }
  func.func @transform_8(%arg0: i32) -> (i32, i32, i32) {
    %c0_i32 = arith.constant 0 : i32
    %c0_i32_0 = arith.constant 0 : i32
    %c0_i32_1 = arith.constant 0 : i32
    %c0_i32_2 = arith.constant 0 : i32
    return %c0_i32, %c0_i32_0, %c0_i32_1 : i32, i32, i32
  }
  func.func @transform_9(%arg0: i32) -> (i32, i32, i32) {
    %c0_i32 = arith.constant 0 : i32
    %c0_i32_0 = arith.constant 0 : i32
    %c0_i32_1 = arith.constant 0 : i32
    %c0_i32_2 = arith.constant 0 : i32
    return %c0_i32, %c0_i32_0, %c0_i32_1 : i32, i32, i32
  }
  func.func @transform_10(%arg0: i32) -> (i32, i32, i32) {
    %c0_i32 = arith.constant 0 : i32
    %c0_i32_0 = arith.constant 0 : i32
    %c0_i32_1 = arith.constant 0 : i32
    %c0_i32_2 = arith.constant 0 : i32
    return %c0_i32, %c0_i32_0, %c0_i32_1 : i32, i32, i32
  }
  func.func @transform_11(%arg0: i32) -> (i32, i32, i32) {
    %c0_i32 = arith.constant 0 : i32
    %c0_i32_0 = arith.constant 0 : i32
    %c0_i32_1 = arith.constant 0 : i32
    %c0_i32_2 = arith.constant 0 : i32
    return %c0_i32, %c0_i32_0, %c0_i32_1 : i32, i32, i32
  }
  func.func @transform_12(%arg0: i32) -> (i32, i32, i32) {
    %c0_i32 = arith.constant 0 : i32
    %c0_i32_0 = arith.constant 0 : i32
    %c0_i32_1 = arith.constant 0 : i32
    %c0_i32_2 = arith.constant 0 : i32
    return %c0_i32, %c0_i32_0, %c0_i32_1 : i32, i32, i32
  }
  func.func @transform_13(%arg0: i32) -> (i32, i32, i32) {
    %c0_i32 = arith.constant 0 : i32
    %c0_i32_0 = arith.constant 0 : i32
    %c0_i32_1 = arith.constant 0 : i32
    %c0_i32_2 = arith.constant 0 : i32
    return %c0_i32, %c0_i32_0, %c0_i32_1 : i32, i32, i32
  }
  func.func @transform_14(%arg0: i32) -> (i32, i32, i32) {
    %c0_i32 = arith.constant 0 : i32
    %c0_i32_0 = arith.constant 0 : i32
    %c0_i32_1 = arith.constant 0 : i32
    %c0_i32_2 = arith.constant 0 : i32
    return %c0_i32, %c0_i32_0, %c0_i32_1 : i32, i32, i32
  }
  func.func @transform_15(%arg0: i32) -> (i32, i32, i32) {
    %c0_i32 = arith.constant 0 : i32
    %c0_i32_0 = arith.constant 0 : i32
    %c0_i32_1 = arith.constant 0 : i32
    %c0_i32_2 = arith.constant 0 : i32
    return %c0_i32, %c0_i32_0, %c0_i32_1 : i32, i32, i32
  }
  func.func @transform_16(%arg0: i32) -> (i32, i32, i32) {
    %c0_i32 = arith.constant 0 : i32
    %c0_i32_0 = arith.constant 0 : i32
    %c0_i32_1 = arith.constant 0 : i32
    %c0_i32_2 = arith.constant 0 : i32
    return %c0_i32, %c0_i32_0, %c0_i32_1 : i32, i32, i32
  }
  func.func @transform_17(%arg0: i32) -> (i32, i32, i32) {
    %c0_i32 = arith.constant 0 : i32
    %c0_i32_0 = arith.constant 0 : i32
    %c0_i32_1 = arith.constant 0 : i32
    %c0_i32_2 = arith.constant 0 : i32
    return %c0_i32, %c0_i32_0, %c0_i32_1 : i32, i32, i32
  }
  func.func @transform_18(%arg0: i32) -> (i32, i32, i32) {
    %c0_i32 = arith.constant 0 : i32
    %c0_i32_0 = arith.constant 0 : i32
    %c0_i32_1 = arith.constant 0 : i32
    %c0_i32_2 = arith.constant 0 : i32
    return %c0_i32, %c0_i32_0, %c0_i32_1 : i32, i32, i32
  }
  func.func @transform_19(%arg0: i32) -> (i32, i32, i32) {
    %c0_i32 = arith.constant 0 : i32
    %c0_i32_0 = arith.constant 0 : i32
    %c0_i32_1 = arith.constant 0 : i32
    %c0_i32_2 = arith.constant 0 : i32
    return %c0_i32, %c0_i32_0, %c0_i32_1 : i32, i32, i32
  }
  func.func @transform_20(%arg0: i32) -> (i32, i32, i32) {
    %c0_i32 = arith.constant 0 : i32
    %c0_i32_0 = arith.constant 0 : i32
    %c0_i32_1 = arith.constant 0 : i32
    %c0_i32_2 = arith.constant 0 : i32
    return %c0_i32, %c0_i32_0, %c0_i32_1 : i32, i32, i32
  }
  func.func @transform_21(%arg0: i32) -> (i32, i32) {
    %c0_i32 = arith.constant 0 : i32
    %c0_i32_0 = arith.constant 0 : i32
    %c0_i32_1 = arith.constant 0 : i32
    return %c0_i32, %c0_i32_0 : i32, i32
  }
  func.func @transform_22(%arg0: i32) -> (i32, i32) {
    %c0_i32 = arith.constant 0 : i32
    %c0_i32_0 = arith.constant 0 : i32
    %c0_i32_1 = arith.constant 0 : i32
    return %c0_i32, %c0_i32_0 : i32, i32
  }
}

</mosaic_0001>

<bundles_post_ra>
// kernel: advanced_unet_forward.1
= control target key start
LH: loop header
LB: loop body
LE: loop exit
PB: predicated region body
PF: predicated region fallthrough
CT: control target
= control target key end

     0   :  { %v19354_v4 = vmov 0   ;;  %s15924_s23 = smov 1   ;;  %s15927_s24 = smov 111   ;;  %v88_v7 = vlaneseq  ;;  %vm183_vm1 = vcmask 1040384   ;;  %vm184_vm3 = vcmask 1041408   ;;  %s19324_s0 = inlined_call_operand.vmem [shape: f32[3,512], index: 0, kind: input, shape index: {}]   ;;  %s19325_s9 = inlined_call_operand.vmem [shape: bf16[9,16,3], index: 9, kind: input, shape index: {}]   ;;  %s19326_s8 = inlined_call_operand.vmem [shape: f32[29,32,1], index: 8, kind: input, shape index: {}]   ;;  %s19327_s1 = inlined_call_operand.vmem [shape: f32[9,1,512], index: 1, kind: input, shape index: {}]   ;;  %s19328_s10 = inlined_call_operand.vmem [shape: bf16[9,16,16], index: 10, kind: input, shape index: {}]   ;;  %s19329_s11 = inlined_call_operand.vmem [shape: bf16[9,16,16], index: 11, kind: input, shape index: {}]   ;;  %s19330_s4 = inlined_call_operand.vmem [shape: bf16[512,128], index: 4, kind: input, shape index: {}]   ;;  %s19331_s12 = inlined_call_operand.vmem [shape: bf16[9,32,16], index: 12, kind: input, shape index: {}]   ;;  %s19332_s2 = inlined_call_operand.vmem [shape: f32[9,1,128], index: 2, kind: input, shape index: {}]   ;;  %s19333_s13 = inlined_call_operand.vmem [shape: bf16[9,32,32], index: 13, kind: input, shape index: {}]   ;;  %s19334_s14 = inlined_call_operand.vmem [shape: bf16[9,32,32], index: 14, kind: input, shape index: {}]   ;;  %s19335_s5 = inlined_call_operand.vmem [shape: bf16[128,32], index: 5, kind: input, shape index: {}]   ;;  %s19336_s3 = inlined_call_operand.vmem [shape: bf16[9,32,32], index: 3, kind: input, shape index: {}]   ;;  %s19337_s15 = inlined_call_operand.vmem [shape: bf16[9,32,32], index: 15, kind: input, shape index: {}]   ;;  %s19338_s16 = inlined_call_operand.vmem [shape: bf16[9,32,32], index: 16, kind: input, shape index: {}]   ;;  %s19339_s17 = inlined_call_operand.vmem [shape: bf16[9,32,32], index: 17, kind: input, shape index: {}]   ;;  %s19340_s20 = inlined_call_operand.vmem [shape: bf16[4,16,32], index: 20, kind: input, shape index: {}]   ;;  %s19341_s6 = inlined_call_operand.vmem [shape: bf16[4,32,128], index: 6, kind: input, shape index: {}]   ;;  %s19342_s7 = inlined_call_operand.vmem [shape: f32[1,32], index: 7, kind: input, shape index: {}]   ;;  %s19343_s18 = inlined_call_operand.vmem [shape: bf16[9,16,16], index: 18, kind: input, shape index: {}]   ;;  %s19344_s19 = inlined_call_operand.vmem [shape: bf16[9,16,16], index: 19, kind: input, shape index: {}]   ;;  %s19345_s21 = inlined_call_operand.vmem [shape: bf16[8,16], index: 21, kind: input, shape index: {}]   ;;  %s19346_s22 = inlined_call_operand.vmem [shape: f32[8,128], index: 22, kind: output, shape index: {}]  }
   0x1   :  { %19387 = sst [smem:[#allocation15_spill]] %s19324_s0  ;;  %s15922_s0 = smov 16   ;;  %231 = vmatprep.mubr.bf16.mxu0 %v19354_v4  ;;  %274 = vmatprep.mubr.bf16.mxu1 %v19354_v4  ;;  %v15931_v25 = vmov 65535   ;;  %vm179_vm5 = vcmask 23552   ;;  %vm1596_vm11 = vcmask 130048   ;;  %vm5428_vm12 = vcmask 261120  }
   0x2   :  { %19388 = sst [smem:[#allocation16_spill]] %s19325_s9  ;;  %s19394_s29 = sld [smem:[#allocation15_spill]]  ;;  %15508 = vset.pattern.permute.xlu0 %v19354_v4  ;;  %15509 = vset.pattern.permute.xlu1 %v19354_v4  ;;  %v98_v8 = vshrl.u32 %v88_v7, 7  ;;  %v16147_v9 = vand.u32 127, %v88_v7  ;;  %v185_v26 = vsel %vm183_vm1, 4294967295, %v15931_v25  ;;  %vm15939_vm13 = vmmov 0  }
   0x3   :  { %19389 = sst [smem:[#allocation17_spill]] %s19326_s8  ;;  %s15925_s9 = smov 127   ;;  %v16192_v35 = vsel %vm184_vm3, %v185_v26, 0 }
   0x4   :  { %19390 = sst [smem:[#allocation18_spill]] %s19327_s1  ;;  %s15929_s25 = smov 15   ;;  %v16149_v10 = vsub.s32 1, %v98_v8  ;;  %v16151_v11 = vsub.s32 3, %v98_v8  ;;  %v16153_v12 = vsub.s32 0, %v98_v8  ;;  %v16155_v13 = vsub.s32 2, %v98_v8 }
   0x5   :  { %19391 = sst [smem:[#allocation19_spill]] %s19328_s10  ;;  %s15930_s26 = smov 113   ;;  %vm135_vm0 = vcmp.lt.s32.totalorder %v16147_v9, 16  ;;  %vm340_vm2 = vcmp.lt.s32.totalorder %v16147_v9, 1  ;;  %vm500_vm4 = vcmp.lt.s32.totalorder %v16147_v9, 127  ;;  %vm700_vm6 = vcmp.lt.s32.totalorder %v16147_v9, 112 }
   0x6   :  { %19392 = sst [smem:[#allocation20_spill]] %s19329_s11  ;;  %s15926_s11 = smov 112   ;;  %vm853_vm7 = vcmp.lt.s32.totalorder %v16147_v9, 111  ;;  %vm90_vm8 = vcmp.lt.s32.totalorder %v16147_v9, 17  ;;  %vm293_vm9 = vcmp.lt.s32.totalorder %v16147_v9, 15  ;;  %vm653_vm10 = vcmp.lt.s32.totalorder %v16147_v9, 113 }
   0x7   :  { %19393 = sst [smem:[#allocation21_spill]] %s19330_s4  ;;  %s15928_s4 = smov 17  }
   0x8   :  { %v16058_v0 = vld [vmem:[%s19394_s29 + $0x8] sm:$0x77]  ;;  %v16063_v1 = vld [vmem:[%s19394_s29] sm:$0x77]  ;;  %s19395_s1 = sld [smem:[#allocation17_spill]]  ;;  %s19396_s8 = sld [smem:[#allocation18_spill]] }
   0x9   :  { %131 = vrot.lane.b32.xlu1 %v16058_v0, %s15922_s0  ;;  %127 = vrot.lane.b32.xlu0 %v16063_v1, %s15922_s0  ;;  %v16071_v2 = vcombine.high %v16058_v0, %v16058_v0  ;;  %v16075_v3 = vcombine.high %v16063_v1, %v16063_v1  ;;  %s19398_s28 = sld [smem:[#allocation16_spill]]  ;;  %s19420_s10 = sld [smem:[#allocation20_spill]] }
   0xa   :  { %s15932_s27 = smov 8   ;;  %s19381_s29 = smov 119  }
   0xb   :  { %s19379_s30 = smov 9  }
   0xd   :  { %133 = vrot.lane.b32.xlu1 %v16071_v2, %s15922_s0  ;;  %129 = vrot.lane.b32.xlu0 %v16075_v3, %s15922_s0 }
   0xe   :  { %v1454_v5 = vld [vmem:[%s19395_s1] sm:$0xff]  ;;  %v1455_v6 = vld [vmem:[%s19395_s1 + $0x8] sm:$0xff]  ;;  %v12970_v46 = vld [vmem:[%s19396_s8 + $0x14] sm:$0xf] }
   0xf   :  { %v12953_v14 = vld [vmem:[%s19396_s8 + $0x4] sm:$0xf]  ;;  %v12962_v17 = vld [vmem:[%s19396_s8 + $0xc] sm:$0xf]  ;;  %v16218_v56 = vrot.slane %v12970_v46, %v16149_v10  ;;  %v15538_v9 = vld [vmem:[%s19420_s10 + $0x30] sm:$0xff]  }
  0x10   :  { %v16165_v18 = vrot.slane %v12953_v14, %v16151_v11  ;;  %v16168_v19 = vrot.slane %v12953_v14, %v16149_v10  ;;  %v16171_v20 = vrot.slane %v12953_v14, %v16153_v12  ;;  %v16174_v21 = vrot.slane %v12953_v14, %v16155_v13  ;;  %v15512_v55 = vld [vmem:[%s19398_s28 + $0x8] sm:$0xff]  }
  0x11   :  { %334 = vrot.lane.b32.xlu1 %v16075_v3, %s15924_s23  ;;  %332 = vrot.lane.b32.xlu0 %v16063_v1, %s15924_s23  ;;  %v16178_v24 = vrot.slane %v12962_v17, %v16149_v10  ;;  %v16197_v43 = vrot.slane %v12962_v17, %v16153_v12  ;;  %v16200_v44 = vrot.slane %v12962_v17, %v16155_v13 }
  0x12   :  { %19397 = vst [vmem:[#allocation2_spill] sm:$0xff] %v16168_v19  ;;  %v16203_v45 = vrot.slane %v12962_v17, %v16151_v11  ;;  %v16238_v17 = vrot.slane %v12970_v46, %v16155_v13 }
  0x15   :  { %338 = vrot.lane.b32.xlu1 %v16071_v2, %s15924_s23  ;;  %336 = vrot.lane.b32.xlu0 %v16058_v0, %s15924_s23 }
  0x19   :  { %494 = vrot.lane.b32.xlu0 %v16075_v3, %s15925_s9  ;;  %496 = vrot.lane.b32.xlu1 %v16058_v0, %s15925_s9 }
  0x1d   :  { %492 = vrot.lane.b32.xlu0 %v16063_v1, %s15925_s9  ;;  %498 = vrot.lane.b32.xlu1 %v16071_v2, %s15925_s9 }
  0x21   :  { %694 = vrot.lane.b32.xlu0 %v16075_v3, %s15926_s11  ;;  %696 = vrot.lane.b32.xlu1 %v16058_v0, %s15926_s11 }
  0x25   :  { %692 = vrot.lane.b32.xlu0 %v16063_v1, %s15926_s11  ;;  %698 = vrot.lane.b32.xlu1 %v16071_v2, %s15926_s11 }
  0x29   :  { %847 = vrot.lane.b32.xlu0 %v16075_v3, %s15927_s24  ;;  %849 = vrot.lane.b32.xlu1 %v16058_v0, %s15927_s24 }
  0x2d   :  { %845 = vrot.lane.b32.xlu0 %v16063_v1, %s15927_s24  ;;  %851 = vrot.lane.b32.xlu1 %v16071_v2, %s15927_s24 }
  0x31   :  { %82 = vrot.lane.b32.xlu1 %v16075_v3, %s15928_s4  ;;  %80 = vrot.lane.b32.xlu0 %v16063_v1, %s15928_s4 }
  0x35   :  { %86 = vrot.lane.b32.xlu1 %v16071_v2, %s15928_s4  ;;  %84 = vrot.lane.b32.xlu0 %v16058_v0, %s15928_s4 }
  0x39   :  { %287 = vrot.lane.b32.xlu1 %v16075_v3, %s15929_s25  ;;  %285 = vrot.lane.b32.xlu0 %v16063_v1, %s15929_s25 }
  0x3d   :  { %291 = vrot.lane.b32.xlu1 %v16071_v2, %s15929_s25  ;;  %289 = vrot.lane.b32.xlu0 %v16058_v0, %s15929_s25 }
  0x41   :  { %647 = vrot.lane.b32.xlu0 %v16075_v3, %s15930_s26  ;;  %649 = vrot.lane.b32.xlu1 %v16058_v0, %s15930_s26 }
  0x45   :  { %645 = vrot.lane.b32.xlu0 %v16063_v1, %s15930_s26  ;;  %651 = vrot.lane.b32.xlu1 %v16071_v2, %s15930_s26 }
  0x49   :  { %1458 = vperm.xlu0 %15508, %v1454_v5   ;;  %1463 = vperm.xlu1 %15509, %v1455_v6   ;;  %v16231_v5 = vrot.slane %v12970_v46, %v16153_v12 }
  0x7b   :  { %v132_v15 = vpop.permute.xlu1 %131  ;;  %v128_v16 = vpop.permute.xlu0 %127 }
  0x7f   :  { %v134_v22 = vpop.permute.xlu1 %133  ;;  %v130_v23 = vpop.permute.xlu0 %129 }
  0x80   :  { %v139_v27 = vsel %vm135_vm0, %v134_v22, %v128_v16  ;;  %v137_v28 = vsel %vm135_vm0, %v130_v23, %v132_v15  ;;  %v136_v29 = vsel %vm135_vm0, %v132_v15, %v134_v22  ;;  %v138_v30 = vsel %vm135_vm0, %v128_v16, %v130_v23 }
  0x81   :  { %v166_v31 = vmul.f32 %v16165_v18, %v136_v29  ;;  %v164_v32 = vmul.f32 %v16168_v19, %v138_v30  ;;  %v163_v33 = vmul.f32 %v16171_v20, %v139_v27  ;;  %v165_v34 = vmul.f32 %v16174_v21, %v137_v28  ;;  %v12979_v28 = vld [vmem:[%s19396_s8 + $0x1c] sm:$0xf] }
  0x82   :  { %v16241_v22 = vrot.slane %v12970_v46, %v16151_v11 }
  0x83   :  { %v335_v36 = vpop.permute.xlu1 %334  ;;  %v333_v37 = vpop.permute.xlu0 %332  ;;  %v170_v38 = vpack.c.bf16 %v166_v31, %v166_v31  ;;  %v168_v39 = vpack.c.bf16 %v164_v32, %v164_v32  ;;  %v167_v40 = vpack.c.bf16 %v163_v33, %v163_v33  ;;  %v169_v41 = vpack.c.bf16 %v165_v34, %v165_v34 }
  0x84   :  { %v343_v42 = vsel %vm340_vm2, %v333_v37, %v335_v36 }
  0x85   :  { %v369_v47 = vmul.f32 %v16178_v24, %v343_v42  ;;  %v197_v48 = vand.u32 %v16192_v35, %v170_v38  ;;  %v191_v49 = vand.u32 %v16192_v35, %v168_v39  ;;  %v188_v50 = vand.u32 %v16192_v35, %v167_v40 }
  0x86   :  { %v194_v51 = vand.u32 %v16192_v35, %v169_v41 }
  0x87   :  { %v373_v52 = vpack.c.bf16 %v369_v47, %v369_v47  ;;  %242 = vmatprep.subr.bf16.mxu1 %v197_v48  ;;  %v339_v53 = vpop.permute.xlu1 %338  ;;  %199 = vmatprep.subr.bf16.mxu0 %v191_v49  ;;  %v337_v54 = vpop.permute.xlu0 %336  ;;  %v15513_v47 = vld [vmem:[%s19398_s28 + $0x18] sm:$0xff]  }
  0x88   :  { %v344_v57 = vsel %vm340_vm2, %v339_v53, %v333_v37  ;;  %v341_v58 = vsel %vm340_vm2, %v337_v54, %v339_v53  ;;  %v342_v59 = vsel %vm340_vm2, %v335_v36, %v337_v54  ;;  %200 = vmatpush1.bf16.msra.mxu0 %v188_v50  ;;  %243 = vmatpush1.bf16.msra.mxu1 %v194_v51  ;;  %v12985_v54 = vld [vmem:[%s19396_s8 + $0x20] sm:$0xf] }
  0x89   :  { %v368_v60 = vmul.f32 %v16197_v43, %v344_v57  ;;  %v370_v61 = vmul.f32 %v16200_v44, %v342_v59  ;;  %v371_v62 = vmul.f32 %v16203_v45, %v341_v58  ;;  %v391_v63 = vand.u32 %v373_v52, %v16192_v35 }
  0x8a   :  { %v16260_v36 = vrot.slane %v12979_v28, %v16149_v10  ;;  %v16272_v51 = vrot.slane %v12979_v28, %v16153_v12  ;;  %v16275_v52 = vrot.slane %v12979_v28, %v16155_v13  ;;  %v16278_v53 = vrot.slane %v12979_v28, %v16151_v11 }
  0x8b   :  { %v372_v6 = vpack.c.bf16 %v368_v60, %v368_v60  ;;  %v374_v7 = vpack.c.bf16 %v370_v61, %v370_v61  ;;  %v375_v8 = vpack.c.bf16 %v371_v62, %v371_v62  ;;  %12957 = vmatmul.mubr.msk.bf16.vlgmr.msra.gmra.mrb[0].mxu0 %vm179_vm5, %v15512_v55  ;;  %12958 = vmatmul.mubr.msk.bf16.vlgmr.msra.gmra.mrb[0].mxu1 %vm179_vm5, %v15512_v55  ;;  %v495_v14 = vpop.permute.xlu0 %494  ;;  %v497_v15 = vpop.permute.xlu1 %496 }
  0x8c   :  { %399 = vmatprep.subr.bf16.mxu0 %v391_v63  ;;  %v502_v16 = vsel %vm500_vm4, %v495_v14, %v497_v15  ;;  %431 = vmatprep.mubr.bf16.mxu0 %v19354_v4  ;;  %v16290_v63 = vrot.slane %v12985_v54, %v16149_v10 }
  0x8d   :  { %v388_v23 = vand.u32 %v372_v6, %v16192_v35  ;;  %v394_v25 = vand.u32 %v374_v7, %v16192_v35  ;;  %v397_v26 = vand.u32 %v375_v8, %v16192_v35  ;;  %v529_v27 = vmul.f32 %v16218_v56, %v502_v16  ;;  %474 = vmatprep.mubr.bf16.mxu1 %v19354_v4 }
  0x8f   :  { %442 = vmatprep.subr.bf16.mxu1 %v397_v26  ;;  %v533_v29 = vpack.c.bf16 %v529_v27, %v529_v27  ;;  %400 = vmatpush1.bf16.msra.mxu0 %v388_v23  ;;  %v493_v30 = vpop.permute.xlu0 %492  ;;  %v499_v31 = vpop.permute.xlu1 %498 }
  0x90   :  { %443 = vmatpush1.bf16.msra.mxu1 %v394_v25  ;;  %v503_v32 = vsel %vm500_vm4, %v493_v30, %v495_v14  ;;  %v501_v33 = vsel %vm500_vm4, %v497_v15, %v499_v31  ;;  %v504_v34 = vsel %vm500_vm4, %v499_v31, %v493_v30 }
  0x91   :  { %v528_v37 = vmul.f32 %v16231_v5, %v503_v32  ;;  %v530_v38 = vmul.f32 %v16238_v17, %v501_v33  ;;  %v531_v39 = vmul.f32 %v16241_v22, %v504_v34  ;;  %v551_v40 = vand.u32 %v533_v29, %v16192_v35  ;;  %v15514_v34 = vld [vmem:[%s19398_s28 + $0x28] sm:$0xff]  }
  0x92   :  { %v16310_v33 = vrot.slane %v12985_v54, %v16151_v11 }
  0x93   :  { %v532_v41 = vpack.c.bf16 %v528_v37, %v528_v37  ;;  %v534_v42 = vpack.c.bf16 %v530_v38, %v530_v38  ;;  %v535_v46 = vpack.c.bf16 %v531_v39, %v531_v39  ;;  %559 = vmatprep.subr.bf16.mxu0 %v551_v40  ;;  %v695_v48 = vpop.permute.xlu0 %694  ;;  %v697_v49 = vpop.permute.xlu1 %696  ;;  %v16316_v38 = vrot.slane %v12985_v54, %v16153_v12 }
  0x94   :  { %v702_v50 = vsel %vm700_vm6, %v695_v48, %v697_v49 }
  0x95   :  { %v548_v55 = vand.u32 %v532_v41, %v16192_v35  ;;  %v554_v57 = vand.u32 %v534_v42, %v16192_v35  ;;  %v729_v58 = vmul.f32 %v16260_v36, %v702_v50  ;;  %v557_v59 = vand.u32 %v535_v46, %v16192_v35  ;;  %v95_v41 = vld [vmem:[%s19396_s8] sm:$0xf] }
  0x97   :  { %12966 = vmatmul.mubr.msk.bf16.vlgmr.msra.gmra.mrb[0].mxu0 %vm179_vm5, %v15513_v47  ;;  %12967 = vmatmul.mubr.msk.bf16.vlgmr.msra.gmra.mrb[0].mxu1 %vm179_vm5, %v15513_v47  ;;  %v733_v60 = vpack.c.bf16 %v729_v58, %v729_v58  ;;  %v693_v61 = vpop.permute.xlu0 %692  ;;  %v699_v62 = vpop.permute.xlu1 %698  ;;  %v16324_v47 = vrot.slane %v12985_v54, %v16155_v13  ;;  %v16336_v58 = vrot.slane %v95_v41, %v16149_v10 }
  0x98   :  { %560 = vmatpush1.bf16.msra.mxu0 %v548_v55  ;;  %602 = vmatprep.subr.bf16.mxu1 %v557_v59  ;;  %v703_v6 = vsel %vm700_vm6, %v693_v61, %v695_v48  ;;  %v701_v7 = vsel %vm700_vm6, %v697_v49, %v699_v62  ;;  %v704_v8 = vsel %vm700_vm6, %v699_v62, %v693_v61 }
  0x99   :  { %603 = vmatpush1.bf16.msra.mxu1 %v554_v57  ;;  %v728_v14 = vmul.f32 %v16272_v51, %v703_v6  ;;  %v730_v15 = vmul.f32 %v16275_v52, %v701_v7  ;;  %v731_v16 = vmul.f32 %v16278_v53, %v704_v8  ;;  %591 = vmatprep.mubr.bf16.mxu0 %v19354_v4 }
  0x9a   :  { %634 = vmatprep.mubr.bf16.mxu1 %v19354_v4  ;;  %v751_v23 = vand.u32 %v733_v60, %v16192_v35  ;;  %v16347_v7 = vrot.slane %v95_v41, %v16151_v11 }
  0x9b   :  { %v735_v25 = vpack.c.bf16 %v731_v16, %v731_v16  ;;  %v848_v26 = vpop.permute.xlu0 %847  ;;  %v850_v27 = vpop.permute.xlu1 %849  ;;  %v732_v28 = vpack.c.bf16 %v728_v14, %v728_v14  ;;  %v734_v29 = vpack.c.bf16 %v730_v15, %v730_v15 }
  0x9c   :  { %759 = vmatprep.subr.bf16.mxu0 %v751_v23  ;;  %v855_v30 = vsel %vm853_vm7, %v848_v26, %v850_v27 }
  0x9d   :  { %v882_v31 = vmul.f32 %v16290_v63, %v855_v30  ;;  %v757_v32 = vand.u32 %v735_v25, %v16192_v35  ;;  %v748_v42 = vand.u32 %v732_v28, %v16192_v35  ;;  %v754_v46 = vand.u32 %v734_v29, %v16192_v35  ;;  %v15515_v29 = vld [vmem:[%s19398_s28 + $0x38] sm:$0xff]  }
  0x9f   :  { %v886_v37 = vpack.c.bf16 %v882_v31, %v882_v31  ;;  %802 = vmatprep.subr.bf16.mxu1 %v757_v32  ;;  %v846_v39 = vpop.permute.xlu0 %845  ;;  %v852_v40 = vpop.permute.xlu1 %851  ;;  %v12959_v32 = vld [vmem:[%s19396_s8 + $0x8] sm:$0xf] }
  0xa0   :  { %v857_v48 = vsel %vm853_vm7, %v852_v40, %v846_v39  ;;  %v856_v49 = vsel %vm853_vm7, %v846_v39, %v848_v26  ;;  %v854_v50 = vsel %vm853_vm7, %v850_v27, %v852_v40  ;;  %v16364_v40 = vrot.slane %v95_v41, %v16153_v12 }
  0xa1   :  { %v884_v55 = vmul.f32 %v16310_v33, %v857_v48  ;;  %v904_v57 = vand.u32 %v886_v37, %v16192_v35  ;;  %v881_v61 = vmul.f32 %v16316_v38, %v856_v49  ;;  %v883_v62 = vmul.f32 %v16324_v47, %v854_v50 }
  0xa2   :  { %v16375_v50 = vrot.slane %v12959_v32, %v16149_v10 }
  0xa3   :  { %12974 = vmatmul.mubr.msk.bf16.vlgmr.msra.gmra.mrb[0].mxu0 %vm179_vm5, %v15514_v34  ;;  %12975 = vmatmul.mubr.msk.bf16.vlgmr.msra.gmra.mrb[0].mxu1 %vm179_vm5, %v15514_v34  ;;  %v888_v54 = vpack.c.bf16 %v884_v55, %v884_v55  ;;  %v83_v59 = vpop.permute.xlu1 %82  ;;  %v81_v60 = vpop.permute.xlu0 %80  ;;  %v885_v23 = vpack.c.bf16 %v881_v61, %v881_v61  ;;  %v887_v25 = vpack.c.bf16 %v883_v62, %v883_v62 }
  0xa4   :  { %760 = vmatpush1.bf16.msra.mxu0 %v748_v42  ;;  %803 = vmatpush1.bf16.msra.mxu1 %v754_v46  ;;  %v93_v6 = vsel %vm90_vm8, %v81_v60, %v83_v59  ;;  %v16367_v42 = vrot.slane %v95_v41, %v16155_v13 }
  0xa5   :  { %791 = vmatprep.mubr.bf16.mxu0 %v19354_v4  ;;  %834 = vmatprep.mubr.bf16.mxu1 %v19354_v4  ;;  %v118_v8 = vmul.f32 %v16336_v58, %v93_v6  ;;  %v910_v14 = vand.u32 %v888_v54, %v16192_v35  ;;  %v901_v37 = vand.u32 %v885_v23, %v16192_v35 }
  0xa6   :  { %912 = vmatprep.subr.bf16.mxu0 %v904_v57  ;;  %v907_v39 = vand.u32 %v887_v25, %v16192_v35  ;;  %v16379_v57 = vrot.slane %v12959_v32, %v16151_v11  ;;  %v15516_v25 = vld [vmem:[%s19398_s28 + $0x40] sm:$0xff]  }
  0xa7   :  { %v87_v15 = vpop.permute.xlu1 %86  ;;  %v85_v16 = vpop.permute.xlu0 %84  ;;  %955 = vmatprep.subr.bf16.mxu1 %v910_v14  ;;  %v122_v28 = vpack.c.bf16 %v118_v8, %v118_v8 }
  0xa8   :  { %v91_v26 = vsel %vm90_vm8, %v85_v16, %v87_v15  ;;  %v94_v46 = vsel %vm90_vm8, %v87_v15, %v81_v60  ;;  %v92_v48 = vsel %vm90_vm8, %v83_v59, %v85_v16 }
  0xa9   :  { %v120_v27 = vmul.f32 %v16347_v7, %v91_v26  ;;  %v1010_v55 = vand.u32 %v16192_v35, %v122_v28  ;;  %v117_v59 = vmul.f32 %v16364_v40, %v94_v46  ;;  %v119_v61 = vmul.f32 %v16367_v42, %v92_v48 }
  0xaa   :  { %v16399_v28 = vrot.slane %v12959_v32, %v16153_v12 }
  0xab   :  { %v124_v30 = vpack.c.bf16 %v120_v27, %v120_v27  ;;  %v288_v31 = vpop.permute.xlu1 %287  ;;  %v286_v34 = vpop.permute.xlu0 %285  ;;  %v121_v14 = vpack.c.bf16 %v117_v59, %v117_v59  ;;  %v123_v15 = vpack.c.bf16 %v119_v61, %v119_v61  ;;  %v12976_v59 = vld [vmem:[%s19396_s8 + $0x18] sm:$0xf]  ;;  %s19385_s8 = smov 120  }
  0xac   :  { %v296_v41 = vsel %vm293_vm9, %v286_v34, %v288_v31 }
  0xad   :  { %v1016_v49 = vand.u32 %v16192_v35, %v124_v30  ;;  %v322_v6 = vmul.f32 %v16375_v50, %v296_v41  ;;  %v1007_v26 = vand.u32 %v16192_v35, %v121_v14  ;;  %v1013_v27 = vand.u32 %v16192_v35, %v123_v15 }
  0xae   :  { %v486_v41 = vpack.c.bf16 %v16075_v3, %v16075_v3  ;;  %v16430_v3 = vrot.slane %v12976_v59, %v16149_v10  ;;  %v16435_v15 = vrot.slane %v12976_v59, %v16151_v11 }
  0xaf   :  { %12983 = vmatmul.mubr.msk.bf16.vlgmr.msra.gmra.mrb[0].mxu0 %vm179_vm5, %v15515_v29  ;;  %12984 = vmatmul.mubr.msk.bf16.vlgmr.msra.gmra.mrb[0].mxu1 %vm179_vm5, %v15515_v29  ;;  %v292_v54 = vpop.permute.xlu1 %291  ;;  %v290_v60 = vpop.permute.xlu0 %289  ;;  %v326_v16 = vpack.c.bf16 %v322_v6, %v322_v6  ;;  %v16402_v29 = vrot.slane %v12959_v32, %v16155_v13 }
  0xb0   :  { %913 = vmatpush1.bf16.msra.mxu0 %v901_v37  ;;  %956 = vmatpush1.bf16.msra.mxu1 %v907_v39  ;;  %v294_v62 = vsel %vm293_vm9, %v290_v60, %v292_v54  ;;  %v297_v30 = vsel %vm293_vm9, %v292_v54, %v286_v34  ;;  %v295_v37 = vsel %vm293_vm9, %v288_v31, %v290_v60  ;;  %v15517_v60 = vld [vmem:[%s19398_s28] sm:$0xff]  }
  0xb1   :  { %944 = vmatprep.mubr.bf16.mxu0 %v19354_v4  ;;  %987 = vmatprep.mubr.bf16.mxu1 %v19354_v4  ;;  %v324_v8 = vmul.f32 %v16379_v57, %v294_v62  ;;  %v1116_v46 = vand.u32 %v326_v16, %v16192_v35  ;;  %v321_v48 = vmul.f32 %v16399_v28, %v297_v30 }
  0xb2   :  { %1061 = vmatprep.subr.bf16.mxu1 %v1016_v49  ;;  %1018 = vmatprep.subr.bf16.mxu0 %v1010_v55  ;;  %v323_v32 = vmul.f32 %v16402_v29, %v295_v37  ;;  %v488_v54 = vpack.c.bf16 %v16071_v2, %v16071_v2  ;;  %19399 = vst [vmem:[#allocation3_spill] sm:$0xff] %v16430_v3  ;;  %19400 = vst [vmem:[#allocation4_spill] sm:$0xff] %v16435_v15  ;;  %v15518_v37 = vld [vmem:[%s19398_s28 + $0x10] sm:$0xff]  }
  0xb3   :  { %v328_v23 = vpack.c.bf16 %v324_v8, %v324_v8  ;;  %v650_v31 = vpop.permute.xlu1 %649  ;;  %v325_v34 = vpack.c.bf16 %v321_v48, %v321_v48  ;;  %v648_v55 = vpop.permute.xlu0 %647  ;;  %v1222_v2 = vand.u32 %v486_v41, %v16192_v35  ;;  %v15519_v41 = vld [vmem:[%s19398_s28 + $0x20] sm:$0xff]  }
  0xb4   :  { %v327_v49 = vpack.c.bf16 %v323_v32, %v323_v32  ;;  %v1228_v8 = vand.u32 %v488_v54, %v16192_v35  ;;  %v655_v16 = vsel %vm653_vm10, %v648_v55, %v650_v31  ;;  %v16460_v32 = vrot.slane %v12976_v59, %v16155_v13 }
  0xb5   :  { %v1122_v39 = vand.u32 %v328_v23, %v16192_v35  ;;  %v1113_v61 = vand.u32 %v325_v34, %v16192_v35  ;;  %v682_v10 = vmul.f32 %v16430_v3, %v655_v16 }
  0xb6   :  { %v1119_v62 = vand.u32 %v327_v49, %v16192_v35  ;;  %19402 = vst [vmem:[#allocation6_spill] sm:$0xff] %v16460_v32 }
  0xb7   :  { %v652_v6 = vpop.permute.xlu1 %651  ;;  %v646_v14 = vpop.permute.xlu0 %645 }
  0xb8   :  { %v657_v23 = vsel %vm653_vm10, %v652_v6, %v646_v14 }
  0xb9   :  { %v684_v11 = vmul.f32 %v16435_v15, %v657_v23 }
  0xbb   :  { %12989 = vmatmul.mubr.msk.bf16.vlgmr.msra.gmra.mrb[0].mxu0 %vm179_vm5, %v15516_v25  ;;  %12990 = vmatmul.mubr.msk.bf16.vlgmr.msra.gmra.mrb[0].mxu1 %vm179_vm5, %v15516_v25  ;;  %v487_v25 = vpack.c.bf16 %v16058_v0, %v16058_v0  ;;  %v688_v30 = vpack.c.bf16 %v684_v11, %v684_v11  ;;  %v656_v0 = vsel %vm653_vm10, %v646_v14, %v648_v55 }
  0xbc   :  { %1062 = vmatpush1.bf16.msra.mxu1 %v1013_v27  ;;  %1019 = vmatpush1.bf16.msra.mxu0 %v1007_v26  ;;  %v485_v26 = vpack.c.bf16 %v16063_v1, %v16063_v1  ;;  %v686_v27 = vpack.c.bf16 %v682_v10, %v682_v10  ;;  %v654_v1 = vsel %vm653_vm10, %v650_v31, %v652_v6 }
  0xbd   :  { %1050 = vmatprep.mubr.bf16.mxu0 %v19354_v4  ;;  %1093 = vmatprep.mubr.bf16.mxu1 %v19354_v4  ;;  %v1334_v49 = vand.u32 %v688_v30, %v16192_v35  ;;  %v683_v13 = vmul.f32 %v16460_v32, %v654_v1 }
  0xbe   :  { %1167 = vmatprep.subr.bf16.mxu1 %v1122_v39  ;;  %1124 = vmatprep.subr.bf16.mxu0 %v1116_v46  ;;  %v1225_v39 = vand.u32 %v487_v25, %v16192_v35  ;;  %v16456_v46 = vrot.slane %v12976_v59, %v16153_v12  ;;  %v1219_v48 = vand.u32 %v485_v26, %v16192_v35  ;;  %v15520_v59 = vld [vmem:[%s19398_s28 + $0x30] sm:$0xff]   ;;  %s19411_s28 = sld [smem:[#allocation19_spill]] }
  0xbf   :  { %v1328_v34 = vand.u32 %v686_v27, %v16192_v35  ;;  %v687_v55 = vpack.c.bf16 %v683_v13, %v683_v13 }
  0xc0   :  { %19401 = vst [vmem:[#allocation5_spill] sm:$0xff] %v16456_v46  ;;  %v681_v12 = vmul.f32 %v16456_v46, %v656_v0 }
  0xc2   :  { %v685_v31 = vpack.c.bf16 %v681_v12, %v681_v12 }
  0xc4   :  { %v1325_v54 = vand.u32 %v685_v31, %v16192_v35 }
  0xc7   :  { %12992 = vmatmul.mubr.msk.bf16.vlgmr.msra.gmra.mrb[0].mxu0 %vm179_vm5, %v15517_v60  ;;  %12993 = vmatmul.mubr.msk.bf16.vlgmr.msra.gmra.mrb[0].mxu1 %vm179_vm5, %v15517_v60  ;;  %v1331_v60 = vand.u32 %v687_v55, %v16192_v35 }
  0xc8   :  { %1168 = vmatpush1.bf16.msra.mxu1 %v1119_v62  ;;  %1125 = vmatpush1.bf16.msra.mxu0 %v1113_v61  ;;  %v1459_v35 = vpop.permute.xlu0 %1458  ;;  %v1464_v61 = vpop.permute.xlu1 %1463 }
  0xc9   :  { %1156 = vmatprep.mubr.bf16.mxu0 %v19354_v4  ;;  %1199 = vmatprep.mubr.bf16.mxu1 %v19354_v4 }
  0xca   :  { %1230 = vmatprep.subr.bf16.mxu0 %v1222_v2  ;;  %1273 = vmatprep.subr.bf16.mxu1 %v1228_v8 }
  0xd3   :  { %12995 = vmatmul.mubr.msk.bf16.vlgmr.msra.gmra.mrb[0].mxu0 %vm179_vm5, %v15518_v37  ;;  %12996 = vmatmul.mubr.msk.bf16.vlgmr.msra.gmra.mrb[0].mxu1 %vm179_vm5, %v15518_v37 }
  0xd4   :  { %1274 = vmatpush1.bf16.msra.mxu1 %v1225_v39  ;;  %1231 = vmatpush1.bf16.msra.mxu0 %v1219_v48 }
  0xd5   :  { %1262 = vmatprep.mubr.bf16.mxu0 %v19354_v4  ;;  %1305 = vmatprep.mubr.bf16.mxu1 %v19354_v4 }
  0xd6   :  { %1336 = vmatprep.subr.bf16.mxu0 %v1328_v34  ;;  %1379 = vmatprep.subr.bf16.mxu1 %v1334_v49 }
  0xdf   :  { %12998 = vmatmul.mubr.msk.bf16.vlgmr.msra.gmra.mrb[0].mxu0 %vm179_vm5, %v15519_v41  ;;  %12999 = vmatmul.mubr.msk.bf16.vlgmr.msra.gmra.mrb[0].mxu1 %vm179_vm5, %v15519_v41 }
  0xe0   :  { %1337 = vmatpush1.bf16.msra.mxu0 %v1325_v54  ;;  %1380 = vmatpush1.bf16.msra.mxu1 %v1331_v60 }
  0xe1   :  { %1368 = vmatprep.mubr.bf16.mxu0 %v19354_v4  ;;  %1411 = vmatprep.mubr.bf16.mxu1 %v19354_v4 }
  0xeb   :  { %13001 = vmatmul.mubr.msk.bf16.vlgmr.msra.gmra.mrb[0].mxu0 %vm179_vm5, %v15520_v59  ;;  %13002 = vmatmul.mubr.msk.bf16.vlgmr.msra.gmra.mrb[0].mxu1 %vm179_vm5, %v15520_v59 }
  0xec   :  { %1632 = vmatprep.mubr.bf16.mxu0 %v19354_v4  ;;  %1675 = vmatprep.mubr.bf16.mxu1 %v19354_v4 }
 0x1be   :  { %v1413_v62 = vpop.f32.mrb[0].mxu1  ;;  %v1370_v6 = vpop.f32.mrb[0].mxu0 }
 0x1bf   :  { %v1468_v2 = vadd.f32 %v1459_v35, %v1413_v62  ;;  %v1466_v8 = vadd.f32 %v1459_v35, %v1370_v6  ;;  %v1372_v14 = vpop.f32.mrb[1].mxu0  ;;  %v1415_v16 = vpop.f32.mrb[1].mxu1 }
 0x1c0   :  { %v1374_v23 = vpop.f32.mrb[2].mxu0  ;;  %v1417_v10 = vpop.f32.mrb[2].mxu1  ;;  %v1467_v55 = vadd.f32 %v1459_v35, %v1372_v14 }
 0x1c1   :  { %v1476_v11 = vmul.f32 0.5, %v1468_v2  ;;  %v1474_v25 = vmul.f32 0.5, %v1466_v8  ;;  %v1470_v26 = vadd.f32 %v1464_v61, %v1374_v23  ;;  %v1472_v27 = vadd.f32 %v1464_v61, %v1417_v10  ;;  %v1376_v30 = vpop.f32.mrb[3].mxu0  ;;  %v1419_v37 = vpop.f32.mrb[3].mxu1 }
 0x1c2   :  { %v1471_v6 = vadd.f32 %v1464_v61, %v1376_v30  ;;  %v1475_v23 = vmul.f32 0.5, %v1467_v55  ;;  %v1469_v10 = vadd.f32 %v1459_v35, %v1415_v16 }
 0x1c3   :  { %15735 = vtanh.f32 %v1476_v11  ;;  %v1478_v39 = vmul.f32 0.5, %v1470_v26  ;;  %v1480_v48 = vmul.f32 0.5, %v1472_v27 }
 0x1c4   :  { %15737 = vtanh.f32 %v1474_v25  ;;  %v1479_v14 = vmul.f32 0.5, %v1471_v6 }
 0x1c5   :  { %15739 = vtanh.f32 %v1478_v39 }
 0x1c6   :  { %15741 = vtanh.f32 %v1480_v48  ;;  %v1473_v48 = vadd.f32 %v1464_v61, %v1419_v37 }
 0x1c7   :  { %15743 = vtanh.f32 %v1475_v23 }
 0x1c8   :  { %15745 = vtanh.f32 %v1479_v14  ;;  %v1481_v35 = vmul.f32 0.5, %v1473_v48  ;;  %v13046_v14 = vld [vmem:[%s19395_s1 + $0xa0] sm:$0xff] }
 0x1cd   :  { %v15736_v0 = vpop.eup %15735 }
 0x1ce   :  { %v15738_v1 = vpop.eup %15737  ;;  %v1492_v34 = vmul.f32 0.5, %v15736_v0 }
 0x1cf   :  { %v1490_v49 = vmul.f32 0.5, %v15738_v1  ;;  %v15740_v12 = vpop.eup %15739 }
 0x1d0   :  { %v15742_v31 = vpop.eup %15741  ;;  %v1494_v41 = vmul.f32 0.5, %v15740_v12  ;;  %v1500_v54 = vadd.f32 0.5, %v1492_v34 }
 0x1d1   :  { %v1498_v13 = vadd.f32 0.5, %v1490_v49  ;;  %v1496_v59 = vmul.f32 0.5, %v15742_v31  ;;  %v15744_v61 = vpop.eup %15743 }
 0x1d2   :  { %v1502_v62 = vadd.f32 0.5, %v1494_v41  ;;  %v16496_v39 = vmul.f32 %v1500_v54, %v1468_v2  ;;  %v15746_v2 = vpop.eup %15745  ;;  %v1491_v16 = vmul.f32 0.5, %v15744_v61 }
 0x1d3   :  { %v16490_v60 = vmul.f32 %v1498_v13, %v1466_v8  ;;  %v1504_v25 = vadd.f32 0.5, %v1496_v59  ;;  %v1477_v8 = vmul.f32 0.5, %v1469_v10 }
 0x1d4   :  { %v16494_v11 = vmul.f32 %v1502_v62, %v1470_v26  ;;  %19405 = vst [vmem:[#allocation9_spill] sm:$0xff] %v16496_v39  ;;  %v1499_v0 = vadd.f32 0.5, %v1491_v16 }
 0x1d5   :  { %19403 = vst [vmem:[#allocation7_spill] sm:$0xff] %v16490_v60  ;;  %1552 = vrot.lane.b32.xlu1 %v16490_v60, %s15922_s0  ;;  %v16502_v30 = vmul.f32 %v1504_v25, %v1472_v27  ;;  %15747 = vtanh.f32 %v1477_v8  ;;  %v1495_v27 = vmul.f32 0.5, %v15746_v2  ;;  %v13047_v8 = vld [vmem:[%s19395_s1 + $0xa8] sm:$0xff] }
 0x1d6   :  { %19404 = vst [vmem:[#allocation8_spill] sm:$0xff] %v16494_v11  ;;  %1554 = vrot.lane.b32.xlu0 %v16494_v11, %s15922_s0  ;;  %15749 = vtanh.f32 %v1481_v35  ;;  %v16524_v12 = vmul.f32 %v1499_v0, %v1467_v55 }
 0x1d7   :  { %19406 = vst [vmem:[#allocation10_spill] sm:$0xff] %v16502_v30  ;;  %v1503_v34 = vadd.f32 0.5, %v1495_v27 }
 0x1d8   :  { %19407 = vst [vmem:[#allocation11_spill] sm:$0xff] %v16524_v12 }
 0x1d9   :  { %1560 = vrot.lane.b32.xlu1 %v16496_v39, %s15922_s0  ;;  %v16530_v31 = vmul.f32 %v1503_v34, %v1471_v6 }
 0x1da   :  { %1562 = vrot.lane.b32.xlu0 %v16502_v30, %s15922_s0 }
 0x1db   :  { %19408 = vst [vmem:[#allocation12_spill] sm:$0xff] %v16530_v31 }
 0x1dd   :  { %1725 = vrot.lane.b32.xlu1 %v16490_v60, %s15924_s23 }
 0x1de   :  { %1727 = vrot.lane.b32.xlu0 %v16494_v11, %s15924_s23 }
 0x1df   :  { %v15748_v26 = vpop.eup %15747 }
 0x1e0   :  { %v15750_v37 = vpop.eup %15749  ;;  %v1493_v1 = vmul.f32 0.5, %v15748_v26 }
 0x1e1   :  { %1733 = vrot.lane.b32.xlu1 %v16496_v39, %s15924_s23  ;;  %v1497_v49 = vmul.f32 0.5, %v15750_v37 }
 0x1e2   :  { %1735 = vrot.lane.b32.xlu0 %v16502_v30, %s15924_s23  ;;  %v1501_v13 = vadd.f32 0.5, %v1493_v1 }
 0x1e3   :  { %v1505_v41 = vadd.f32 0.5, %v1497_v49 }
 0x1e4   :  { %v16532_v54 = vmul.f32 %v1501_v13, %v1469_v10 }
 0x1e5   :  { %1873 = vrot.lane.b32.xlu1 %v16496_v39, %s15925_s9  ;;  %v16538_v55 = vmul.f32 %v1505_v41, %v1473_v48 }
 0x1e6   :  { %1875 = vrot.lane.b32.xlu0 %v16502_v30, %s15925_s9  ;;  %19409 = vst [vmem:[#allocation13_spill] sm:$0xff] %v16532_v54 }
 0x1e7   :  { %19410 = vst [vmem:[#allocation14_spill] sm:$0xff] %v16538_v55 }
 0x1e9   :  { %1865 = vrot.lane.b32.xlu1 %v16490_v60, %s15925_s9 }
 0x1ea   :  { %1867 = vrot.lane.b32.xlu0 %v16494_v11, %s15925_s9 }
 0x1ed   :  { %2045 = vrot.lane.b32.xlu1 %v16496_v39, %s15926_s11 }
 0x1ee   :  { %2047 = vrot.lane.b32.xlu0 %v16502_v30, %s15926_s11 }
 0x1f1   :  { %1556 = vrot.lane.b32.xlu1 %v16524_v12, %s15922_s0 }
 0x1f2   :  { %1558 = vrot.lane.b32.xlu0 %v16530_v31, %s15922_s0 }
 0x1f5   :  { %1564 = vrot.lane.b32.xlu1 %v16532_v54, %s15922_s0 }
 0x1f6   :  { %1566 = vrot.lane.b32.xlu0 %v16538_v55, %s15922_s0 }
 0x1f9   :  { %2037 = vrot.lane.b32.xlu1 %v16490_v60, %s15926_s11 }
 0x1fa   :  { %2039 = vrot.lane.b32.xlu0 %v16494_v11, %s15926_s11 }
 0x1fd   :  { %1729 = vrot.lane.b32.xlu1 %v16524_v12, %s15924_s23 }
 0x1fe   :  { %1731 = vrot.lane.b32.xlu0 %v16530_v31, %s15924_s23 }
 0x201   :  { %1737 = vrot.lane.b32.xlu1 %v16532_v54, %s15924_s23 }
 0x202   :  { %1739 = vrot.lane.b32.xlu0 %v16538_v55, %s15924_s23 }
 0x205   :  { %1869 = vrot.lane.b32.xlu1 %v16524_v12, %s15925_s9 }
 0x206   :  { %2180 = vrot.lane.b32.xlu0 %v16502_v30, %s15927_s24 }
 0x209   :  { %1877 = vrot.lane.b32.xlu1 %v16532_v54, %s15925_s9 }
 0x20a   :  { %2172 = vrot.lane.b32.xlu0 %v16494_v11, %s15927_s24 }
 0x20d   :  { %2041 = vrot.lane.b32.xlu1 %v16524_v12, %s15926_s11 }
 0x20e   :  { %1871 = vrot.lane.b32.xlu0 %v16530_v31, %s15925_s9 }
 0x211   :  { %2049 = vrot.lane.b32.xlu1 %v16532_v54, %s15926_s11 }
 0x212   :  { %1879 = vrot.lane.b32.xlu0 %v16538_v55, %s15925_s9 }
 0x215   :  { %2174 = vrot.lane.b32.xlu1 %v16524_v12, %s15927_s24 }
 0x216   :  { %1516 = vrot.lane.b32.xlu0 %v16494_v11, %s15928_s4 }
 0x219   :  { %2178 = vrot.lane.b32.xlu1 %v16496_v39, %s15927_s24 }
 0x21a   :  { %2043 = vrot.lane.b32.xlu0 %v16530_v31, %s15926_s11 }
 0x21d   :  { %2170 = vrot.lane.b32.xlu1 %v16490_v60, %s15927_s24 }
 0x21e   :  { %2051 = vrot.lane.b32.xlu0 %v16538_v55, %s15926_s11 }
 0x221   :  { %2182 = vrot.lane.b32.xlu1 %v16532_v54, %s15927_s24 }
 0x222   :  { %1524 = vrot.lane.b32.xlu0 %v16502_v30, %s15928_s4 }
 0x225   :  { %1514 = vrot.lane.b32.xlu1 %v16490_v60, %s15928_s4 }
 0x226   :  { %2176 = vrot.lane.b32.xlu0 %v16530_v31, %s15927_s24 }
 0x229   :  { %1518 = vrot.lane.b32.xlu1 %v16524_v12, %s15928_s4 }
 0x22a   :  { %2184 = vrot.lane.b32.xlu0 %v16538_v55, %s15927_s24 }
 0x22d   :  { %1526 = vrot.lane.b32.xlu1 %v16532_v54, %s15928_s4 }
 0x22e   :  { %1520 = vrot.lane.b32.xlu0 %v16530_v31, %s15928_s4 }
 0x231   :  { %1522 = vrot.lane.b32.xlu1 %v16496_v39, %s15928_s4 }
 0x232   :  { %1528 = vrot.lane.b32.xlu0 %v16538_v55, %s15928_s4 }
 0x235   :  { %1686 = vrot.lane.b32.xlu1 %v16490_v60, %s15929_s25 }
 0x236   :  { %1688 = vrot.lane.b32.xlu0 %v16494_v11, %s15929_s25 }
 0x239   :  { %1690 = vrot.lane.b32.xlu1 %v16524_v12, %s15929_s25 }
 0x23a   :  { %1692 = vrot.lane.b32.xlu0 %v16530_v31, %s15929_s25 }
 0x23d   :  { %1698 = vrot.lane.b32.xlu1 %v16532_v54, %s15929_s25 }
 0x23e   :  { %1700 = vrot.lane.b32.xlu0 %v16538_v55, %s15929_s25 }
 0x241   :  { %1694 = vrot.lane.b32.xlu1 %v16496_v39, %s15929_s25 }
 0x242   :  { %1696 = vrot.lane.b32.xlu0 %v16502_v30, %s15929_s25 }
 0x245   :  { %2002 = vrot.lane.b32.xlu1 %v16524_v12, %s15930_s26 }
 0x246   :  { %2008 = vrot.lane.b32.xlu0 %v16502_v30, %s15930_s26 }
 0x247   :  { %v1553_v59 = vpop.permute.xlu1 %1552 }
 0x248   :  { %v1555_v62 = vpop.permute.xlu0 %1554 }
 0x249   :  { %2006 = vrot.lane.b32.xlu1 %v16496_v39, %s15930_s26 }
 0x24a   :  { %2000 = vrot.lane.b32.xlu0 %v16494_v11, %s15930_s26 }
 0x24b   :  { %v1561_v6 = vpop.permute.xlu1 %1560 }
 0x24c   :  { %v1563_v23 = vpop.permute.xlu0 %1562 }
 0x24d   :  { %1998 = vrot.lane.b32.xlu1 %v16490_v60, %s15930_s26 }
 0x24e   :  { %2004 = vrot.lane.b32.xlu0 %v16530_v31, %s15930_s26 }
 0x24f   :  { %v1726_v10 = vpop.permute.xlu1 %1725 }
 0x250   :  { %v16632_v25 = vpop.permute.xlu0 %1727 }
 0x251   :  { %2010 = vrot.lane.b32.xlu1 %v16532_v54, %s15930_s26 }
 0x252   :  { %2012 = vrot.lane.b32.xlu0 %v16538_v55, %s15930_s26 }
 0x253   :  { %v1734_v48 = vpop.permute.xlu1 %1733 }
 0x254   :  { %v1736_v35 = vpop.permute.xlu0 %1735 }
 0x255   :  { %2716 = vperm.xlu1 %15509, %v13046_v14  }
 0x256   :  { %2721 = vperm.xlu0 %15508, %v13047_v8  }
 0x257   :  { %v16642_v61 = vpop.permute.xlu1 %1873 }
 0x258   :  { %v16644_v2 = vpop.permute.xlu0 %1875 }
 0x25b   :  { %v16646_v16 = vpop.permute.xlu1 %1865 }
 0x25c   :  { %v16648_v26 = vpop.permute.xlu0 %1867 }
 0x25f   :  { %v16650_v27 = vpop.permute.xlu1 %2045 }
 0x260   :  { %v16652_v37 = vpop.permute.xlu0 %2047 }
 0x263   :  { %v1557_v0 = vpop.permute.xlu1 %1556 }
 0x264   :  { %v1572_v1 = vsel %vm135_vm0, %v1553_v59, %v1557_v0  ;;  %v1559_v34 = vpop.permute.xlu0 %1558  ;;  %v1570_v32 = vsel %vm135_vm0, %v1557_v0, %v1561_v6 }
 0x265   :  { %v1573_v49 = vsel %vm135_vm0, %v1555_v62, %v1559_v34  ;;  %v1577_v41 = vmul.f32 %v1572_v1, %v16168_v19  ;;  %v1571_v14 = vsel %vm135_vm0, %v1559_v34, %v1563_v23  ;;  %v1578_v0 = vmul.f32 %v1570_v32, %v16174_v21 }
 0x266   :  { %v1581_v8 = vmul.f32 %v1573_v49, %v16168_v19  ;;  %v1582_v30 = vmul.f32 %v1571_v14, %v16174_v21 }
 0x267   :  { %v1565_v13 = vpop.permute.xlu1 %1564 }
 0x268   :  { %v1568_v4 = vsel %vm135_vm0, %v1561_v6, %v1565_v13  ;;  %v1574_v15 = vsel %vm135_vm0, %v1565_v13, %v1553_v59  ;;  %v1567_v46 = vpop.permute.xlu0 %1566  ;;  %v1585_v3 = vpack.c.bf16 %v1581_v8, %v1577_v41  ;;  %v1586_v14 = vpack.c.bf16 %v1582_v30, %v1578_v0 }
 0x269   :  { %v1569_v1 = vsel %vm135_vm0, %v1563_v23, %v1567_v46  ;;  %v1575_v34 = vsel %vm135_vm0, %v1567_v46, %v1555_v62  ;;  %v1576_v19 = vmul.f32 %v1574_v15, %v16171_v20  ;;  %v1579_v39 = vmul.f32 %v1568_v4, %v16165_v18  ;;  %v15521_v46 = vld [vmem:[%s19411_s28 + $0x8] sm:$0xff]  }
 0x26a   :  { %v1580_v59 = vmul.f32 %v1575_v34, %v16171_v20  ;;  %v1583_v6 = vmul.f32 %v1569_v1, %v16165_v18  ;;  %1600 = vmatprep.subr.bf16.mxu0 %v1585_v3  ;;  %v19412_v34 = vmov 0  }
 0x26b   :  { %v16673_v49 = vpop.permute.xlu1 %2037 }
 0x26c   :  { %v1584_v13 = vpack.c.bf16 %v1580_v59, %v1576_v19  ;;  %v16680_v41 = vpop.permute.xlu0 %2039  ;;  %v1587_v23 = vpack.c.bf16 %v1583_v6, %v1579_v39 }
 0x26e   :  { %1601 = vmatpush1.bf16.msra.mxu0 %v1584_v13  ;;  %1643 = vmatprep.subr.bf16.mxu1 %v1587_v23 }
 0x26f   :  { %v1730_v8 = vpop.permute.xlu1 %1729  ;;  %1644 = vmatpush1.bf16.msra.mxu1 %v1586_v14 }
 0x270   :  { %v1745_v4 = vsel %vm340_vm2, %v1726_v10, %v1730_v8  ;;  %v1732_v3 = vpop.permute.xlu0 %1731  ;;  %v1743_v59 = vsel %vm340_vm2, %v1730_v8, %v1734_v48 }
 0x271   :  { %v1746_v19 = vsel %vm340_vm2, %v16632_v25, %v1732_v3  ;;  %13006 = vmatmul.mubr.msk.bf16.vlgmr.msra.gmra.mrb[4].mxu0 %vm1596_vm11, %v15521_v46  ;;  %v1750_v32 = vmul.f32 %v1745_v4, %v16178_v24  ;;  %v1744_v39 = vsel %vm340_vm2, %v1732_v3, %v1736_v35  ;;  %v1751_v8 = vmul.f32 %v1743_v59, %v16200_v44 }
 0x272   :  { %v1754_v30 = vmul.f32 %v1746_v19, %v16178_v24  ;;  %13007 = vmatmul.mubr.msk.bf16.vlgmr.msra.gmra.mrb[4].mxu1 %vm1596_vm11, %v15521_v46  ;;  %1804 = vmatprep.mubr.bf16.mxu0 %v19412_v34  ;;  %v1755_v13 = vmul.f32 %v1744_v39, %v16200_v44 }
 0x273   :  { %v1738_v15 = vpop.permute.xlu1 %1737  ;;  %1847 = vmatprep.mubr.bf16.mxu1 %v19412_v34 }
 0x274   :  { %v1741_v62 = vsel %vm340_vm2, %v1734_v48, %v1738_v15  ;;  %v1747_v1 = vsel %vm340_vm2, %v1738_v15, %v1726_v10  ;;  %v1740_v6 = vpop.permute.xlu0 %1739  ;;  %v1758_v0 = vpack.c.bf16 %v1754_v30, %v1750_v32  ;;  %v1759_v32 = vpack.c.bf16 %v1755_v13, %v1751_v8 }
 0x275   :  { %v1742_v23 = vsel %vm340_vm2, %v1736_v35, %v1740_v6  ;;  %v1748_v14 = vsel %vm340_vm2, %v1740_v6, %v16632_v25  ;;  %v1749_v10 = vmul.f32 %v1747_v1, %v16197_v43  ;;  %v1752_v4 = vmul.f32 %v1741_v62, %v16203_v45  ;;  %v15522_v25 = vld [vmem:[%s19411_s28 + $0x18] sm:$0xff]  }
 0x276   :  { %v1753_v3 = vmul.f32 %v1748_v14, %v16197_v43  ;;  %v1756_v48 = vmul.f32 %v1742_v23, %v16203_v45  ;;  %1772 = vmatprep.subr.bf16.mxu0 %v1758_v0 }
 0x277   :  { %v1870_v46 = vpop.permute.xlu1 %1869 }
 0x278   :  { %v1757_v19 = vpack.c.bf16 %v1753_v3, %v1749_v10  ;;  %v16715_v15 = vpop.permute.xlu0 %2180  ;;  %v1760_v35 = vpack.c.bf16 %v1756_v48, %v1752_v4  ;;  %v1883_v1 = vsel %vm500_vm4, %v1870_v46, %v16642_v61  ;;  %v1885_v59 = vsel %vm500_vm4, %v16646_v16, %v1870_v46 }
 0x279   :  { %v1889_v14 = vmul.f32 %v1885_v59, %v16231_v5  ;;  %v1890_v10 = vmul.f32 %v1883_v1, %v16218_v56 }
 0x27a   :  { %1773 = vmatpush1.bf16.msra.mxu0 %v1757_v19  ;;  %1815 = vmatprep.subr.bf16.mxu1 %v1760_v35 }
 0x27b   :  { %v1878_v39 = vpop.permute.xlu1 %1877  ;;  %1816 = vmatpush1.bf16.msra.mxu1 %v1759_v32 }
 0x27c   :  { %v16720_v30 = vpop.permute.xlu0 %2172  ;;  %v1881_v3 = vsel %vm500_vm4, %v16642_v61, %v1878_v39  ;;  %v1887_v48 = vsel %vm500_vm4, %v1878_v39, %v16646_v16  ;;  %v15523_v39 = vld [vmem:[%s19411_s28 + $0x28] sm:$0xff]  }
 0x27d   :  { %13013 = vmatmul.mubr.msk.bf16.vlgmr.msra.gmra.mrb[4].mxu0 %vm1596_vm11, %v15522_v25  ;;  %v1891_v59 = vmul.f32 %v1881_v3, %v16238_v17  ;;  %v1892_v61 = vmul.f32 %v1887_v48, %v16241_v22 }
 0x27e   :  { %13014 = vmatmul.mubr.msk.bf16.vlgmr.msra.gmra.mrb[4].mxu1 %vm1596_vm11, %v15522_v25  ;;  %1944 = vmatprep.mubr.bf16.mxu0 %v19412_v34 }
 0x27f   :  { %v2042_v62 = vpop.permute.xlu1 %2041  ;;  %1987 = vmatprep.mubr.bf16.mxu1 %v19412_v34 }
 0x280   :  { %v1872_v6 = vpop.permute.xlu0 %1871 }
 0x281   :  { %v1884_v0 = vsel %vm500_vm4, %v1872_v6, %v16644_v2  ;;  %v1886_v13 = vsel %vm500_vm4, %v16648_v26, %v1872_v6 }
 0x282   :  { %v1893_v4 = vmul.f32 %v1886_v13, %v16231_v5  ;;  %v1894_v46 = vmul.f32 %v1884_v0, %v16218_v56 }
 0x283   :  { %v2050_v23 = vpop.permute.xlu1 %2049 }
 0x284   :  { %v1897_v8 = vpack.c.bf16 %v1893_v4, %v1889_v14  ;;  %v1880_v19 = vpop.permute.xlu0 %1879  ;;  %v1898_v35 = vpack.c.bf16 %v1894_v46, %v1890_v10  ;;  %v2055_v14 = vsel %vm700_vm6, %v2042_v62, %v16650_v27  ;;  %v2057_v10 = vsel %vm700_vm6, %v16673_v49, %v2042_v62 }
 0x285   :  { %v1882_v32 = vsel %vm500_vm4, %v16644_v2, %v1880_v19  ;;  %v1888_v25 = vsel %vm500_vm4, %v1880_v19, %v16648_v26  ;;  %v2062_v19 = vmul.f32 %v2055_v14, %v16260_v36  ;;  %v15524_v14 = vld [vmem:[%s19411_s28 + $0x38] sm:$0xff]  }
 0x286   :  { %v1895_v6 = vmul.f32 %v1882_v32, %v16238_v17  ;;  %v1896_v16 = vmul.f32 %v1888_v25, %v16241_v22  ;;  %1912 = vmatprep.subr.bf16.mxu0 %v1898_v35  ;;  %v2053_v32 = vsel %vm700_vm6, %v16650_v27, %v2050_v23  ;;  %v2059_v25 = vsel %vm700_vm6, %v2050_v23, %v16673_v49 }
 0x287   :  { %v2175_v1 = vpop.permute.xlu1 %2174  ;;  %1913 = vmatpush1.bf16.msra.mxu0 %v1897_v8  ;;  %v2061_v8 = vmul.f32 %v2057_v10, %v16272_v51  ;;  %v2063_v27 = vmul.f32 %v2053_v32, %v16275_v52 }
 0x288   :  { %v1899_v2 = vpack.c.bf16 %v1895_v6, %v1891_v59  ;;  %v16761_v0 = vpop.permute.xlu0 %1516  ;;  %v1900_v13 = vpack.c.bf16 %v1896_v16, %v1892_v61 }
 0x28a   :  { %13020 = vmatmul.mubr.msk.bf16.vlgmr.msra.gmra.mrb[4].mxu0 %vm1596_vm11, %v15523_v39  ;;  %1955 = vmatprep.subr.bf16.mxu1 %v1900_v13  ;;  %v2064_v13 = vmul.f32 %v2059_v25, %v16278_v53 }
 0x28b   :  { %v2179_v26 = vpop.permute.xlu1 %2178  ;;  %1956 = vmatpush1.bf16.msra.mxu1 %v1899_v2  ;;  %2116 = vmatprep.mubr.bf16.mxu0 %v19412_v34 }
 0x28c   :  { %v2044_v4 = vpop.permute.xlu0 %2043 }
 0x28d   :  { %v2056_v46 = vsel %vm700_vm6, %v2044_v4, %v16652_v37  ;;  %v2058_v3 = vsel %vm700_vm6, %v16680_v41, %v2044_v4 }
 0x28e   :  { %v2065_v35 = vmul.f32 %v2058_v3, %v16272_v51  ;;  %v2066_v62 = vmul.f32 %v2056_v46, %v16260_v36  ;;  %13021 = vmatmul.mubr.msk.bf16.vlgmr.msra.gmra.mrb[4].mxu1 %vm1596_vm11, %v15523_v39 }
 0x28f   :  { %v2171_v48 = vpop.permute.xlu1 %2170  ;;  %2159 = vmatprep.mubr.bf16.mxu1 %v19412_v34 }
 0x290   :  { %v2069_v59 = vpack.c.bf16 %v2065_v35, %v2061_v8  ;;  %v2052_v61 = vpop.permute.xlu0 %2051  ;;  %v2070_v6 = vpack.c.bf16 %v2066_v62, %v2062_v19  ;;  %v2190_v3 = vsel %vm853_vm7, %v2171_v48, %v2175_v1 }
 0x291   :  { %v2054_v16 = vsel %vm700_vm6, %v16652_v37, %v2052_v61  ;;  %v2060_v39 = vsel %vm700_vm6, %v2052_v61, %v16680_v41  ;;  %v2188_v41 = vsel %vm853_vm7, %v2175_v1, %v2179_v26  ;;  %v2194_v25 = vmul.f32 %v2190_v3, %v16316_v38 }
 0x292   :  { %v2067_v49 = vmul.f32 %v2054_v16, %v16275_v52  ;;  %v2068_v23 = vmul.f32 %v2060_v39, %v16278_v53  ;;  %2084 = vmatprep.subr.bf16.mxu0 %v2070_v6  ;;  %v2195_v32 = vmul.f32 %v2188_v41, %v16290_v63 }
 0x293   :  { %v2183_v2 = vpop.permute.xlu1 %2182  ;;  %2085 = vmatpush1.bf16.msra.mxu0 %v2069_v59 }
 0x294   :  { %v2071_v37 = vpack.c.bf16 %v2067_v49, %v2063_v27  ;;  %v1525_v10 = vpop.permute.xlu0 %1524  ;;  %v2072_v4 = vpack.c.bf16 %v2068_v23, %v2064_v13  ;;  %v2186_v61 = vsel %vm853_vm7, %v2179_v26, %v2183_v2  ;;  %v2192_v6 = vsel %vm853_vm7, %v2183_v2, %v2171_v48 }
 0x295   :  { %v2197_v26 = vmul.f32 %v2192_v6, %v16310_v33 }
 0x296   :  { %13027 = vmatmul.mubr.msk.bf16.vlgmr.msra.gmra.mrb[4].mxu0 %vm1596_vm11, %v15524_v14  ;;  %2127 = vmatprep.subr.bf16.mxu1 %v2072_v4 }
 0x297   :  { %v1515_v46 = vpop.permute.xlu1 %1514  ;;  %2128 = vmatpush1.bf16.msra.mxu1 %v2071_v37  ;;  %2249 = vmatprep.mubr.bf16.mxu0 %v19412_v34  ;;  %v15525_v37 = vld [vmem:[%s19411_s28 + $0x40] sm:$0xff]  }
 0x298   :  { %v2177_v8 = vpop.permute.xlu0 %2176 }
 0x299   :  { %v2189_v19 = vsel %vm853_vm7, %v2177_v8, %v16715_v15  ;;  %v2191_v35 = vsel %vm853_vm7, %v16720_v30, %v2177_v8 }
 0x29a   :  { %v2198_v59 = vmul.f32 %v2191_v35, %v16316_v38  ;;  %v2199_v1 = vmul.f32 %v2189_v19, %v16290_v63  ;;  %13028 = vmatmul.mubr.msk.bf16.vlgmr.msra.gmra.mrb[4].mxu1 %vm1596_vm11, %v15524_v14  ;;  %v2196_v14 = vmul.f32 %v2186_v61, %v16324_v47 }
 0x29b   :  { %v1519_v62 = vpop.permute.xlu1 %1518  ;;  %2292 = vmatprep.mubr.bf16.mxu1 %v19412_v34 }
 0x29c   :  { %v2202_v16 = vpack.c.bf16 %v2198_v59, %v2194_v25  ;;  %v2185_v39 = vpop.permute.xlu0 %2184  ;;  %v2203_v27 = vpack.c.bf16 %v2199_v1, %v2195_v32 }
 0x29d   :  { %v2187_v13 = vsel %vm853_vm7, %v16715_v15, %v2185_v39  ;;  %v2193_v49 = vsel %vm853_vm7, %v2185_v39, %v16720_v30  ;;  %v1534_v15 = vsel %vm90_vm8, %v1515_v46, %v1519_v62 }
 0x29e   :  { %v2200_v48 = vmul.f32 %v2187_v13, %v16324_v47  ;;  %v2201_v2 = vmul.f32 %v2193_v49, %v16310_v33  ;;  %2217 = vmatprep.subr.bf16.mxu0 %v2203_v27  ;;  %v1539_v19 = vmul.f32 %v1534_v15, %v16336_v58  ;;  %v15526_v15 = vld [vmem:[%s19411_s28] sm:$0xff]  }
 0x29f   :  { %v1527_v23 = vpop.permute.xlu1 %1526  ;;  %2218 = vmatpush1.bf16.msra.mxu0 %v2202_v16 }
 0x2a0   :  { %v2204_v4 = vpack.c.bf16 %v2200_v48, %v2196_v14  ;;  %v1521_v30 = vpop.permute.xlu0 %1520  ;;  %v2205_v41 = vpack.c.bf16 %v2201_v2, %v2197_v26  ;;  %v1536_v25 = vsel %vm90_vm8, %v1527_v23, %v1515_v46 }
 0x2a1   :  { %v1535_v3 = vsel %vm90_vm8, %v16761_v0, %v1521_v30  ;;  %v1533_v1 = vsel %vm90_vm8, %v1521_v30, %v1525_v10  ;;  %v1538_v27 = vmul.f32 %v1536_v25, %v16364_v40 }
 0x2a2   :  { %v1543_v35 = vmul.f32 %v1535_v3, %v16336_v58  ;;  %13032 = vmatmul.mubr.msk.bf16.vlgmr.msra.gmra.mrb[4].mxu0 %vm1596_vm11, %v15525_v37  ;;  %2260 = vmatprep.subr.bf16.mxu1 %v2205_v41  ;;  %v1544_v14 = vmul.f32 %v1533_v1, %v16367_v42 }
 0x2a3   :  { %v1523_v8 = vpop.permute.xlu1 %1522  ;;  %2343 = vmatprep.mubr.bf16.mxu0 %v19412_v34  ;;  %2261 = vmatpush1.bf16.msra.mxu1 %v2204_v4 }
 0x2a4   :  { %v1532_v32 = vsel %vm90_vm8, %v1519_v62, %v1523_v8  ;;  %v1530_v59 = vsel %vm90_vm8, %v1523_v8, %v1527_v23  ;;  %v1529_v61 = vpop.permute.xlu0 %1528  ;;  %v1547_v6 = vpack.c.bf16 %v1543_v35, %v1539_v19 }
 0x2a5   :  { %v1540_v16 = vmul.f32 %v1532_v32, %v16367_v42  ;;  %v1531_v62 = vsel %vm90_vm8, %v1525_v10, %v1529_v61  ;;  %v1537_v46 = vsel %vm90_vm8, %v1529_v61, %v16761_v0  ;;  %v1541_v13 = vmul.f32 %v1530_v59, %v16347_v7 }
 0x2a6   :  { %v1542_v49 = vmul.f32 %v1537_v46, %v16364_v40  ;;  %v1545_v23 = vmul.f32 %v1531_v62, %v16347_v7  ;;  %2311 = vmatprep.subr.bf16.mxu0 %v1547_v6  ;;  %13033 = vmatmul.mubr.msk.bf16.vlgmr.msra.gmra.mrb[4].mxu1 %vm1596_vm11, %v15525_v37 }
 0x2a7   :  { %v1687_v39 = vpop.permute.xlu1 %1686  ;;  %2386 = vmatprep.mubr.bf16.mxu1 %v19412_v34  ;;  %v1548_v0 = vpack.c.bf16 %v1544_v14, %v1540_v16 }
 0x2a8   :  { %v1546_v26 = vpack.c.bf16 %v1542_v49, %v1538_v27  ;;  %v1689_v10 = vpop.permute.xlu0 %1688  ;;  %v1549_v48 = vpack.c.bf16 %v1545_v23, %v1541_v13  ;;  %v1859_v49 = vpack.c.bf16 %v16530_v31, %v16524_v12 }
 0x2aa   :  { %2312 = vmatpush1.bf16.msra.mxu0 %v1546_v26  ;;  %2354 = vmatprep.subr.bf16.mxu1 %v1549_v48  ;;  %v15527_v48 = vld [vmem:[%s19411_s28 + $0x10] sm:$0xff]  }
 0x2ab   :  { %v1691_v2 = vpop.permute.xlu1 %1690  ;;  %2355 = vmatpush1.bf16.msra.mxu1 %v1548_v0 }
 0x2ac   :  { %v1706_v4 = vsel %vm293_vm9, %v1687_v39, %v1691_v2  ;;  %v1693_v30 = vpop.permute.xlu0 %1692 }
 0x2ad   :  { %v1707_v37 = vsel %vm293_vm9, %v1689_v10, %v1693_v30  ;;  %v1711_v3 = vmul.f32 %v1706_v4, %v16375_v50 }
 0x2ae   :  { %v1715_v8 = vmul.f32 %v1707_v37, %v16375_v50  ;;  %13035 = vmatmul.mubr.msk.bf16.vlgmr.msra.gmra.mrb[4].mxu0 %vm1596_vm11, %v15526_v15  ;;  %v1861_v37 = vpack.c.bf16 %v16538_v55, %v16532_v54 }
 0x2af   :  { %v1699_v41 = vpop.permute.xlu1 %1698  ;;  %2437 = vmatprep.mubr.bf16.mxu0 %v19412_v34 }
 0x2b0   :  { %v1708_v19 = vsel %vm293_vm9, %v1699_v41, %v1687_v39  ;;  %v1701_v35 = vpop.permute.xlu0 %1700  ;;  %v1719_v32 = vpack.c.bf16 %v1715_v8, %v1711_v3 }
 0x2b1   :  { %v1709_v25 = vsel %vm293_vm9, %v1701_v35, %v1689_v10  ;;  %v1710_v1 = vmul.f32 %v1708_v19, %v16399_v28  ;;  %v19413_v19 = vld [vmem:[#allocation9_spill] sm:$0xff] }
 0x2b2   :  { %v1714_v61 = vmul.f32 %v1709_v25, %v16399_v28  ;;  %2405 = vmatprep.subr.bf16.mxu0 %v1719_v32  ;;  %13036 = vmatmul.mubr.msk.bf16.vlgmr.msra.gmra.mrb[4].mxu1 %vm1596_vm11, %v15526_v15 }
 0x2b3   :  { %v1695_v59 = vpop.permute.xlu1 %1694  ;;  %2480 = vmatprep.mubr.bf16.mxu1 %v19412_v34 }
 0x2b4   :  { %v1702_v6 = vsel %vm293_vm9, %v1695_v59, %v1699_v41  ;;  %v1704_v16 = vsel %vm293_vm9, %v1691_v2, %v1695_v59  ;;  %v1718_v62 = vpack.c.bf16 %v1714_v61, %v1710_v1  ;;  %v1697_v46 = vpop.permute.xlu0 %1696  ;;  %v19415_v1 = vld [vmem:[#allocation3_spill] sm:$0xff] }
 0x2b5   :  { %v1703_v39 = vsel %vm293_vm9, %v1697_v46, %v1701_v35  ;;  %v1705_v27 = vsel %vm293_vm9, %v1693_v30, %v1697_v46  ;;  %v1712_v23 = vmul.f32 %v1704_v16, %v16402_v29  ;;  %v1713_v14 = vmul.f32 %v1702_v6, %v16379_v57  ;;  %v19414_v35 = vld [vmem:[#allocation10_spill] sm:$0xff]  ;;  %v19416_v46 = vld [vmem:[#allocation5_spill] sm:$0xff] }
 0x2b6   :  { %v1716_v26 = vmul.f32 %v1705_v27, %v16402_v29  ;;  %v1717_v10 = vmul.f32 %v1703_v39, %v16379_v57  ;;  %2406 = vmatpush1.bf16.msra.mxu0 %v1718_v62  ;;  %v1858_v30 = vpack.c.bf16 %v16494_v11, %v16490_v60  ;;  %v1860_v32 = vpack.c.bf16 %v19414_v35, %v19413_v19 }
 0x2b7   :  { %v2003_v13 = vpop.permute.xlu1 %2002  ;;  %2499 = vmatprep.subr.bf16.mxu0 %v1859_v49 }
 0x2b8   :  { %v1720_v0 = vpack.c.bf16 %v1716_v26, %v1712_v23  ;;  %v2009_v2 = vpop.permute.xlu0 %2008  ;;  %v1721_v15 = vpack.c.bf16 %v1717_v10, %v1713_v14  ;;  %v15528_v23 = vld [vmem:[%s19411_s28 + $0x20] sm:$0xff]  }
 0x2ba   :  { %13038 = vmatmul.mubr.msk.bf16.vlgmr.msra.gmra.mrb[4].mxu0 %vm1596_vm11, %v15527_v48  ;;  %2448 = vmatprep.subr.bf16.mxu1 %v1721_v15 }
 0x2bb   :  { %v2007_v4 = vpop.permute.xlu1 %2006  ;;  %2500 = vmatpush1.bf16.msra.mxu0 %v1858_v30  ;;  %2449 = vmatpush1.bf16.msra.mxu1 %v1720_v0  ;;  %v19417_v0 = vld [vmem:[#allocation6_spill] sm:$0xff] }
 0x2bc   :  { %2542 = vmatprep.subr.bf16.mxu1 %v1861_v37  ;;  %v2001_v41 = vpop.permute.xlu0 %2000  ;;  %2531 = vmatprep.mubr.bf16.mxu0 %v19412_v34  ;;  %v2016_v8 = vsel %vm653_vm10, %v2003_v13, %v2007_v4 }
 0x2bd   :  { %v2023_v61 = vmul.f32 %v2016_v8, %v19415_v1  ;;  %v19418_v8 = vld [vmem:[#allocation4_spill] sm:$0xff] }
 0x2be   :  { %13039 = vmatmul.mubr.msk.bf16.vlgmr.msra.gmra.mrb[4].mxu1 %vm1596_vm11, %v15527_v48 }
 0x2bf   :  { %v1999_v3 = vpop.permute.xlu1 %1998  ;;  %2543 = vmatpush1.bf16.msra.mxu1 %v1860_v32  ;;  %2574 = vmatprep.mubr.bf16.mxu1 %v19412_v34 }
 0x2c0   :  { %v2018_v25 = vsel %vm653_vm10, %v1999_v3, %v2003_v13  ;;  %v2005_v59 = vpop.permute.xlu0 %2004 }
 0x2c1   :  { %v2017_v6 = vsel %vm653_vm10, %v2005_v59, %v2009_v2  ;;  %v2019_v16 = vsel %vm653_vm10, %v2001_v41, %v2005_v59  ;;  %v2022_v39 = vmul.f32 %v2018_v25, %v19416_v46 }
 0x2c2   :  { %v2026_v27 = vmul.f32 %v2019_v16, %v19416_v46  ;;  %v2027_v13 = vmul.f32 %v2017_v6, %v19415_v1 }
 0x2c3   :  { %v2011_v62 = vpop.permute.xlu1 %2010 }
 0x2c4   :  { %v2014_v49 = vsel %vm653_vm10, %v2007_v4, %v2011_v62  ;;  %v2020_v14 = vsel %vm653_vm10, %v2011_v62, %v1999_v3  ;;  %v2030_v26 = vpack.c.bf16 %v2026_v27, %v2022_v39  ;;  %v2013_v10 = vpop.permute.xlu0 %2012  ;;  %v2031_v48 = vpack.c.bf16 %v2027_v13, %v2023_v61 }
 0x2c5   :  { %v2024_v15 = vmul.f32 %v2014_v49, %v19417_v0  ;;  %v2015_v30 = vsel %vm653_vm10, %v2009_v2, %v2013_v10  ;;  %v2021_v37 = vsel %vm653_vm10, %v2013_v10, %v2001_v41  ;;  %v2025_v4 = vmul.f32 %v2020_v14, %v19418_v8  ;;  %v15529_v2 = vld [vmem:[%s19411_s28 + $0x30] sm:$0xff]   ;;  %s19422_s28 = sld [smem:[#allocation21_spill]] }
 0x2c6   :  { %v2028_v32 = vmul.f32 %v2015_v30, %v19417_v0  ;;  %v2029_v25 = vmul.f32 %v2021_v37, %v19418_v8  ;;  %13041 = vmatmul.mubr.msk.bf16.vlgmr.msra.gmra.mrb[4].mxu0 %vm1596_vm11, %v15528_v23  ;;  %2593 = vmatprep.subr.bf16.mxu0 %v2031_v48 }
 0x2c7   :  { %2594 = vmatpush1.bf16.msra.mxu0 %v2030_v26  ;;  %2625 = vmatprep.mubr.bf16.mxu0 %v19412_v34 }
 0x2c8   :  { %v2032_v3 = vpack.c.bf16 %v2028_v32, %v2024_v15  ;;  %v2033_v59 = vpack.c.bf16 %v2029_v25, %v2025_v4 }
 0x2ca   :  { %2636 = vmatprep.subr.bf16.mxu1 %v2033_v59  ;;  %13042 = vmatmul.mubr.msk.bf16.vlgmr.msra.gmra.mrb[4].mxu1 %vm1596_vm11, %v15528_v23 }
 0x2cb   :  { %2637 = vmatpush1.bf16.msra.mxu1 %v2032_v3  ;;  %2668 = vmatprep.mubr.bf16.mxu1 %v19412_v34 }
 0x2d2   :  { %13044 = vmatmul.mubr.msk.bf16.vlgmr.msra.gmra.mrb[4].mxu0 %vm1596_vm11, %v15529_v2 }
 0x2d3   :  { %2983 = vmatprep.mubr.bf16.mxu0 %v19412_v34 }
 0x2d4   :  { %v2717_v41 = vpop.permute.xlu1 %2716 }
 0x2d5   :  { %v2722_v62 = vpop.permute.xlu0 %2721 }
 0x2d6   :  { %13045 = vmatmul.mubr.msk.bf16.vlgmr.msra.gmra.mrb[4].mxu1 %vm1596_vm11, %v15529_v2 }
 0x2d7   :  { %3026 = vmatprep.mubr.bf16.mxu1 %v19412_v34 }
 0x3a5   :  { %v2627_v61 = vpop.f32.mrb[4].mxu0 }
 0x3a6   :  { %v2724_v6 = vadd.f32 %v2717_v41, %v2627_v61  ;;  %v2629_v16 = vpop.f32.mrb[5].mxu0 }
 0x3a7   :  { %v2725_v39 = vadd.f32 %v2717_v41, %v2629_v16  ;;  %v2631_v27 = vpop.f32.mrb[6].mxu0  ;;  %v13049_v16 = vld [vmem:[%s19395_s1 + $0xc8] sm:$0xff] }
 0x3a8   :  { %v2728_v13 = vadd.f32 %v2722_v62, %v2631_v27  ;;  %v2633_v49 = vpop.f32.mrb[7].mxu0  ;;  %v13048_v27 = vld [vmem:[%s19395_s1 + $0xc0] sm:$0xff] }
 0x3a9   :  { %v2738_v23 = vadd.f32 %v2725_v39, %v2724_v6  ;;  %v2729_v14 = vadd.f32 %v2722_v62, %v2633_v49  ;;  %v2670_v26 = vpop.f32.mrb[4].mxu1 }
 0x3aa   :  { %v2726_v48 = vadd.f32 %v2717_v41, %v2670_v26  ;;  %v2672_v15 = vpop.f32.mrb[5].mxu1 }
 0x3ab   :  { %v2743_v10 = vadd.f32 %v2729_v14, %v2728_v13  ;;  %v2727_v30 = vadd.f32 %v2717_v41, %v2672_v15  ;;  %v2674_v37 = vpop.f32.mrb[6].mxu1 }
 0x3ac   :  { %v2739_v4 = vadd.f32 %v2738_v23, %v2726_v48  ;;  %v2730_v32 = vadd.f32 %v2722_v62, %v2674_v37  ;;  %v2676_v25 = vpop.f32.mrb[7].mxu1 }
 0x3ad   :  { %v2731_v3 = vadd.f32 %v2722_v62, %v2676_v25 }
 0x3ae   :  { %v2740_v59 = vadd.f32 %v2739_v4, %v2727_v30  ;;  %v2744_v2 = vadd.f32 %v2743_v10, %v2730_v32 }
 0x3b0   :  { %v2745_v61 = vadd.f32 %v2744_v2, %v2731_v3  ;;  %2741 = vadd.xlane.f32.xlu1 %v2740_v59 }
 0x3b2   :  { %2746 = vadd.xlane.f32.xlu0 %v2745_v61 }
 0x3c1   :  { %2797 = vperm.xlu1 %15509, %v13049_v16  }
 0x3c8   :  { %2792 = vperm.xlu0 %15508, %v13048_v27  }
 0x43d   :  { %v2742_v41 = vpop.xlane.xlu1 %2741 }
 0x43e   :  { %v2748_v49 = vmul.f32 0.001953125, %v2742_v41 }
 0x43f   :  { %v2747_v23 = vpop.xlane.xlu0 %2746 }
 0x440   :  { %v2750_v26 = vsub.f32 %v2724_v6, %v2748_v49  ;;  %v2751_v62 = vsub.f32 %v2725_v39, %v2748_v49  ;;  %v2749_v15 = vmul.f32 0.001953125, %v2747_v23  ;;  %v2752_v10 = vsub.f32 %v2726_v48, %v2748_v49 }
 0x441   :  { %v2753_v2 = vsub.f32 %v2727_v30, %v2748_v49 }
 0x442   :  { %v2754_v37 = vsub.f32 %v2728_v13, %v2749_v15  ;;  %v2755_v4 = vsub.f32 %v2729_v14, %v2749_v15  ;;  %v2756_v25 = vsub.f32 %v2730_v32, %v2749_v15  ;;  %v2758_v59 = vmul.f32 %v2750_v26, %v2750_v26  ;;  %v13050_v13 = vld [vmem:[%s19395_s1 + $0xe0] sm:$0xff]  ;;  %v13051_v14 = vld [vmem:[%s19395_s1 + $0xe8] sm:$0xff] }
 0x443   :  { %v2759_v61 = vmul.f32 %v2751_v62, %v2751_v62  ;;  %v2757_v55 = vsub.f32 %v2731_v3, %v2749_v15  ;;  %v2760_v31 = vmul.f32 %v2752_v10, %v2752_v10  ;;  %v2761_v12 = vmul.f32 %v2753_v2, %v2753_v2 }
 0x444   :  { %v2762_v16 = vmul.f32 %v2754_v37, %v2754_v37  ;;  %v2763_v54 = vmul.f32 %v2755_v4, %v2755_v4  ;;  %v2764_v11 = vmul.f32 %v2756_v25, %v2756_v25 }
 0x445   :  { %v2766_v35 = vadd.f32 %v2759_v61, %v2758_v59  ;;  %v2765_v19 = vmul.f32 %v2757_v55, %v2757_v55 }
 0x446   :  { %v2771_v27 = vadd.f32 %v2763_v54, %v2762_v16  ;;  %v2798_v54 = vpop.permute.xlu1 %2797 }
 0x447   :  { %v2767_v41 = vadd.f32 %v2766_v35, %v2760_v31  ;;  %v2793_v48 = vpop.permute.xlu0 %2792 }
 0x448   :  { %v2772_v6 = vadd.f32 %v2771_v27, %v2764_v11 }
 0x449   :  { %v2768_v39 = vadd.f32 %v2767_v41, %v2761_v12 }
 0x44a   :  { %v2773_v23 = vadd.f32 %v2772_v6, %v2765_v19 }
 0x44b   :  { %2769 = vadd.xlane.f32.xlu0 %v2768_v39 }
 0x44c   :  { %2774 = vadd.xlane.f32.xlu1 %v2773_v23 }
 0x45d   :  { %2810 = vperm.xlu1 %15509, %v13050_v13  }
 0x461   :  { %2815 = vperm.xlu0 %15508, %v13051_v14  }
 0x4d8   :  { %v2770_v30 = vpop.xlane.xlu0 %2769 }
 0x4d9   :  { %v2776_v31 = vmul.f32 0.001953125, %v2770_v30  ;;  %v2775_v35 = vpop.xlane.xlu1 %2774 }
 0x4da   :  { %v2777_v11 = vmul.f32 0.001953125, %v2775_v35 }
 0x4db   :  { %v2778_v12 = vadd.f32 1e-05, %v2776_v31 }
 0x4dc   :  { %v2779_v19 = vadd.f32 1e-05, %v2777_v11 }
 0x4dd   :  { %15751 = vrsqrt.f32 %v2778_v12  ;;  %v2811_v30 = vpop.permute.xlu1 %2810 }
 0x4de   :  { %15753 = vrsqrt.f32 %v2779_v19 }
 0x4e7   :  { %v15752_v32 = vpop.eup %15751 }
 0x4e8   :  { %v15754_v3 = vpop.eup %15753  ;;  %v2782_v49 = vmul.f32 %v15752_v32, %v2750_v26  ;;  %v2783_v15 = vmul.f32 %v15752_v32, %v2751_v62  ;;  %v2784_v59 = vmul.f32 %v15752_v32, %v2752_v10  ;;  %v2785_v61 = vmul.f32 %v15752_v32, %v2753_v2  ;;  %v2816_v26 = vpop.permute.xlu0 %2815 }
 0x4e9   :  { %v2786_v16 = vmul.f32 %v15754_v3, %v2754_v37  ;;  %v2787_v27 = vmul.f32 %v15754_v3, %v2755_v4  ;;  %v2788_v41 = vmul.f32 %v15754_v3, %v2756_v25  ;;  %v2789_v6 = vmul.f32 %v15754_v3, %v2757_v55 }
 0x4ea   :  { %v2800_v39 = vmul.f32 %v2793_v48, %v2782_v49  ;;  %v2801_v23 = vmul.f32 %v2793_v48, %v2783_v15  ;;  %v2802_v13 = vmul.f32 %v2793_v48, %v2784_v59  ;;  %v2803_v14 = vmul.f32 %v2793_v48, %v2785_v61 }
 0x4eb   :  { %v2804_v35 = vmul.f32 %v2798_v54, %v2786_v16  ;;  %v2805_v31 = vmul.f32 %v2798_v54, %v2787_v27  ;;  %v2807_v11 = vmul.f32 %v2798_v54, %v2789_v6  ;;  %v2806_v25 = vmul.f32 %v2798_v54, %v2788_v41 }
 0x4ec   :  { %v2818_v12 = vadd.f32 %v2811_v30, %v2800_v39  ;;  %v2819_v19 = vadd.f32 %v2811_v30, %v2801_v23  ;;  %v2820_v60 = vadd.f32 %v2811_v30, %v2802_v13  ;;  %v2821_v8 = vadd.f32 %v2811_v30, %v2803_v14 }
 0x4ed   :  { %v2822_v62 = vadd.f32 %v2816_v26, %v2804_v35  ;;  %v2823_v10 = vadd.f32 %v2816_v26, %v2805_v31  ;;  %v2825_v32 = vadd.f32 %v2816_v26, %v2807_v11  ;;  %v2824_v49 = vadd.f32 %v2816_v26, %v2806_v25 }
 0x4ee   :  { %v2826_v2 = vmul.f32 0.5, %v2818_v12  ;;  %v2827_v37 = vmul.f32 0.5, %v2819_v19  ;;  %v2828_v4 = vmul.f32 0.5, %v2820_v60  ;;  %v2829_v55 = vmul.f32 0.5, %v2821_v8 }
 0x4ef   :  { %v2830_v3 = vmul.f32 0.5, %v2822_v62  ;;  %v2831_v48 = vmul.f32 0.5, %v2823_v10  ;;  %v2833_v15 = vmul.f32 0.5, %v2825_v32  ;;  %v2832_v59 = vmul.f32 0.5, %v2824_v49 }
 0x4f0   :  { %15755 = vtanh.f32 %v2826_v2 }
 0x4f1   :  { %15757 = vtanh.f32 %v2827_v37 }
 0x4f2   :  { %15759 = vtanh.f32 %v2828_v4 }
 0x4f3   :  { %15761 = vtanh.f32 %v2829_v55 }
 0x4f4   :  { %15763 = vtanh.f32 %v2830_v3 }
 0x4f5   :  { %15765 = vtanh.f32 %v2831_v48 }
 0x4f6   :  { %15767 = vtanh.f32 %v2833_v15 }
 0x4f7   :  { %15769 = vtanh.f32 %v2832_v59 }
 0x4fa   :  { %v15756_v61 = vpop.eup %15755 }
 0x4fb   :  { %v15758_v16 = vpop.eup %15757  ;;  %v2842_v27 = vmul.f32 0.5, %v15756_v61 }
 0x4fc   :  { %v15760_v6 = vpop.eup %15759  ;;  %v2843_v54 = vmul.f32 0.5, %v15758_v16 }
 0x4fd   :  { %v15762_v41 = vpop.eup %15761  ;;  %v2850_v39 = vadd.f32 0.5, %v2842_v27  ;;  %v2844_v37 = vmul.f32 0.5, %v15760_v6 }
 0x4fe   :  { %v15764_v23 = vpop.eup %15763  ;;  %v2845_v13 = vmul.f32 0.5, %v15762_v41  ;;  %v2851_v30 = vadd.f32 0.5, %v2843_v54 }
 0x4ff   :  { %v15766_v14 = vpop.eup %15765  ;;  %v16963_v35 = vmul.f32 %v2850_v39, %v2818_v12  ;;  %v2846_v31 = vmul.f32 0.5, %v15764_v23  ;;  %v2852_v12 = vadd.f32 0.5, %v2844_v37  ;;  %v19419_v23 = vld [vmem:[#allocation2_spill] sm:$0xff] }
 0x500   :  { %v2847_v11 = vmul.f32 0.5, %v15766_v14  ;;  %v15768_v26 = vpop.eup %15767  ;;  %v2853_v4 = vadd.f32 0.5, %v2845_v13  ;;  %v16967_v25 = vmul.f32 %v2851_v30, %v2819_v19 }
 0x501   :  { %v2854_v2 = vadd.f32 0.5, %v2846_v31  ;;  %2904 = vrot.lane.b32.xlu1 %v16963_v35, %s15922_s0  ;;  %v2849_v55 = vmul.f32 0.5, %v15768_v26  ;;  %v15770_v15 = vpop.eup %15769  ;;  %v16983_v19 = vmul.f32 %v2852_v12, %v2820_v60  ;;  %v13096_v12 = vld [vmem:[%s19395_s1 + $0x108] sm:$0xff] }
 0x502   :  { %v2855_v3 = vadd.f32 0.5, %v2847_v11  ;;  %v16975_v59 = vmul.f32 %v2853_v4, %v2821_v8  ;;  %v2848_v61 = vmul.f32 0.5, %v15770_v15 }
 0x503   :  { %v16969_v48 = vmul.f32 %v2854_v2, %v2822_v62  ;;  %v2857_v16 = vadd.f32 0.5, %v2849_v55  ;;  %v13095_v2 = vld [vmem:[%s19395_s1 + $0x100] sm:$0xff] }
 0x504   :  { %v16977_v27 = vmul.f32 %v2855_v3, %v2823_v10  ;;  %v2856_v62 = vadd.f32 0.5, %v2848_v61 }
 0x505   :  { %2906 = vrot.lane.b32.xlu0 %v16969_v48, %s15922_s0  ;;  %2908 = vrot.lane.b32.xlu1 %v16967_v25, %s15922_s0  ;;  %v16985_v6 = vmul.f32 %v2857_v16, %v2825_v32 }
 0x506   :  { %v16991_v8 = vmul.f32 %v2856_v62, %v2824_v49 }
 0x509   :  { %2910 = vrot.lane.b32.xlu0 %v16977_v27, %s15922_s0  ;;  %2916 = vrot.lane.b32.xlu1 %v16975_v59, %s15922_s0 }
 0x50d   :  { %2918 = vrot.lane.b32.xlu0 %v16985_v6, %s15922_s0  ;;  %2912 = vrot.lane.b32.xlu1 %v16983_v19, %s15922_s0 }
 0x511   :  { %2914 = vrot.lane.b32.xlu0 %v16991_v8, %s15922_s0  ;;  %3076 = vrot.lane.b32.xlu1 %v16963_v35, %s15924_s23  ;;  %s19383_s0 = smov 121  }
 0x515   :  { %3078 = vrot.lane.b32.xlu0 %v16969_v48, %s15924_s23  ;;  %3080 = vrot.lane.b32.xlu1 %v16967_v25, %s15924_s23 }
 0x519   :  { %3082 = vrot.lane.b32.xlu0 %v16977_v27, %s15924_s23  ;;  %3088 = vrot.lane.b32.xlu1 %v16975_v59, %s15924_s23 }
 0x51d   :  { %3090 = vrot.lane.b32.xlu0 %v16985_v6, %s15924_s23  ;;  %3084 = vrot.lane.b32.xlu1 %v16983_v19, %s15924_s23 }
 0x521   :  { %3086 = vrot.lane.b32.xlu0 %v16991_v8, %s15924_s23  ;;  %3220 = vrot.lane.b32.xlu1 %v16967_v25, %s15925_s9 }
 0x525   :  { %3222 = vrot.lane.b32.xlu0 %v16977_v27, %s15925_s9  ;;  %3224 = vrot.lane.b32.xlu1 %v16983_v19, %s15925_s9 }
 0x529   :  { %3226 = vrot.lane.b32.xlu0 %v16991_v8, %s15925_s9  ;;  %3216 = vrot.lane.b32.xlu1 %v16963_v35, %s15925_s9 }
 0x52d   :  { %3218 = vrot.lane.b32.xlu0 %v16969_v48, %s15925_s9  ;;  %3228 = vrot.lane.b32.xlu1 %v16975_v59, %s15925_s9 }
 0x531   :  { %3230 = vrot.lane.b32.xlu0 %v16985_v6, %s15925_s9  ;;  %3392 = vrot.lane.b32.xlu1 %v16967_v25, %s15926_s11 }
 0x535   :  { %3394 = vrot.lane.b32.xlu0 %v16977_v27, %s15926_s11  ;;  %3396 = vrot.lane.b32.xlu1 %v16983_v19, %s15926_s11 }
 0x539   :  { %3398 = vrot.lane.b32.xlu0 %v16991_v8, %s15926_s11  ;;  %3388 = vrot.lane.b32.xlu1 %v16963_v35, %s15926_s11 }
 0x53d   :  { %3390 = vrot.lane.b32.xlu0 %v16969_v48, %s15926_s11  ;;  %3400 = vrot.lane.b32.xlu1 %v16975_v59, %s15926_s11 }
 0x541   :  { %3402 = vrot.lane.b32.xlu0 %v16985_v6, %s15926_s11  ;;  %3525 = vrot.lane.b32.xlu1 %v16967_v25, %s15927_s24 }
 0x545   :  { %3527 = vrot.lane.b32.xlu0 %v16977_v27, %s15927_s24  ;;  %3529 = vrot.lane.b32.xlu1 %v16983_v19, %s15927_s24 }
 0x549   :  { %3531 = vrot.lane.b32.xlu0 %v16991_v8, %s15927_s24  ;;  %3521 = vrot.lane.b32.xlu1 %v16963_v35, %s15927_s24 }
 0x54d   :  { %3523 = vrot.lane.b32.xlu0 %v16969_v48, %s15927_s24  ;;  %3533 = vrot.lane.b32.xlu1 %v16975_v59, %s15927_s24 }
 0x551   :  { %3535 = vrot.lane.b32.xlu0 %v16985_v6, %s15927_s24  ;;  %2866 = vrot.lane.b32.xlu1 %v16963_v35, %s15928_s4 }
 0x555   :  { %2868 = vrot.lane.b32.xlu0 %v16969_v48, %s15928_s4  ;;  %2870 = vrot.lane.b32.xlu1 %v16967_v25, %s15928_s4 }
 0x559   :  { %2872 = vrot.lane.b32.xlu0 %v16977_v27, %s15928_s4  ;;  %2878 = vrot.lane.b32.xlu1 %v16975_v59, %s15928_s4 }
 0x55d   :  { %2880 = vrot.lane.b32.xlu0 %v16985_v6, %s15928_s4  ;;  %2874 = vrot.lane.b32.xlu1 %v16983_v19, %s15928_s4 }
 0x561   :  { %2876 = vrot.lane.b32.xlu0 %v16991_v8, %s15928_s4  ;;  %3037 = vrot.lane.b32.xlu1 %v16963_v35, %s15929_s25 }
 0x565   :  { %3039 = vrot.lane.b32.xlu0 %v16969_v48, %s15929_s25  ;;  %3041 = vrot.lane.b32.xlu1 %v16967_v25, %s15929_s25 }
 0x569   :  { %3043 = vrot.lane.b32.xlu0 %v16977_v27, %s15929_s25  ;;  %3049 = vrot.lane.b32.xlu1 %v16975_v59, %s15929_s25 }
 0x56d   :  { %3051 = vrot.lane.b32.xlu0 %v16985_v6, %s15929_s25  ;;  %3045 = vrot.lane.b32.xlu1 %v16983_v19, %s15929_s25 }
 0x571   :  { %3047 = vrot.lane.b32.xlu0 %v16991_v8, %s15929_s25  ;;  %3353 = vrot.lane.b32.xlu1 %v16967_v25, %s15930_s26  ;;  %s19431_s25 = smov 9  }
 0x573   :  { %v2905_v60 = vpop.permute.xlu1 %2904 }
 0x575   :  { %3355 = vrot.lane.b32.xlu0 %v16977_v27, %s15930_s26  ;;  %3357 = vrot.lane.b32.xlu1 %v16983_v19, %s15930_s26 }
 0x577   :  { %v2907_v10 = vpop.permute.xlu0 %2906  ;;  %v2909_v32 = vpop.permute.xlu1 %2908 }
 0x578   :  { %v2924_v49 = vsel %vm135_vm0, %v2905_v60, %v2909_v32 }
 0x579   :  { %3359 = vrot.lane.b32.xlu0 %v16991_v8, %s15930_s26  ;;  %3349 = vrot.lane.b32.xlu1 %v16963_v35, %s15930_s26  ;;  %v2929_v13 = vmul.f32 %v2924_v49, %v19419_v23 }
 0x57b   :  { %v2911_v54 = vpop.permute.xlu0 %2910  ;;  %v2917_v41 = vpop.permute.xlu1 %2916 }
 0x57c   :  { %v2925_v39 = vsel %vm135_vm0, %v2907_v10, %v2911_v54  ;;  %v2926_v30 = vsel %vm135_vm0, %v2917_v41, %v2905_v60 }
 0x57d   :  { %v2933_v14 = vmul.f32 %v2925_v39, %v19419_v23  ;;  %3351 = vrot.lane.b32.xlu0 %v16969_v48, %s15930_s26  ;;  %3361 = vrot.lane.b32.xlu1 %v16975_v59, %s15930_s26  ;;  %v2928_v4 = vmul.f32 %v2926_v30, %v16171_v20 }
 0x57f   :  { %v2919_v31 = vpop.permute.xlu0 %2918  ;;  %v2913_v11 = vpop.permute.xlu1 %2912  ;;  %v2937_v26 = vpack.c.bf16 %v2933_v14, %v2929_v13 }
 0x580   :  { %v2927_v37 = vsel %vm135_vm0, %v2919_v31, %v2907_v10  ;;  %v2922_v3 = vsel %vm135_vm0, %v2909_v32, %v2913_v11  ;;  %v2920_v15 = vsel %vm135_vm0, %v2913_v11, %v2917_v41  ;;  %v15530_v32 = vld [vmem:[%s19420_s10 + $0x8] sm:$0xff]  }
 0x581   :  { %v2932_v55 = vmul.f32 %v2927_v37, %v16171_v20  ;;  %3363 = vrot.lane.b32.xlu0 %v16985_v6, %s15930_s26  ;;  %2951 = vmatprep.subr.bf16.mxu0 %v2937_v26  ;;  %v2930_v20 = vmul.f32 %v2922_v3, %v16174_v21  ;;  %v2931_v49 = vmul.f32 %v2920_v15, %v16165_v18 }
 0x582   :  { %4067 = vperm.xlu1 %15509, %v13095_v2  }
 0x583   :  { %v2936_v61 = vpack.c.bf16 %v2932_v55, %v2928_v4  ;;  %v2915_v16 = vpop.permute.xlu0 %2914  ;;  %v3077_v62 = vpop.permute.xlu1 %3076 }
 0x584   :  { %v2921_v60 = vsel %vm135_vm0, %v2915_v16, %v2919_v31  ;;  %v2923_v10 = vsel %vm135_vm0, %v2911_v54, %v2915_v16 }
 0x585   :  { %v2934_v41 = vmul.f32 %v2923_v10, %v16174_v21  ;;  %v2935_v39 = vmul.f32 %v2921_v60, %v16165_v18  ;;  %4072 = vperm.xlu0 %15508, %v13096_v12   ;;  %2952 = vmatpush1.bf16.msra.mxu0 %v2936_v61 }
 0x587   :  { %v2938_v23 = vpack.c.bf16 %v2934_v41, %v2930_v20  ;;  %v3079_v13 = vpop.permute.xlu0 %3078  ;;  %v3081_v14 = vpop.permute.xlu1 %3080  ;;  %v2939_v30 = vpack.c.bf16 %v2935_v39, %v2931_v49 }
 0x588   :  { %13055 = vmatmul.mubr.msk.bf16.vlgmr.msra.gmra.mrb[8].mxu0 %vm1596_vm11, %v15530_v32  ;;  %v3096_v54 = vsel %vm340_vm2, %v3077_v62, %v3081_v14 }
 0x589   :  { %2994 = vmatprep.subr.bf16.mxu1 %v2939_v30  ;;  %3155 = vmatprep.mubr.bf16.mxu0 %v19412_v34  ;;  %v3101_v21 = vmul.f32 %v3096_v54, %v16178_v24 }
 0x58a   :  { %2995 = vmatpush1.bf16.msra.mxu1 %v2938_v23 }
 0x58b   :  { %v3083_v31 = vpop.permute.xlu0 %3082  ;;  %v3089_v11 = vpop.permute.xlu1 %3088 }
 0x58c   :  { %v3097_v18 = vsel %vm340_vm2, %v3079_v13, %v3083_v31  ;;  %v3098_v2 = vsel %vm340_vm2, %v3089_v11, %v3077_v62 }
 0x58d   :  { %v3105_v26 = vmul.f32 %v3097_v18, %v16178_v24  ;;  %13056 = vmatmul.mubr.msk.bf16.vlgmr.msra.gmra.mrb[8].mxu1 %vm1596_vm11, %v15530_v32  ;;  %v3100_v15 = vmul.f32 %v3098_v2, %v16197_v43 }
 0x58e   :  { %3198 = vmatprep.mubr.bf16.mxu1 %v19412_v34 }
 0x58f   :  { %v3091_v37 = vpop.permute.xlu0 %3090  ;;  %v3085_v4 = vpop.permute.xlu1 %3084  ;;  %v3109_v55 = vpack.c.bf16 %v3105_v26, %v3101_v21 }
 0x590   :  { %v3099_v3 = vsel %vm340_vm2, %v3091_v37, %v3079_v13  ;;  %v3092_v24 = vsel %vm340_vm2, %v3085_v4, %v3089_v11  ;;  %v3094_v61 = vsel %vm340_vm2, %v3081_v14, %v3085_v4 }
 0x591   :  { %v3104_v12 = vmul.f32 %v3099_v3, %v16197_v43  ;;  %3123 = vmatprep.subr.bf16.mxu0 %v3109_v55  ;;  %v15531_v43 = vld [vmem:[%s19420_s10 + $0x18] sm:$0xff]   ;;  %v3102_v32 = vmul.f32 %v3094_v61, %v16200_v44  ;;  %v3103_v49 = vmul.f32 %v3092_v24, %v16203_v45 }
 0x593   :  { %v3108_v16 = vpack.c.bf16 %v3104_v12, %v3100_v15  ;;  %v3087_v62 = vpop.permute.xlu0 %3086  ;;  %v3221_v20 = vpop.permute.xlu1 %3220 }
 0x594   :  { %v3093_v60 = vsel %vm340_vm2, %v3087_v62, %v3091_v37  ;;  %v3095_v10 = vsel %vm340_vm2, %v3083_v31, %v3087_v62 }
 0x595   :  { %v3106_v41 = vmul.f32 %v3095_v10, %v16200_v44  ;;  %v3107_v39 = vmul.f32 %v3093_v60, %v16203_v45  ;;  %3124 = vmatpush1.bf16.msra.mxu0 %v3108_v16 }
 0x597   :  { %v3110_v23 = vpack.c.bf16 %v3106_v41, %v3102_v32  ;;  %v3223_v13 = vpop.permute.xlu0 %3222  ;;  %v3225_v14 = vpop.permute.xlu1 %3224  ;;  %v3111_v30 = vpack.c.bf16 %v3107_v39, %v3103_v49 }
 0x598   :  { %13062 = vmatmul.mubr.msk.bf16.vlgmr.msra.gmra.mrb[8].mxu0 %vm1596_vm11, %v15531_v43  ;;  %v3234_v54 = vsel %vm500_vm4, %v3221_v20, %v3225_v14 }
 0x599   :  { %3166 = vmatprep.subr.bf16.mxu1 %v3111_v30  ;;  %3295 = vmatprep.mubr.bf16.mxu0 %v19412_v34  ;;  %v3241_v45 = vmul.f32 %v3234_v54, %v16218_v56 }
 0x59a   :  { %3167 = vmatpush1.bf16.msra.mxu1 %v3110_v23 }
 0x59b   :  { %v3227_v31 = vpop.permute.xlu0 %3226  ;;  %v3217_v11 = vpop.permute.xlu1 %3216 }
 0x59c   :  { %v3235_v44 = vsel %vm500_vm4, %v3223_v13, %v3227_v31  ;;  %v3236_v21 = vsel %vm500_vm4, %v3217_v11, %v3221_v20 }
 0x59d   :  { %v3245_v18 = vmul.f32 %v3235_v44, %v16218_v56  ;;  %13063 = vmatmul.mubr.msk.bf16.vlgmr.msra.gmra.mrb[8].mxu1 %vm1596_vm11, %v15531_v43  ;;  %v3240_v55 = vmul.f32 %v3236_v21, %v16231_v5 }
 0x59e   :  { %3338 = vmatprep.mubr.bf16.mxu1 %v19412_v34 }
 0x59f   :  { %v3219_v26 = vpop.permute.xlu0 %3218  ;;  %v3229_v2 = vpop.permute.xlu1 %3228  ;;  %v3249_v37 = vpack.c.bf16 %v3245_v18, %v3241_v45 }
 0x5a0   :  { %v3237_v4 = vsel %vm500_vm4, %v3219_v26, %v3223_v13  ;;  %v3232_v56 = vsel %vm500_vm4, %v3225_v14, %v3229_v2  ;;  %v3238_v15 = vsel %vm500_vm4, %v3229_v2, %v3217_v11 }
 0x5a1   :  { %v3244_v3 = vmul.f32 %v3237_v4, %v16231_v5  ;;  %3263 = vmatprep.subr.bf16.mxu0 %v3249_v37  ;;  %v15532_v5 = vld [vmem:[%s19420_s10 + $0x28] sm:$0xff]   ;;  %v3242_v20 = vmul.f32 %v3232_v56, %v16238_v17  ;;  %v3243_v60 = vmul.f32 %v3238_v15, %v16241_v22 }
 0x5a3   :  { %v3248_v12 = vpack.c.bf16 %v3244_v3, %v3240_v55  ;;  %v3231_v24 = vpop.permute.xlu0 %3230  ;;  %v3393_v61 = vpop.permute.xlu1 %3392 }
 0x5a4   :  { %v3233_v16 = vsel %vm500_vm4, %v3227_v31, %v3231_v24  ;;  %v3239_v62 = vsel %vm500_vm4, %v3231_v24, %v3219_v26 }
 0x5a5   :  { %v3246_v10 = vmul.f32 %v3233_v16, %v16238_v17  ;;  %v3247_v43 = vmul.f32 %v3239_v62, %v16241_v22  ;;  %3264 = vmatpush1.bf16.msra.mxu0 %v3248_v12 }
 0x5a7   :  { %v3250_v32 = vpack.c.bf16 %v3246_v10, %v3242_v20  ;;  %v3395_v49 = vpop.permute.xlu0 %3394  ;;  %v3397_v41 = vpop.permute.xlu1 %3396  ;;  %v3251_v39 = vpack.c.bf16 %v3247_v43, %v3243_v60 }
 0x5a8   :  { %13069 = vmatmul.mubr.msk.bf16.vlgmr.msra.gmra.mrb[8].mxu0 %vm1596_vm11, %v15532_v5  ;;  %v3406_v23 = vsel %vm700_vm6, %v3393_v61, %v3397_v41 }
 0x5a9   :  { %3306 = vmatprep.subr.bf16.mxu1 %v3251_v39  ;;  %3467 = vmatprep.mubr.bf16.mxu0 %v19412_v34  ;;  %v3413_v22 = vmul.f32 %v3406_v23, %v16260_v36 }
 0x5aa   :  { %3307 = vmatpush1.bf16.msra.mxu1 %v3250_v32 }
 0x5ab   :  { %v3399_v13 = vpop.permute.xlu0 %3398  ;;  %v3389_v14 = vpop.permute.xlu1 %3388 }
 0x5ac   :  { %v3407_v17 = vsel %vm700_vm6, %v3395_v49, %v3399_v13  ;;  %v3408_v54 = vsel %vm700_vm6, %v3389_v14, %v3393_v61 }
 0x5ad   :  { %v3417_v30 = vmul.f32 %v3407_v17, %v16260_v36  ;;  %13070 = vmatmul.mubr.msk.bf16.vlgmr.msra.gmra.mrb[8].mxu1 %vm1596_vm11, %v15532_v5  ;;  %v3412_v18 = vmul.f32 %v3408_v54, %v16272_v51 }
 0x5ae   :  { %3510 = vmatprep.mubr.bf16.mxu1 %v19412_v34 }
 0x5af   :  { %v3391_v31 = vpop.permute.xlu0 %3390  ;;  %v3401_v11 = vpop.permute.xlu1 %3400  ;;  %v3421_v44 = vpack.c.bf16 %v3417_v30, %v3413_v22 }
 0x5b0   :  { %v3409_v45 = vsel %vm700_vm6, %v3391_v31, %v3395_v49  ;;  %v3404_v36 = vsel %vm700_vm6, %v3397_v41, %v3401_v11  ;;  %v3410_v26 = vsel %vm700_vm6, %v3401_v11, %v3389_v14 }
 0x5b1   :  { %v3416_v21 = vmul.f32 %v3409_v45, %v16272_v51  ;;  %3435 = vmatprep.subr.bf16.mxu0 %v3421_v44  ;;  %v15533_v51 = vld [vmem:[%s19420_s10 + $0x38] sm:$0xff]   ;;  %v3414_v56 = vmul.f32 %v3404_v36, %v16275_v52  ;;  %v3415_v15 = vmul.f32 %v3410_v26, %v16278_v53 }
 0x5b3   :  { %v3420_v2 = vpack.c.bf16 %v3416_v21, %v3412_v18  ;;  %v3403_v37 = vpop.permute.xlu0 %3402  ;;  %v3526_v4 = vpop.permute.xlu1 %3525 }
 0x5b4   :  { %v3405_v55 = vsel %vm700_vm6, %v3399_v13, %v3403_v37  ;;  %v3411_v3 = vsel %vm700_vm6, %v3403_v37, %v3391_v31 }
 0x5b5   :  { %v3418_v12 = vmul.f32 %v3405_v55, %v16275_v52  ;;  %v3419_v24 = vmul.f32 %v3411_v3, %v16278_v53  ;;  %3436 = vmatpush1.bf16.msra.mxu0 %v3420_v2 }
 0x5b7   :  { %v3422_v61 = vpack.c.bf16 %v3418_v12, %v3414_v56  ;;  %v3528_v16 = vpop.permute.xlu0 %3527  ;;  %v3530_v62 = vpop.permute.xlu1 %3529  ;;  %v3423_v5 = vpack.c.bf16 %v3419_v24, %v3415_v15 }
 0x5b8   :  { %13076 = vmatmul.mubr.msk.bf16.vlgmr.msra.gmra.mrb[8].mxu0 %vm1596_vm11, %v15533_v51  ;;  %v3539_v20 = vsel %vm853_vm7, %v3526_v4, %v3530_v62 }
 0x5b9   :  { %3478 = vmatprep.subr.bf16.mxu1 %v3423_v5  ;;  %3600 = vmatprep.mubr.bf16.mxu0 %v19412_v34  ;;  %v3546_v53 = vmul.f32 %v3539_v20, %v16290_v63 }
 0x5ba   :  { %3479 = vmatpush1.bf16.msra.mxu1 %v3422_v61 }
 0x5bb   :  { %v3532_v60 = vpop.permute.xlu0 %3531  ;;  %v3522_v10 = vpop.permute.xlu1 %3521 }
 0x5bc   :  { %v3540_v52 = vsel %vm853_vm7, %v3528_v16, %v3532_v60  ;;  %v3541_v32 = vsel %vm853_vm7, %v3522_v10, %v3526_v4 }
 0x5bd   :  { %v3550_v43 = vmul.f32 %v3540_v52, %v16290_v63  ;;  %13077 = vmatmul.mubr.msk.bf16.vlgmr.msra.gmra.mrb[8].mxu1 %vm1596_vm11, %v15533_v51  ;;  %v3545_v13 = vmul.f32 %v3541_v32, %v16316_v38 }
 0x5be   :  { %3643 = vmatprep.mubr.bf16.mxu1 %v19412_v34 }
 0x5bf   :  { %v3524_v49 = vpop.permute.xlu0 %3523  ;;  %v3534_v41 = vpop.permute.xlu1 %3533  ;;  %v3554_v39 = vpack.c.bf16 %v3550_v43, %v3546_v53 }
 0x5c0   :  { %v3542_v23 = vsel %vm853_vm7, %v3524_v49, %v3528_v16  ;;  %v3537_v63 = vsel %vm853_vm7, %v3530_v62, %v3534_v41  ;;  %v3543_v17 = vsel %vm853_vm7, %v3534_v41, %v3522_v10 }
 0x5c1   :  { %v3549_v14 = vmul.f32 %v3542_v23, %v16316_v38  ;;  %3568 = vmatprep.subr.bf16.mxu0 %v3554_v39  ;;  %v15534_v38 = vld [vmem:[%s19420_s10 + $0x40] sm:$0xff]   ;;  %v3547_v44 = vmul.f32 %v3537_v63, %v16324_v47  ;;  %v3548_v45 = vmul.f32 %v3543_v17, %v16310_v33 }
 0x5c3   :  { %v3553_v22 = vpack.c.bf16 %v3549_v14, %v3545_v13  ;;  %v3536_v30 = vpop.permute.xlu0 %3535  ;;  %v2867_v54 = vpop.permute.xlu1 %2866 }
 0x5c4   :  { %v3538_v31 = vsel %vm853_vm7, %v3532_v60, %v3536_v30  ;;  %v3544_v11 = vsel %vm853_vm7, %v3536_v30, %v3524_v49 }
 0x5c5   :  { %v3551_v18 = vmul.f32 %v3538_v31, %v16324_v47  ;;  %v3552_v21 = vmul.f32 %v3544_v11, %v16310_v33  ;;  %3569 = vmatpush1.bf16.msra.mxu0 %v3553_v22 }
 0x5c7   :  { %v3555_v36 = vpack.c.bf16 %v3551_v18, %v3547_v44  ;;  %v2869_v26 = vpop.permute.xlu0 %2868  ;;  %v2871_v2 = vpop.permute.xlu1 %2870  ;;  %v3556_v37 = vpack.c.bf16 %v3552_v21, %v3548_v45 }
 0x5c8   :  { %13081 = vmatmul.mubr.msk.bf16.vlgmr.msra.gmra.mrb[8].mxu0 %vm1596_vm11, %v15534_v38  ;;  %v2886_v4 = vsel %vm90_vm8, %v2867_v54, %v2871_v2 }
 0x5c9   :  { %3611 = vmatprep.subr.bf16.mxu1 %v3556_v37  ;;  %3694 = vmatprep.mubr.bf16.mxu0 %v19412_v34  ;;  %v2891_v33 = vmul.f32 %v2886_v4, %v16336_v58 }
 0x5ca   :  { %3612 = vmatpush1.bf16.msra.mxu1 %v3555_v36 }
 0x5cb   :  { %v2873_v55 = vpop.permute.xlu0 %2872  ;;  %v2879_v3 = vpop.permute.xlu1 %2878 }
 0x5cc   :  { %v2887_v47 = vsel %vm90_vm8, %v2869_v26, %v2873_v55  ;;  %v2888_v56 = vsel %vm90_vm8, %v2879_v3, %v2867_v54 }
 0x5cd   :  { %v2895_v51 = vmul.f32 %v2887_v47, %v16336_v58  ;;  %13082 = vmatmul.mubr.msk.bf16.vlgmr.msra.gmra.mrb[8].mxu1 %vm1596_vm11, %v15534_v38  ;;  %v2890_v16 = vmul.f32 %v2888_v56, %v16364_v40 }
 0x5ce   :  { %3737 = vmatprep.mubr.bf16.mxu1 %v19412_v34 }
 0x5cf   :  { %v2881_v15 = vpop.permute.xlu0 %2880  ;;  %v2875_v12 = vpop.permute.xlu1 %2874  ;;  %v2899_v24 = vpack.c.bf16 %v2895_v51, %v2891_v33 }
 0x5d0   :  { %v2889_v61 = vsel %vm90_vm8, %v2881_v15, %v2869_v26  ;;  %v2882_v58 = vsel %vm90_vm8, %v2875_v12, %v2879_v3  ;;  %v2884_v5 = vsel %vm90_vm8, %v2871_v2, %v2875_v12 }
 0x5d1   :  { %v2894_v62 = vmul.f32 %v2889_v61, %v16364_v40  ;;  %3662 = vmatprep.subr.bf16.mxu0 %v2899_v24  ;;  %v15535_v40 = vld [vmem:[%s19420_s10] sm:$0xff]   ;;  %v2892_v43 = vmul.f32 %v2884_v5, %v16367_v42  ;;  %v2893_v32 = vmul.f32 %v2882_v58, %v16347_v7 }
 0x5d3   :  { %v2898_v20 = vpack.c.bf16 %v2894_v62, %v2890_v16  ;;  %v2877_v60 = vpop.permute.xlu0 %2876  ;;  %v3038_v10 = vpop.permute.xlu1 %3037 }
 0x5d4   :  { %v2883_v52 = vsel %vm90_vm8, %v2877_v60, %v2881_v15  ;;  %v2885_v53 = vsel %vm90_vm8, %v2873_v55, %v2877_v60  ;;  %v3210_v55 = vpack.c.bf16 %v16977_v27, %v16967_v25  ;;  %v3209_v25 = vpack.c.bf16 %v16969_v48, %v16963_v35 }
 0x5d5   :  { %v2896_v49 = vmul.f32 %v2885_v53, %v16367_v42  ;;  %v2897_v41 = vmul.f32 %v2883_v52, %v16347_v7  ;;  %3663 = vmatpush1.bf16.msra.mxu0 %v2898_v20  ;;  %v3212_v27 = vpack.c.bf16 %v16985_v6, %v16975_v59  ;;  %v3211_v35 = vpack.c.bf16 %v16991_v8, %v16983_v19  ;;  %v15537_v19 = vld [vmem:[%s19420_s10 + $0x20] sm:$0xff]  }
 0x5d7   :  { %v2900_v39 = vpack.c.bf16 %v2896_v49, %v2892_v43  ;;  %v3040_v23 = vpop.permute.xlu0 %3039  ;;  %v3042_v13 = vpop.permute.xlu1 %3041  ;;  %v2901_v14 = vpack.c.bf16 %v2897_v41, %v2893_v32 }
 0x5d8   :  { %13084 = vmatmul.mubr.msk.bf16.vlgmr.msra.gmra.mrb[8].mxu0 %vm1596_vm11, %v15535_v40  ;;  %v3057_v63 = vsel %vm293_vm9, %v3038_v10, %v3042_v13 }
 0x5d9   :  { %3705 = vmatprep.subr.bf16.mxu1 %v2901_v14  ;;  %3788 = vmatprep.mubr.bf16.mxu0 %v19412_v34  ;;  %v3062_v7 = vmul.f32 %v3057_v63, %v16375_v50 }
 0x5da   :  { %3706 = vmatpush1.bf16.msra.mxu1 %v2900_v39 }
 0x5db   :  { %v3044_v17 = vpop.permute.xlu0 %3043  ;;  %v3050_v22 = vpop.permute.xlu1 %3049 }
 0x5dc   :  { %v3058_v42 = vsel %vm293_vm9, %v3040_v23, %v3044_v17  ;;  %v3059_v54 = vsel %vm293_vm9, %v3050_v22, %v3038_v10 }
 0x5dd   :  { %v3066_v30 = vmul.f32 %v3058_v42, %v16375_v50  ;;  %13085 = vmatmul.mubr.msk.bf16.vlgmr.msra.gmra.mrb[8].mxu1 %vm1596_vm11, %v15535_v40  ;;  %v3061_v45 = vmul.f32 %v3059_v54, %v16399_v28 }
 0x5de   :  { %3831 = vmatprep.mubr.bf16.mxu1 %v19412_v34 }
 0x5df   :  { %v3052_v31 = vpop.permute.xlu0 %3051  ;;  %v3046_v11 = vpop.permute.xlu1 %3045  ;;  %v3070_v38 = vpack.c.bf16 %v3066_v30, %v3062_v7 }
 0x5e0   :  { %v3060_v44 = vsel %vm293_vm9, %v3052_v31, %v3040_v23  ;;  %v3053_v50 = vsel %vm293_vm9, %v3046_v11, %v3050_v22  ;;  %v3055_v21 = vsel %vm293_vm9, %v3042_v13, %v3046_v11 }
 0x5e1   :  { %v3065_v18 = vmul.f32 %v3060_v44, %v16399_v28  ;;  %3756 = vmatprep.subr.bf16.mxu0 %v3070_v38  ;;  %v15536_v28 = vld [vmem:[%s19420_s10 + $0x10] sm:$0xff]   ;;  %v3063_v3 = vmul.f32 %v3055_v21, %v16402_v29  ;;  %v3064_v47 = vmul.f32 %v3053_v50, %v16379_v57  ;;  %s19377_s10 = smov 7  }
 0x5e3   :  { %v3069_v36 = vpack.c.bf16 %v3065_v18, %v3061_v45  ;;  %v3048_v26 = vpop.permute.xlu0 %3047  ;;  %v3354_v2 = vpop.permute.xlu1 %3353 }
 0x5e4   :  { %v3054_v37 = vsel %vm293_vm9, %v3048_v26, %v3052_v31  ;;  %v3056_v4 = vsel %vm293_vm9, %v3044_v17, %v3048_v26 }
 0x5e5   :  { %v3067_v33 = vmul.f32 %v3056_v4, %v16402_v29  ;;  %v3068_v51 = vmul.f32 %v3054_v37, %v16379_v57  ;;  %3757 = vmatpush1.bf16.msra.mxu0 %v3069_v36 }
 0x5e6   :  { %3850 = vmatprep.subr.bf16.mxu0 %v3210_v55 }
 0x5e7   :  { %v3071_v56 = vpack.c.bf16 %v3067_v33, %v3063_v3  ;;  %v3356_v15 = vpop.permute.xlu0 %3355  ;;  %v3358_v12 = vpop.permute.xlu1 %3357  ;;  %v3072_v24 = vpack.c.bf16 %v3068_v51, %v3064_v47  ;;  %v13097_v3 = vld [vmem:[%s19395_s1 + $0x120] sm:$0xff] }
 0x5e8   :  { %13087 = vmatmul.mubr.msk.bf16.vlgmr.msra.gmra.mrb[8].mxu0 %vm1596_vm11, %v15536_v28  ;;  %v3367_v29 = vsel %vm653_vm10, %v3354_v2, %v3358_v12 }
 0x5e9   :  { %3799 = vmatprep.subr.bf16.mxu1 %v3072_v24  ;;  %3851 = vmatpush1.bf16.msra.mxu0 %v3209_v25  ;;  %v3374_v48 = vmul.f32 %v3367_v29, %v19415_v1 }
 0x5ea   :  { %3800 = vmatpush1.bf16.msra.mxu1 %v3071_v56  ;;  %3882 = vmatprep.mubr.bf16.mxu0 %v19412_v34 }
 0x5eb   :  { %3893 = vmatprep.subr.bf16.mxu1 %v3212_v27  ;;  %v3360_v57 = vpop.permute.xlu0 %3359  ;;  %v3350_v61 = vpop.permute.xlu1 %3349 }
 0x5ec   :  { %v3368_v16 = vsel %vm653_vm10, %v3356_v15, %v3360_v57  ;;  %v3369_v59 = vsel %vm653_vm10, %v3350_v61, %v3354_v2 }
 0x5ed   :  { %v3378_v62 = vmul.f32 %v3368_v16, %v19415_v1  ;;  %13088 = vmatmul.mubr.msk.bf16.vlgmr.msra.gmra.mrb[8].mxu1 %vm1596_vm11, %v15536_v28  ;;  %v3373_v1 = vmul.f32 %v3369_v59, %v19416_v46  ;;  %v13098_v28 = vld [vmem:[%s19395_s1 + $0x128] sm:$0xff] }
 0x5ee   :  { %3894 = vmatpush1.bf16.msra.mxu1 %v3211_v35  ;;  %3925 = vmatprep.mubr.bf16.mxu1 %v19412_v34 }
 0x5ef   :  { %v3352_v6 = vpop.permute.xlu0 %3351  ;;  %v3362_v58 = vpop.permute.xlu1 %3361  ;;  %v3382_v5 = vpack.c.bf16 %v3378_v62, %v3374_v48 }
 0x5f0   :  { %v3370_v20 = vsel %vm653_vm10, %v3352_v6, %v3356_v15  ;;  %v3365_v60 = vsel %vm653_vm10, %v3358_v12, %v3362_v58  ;;  %v3371_v10 = vsel %vm653_vm10, %v3362_v58, %v3350_v61 }
 0x5f1   :  { %v3377_v8 = vmul.f32 %v3370_v20, %v19416_v46  ;;  %3944 = vmatprep.subr.bf16.mxu0 %v3382_v5  ;;  %v3375_v40 = vmul.f32 %v3365_v60, %v19417_v0  ;;  %v19421_v46 = vld [vmem:[#allocation4_spill] sm:$0xff] }
 0x5f2   :  { %v3376_v49 = vmul.f32 %v3371_v10, %v19421_v46 }
 0x5f3   :  { %v3381_v52 = vpack.c.bf16 %v3377_v8, %v3373_v1  ;;  %v3364_v53 = vpop.permute.xlu0 %3363 }
 0x5f4   :  { %v3366_v43 = vsel %vm653_vm10, %v3360_v57, %v3364_v53  ;;  %v3372_v32 = vsel %vm653_vm10, %v3364_v53, %v3352_v6  ;;  %13090 = vmatmul.mubr.msk.bf16.vlgmr.msra.gmra.mrb[8].mxu0 %vm1596_vm11, %v15537_v19  ;;  %v13100_v53 = vld [vmem:[%s19395_s1 + $0x148] sm:$0xff] }
 0x5f5   :  { %v3379_v41 = vmul.f32 %v3366_v43, %v19417_v0  ;;  %v3380_v39 = vmul.f32 %v3372_v32, %v19421_v46  ;;  %3945 = vmatpush1.bf16.msra.mxu0 %v3381_v52  ;;  %3976 = vmatprep.mubr.bf16.mxu0 %v19412_v34  ;;  %v13099_v52 = vld [vmem:[%s19395_s1 + $0x140] sm:$0xff] }
 0x5f6   :  { %v15540_v43 = vld [vmem:[%s19422_s28 + $0xc0] sm:$0xff]  }
 0x5f7   :  { %v3383_v23 = vpack.c.bf16 %v3379_v41, %v3375_v40  ;;  %v3384_v13 = vpack.c.bf16 %v3380_v39, %v3376_v49  ;;  %v15539_v40 = vld [vmem:[%s19422_s28 + $0x40] sm:$0xff]   ;;  %v15543_v49 = vld [vmem:[%s19422_s28 + $0x48] sm:$0xff]  }
 0x5f8   :  { %13847 = vmatprep.subr.bf16.mxu0 %v15539_v40  ;;  %v15541_v32 = vld [vmem:[%s19422_s28] sm:$0xff]   ;;  %v15544_v41 = vld [vmem:[%s19422_s28 + $0xc8] sm:$0xff]  }
 0x5f9   :  { %13091 = vmatmul.mubr.msk.bf16.vlgmr.msra.gmra.mrb[8].mxu1 %vm1596_vm11, %v15537_v19  ;;  %3987 = vmatprep.subr.bf16.mxu1 %v3384_v13  ;;  %v15542_v46 = vld [vmem:[%s19422_s28 + $0x80] sm:$0xff]   ;;  %v15545_v39 = vld [vmem:[%s19422_s28 + $0x8] sm:$0xff]   ;;  %v15547_v13 = vld [vmem:[%s19422_s28 + $0x50] sm:$0xff]  }
 0x5fa   :  { %3988 = vmatpush1.bf16.msra.mxu1 %v3383_v23  ;;  %4019 = vmatprep.mubr.bf16.mxu1 %v19412_v34  ;;  %v15546_v23 = vld [vmem:[%s19422_s28 + $0x88] sm:$0xff]  }
 0x5fb   :  { %13869 = vmatprep.subr.bf16.mxu1 %v15540_v43 }
 0x600   :  { %13093 = vmatmul.mubr.msk.bf16.vlgmr.msra.gmra.mrb[8].mxu0 %vm1596_vm11, %v15538_v9 }
 0x601   :  { %v4068_v14 = vpop.permute.xlu1 %4067  ;;  %13848 = vmatpush3.bf16.msra.mxu0 %v15541_v32 }
 0x602   :  { %13849 = vmatprep.subr.bf16.mxu0 %v15543_v49 }
 0x604   :  { %v4073_v7 = vpop.permute.xlu0 %4072 }
 0x605   :  { %13094 = vmatmul.mubr.msk.bf16.vlgmr.msra.gmra.mrb[8].mxu1 %vm1596_vm11, %v15538_v9  ;;  %13850 = vmatpush3.bf16.msra.mxu0 %v15545_v39  ;;  %v15548_v9 = vld [vmem:[%s19422_s28 + $0xd0] sm:$0xff]   ;;  %v19424_v39 = vld [vmem:[#allocation9_spill] sm:$0xff] }
 0x606   :  { %13870 = vmatpush3.bf16.msra.mxu1 %v15542_v46  ;;  %13851 = vmatprep.subr.bf16.mxu0 %v15547_v13  ;;  %v19425_v13 = vld [vmem:[#allocation11_spill] sm:$0xff] }
 0x607   :  { %13871 = vmatprep.subr.bf16.mxu1 %v15544_v41  ;;  %v19423_v41 = vld [vmem:[#allocation7_spill] sm:$0xff] }
 0x60a   :  { %13872 = vmatpush3.bf16.msra.mxu1 %v15546_v23 }
 0x60b   :  { %13873 = vmatprep.subr.bf16.mxu1 %v15548_v9 }
 0x6d3   :  { %v3978_v0 = vpop.f32.mrb[8].mxu0 }
 0x6d4   :  { %v3980_v63 = vpop.f32.mrb[9].mxu0  ;;  %v4075_v17 = vadd.f32 %v4068_v14, %v3978_v0  ;;  %v15549_v0 = vld [vmem:[%s19422_s28 + $0x10] sm:$0xff]  }
 0x6d5   :  { %v4076_v22 = vadd.f32 %v4068_v14, %v3980_v63  ;;  %v3982_v42 = vpop.f32.mrb[10].mxu0  ;;  %13852 = vmatpush3.bf16.msra.mxu0 %v15549_v0  ;;  %v15551_v63 = vld [vmem:[%s19422_s28 + $0x58] sm:$0xff]   ;;  %v19426_v0 = vld [vmem:[#allocation8_spill] sm:$0xff] }
 0x6d6   :  { %v3984_v30 = vpop.f32.mrb[11].mxu0  ;;  %v4079_v54 = vadd.f32 %v4073_v7, %v3982_v42  ;;  %13853 = vmatprep.subr.bf16.mxu0 %v15551_v63  ;;  %v15554_v42 = vld [vmem:[%s19422_s28 + $0x98] sm:$0xff]   ;;  %v19427_v63 = vld [vmem:[#allocation10_spill] sm:$0xff] }
 0x6d7   :  { %v4080_v31 = vadd.f32 %v4073_v7, %v3984_v30  ;;  %v4089_v34 = vadd.f32 %v4076_v22, %v4075_v17  ;;  %v15556_v30 = vld [vmem:[%s19422_s28 + $0xe0] sm:$0xff]  }
 0x6d8   :  { %v4021_v11 = vpop.f32.mrb[8].mxu1 }
 0x6d9   :  { %v4077_v38 = vadd.f32 %v4068_v14, %v4021_v11  ;;  %v4023_v44 = vpop.f32.mrb[9].mxu1  ;;  %v4094_v50 = vadd.f32 %v4080_v31, %v4079_v54  ;;  %v15559_v11 = vld [vmem:[%s19422_s28 + $0x68] sm:$0xff]  }
 0x6da   :  { %v4078_v45 = vadd.f32 %v4068_v14, %v4023_v44  ;;  %v4025_v18 = vpop.f32.mrb[10].mxu1  ;;  %v15550_v14 = vld [vmem:[%s19422_s28 + $0x90] sm:$0xff]   ;;  %v15562_v44 = vld [vmem:[%s19422_s28 + $0xa8] sm:$0xff]  }
 0x6db   :  { %v4090_v21 = vadd.f32 %v4089_v34, %v4077_v38  ;;  %v4081_v36 = vadd.f32 %v4073_v7, %v4025_v18  ;;  %v4027_v26 = vpop.f32.mrb[11].mxu1  ;;  %13874 = vmatpush3.bf16.msra.mxu1 %v15550_v14  ;;  %v15560_v34 = vld [vmem:[%s19422_s28 + $0xe8] sm:$0xff]   ;;  %v15564_v18 = vld [vmem:[%s19422_s28 + $0xf0] sm:$0xff]  }
 0x6dc   :  { %v4082_v2 = vadd.f32 %v4073_v7, %v4027_v26  ;;  %v15555_v7 = vld [vmem:[%s19422_s28 + $0x60] sm:$0xff]   ;;  %v15568_v26 = vld [vmem:[%s19422_s28 + $0xf8] sm:$0xff]  }
 0x6dd   :  { %v4091_v37 = vadd.f32 %v4090_v21, %v4078_v45  ;;  %v4095_v4 = vadd.f32 %v4094_v50, %v4081_v36  ;;  %v15565_v50 = vld [vmem:[%s19422_s28 + $0x30] sm:$0xff]  }
 0x6de   :  { %v15566_v21 = vld [vmem:[%s19422_s28 + $0xb0] sm:$0xff]  }
 0x6df   :  { %v4096_v55 = vadd.f32 %v4095_v4, %v4082_v2  ;;  %4092 = vadd.xlane.f32.xlu1 %v4091_v37  ;;  %v15570_v37 = vld [vmem:[%s19422_s28 + $0xb8] sm:$0xff]  }
 0x6e1   :  { %4097 = vadd.xlane.f32.xlu0 %v4096_v55 }
 0x6f0   :  { %4148 = vperm.xlu1 %15509, %v13098_v28  }
 0x6f7   :  { %4143 = vperm.xlu0 %15508, %v13097_v3  }
 0x76c   :  { %v4093_v47 = vpop.xlane.xlu1 %4092 }
 0x76d   :  { %v4099_v33 = vmul.f32 0.001953125, %v4093_v47 }
 0x76e   :  { %v4098_v51 = vpop.xlane.xlu0 %4097 }
 0x76f   :  { %v17380_v56 = vsub.f32 %v4075_v17, %v4099_v33  ;;  %v17382_v15 = vsub.f32 %v4076_v22, %v4099_v33  ;;  %v4100_v12 = vmul.f32 0.001953125, %v4098_v51  ;;  %v17384_v24 = vsub.f32 %v4077_v38, %v4099_v33  ;;  %v15552_v17 = vld [vmem:[%s19422_s28 + $0xd8] sm:$0xff]   ;;  %v15561_v38 = vld [vmem:[%s19422_s28 + $0x28] sm:$0xff]  }
 0x770   :  { %v17394_v61 = vsub.f32 %v4078_v45, %v4099_v33  ;;  %v15553_v22 = vld [vmem:[%s19422_s28 + $0x18] sm:$0xff]   ;;  %13875 = vmatprep.subr.bf16.mxu1 %v15552_v17  ;;  %v15563_v45 = vld [vmem:[%s19422_s28 + $0x70] sm:$0xff]   ;;  %v4149_v55 = vpop.permute.xlu1 %4148 }
 0x771   :  { %v17386_v25 = vsub.f32 %v4079_v54, %v4100_v12  ;;  %v17388_v27 = vsub.f32 %v4080_v31, %v4100_v12  ;;  %v17390_v29 = vsub.f32 %v4081_v36, %v4100_v12  ;;  %v4109_v57 = vmul.f32 %v17380_v56, %v17380_v56  ;;  %13854 = vmatpush3.bf16.msra.mxu0 %v15553_v22  ;;  %v15557_v54 = vld [vmem:[%s19422_s28 + $0x20] sm:$0xff]   ;;  %v15567_v36 = vld [vmem:[%s19422_s28 + $0x78] sm:$0xff]   ;;  %v19428_v22 = vld [vmem:[#allocation12_spill] sm:$0xff] }
 0x772   :  { %v4110_v16 = vmul.f32 %v17382_v15, %v17382_v15  ;;  %v17398_v35 = vsub.f32 %v4082_v2, %v4100_v12  ;;  %v4111_v59 = vmul.f32 %v17384_v24, %v17384_v24  ;;  %v4112_v20 = vmul.f32 %v17394_v61, %v17394_v61  ;;  %13876 = vmatpush3.bf16.msra.mxu1 %v15554_v42  ;;  %v15558_v31 = vld [vmem:[%s19422_s28 + $0xa0] sm:$0xff]   ;;  %v15569_v2 = vld [vmem:[%s19422_s28 + $0x38] sm:$0xff]  }
 0x773   :  { %v4113_v48 = vmul.f32 %v17386_v25, %v17386_v25  ;;  %v4114_v62 = vmul.f32 %v17388_v27, %v17388_v27  ;;  %v4115_v58 = vmul.f32 %v17390_v29, %v17390_v29  ;;  %13855 = vmatprep.subr.bf16.mxu0 %v15555_v7  ;;  %13877 = vmatprep.subr.bf16.mxu1 %v15556_v30 }
 0x774   :  { %v4117_v6 = vadd.f32 %v4110_v16, %v4109_v57  ;;  %v4116_v1 = vmul.f32 %v17398_v35, %v17398_v35 }
 0x775   :  { %v4122_v5 = vadd.f32 %v4114_v62, %v4113_v48  ;;  %13856 = vmatpush3.bf16.msra.mxu0 %v15557_v54  ;;  %v19429_v54 = vld [vmem:[#allocation13_spill] sm:$0xff] }
 0x776   :  { %v4118_v19 = vadd.f32 %v4117_v6, %v4111_v59  ;;  %13878 = vmatpush3.bf16.msra.mxu1 %v15558_v31  ;;  %13857 = vmatprep.subr.bf16.mxu0 %v15559_v11  ;;  %v4144_v4 = vpop.permute.xlu0 %4143 }
 0x777   :  { %v4123_v8 = vadd.f32 %v4122_v5, %v4115_v58  ;;  %13879 = vmatprep.subr.bf16.mxu1 %v15560_v34 }
 0x778   :  { %v4119_v60 = vadd.f32 %v4118_v19, %v4112_v20 }
 0x779   :  { %v4124_v10 = vadd.f32 %v4123_v8, %v4116_v1  ;;  %13858 = vmatpush3.bf16.msra.mxu0 %v15561_v38  ;;  %v19430_v38 = vld [vmem:[#allocation14_spill] sm:$0xff] }
 0x77a   :  { %4120 = vadd.xlane.f32.xlu0 %v4119_v60  ;;  %13880 = vmatpush3.bf16.msra.mxu1 %v15562_v44 }
 0x77b   :  { %4125 = vadd.xlane.f32.xlu1 %v4124_v10  ;;  %13859 = vmatprep.subr.bf16.mxu0 %v15563_v45 }
 0x77c   :  { %13881 = vmatprep.subr.bf16.mxu1 %v15564_v18 }
 0x77d   :  { %13860 = vmatpush3.bf16.msra.mxu0 %v15565_v50 }
 0x77e   :  { %13882 = vmatpush3.bf16.msra.mxu1 %v15566_v21  ;;  %13861 = vmatprep.subr.bf16.mxu0 %v15567_v36 }
 0x77f   :  { %13883 = vmatprep.subr.bf16.mxu1 %v15568_v26 }
 0x781   :  { %13862 = vmatpush3.bf16.msra.mxu0 %v15569_v2 }
 0x782   :  { %13884 = vmatpush3.bf16.msra.mxu1 %v15570_v37 }
 0x78c   :  { %4161 = vperm.xlu1 %15509, %v13099_v52  }
 0x790   :  { %4166 = vperm.xlu0 %15508, %v13100_v53  }
 0x807   :  { %v4121_v28 = vpop.xlane.xlu0 %4120 }
 0x808   :  { %v4127_v3 = vmul.f32 0.001953125, %v4121_v28  ;;  %v4126_v47 = vpop.xlane.xlu1 %4125 }
 0x809   :  { %v4128_v33 = vmul.f32 0.001953125, %v4126_v47 }
 0x80a   :  { %v4129_v51 = vadd.f32 1e-05, %v4127_v3 }
 0x80b   :  { %v4130_v12 = vadd.f32 1e-05, %v4128_v33 }
 0x80c   :  { %15771 = vrsqrt.f32 %v4129_v51  ;;  %v4162_v52 = vpop.permute.xlu1 %4161 }
 0x80d   :  { %15773 = vrsqrt.f32 %v4130_v12 }
 0x816   :  { %v15772_v57 = vpop.eup %15771 }
 0x817   :  { %v15774_v16 = vpop.eup %15773  ;;  %v4133_v48 = vmul.f32 %v15772_v57, %v17380_v56  ;;  %v4134_v62 = vmul.f32 %v15772_v57, %v17382_v15  ;;  %v4135_v59 = vmul.f32 %v15772_v57, %v17384_v24  ;;  %v4136_v6 = vmul.f32 %v15772_v57, %v17394_v61 }
 0x818   :  { %v4137_v58 = vmul.f32 %v15774_v16, %v17386_v25  ;;  %v4138_v5 = vmul.f32 %v15774_v16, %v17388_v27  ;;  %v4139_v20 = vmul.f32 %v15774_v16, %v17390_v29  ;;  %v4140_v19 = vmul.f32 %v15774_v16, %v17398_v35  ;;  %v4167_v25 = vpop.permute.xlu0 %4166 }
 0x819   :  { %v4151_v1 = vmul.f32 %v4144_v4, %v4133_v48  ;;  %v4152_v8 = vmul.f32 %v4144_v4, %v4134_v62  ;;  %v4153_v60 = vmul.f32 %v4144_v4, %v4135_v59  ;;  %v4154_v10 = vmul.f32 %v4144_v4, %v4136_v6 }
 0x81a   :  { %v4155_v56 = vmul.f32 %v4149_v55, %v4137_v58  ;;  %v4156_v53 = vmul.f32 %v4149_v55, %v4138_v5  ;;  %v4157_v15 = vmul.f32 %v4149_v55, %v4139_v20  ;;  %v4158_v40 = vmul.f32 %v4149_v55, %v4140_v19 }
 0x81b   :  { %v4169_v24 = vadd.f32 %v4162_v52, %v4151_v1  ;;  %v4170_v43 = vadd.f32 %v4162_v52, %v4152_v8  ;;  %v4171_v61 = vadd.f32 %v4162_v52, %v4153_v60  ;;  %v4172_v32 = vadd.f32 %v4162_v52, %v4154_v10 }
 0x81c   :  { %v4173_v46 = vadd.f32 %v4167_v25, %v4155_v56  ;;  %v4174_v27 = vadd.f32 %v4167_v25, %v4156_v53  ;;  %v4175_v49 = vadd.f32 %v4167_v25, %v4157_v15  ;;  %v4176_v29 = vadd.f32 %v4167_v25, %v4158_v40 }
 0x81d   :  { %v4177_v35 = vadd.f32 %v4169_v24, %v19423_v41  ;;  %v4179_v23 = vadd.f32 %v4171_v61, %v19424_v39  ;;  %v4178_v9 = vadd.f32 %v4170_v43, %v19425_v13  ;;  %v4180_v31 = vadd.f32 %v4172_v32, %v19429_v54  ;;  %v13218_v54 = vld [vmem:[%s19395_s1 + $0x30] sm:$0xff] }
 0x81e   :  { %v4181_v14 = vadd.f32 %v4173_v46, %v19426_v0  ;;  %v4183_v17 = vadd.f32 %v4175_v49, %v19427_v63  ;;  %v4182_v42 = vadd.f32 %v4174_v27, %v19428_v22  ;;  %v4184_v44 = vadd.f32 %v4176_v29, %v19430_v38 }
 0x81f   :  { %v4185_v7 = vmul.f32 0.5, %v4177_v35  ;;  %v4187_v30 = vmul.f32 0.5, %v4179_v23  ;;  %v4186_v45 = vmul.f32 0.5, %v4178_v9  ;;  %v4188_v50 = vmul.f32 0.5, %v4180_v31 }
 0x820   :  { %v4189_v11 = vmul.f32 0.5, %v4181_v14  ;;  %v4191_v34 = vmul.f32 0.5, %v4183_v17  ;;  %v4190_v18 = vmul.f32 0.5, %v4182_v42  ;;  %v4192_v21 = vmul.f32 0.5, %v4184_v44 }
 0x821   :  { %15775 = vtanh.f32 %v4185_v7  ;;  %v13216_v7 = vld [vmem:[%s19395_s1 + $0x20] sm:$0xff] }
 0x822   :  { %15777 = vtanh.f32 %v4187_v30  ;;  %v13217_v30 = vld [vmem:[%s19395_s1 + $0x28] sm:$0xff] }
 0x823   :  { %15779 = vtanh.f32 %v4189_v11  ;;  %v17567_v11 = vld [vmem:[%s19332_s2 + $0x1] ss:$0 sm:$0xff] }
 0x824   :  { %15781 = vtanh.f32 %v4191_v34 }
 0x825   :  { %15783 = vtanh.f32 %v4186_v45 }
 0x826   :  { %15785 = vtanh.f32 %v4190_v18  ;;  %v17574_v18 = vld [vmem:[%s19332_s2 + $0x3] ss:$0 sm:$0xff] }
 0x827   :  { %15787 = vtanh.f32 %v4188_v50 }
 0x828   :  { %15789 = vtanh.f32 %v4192_v21 }
 0x82b   :  { %v15776_v36 = vpop.eup %15775 }
 0x82c   :  { %v15778_v26 = vpop.eup %15777  ;;  %v4201_v2 = vmul.f32 0.5, %v15776_v36 }
 0x82d   :  { %v15780_v37 = vpop.eup %15779  ;;  %v4203_v28 = vmul.f32 0.5, %v15778_v26 }
 0x82e   :  { %v15782_v4 = vpop.eup %15781  ;;  %v4205_v55 = vmul.f32 0.5, %v15780_v37  ;;  %v4209_v12 = vadd.f32 0.5, %v4201_v2  ;;  %v15572_v37 = vld [vmem:[%s19331_s12 + $0x18] sm:$0xff]  }
 0x82f   :  { %v15784_v3 = vpop.eup %15783  ;;  %v4207_v47 = vmul.f32 0.5, %v15782_v4  ;;  %v4211_v20 = vadd.f32 0.5, %v4203_v28  ;;  %v17584_v4 = vld [vmem:[%s19332_s2 + $0x5] ss:$0 sm:$0xff]  ;;  %v15573_v28 = vld [vmem:[%s19331_s12 + $0x30] sm:$0xff]  }
 0x830   :  { %v15786_v33 = vpop.eup %15785  ;;  %v4202_v51 = vmul.f32 0.5, %v15784_v3  ;;  %v4213_v57 = vadd.f32 0.5, %v4205_v55  ;;  %v4217_v60 = vmul.f32 %v4209_v12, %v4177_v35 }
 0x831   :  { %v15788_v16 = vpop.eup %15787  ;;  %v4206_v48 = vmul.f32 0.5, %v15786_v33  ;;  %v4215_v62 = vadd.f32 0.5, %v4207_v47  ;;  %v4219_v40 = vmul.f32 %v4211_v20, %v4179_v23  ;;  %v15571_v23 = vld [vmem:[%s19331_s12 + $0x10] sm:$0xff]  }
 0x832   :  { %v15790_v59 = vpop.eup %15789  ;;  %v4210_v6 = vadd.f32 0.5, %v4202_v51  ;;  %v4204_v58 = vmul.f32 0.5, %v15788_v16  ;;  %v4221_v5 = vmul.f32 %v4213_v57, %v4181_v14  ;;  %v17596_v16 = vld [vmem:[%s19332_s2 + $0x7] ss:$0 sm:$0xff] }
 0x833   :  { %v4214_v19 = vadd.f32 0.5, %v4206_v48  ;;  %v4208_v1 = vmul.f32 0.5, %v15790_v59  ;;  %v4223_v10 = vmul.f32 %v4215_v62, %v4183_v17  ;;  %v15574_v59 = vld [vmem:[%s19331_s12 + $0x38] sm:$0xff]  }
 0x834   :  { %v4212_v8 = vadd.f32 0.5, %v4204_v58  ;;  %v4218_v52 = vmul.f32 %v4210_v6, %v4178_v9  ;;  %v4225_v15 = vpack.c.bf16 %v4221_v5, %v4217_v60  ;;  %v15575_v6 = vld [vmem:[%s19331_s12 + $0x50] sm:$0xff]   ;;  %v15576_v60 = vld [vmem:[%s19331_s12 + $0x58] sm:$0xff]  }
 0x835   :  { %v4222_v56 = vmul.f32 %v4214_v19, %v4182_v42  ;;  %v4216_v53 = vadd.f32 0.5, %v4208_v1  ;;  %v4227_v32 = vpack.c.bf16 %v4223_v10, %v4219_v40  ;;  %v17611_v19 = vld [vmem:[%s19332_s2 + $0x8] ss:$0 sm:$0xff]  ;;  %v15577_v10 = vld [vmem:[%s19331_s12 + $0x70] sm:$0xff]  }
 0x836   :  { %v4220_v43 = vmul.f32 %v4212_v8, %v4180_v31  ;;  %v13219_v31 = vld [vmem:[%s19395_s1 + $0x38] sm:$0xff] }
 0x837   :  { %v4226_v24 = vpack.c.bf16 %v4222_v56, %v4218_v52  ;;  %v4224_v61 = vmul.f32 %v4216_v53, %v4184_v44 }
 0x839   :  { %4517 = vmatprep.mubr.bf16.mxu0 %v4226_v24  ;;  %v4228_v25 = vpack.c.bf16 %v4224_v61, %v4220_v43  ;;  %v15578_v43 = vld [vmem:[%s19331_s12 + $0x78] sm:$0xff]   ;;  %v15579_v61 = vld [vmem:[%s19331_s12 + $0x80] sm:$0xff]  }
 0x83a   :  { %4518 = vmatmul.mubr.bf16.vlgmr.msra.gmra.mrb[12].mxu0 %v4225_v15  ;;  %v17626_v15 = vld [vmem:[%s19332_s2] ss:$0 sm:$0xff] }
 0x83b   :  { %4558 = vmatprep.mubr.bf16.mxu1 %v4228_v25  ;;  %14280 = vmatprep.mubr.msk.bf16.mxu0 %vm1596_vm11, %v15571_v23 }
 0x83c   :  { %4559 = vmatmul.mubr.bf16.vlgmr.msra.gmra.mrb[12].mxu1 %v4227_v32 }
 0x90d   :  { %v13863_v46 = vpop.f32.mrb[12].mxu0 }
 0x90e   :  { %v13864_v27 = vpop.f32.mrb[13].mxu0 }
 0x90f   :  { %v13885_v49 = vpop.f32.mrb[12].mxu1  ;;  %v13865_v29 = vadd.f32 %v13864_v27, %v13863_v46  ;;  %v13866_v41 = vpop.f32.mrb[14].mxu0  ;;  %v17641_v27 = vld [vmem:[%s19332_s2 + $0x2] ss:$0 sm:$0xff] }
 0x910   :  { %v13886_v35 = vpop.f32.mrb[13].mxu1  ;;  %v13867_v39 = vpop.f32.mrb[15].mxu0 }
 0x911   :  { %v13887_v13 = vadd.f32 %v13886_v35, %v13885_v49  ;;  %v13888_v9 = vpop.f32.mrb[14].mxu1  ;;  %v13868_v0 = vadd.f32 %v13867_v39, %v13866_v41  ;;  %v15580_v41 = vld [vmem:[%s19331_s12 + $0x88] sm:$0xff]   ;;  %v15581_v35 = vld [vmem:[%s19331_s12] sm:$0xff]  }
 0x912   :  { %v13889_v14 = vpop.f32.mrb[15].mxu1 }
 0x913   :  { %v4561_v63 = vadd.f32 %v13887_v13, %v13865_v29  ;;  %v13890_v17 = vadd.f32 %v13889_v14, %v13888_v9  ;;  %v15582_v9 = vld [vmem:[%s19331_s12 + $0x8] sm:$0xff]   ;;  %v17665_v14 = vld [vmem:[%s19332_s2 + $0x6] ss:$0 sm:$0xff] }
 0x915   :  { %v4564_v22 = vadd.f32 %v13890_v17, %v13868_v0  ;;  %4585 = vrot.lane.b32.xlu1 %v4561_v63, %s15932_s27  ;;  %v15583_v0 = vld [vmem:[%s19331_s12 + $0x20] sm:$0xff]  }
 0x917   :  { %4587 = vrot.lane.b32.xlu0 %v4564_v22, %s15932_s27  ;;  %v17536_v42 = vpack.c.bf16 %v4564_v22, %v4561_v63 }
 0x919   :  { %4690 = vrot.lane.b32.xlu1 %v4561_v63, %s15924_s23 }
 0x91b   :  { %4692 = vrot.lane.b32.xlu0 %v4564_v22, %s15924_s23 }
 0x91d   :  { %4781 = vrot.lane.b32.xlu1 %v4561_v63, %s15925_s9 }
 0x91f   :  { %4783 = vrot.lane.b32.xlu0 %v4564_v22, %s15925_s9 }
 0x921   :  { %4886 = vrot.lane.b32.xlu1 %v4561_v63, %s19385_s8 }
 0x923   :  { %4888 = vrot.lane.b32.xlu0 %v4564_v22, %s19385_s8 }
 0x925   :  { %4971 = vrot.lane.b32.xlu1 %v4561_v63, %s19381_s29 }
 0x927   :  { %4973 = vrot.lane.b32.xlu0 %v4564_v22, %s19381_s29 }
 0x929   :  { %4567 = vrot.lane.b32.xlu1 %v4561_v63, %s19379_s30 }
 0x92b   :  { %4569 = vrot.lane.b32.xlu0 %v4564_v22, %s19379_s30  ;;  %s19432_s30 = smov 7  }
 0x92d   :  { %4670 = vrot.lane.b32.xlu1 %v4561_v63, %s19377_s10 }
 0x92f   :  { %4672 = vrot.lane.b32.xlu0 %v4564_v22, %s19377_s10  ;;  %s19434_s10 = smov 121  }
 0x931   :  { %4866 = vrot.lane.b32.xlu1 %v4561_v63, %s19383_s0 }
 0x933   :  { %4868 = vrot.lane.b32.xlu0 %v4564_v22, %s19383_s0  ;;  %v15584_v22 = vld [vmem:[%s19331_s12 + $0x28] sm:$0xff]  }
 0x935   :  { %5339 = vperm.xlu1 %15509, %v13216_v7   ;;  %v15585_v7 = vld [vmem:[%s19331_s12 + $0x40] sm:$0xff]  }
 0x937   :  { %5344 = vperm.xlu0 %15508, %v13217_v30  }
 0x939   :  { %5349 = vperm.xlu1 %15509, %v13218_v54  }
 0x93b   :  { %5354 = vperm.xlu0 %15508, %v13219_v31   ;;  %v15586_v31 = vld [vmem:[%s19331_s12 + $0x48] sm:$0xff]  }
 0x987   :  { %v4586_v34 = vpop.permute.xlu1 %4585 }
 0x988   :  { %v4597_v44 = vmul.f32 %v17567_v11, %v4586_v34  ;;  %v15587_v34 = vld [vmem:[%s19331_s12 + $0x60] sm:$0xff]  }
 0x989   :  { %v4588_v38 = vpop.permute.xlu0 %4587 }
 0x98a   :  { %v4598_v45 = vmul.f32 %v17567_v11, %v4588_v38 }
 0x98b   :  { %v4691_v50 = vpop.permute.xlu1 %4690 }
 0x98c   :  { %v4599_v21 = vpack.c.bf16 %v4598_v45, %v4597_v44  ;;  %v4702_v26 = vmul.f32 %v17574_v18, %v4691_v50 }
 0x98d   :  { %v4693_v36 = vpop.permute.xlu0 %4692 }
 0x98e   :  { %v4703_v2 = vmul.f32 %v17574_v18, %v4693_v36  ;;  %14278 = vmatprep.subr.bf16.mxu0 %v4599_v21 }
 0x98f   :  { %14279 = vmatpush3.bf16.msra.mxu0 %v4599_v21  ;;  %v4782_v55 = vpop.permute.xlu1 %4781 }
 0x990   :  { %v4704_v3 = vpack.c.bf16 %v4703_v2, %v4702_v26  ;;  %v4793_v33 = vmul.f32 %v17584_v4, %v4782_v55 }
 0x991   :  { %v4784_v47 = vpop.permute.xlu0 %4783 }
 0x992   :  { %v4794_v51 = vmul.f32 %v17584_v4, %v4784_v47  ;;  %14281 = vmatmul.mubr.msk.bf16.vlgmr.msra.gmra.mrb[16].mxu0 %vm1596_vm11, %v15572_v37  ;;  %14284 = vmatprep.subr.bf16.mxu0 %v4704_v3 }
 0x993   :  { %14285 = vmatpush3.bf16.msra.mxu0 %v4704_v3  ;;  %14286 = vmatprep.mubr.msk.bf16.mxu0 %vm1596_vm11, %v15573_v28  ;;  %v4887_v48 = vpop.permute.xlu1 %4886 }
 0x994   :  { %v4795_v12 = vpack.c.bf16 %v4794_v51, %v4793_v33  ;;  %v4898_v58 = vmul.f32 %v17596_v16, %v4887_v48 }
 0x995   :  { %v4889_v57 = vpop.permute.xlu0 %4888 }
 0x996   :  { %14290 = vmatprep.subr.bf16.mxu0 %v4795_v12  ;;  %v4899_v62 = vmul.f32 %v17596_v16, %v4889_v57 }
 0x997   :  { %v4972_v1 = vpop.permute.xlu1 %4971 }
 0x998   :  { %v4900_v5 = vpack.c.bf16 %v4899_v62, %v4898_v58  ;;  %v4983_v52 = vmul.f32 %v17611_v19, %v4972_v1 }
 0x999   :  { %v4974_v20 = vpop.permute.xlu0 %4973 }
 0x99a   :  { %v4984_v8 = vmul.f32 %v17611_v19, %v4974_v20 }
 0x99b   :  { %v4568_v40 = vpop.permute.xlu1 %4567 }
 0x99c   :  { %v4985_v56 = vpack.c.bf16 %v4984_v8, %v4983_v52  ;;  %v4578_v32 = vmul.f32 %v17626_v15, %v4568_v40  ;;  %v15589_v52 = vld [vmem:[%s19333_s13 + $0x10] sm:$0xff]  }
 0x99d   :  { %v4570_v53 = vpop.permute.xlu0 %4569  ;;  %14336 = vmatprep.mubr.msk.bf16.mxu1 %vm5428_vm12, %v15589_v52 }
 0x99e   :  { %14287 = vmatmul.mubr.msk.bf16.vlgmr.msra.gmra.mrb[16].mxu0 %vm1596_vm11, %v15574_v59  ;;  %v4579_v24 = vmul.f32 %v17626_v15, %v4570_v53 }
 0x99f   :  { %14291 = vmatpush3.bf16.msra.mxu0 %v4795_v12  ;;  %14292 = vmatprep.mubr.msk.bf16.mxu0 %vm1596_vm11, %v15575_v6  ;;  %v4671_v49 = vpop.permute.xlu1 %4670 }
 0x9a0   :  { %14296 = vmatprep.subr.bf16.mxu0 %v4900_v5  ;;  %v4580_v25 = vpack.c.bf16 %v4579_v24, %v4578_v32  ;;  %v4682_v39 = vmul.f32 %v17641_v27, %v4671_v49  ;;  %v13290_v32 = vld [vmem:[%s19395_s1 + $0x170] sm:$0xff] }
 0x9a1   :  { %v4673_v46 = vpop.permute.xlu0 %4672 }
 0x9a2   :  { %v4683_v29 = vmul.f32 %v17641_v27, %v4673_v46 }
 0x9a3   :  { %v4867_v63 = vpop.permute.xlu1 %4866 }
 0x9a4   :  { %v4684_v13 = vpack.c.bf16 %v4683_v29, %v4682_v39  ;;  %v4878_v30 = vmul.f32 %v17665_v14, %v4867_v63 }
 0x9a5   :  { %v4869_v23 = vpop.permute.xlu0 %4868 }
 0x9a6   :  { %v4879_v17 = vmul.f32 %v17665_v14, %v4869_v23 }
 0x9a8   :  { %v4880_v54 = vpack.c.bf16 %v4879_v17, %v4878_v30  ;;  %v15590_v30 = vld [vmem:[%s19333_s13 + $0x18] sm:$0xff]  }
 0x9aa   :  { %14293 = vmatmul.mubr.msk.bf16.vlgmr.msra.gmra.mrb[16].mxu0 %vm1596_vm11, %v15576_v60 }
 0x9ab   :  { %14297 = vmatpush3.bf16.msra.mxu0 %v4900_v5  ;;  %14298 = vmatprep.mubr.msk.bf16.mxu0 %vm1596_vm11, %v15577_v10 }
 0x9ac   :  { %14302 = vmatprep.subr.bf16.mxu0 %v4985_v56 }
 0x9b4   :  { %v5340_v38 = vpop.permute.xlu1 %5339 }
 0x9b6   :  { %14299 = vmatmul.mubr.msk.bf16.vlgmr.msra.gmra.mrb[16].mxu0 %vm1596_vm11, %v15578_v43  ;;  %v5345_v44 = vpop.permute.xlu0 %5344  ;;  %v13288_v43 = vld [vmem:[%s19395_s1 + $0x160] sm:$0xff] }
 0x9b7   :  { %14303 = vmatpush3.bf16.msra.mxu0 %v4985_v56  ;;  %14304 = vmatprep.mubr.msk.bf16.mxu0 %vm1596_vm11, %v15579_v61  ;;  %v13289_v61 = vld [vmem:[%s19395_s1 + $0x168] sm:$0xff] }
 0x9b8   :  { %14308 = vmatprep.subr.bf16.mxu0 %v4580_v25  ;;  %v5350_v45 = vpop.permute.xlu1 %5349 }
 0x9ba   :  { %v5355_v26 = vpop.permute.xlu0 %5354 }
 0x9c2   :  { %14305 = vmatmul.mubr.msk.bf16.vlgmr.msra.gmra.mrb[16].mxu0 %vm1596_vm11, %v15580_v41 }
 0x9c3   :  { %14309 = vmatpush3.bf16.msra.mxu0 %v4580_v25  ;;  %14310 = vmatprep.mubr.msk.bf16.mxu0 %vm1596_vm11, %v15581_v35  ;;  %v13291_v25 = vld [vmem:[%s19395_s1 + $0x178] sm:$0xff] }
 0x9c4   :  { %14314 = vmatprep.subr.bf16.mxu0 %v4684_v13 }
 0x9ce   :  { %14311 = vmatmul.mubr.msk.bf16.vlgmr.msra.gmra.mrb[16].mxu0 %vm1596_vm11, %v15582_v9 }
 0x9cf   :  { %14315 = vmatpush3.bf16.msra.mxu0 %v4684_v13  ;;  %14316 = vmatprep.mubr.msk.bf16.mxu0 %vm1596_vm11, %v15583_v0 }
 0x9d0   :  { %14320 = vmatprep.subr.bf16.mxu0 %v17536_v42 }
 0x9da   :  { %14317 = vmatmul.mubr.msk.bf16.vlgmr.msra.gmra.mrb[16].mxu0 %vm1596_vm11, %v15584_v22 }
 0x9db   :  { %14321 = vmatpush3.bf16.msra.mxu0 %v17536_v42  ;;  %14322 = vmatprep.mubr.msk.bf16.mxu0 %vm1596_vm11, %v15585_v7  ;;  %v15588_v42 = vld [vmem:[%s19331_s12 + $0x68] sm:$0xff]  }
 0x9dc   :  { %14326 = vmatprep.subr.bf16.mxu0 %v4880_v54 }
 0x9e6   :  { %14323 = vmatmul.mubr.msk.bf16.vlgmr.msra.gmra.mrb[16].mxu0 %vm1596_vm11, %v15586_v31 }
 0x9e7   :  { %14327 = vmatpush3.bf16.msra.mxu0 %v4880_v54  ;;  %14328 = vmatprep.mubr.msk.bf16.mxu0 %vm1596_vm11, %v15587_v34 }
 0x9f2   :  { %14329 = vmatmul.mubr.msk.bf16.vlgmr.msra.gmra.mrb[16].mxu0 %vm1596_vm11, %v15588_v42 }
 0xac5   :  { %v14330_v50 = vpop.f32.mrb[16].mxu0 }
 0xac6   :  { %v5359_v21 = vadd.f32 %v14330_v50, %v5350_v45  ;;  %v5301_v36 = vpop.f32.mrb[17].mxu0 }
 0xac7   :  { %v5357_v2 = vadd.f32 %v5340_v38, %v5301_v36  ;;  %v14331_v37 = vpop.f32.mrb[18].mxu0 }
 0xac8   :  { %v5363_v55 = vmul.f32 0.5, %v5359_v21  ;;  %v5360_v28 = vadd.f32 %v14331_v37, %v5355_v26  ;;  %v5304_v3 = vpop.f32.mrb[19].mxu0 }
 0xac9   :  { %v5361_v47 = vmul.f32 0.5, %v5357_v2  ;;  %v5358_v33 = vadd.f32 %v5345_v44, %v5304_v3 }
 0xaca   :  { %15791 = vtanh.f32 %v5363_v55  ;;  %v5364_v51 = vmul.f32 0.5, %v5360_v28 }
 0xacb   :  { %15793 = vtanh.f32 %v5361_v47  ;;  %v5362_v12 = vmul.f32 0.5, %v5358_v33  ;;  %v15593_v47 = vld [vmem:[%s19333_s13 + $0x50] sm:$0xff]  }
 0xacc   :  { %15795 = vtanh.f32 %v5364_v51 }
 0xacd   :  { %15797 = vtanh.f32 %v5362_v12 }
 0xad4   :  { %v15792_v57 = vpop.eup %15791 }
 0xad5   :  { %v15794_v48 = vpop.eup %15793  ;;  %v5371_v59 = vmul.f32 0.5, %v15792_v57 }
 0xad6   :  { %v15796_v62 = vpop.eup %15795  ;;  %v5369_v6 = vmul.f32 0.5, %v15794_v48 }
 0xad7   :  { %v15798_v58 = vpop.eup %15797  ;;  %v5372_v20 = vmul.f32 0.5, %v15796_v62  ;;  %v5375_v8 = vadd.f32 0.5, %v5371_v59 }
 0xad8   :  { %v5373_v5 = vadd.f32 0.5, %v5369_v6  ;;  %v5370_v1 = vmul.f32 0.5, %v15798_v58  ;;  %v15594_v6 = vld [vmem:[%s19333_s13 + $0x58] sm:$0xff]  }
 0xad9   :  { %v5376_v56 = vadd.f32 0.5, %v5372_v20  ;;  %v17700_v40 = vmul.f32 %v5375_v8, %v5359_v21 }
 0xada   :  { %v17690_v60 = vmul.f32 %v5373_v5, %v5357_v2  ;;  %v5374_v10 = vadd.f32 0.5, %v5370_v1  ;;  %v15595_v5 = vld [vmem:[%s19333_s13 + $0x70] sm:$0xff]  }
 0xadb   :  { %v17704_v24 = vmul.f32 %v5376_v56, %v5360_v28  ;;  %v15592_v28 = vld [vmem:[%s19333_s13 + $0x38] sm:$0xff]  }
 0xadc   :  { %v17695_v53 = vmul.f32 %v5374_v10, %v5358_v33  ;;  %5399 = vrot.lane.b32.xlu1 %v17690_v60, %s15932_s27 }
 0xade   :  { %5401 = vrot.lane.b32.xlu0 %v17695_v53, %s15932_s27 }
 0xae0   :  { %5403 = vrot.lane.b32.xlu1 %v17700_v40, %s15932_s27 }
 0xae2   :  { %5405 = vrot.lane.b32.xlu0 %v17704_v24, %s15932_s27 }
 0xae4   :  { %5503 = vrot.lane.b32.xlu1 %v17690_v60, %s15924_s23 }
 0xae6   :  { %5505 = vrot.lane.b32.xlu0 %v17695_v53, %s15924_s23 }
 0xae8   :  { %5507 = vrot.lane.b32.xlu1 %v17700_v40, %s15924_s23 }
 0xaea   :  { %5509 = vrot.lane.b32.xlu0 %v17704_v24, %s15924_s23 }
 0xaec   :  { %5594 = vrot.lane.b32.xlu1 %v17690_v60, %s15925_s9 }
 0xaee   :  { %5596 = vrot.lane.b32.xlu0 %v17695_v53, %s15925_s9 }
 0xaf0   :  { %5598 = vrot.lane.b32.xlu1 %v17700_v40, %s15925_s9 }
 0xaf2   :  { %5600 = vrot.lane.b32.xlu0 %v17704_v24, %s15925_s9 }
 0xaf4   :  { %5697 = vrot.lane.b32.xlu1 %v17690_v60, %s19385_s8 }
 0xaf6   :  { %5699 = vrot.lane.b32.xlu0 %v17695_v53, %s19385_s8 }
 0xaf8   :  { %5701 = vrot.lane.b32.xlu1 %v17700_v40, %s19385_s8 }
 0xafa   :  { %5703 = vrot.lane.b32.xlu0 %v17704_v24, %s19385_s8 }
 0xafc   :  { %5781 = vrot.lane.b32.xlu1 %v17690_v60, %s19381_s29 }
 0xafe   :  { %5783 = vrot.lane.b32.xlu0 %v17695_v53, %s19381_s29 }
 0xb00   :  { %5785 = vrot.lane.b32.xlu1 %v17700_v40, %s19381_s29 }
 0xb02   :  { %5787 = vrot.lane.b32.xlu0 %v17704_v24, %s19381_s29  ;;  %s19433_s29 = smov 119  }
 0xb04   :  { %5381 = vrot.lane.b32.xlu1 %v17690_v60, %s19431_s25 }
 0xb06   :  { %5383 = vrot.lane.b32.xlu0 %v17695_v53, %s19431_s25 }
 0xb08   :  { %5385 = vrot.lane.b32.xlu1 %v17700_v40, %s19431_s25 }
 0xb0a   :  { %5387 = vrot.lane.b32.xlu0 %v17704_v24, %s19431_s25 }
 0xb0c   :  { %5484 = vrot.lane.b32.xlu1 %v17690_v60, %s19432_s30 }
 0xb0e   :  { %5486 = vrot.lane.b32.xlu0 %v17695_v53, %s19432_s30 }
 0xb10   :  { %5488 = vrot.lane.b32.xlu1 %v17700_v40, %s19432_s30 }
 0xb12   :  { %5490 = vrot.lane.b32.xlu0 %v17704_v24, %s19432_s30 }
 0xb14   :  { %5678 = vrot.lane.b32.xlu1 %v17690_v60, %s19383_s0 }
 0xb16   :  { %5680 = vrot.lane.b32.xlu0 %v17695_v53, %s19383_s0 }
 0xb18   :  { %5682 = vrot.lane.b32.xlu1 %v17700_v40, %s19383_s0 }
 0xb1a   :  { %5684 = vrot.lane.b32.xlu0 %v17704_v24, %s19383_s0 }
 0xb1c   :  { %6148 = vperm.xlu1 %15509, %v13288_v43  }
 0xb1e   :  { %6153 = vperm.xlu0 %15508, %v13289_v61  }
 0xb20   :  { %6158 = vperm.xlu1 %15509, %v13290_v32  }
 0xb22   :  { %6163 = vperm.xlu0 %15508, %v13291_v25  }
 0xb4e   :  { %v5400_v46 = vpop.permute.xlu1 %5399 }
 0xb4f   :  { %v5407_v29 = vmul.f32 %v17567_v11, %v5400_v46  ;;  %v15597_v46 = vld [vmem:[%s19333_s13 + $0x80] sm:$0xff]  }
 0xb50   :  { %v5402_v49 = vpop.permute.xlu0 %5401 }
 0xb51   :  { %v5408_v41 = vmul.f32 %v17567_v11, %v5402_v49 }
 0xb52   :  { %v5404_v35 = vpop.permute.xlu1 %5403 }
 0xb53   :  { %v5411_v39 = vpack.c.bf16 %v5408_v41, %v5407_v29  ;;  %v5409_v9 = vmul.f32 %v17567_v11, %v5404_v35 }
 0xb54   :  { %v5406_v13 = vpop.permute.xlu0 %5405 }
 0xb55   :  { %v5410_v0 = vmul.f32 %v17567_v11, %v5406_v13  ;;  %14332 = vmatprep.subr.bf16.mxu1 %v5411_v39  ;;  %v15591_v11 = vld [vmem:[%s19333_s13 + $0x30] sm:$0xff]  }
 0xb56   :  { %v5504_v23 = vpop.permute.xlu1 %5503  ;;  %14333 = vmatpush3.bf16.msra.mxu1 %v5411_v39 }
 0xb57   :  { %v5412_v63 = vpack.c.bf16 %v5410_v0, %v5409_v9  ;;  %v5511_v22 = vmul.f32 %v17574_v18, %v5504_v23 }
 0xb58   :  { %v5506_v17 = vpop.permute.xlu0 %5505 }
 0xb59   :  { %v5512_v7 = vmul.f32 %v17574_v18, %v5506_v17  ;;  %14334 = vmatprep.subr.bf16.mxu1 %v5412_v63  ;;  %v15599_v17 = vld [vmem:[%s19333_s13] sm:$0xff]  }
 0xb5a   :  { %v5508_v54 = vpop.permute.xlu1 %5507  ;;  %14335 = vmatpush3.bf16.msra.mxu1 %v5412_v63 }
 0xb5b   :  { %v5515_v31 = vpack.c.bf16 %v5512_v7, %v5511_v22  ;;  %v5513_v42 = vmul.f32 %v17574_v18, %v5508_v54 }
 0xb5c   :  { %v5510_v34 = vpop.permute.xlu0 %5509 }
 0xb5d   :  { %v5514_v38 = vmul.f32 %v17574_v18, %v5510_v34  ;;  %14337 = vmatmul.mubr.msk.bf16.vlgmr.msra.gmra.mrb[16].mxu1 %vm5428_vm12, %v15590_v30  ;;  %14340 = vmatprep.subr.bf16.mxu1 %v5515_v31 }
 0xb5e   :  { %v5595_v44 = vpop.permute.xlu1 %5594  ;;  %14341 = vmatpush3.bf16.msra.mxu1 %v5515_v31  ;;  %14344 = vmatprep.mubr.msk.bf16.mxu1 %vm5428_vm12, %v15591_v11 }
 0xb5f   :  { %v5516_v45 = vpack.c.bf16 %v5514_v38, %v5513_v42  ;;  %v5602_v21 = vmul.f32 %v17584_v4, %v5595_v44  ;;  %v15601_v44 = vld [vmem:[%s19333_s13 + $0x20] sm:$0xff]  }
 0xb60   :  { %v5597_v50 = vpop.permute.xlu0 %5596 }
 0xb61   :  { %v5603_v36 = vmul.f32 %v17584_v4, %v5597_v50  ;;  %14342 = vmatprep.subr.bf16.mxu1 %v5516_v45 }
 0xb62   :  { %v5599_v26 = vpop.permute.xlu1 %5598  ;;  %14343 = vmatpush3.bf16.msra.mxu1 %v5516_v45 }
 0xb63   :  { %v5606_v2 = vpack.c.bf16 %v5603_v36, %v5602_v21  ;;  %v5604_v18 = vmul.f32 %v17584_v4, %v5599_v26  ;;  %v5587_v21 = vpack.c.bf16 %v17695_v53, %v17690_v60  ;;  %v15602_v36 = vld [vmem:[%s19333_s13 + $0x28] sm:$0xff]  }
 0xb64   :  { %v5601_v37 = vpop.permute.xlu0 %5600 }
 0xb65   :  { %v5605_v55 = vmul.f32 %v17584_v4, %v5601_v37  ;;  %14348 = vmatprep.subr.bf16.mxu1 %v5606_v2 }
 0xb66   :  { %v5698_v3 = vpop.permute.xlu1 %5697 }
 0xb67   :  { %v5607_v33 = vpack.c.bf16 %v5605_v55, %v5604_v18  ;;  %v5705_v12 = vmul.f32 %v17596_v16, %v5698_v3  ;;  %v5588_v18 = vpack.c.bf16 %v17704_v24, %v17700_v40 }
 0xb68   :  { %v5700_v51 = vpop.permute.xlu0 %5699 }
 0xb69   :  { %v5706_v57 = vmul.f32 %v17596_v16, %v5700_v51  ;;  %14345 = vmatmul.mubr.msk.bf16.vlgmr.msra.gmra.mrb[16].mxu1 %vm5428_vm12, %v15592_v28  ;;  %v15604_v51 = vld [vmem:[%s19333_s13 + $0x48] sm:$0xff]  }
 0xb6a   :  { %14349 = vmatpush3.bf16.msra.mxu1 %v5606_v2  ;;  %14352 = vmatprep.mubr.msk.bf16.mxu1 %vm5428_vm12, %v15593_v47  ;;  %v5702_v62 = vpop.permute.xlu1 %5701 }
 0xb6b   :  { %v5709_v4 = vpack.c.bf16 %v5706_v57, %v5705_v12  ;;  %14350 = vmatprep.subr.bf16.mxu1 %v5607_v33  ;;  %v5707_v20 = vmul.f32 %v17596_v16, %v5702_v62  ;;  %v15605_v12 = vld [vmem:[%s19333_s13 + $0x60] sm:$0xff]  }
 0xb6c   :  { %v5704_v48 = vpop.permute.xlu0 %5703 }
 0xb6d   :  { %v5708_v59 = vmul.f32 %v17596_v16, %v5704_v48  ;;  %v15596_v16 = vld [vmem:[%s19333_s13 + $0x78] sm:$0xff]   ;;  %v15606_v48 = vld [vmem:[%s19333_s13 + $0x68] sm:$0xff]  }
 0xb6e   :  { %14351 = vmatpush3.bf16.msra.mxu1 %v5607_v33  ;;  %v5782_v1 = vpop.permute.xlu1 %5781 }
 0xb6f   :  { %14356 = vmatprep.subr.bf16.mxu1 %v5709_v4  ;;  %v5710_v8 = vpack.c.bf16 %v5708_v59, %v5707_v20  ;;  %v5789_v52 = vmul.f32 %v17611_v19, %v5782_v1 }
 0xb70   :  { %v5784_v58 = vpop.permute.xlu0 %5783 }
 0xb71   :  { %v5790_v10 = vmul.f32 %v17611_v19, %v5784_v58 }
 0xb72   :  { %v5786_v61 = vpop.permute.xlu1 %5785 }
 0xb73   :  { %v5793_v43 = vpack.c.bf16 %v5790_v10, %v5789_v52  ;;  %v5791_v49 = vmul.f32 %v17611_v19, %v5786_v61  ;;  %v13296_v61 = vld [vmem:[%s19395_s1 + $0x1a0] sm:$0xff] }
 0xb74   :  { %v5788_v56 = vpop.permute.xlu0 %5787 }
 0xb75   :  { %14353 = vmatmul.mubr.msk.bf16.vlgmr.msra.gmra.mrb[16].mxu1 %vm5428_vm12, %v15594_v6  ;;  %v5792_v32 = vmul.f32 %v17611_v19, %v5788_v56  ;;  %v15598_v19 = vld [vmem:[%s19333_s13 + $0x88] sm:$0xff]  }
 0xb76   :  { %14357 = vmatpush3.bf16.msra.mxu1 %v5709_v4  ;;  %14360 = vmatprep.mubr.msk.bf16.mxu1 %vm5428_vm12, %v15595_v5  ;;  %v5382_v29 = vpop.permute.xlu1 %5381 }
 0xb77   :  { %14358 = vmatprep.subr.bf16.mxu1 %v5710_v8  ;;  %v5794_v41 = vpack.c.bf16 %v5792_v32, %v5791_v49  ;;  %v5389_v39 = vmul.f32 %v17626_v15, %v5382_v29  ;;  %v13292_v32 = vld [vmem:[%s19395_s1 + $0x180] sm:$0xff] }
 0xb78   :  { %v5384_v25 = vpop.permute.xlu0 %5383 }
 0xb79   :  { %v5390_v35 = vmul.f32 %v17626_v15, %v5384_v25  ;;  %v13297_v25 = vld [vmem:[%s19395_s1 + $0x1a8] sm:$0xff] }
 0xb7a   :  { %14359 = vmatpush3.bf16.msra.mxu1 %v5710_v8  ;;  %v5386_v0 = vpop.permute.xlu1 %5385 }
 0xb7b   :  { %14364 = vmatprep.subr.bf16.mxu1 %v5793_v43  ;;  %v5393_v9 = vpack.c.bf16 %v5390_v35, %v5389_v39  ;;  %v5391_v22 = vmul.f32 %v17626_v15, %v5386_v0 }
 0xb7c   :  { %v5388_v13 = vpop.permute.xlu0 %5387 }
 0xb7d   :  { %v5392_v23 = vmul.f32 %v17626_v15, %v5388_v13  ;;  %v15600_v15 = vld [vmem:[%s19333_s13 + $0x8] sm:$0xff]  }
 0xb7e   :  { %v5485_v7 = vpop.permute.xlu1 %5484 }
 0xb7f   :  { %v5394_v30 = vpack.c.bf16 %v5392_v23, %v5391_v22  ;;  %v5492_v11 = vmul.f32 %v17641_v27, %v5485_v7 }
 0xb80   :  { %v5487_v63 = vpop.permute.xlu0 %5486 }
 0xb81   :  { %14361 = vmatmul.mubr.msk.bf16.vlgmr.msra.gmra.mrb[16].mxu1 %vm5428_vm12, %v15596_v16  ;;  %v5493_v54 = vmul.f32 %v17641_v27, %v5487_v63  ;;  %v13294_v16 = vld [vmem:[%s19395_s1 + $0x190] sm:$0xff] }
 0xb82   :  { %14365 = vmatpush3.bf16.msra.mxu1 %v5793_v43  ;;  %14368 = vmatprep.mubr.msk.bf16.mxu1 %vm5428_vm12, %v15597_v46  ;;  %v5489_v42 = vpop.permute.xlu1 %5488  ;;  %v13293_v43 = vld [vmem:[%s19395_s1 + $0x188] sm:$0xff]  ;;  %v13295_v46 = vld [vmem:[%s19395_s1 + $0x198] sm:$0xff] }
 0xb83   :  { %14366 = vmatprep.subr.bf16.mxu1 %v5794_v41  ;;  %v5496_v31 = vpack.c.bf16 %v5493_v54, %v5492_v11  ;;  %v5494_v45 = vmul.f32 %v17641_v27, %v5489_v42  ;;  %v13298_v11 = vld [vmem:[%s19395_s1 + $0x1b0] sm:$0xff] }
 0xb84   :  { %v5491_v34 = vpop.permute.xlu0 %5490 }
 0xb85   :  { %v5495_v38 = vmul.f32 %v17641_v27, %v5491_v34  ;;  %v15603_v27 = vld [vmem:[%s19333_s13 + $0x40] sm:$0xff]  }
 0xb86   :  { %14367 = vmatpush3.bf16.msra.mxu1 %v5794_v41  ;;  %v5679_v2 = vpop.permute.xlu1 %5678 }
 0xb87   :  { %14372 = vmatprep.subr.bf16.mxu1 %v5393_v9  ;;  %v5497_v50 = vpack.c.bf16 %v5495_v38, %v5494_v45  ;;  %v5686_v55 = vmul.f32 %v17665_v14, %v5679_v2 }
 0xb88   :  { %v5681_v26 = vpop.permute.xlu0 %5680 }
 0xb89   :  { %v5687_v37 = vmul.f32 %v17665_v14, %v5681_v26 }
 0xb8a   :  { %v5683_v47 = vpop.permute.xlu1 %5682 }
 0xb8b   :  { %v5690_v28 = vpack.c.bf16 %v5687_v37, %v5686_v55  ;;  %v5688_v57 = vmul.f32 %v17665_v14, %v5683_v47 }
 0xb8c   :  { %v5685_v3 = vpop.permute.xlu0 %5684 }
 0xb8d   :  { %14369 = vmatmul.mubr.msk.bf16.vlgmr.msra.gmra.mrb[16].mxu1 %vm5428_vm12, %v15598_v19  ;;  %v5689_v33 = vmul.f32 %v17665_v14, %v5685_v3 }
 0xb8e   :  { %14373 = vmatpush3.bf16.msra.mxu1 %v5393_v9  ;;  %14376 = vmatprep.mubr.msk.bf16.mxu1 %vm5428_vm12, %v15599_v17 }
 0xb8f   :  { %14374 = vmatprep.subr.bf16.mxu1 %v5394_v30  ;;  %v5691_v4 = vpack.c.bf16 %v5689_v33, %v5688_v57 }
 0xb92   :  { %14375 = vmatpush3.bf16.msra.mxu1 %v5394_v30 }
 0xb93   :  { %14380 = vmatprep.subr.bf16.mxu1 %v5496_v31 }
 0xb99   :  { %14377 = vmatmul.mubr.msk.bf16.vlgmr.msra.gmra.mrb[16].mxu1 %vm5428_vm12, %v15600_v15 }
 0xb9a   :  { %14381 = vmatpush3.bf16.msra.mxu1 %v5496_v31  ;;  %14384 = vmatprep.mubr.msk.bf16.mxu1 %vm5428_vm12, %v15601_v44  ;;  %v13299_v31 = vld [vmem:[%s19395_s1 + $0x1b8] sm:$0xff] }
 0xb9b   :  { %14382 = vmatprep.subr.bf16.mxu1 %v5497_v50  ;;  %v6149_v6 = vpop.permute.xlu1 %6148 }
 0xb9d   :  { %v6154_v62 = vpop.permute.xlu0 %6153 }
 0xb9e   :  { %14383 = vmatpush3.bf16.msra.mxu1 %v5497_v50 }
 0xb9f   :  { %14388 = vmatprep.subr.bf16.mxu1 %v5587_v21  ;;  %v6159_v52 = vpop.permute.xlu1 %6158 }
 0xba1   :  { %v6164_v8 = vpop.permute.xlu0 %6163 }
 0xba5   :  { %14385 = vmatmul.mubr.msk.bf16.vlgmr.msra.gmra.mrb[16].mxu1 %vm5428_vm12, %v15602_v36 }
 0xba6   :  { %14389 = vmatpush3.bf16.msra.mxu1 %v5587_v21  ;;  %14392 = vmatprep.mubr.msk.bf16.mxu1 %vm5428_vm12, %v15603_v27 }
 0xba7   :  { %14390 = vmatprep.subr.bf16.mxu1 %v5588_v18 }
 0xbaa   :  { %14391 = vmatpush3.bf16.msra.mxu1 %v5588_v18 }
 0xbab   :  { %14396 = vmatprep.subr.bf16.mxu1 %v5690_v28 }
 0xbb1   :  { %14393 = vmatmul.mubr.msk.bf16.vlgmr.msra.gmra.mrb[16].mxu1 %vm5428_vm12, %v15604_v51 }
 0xbb2   :  { %14397 = vmatpush3.bf16.msra.mxu1 %v5690_v28  ;;  %14400 = vmatprep.mubr.msk.bf16.mxu1 %vm5428_vm12, %v15605_v12 }
 0xbb3   :  { %14398 = vmatprep.subr.bf16.mxu1 %v5691_v4 }
 0xbb6   :  { %14399 = vmatpush3.bf16.msra.mxu1 %v5691_v4 }
 0xbbd   :  { %14401 = vmatmul.mubr.msk.bf16.vlgmr.msra.gmra.mrb[16].mxu1 %vm5428_vm12, %v15606_v48 }
 0xc90   :  { %v14402_v59 = vpop.f32.mrb[16].mxu1 }
 0xc91   :  { %v6110_v58 = vpop.f32.mrb[17].mxu1  ;;  %v6168_v56 = vadd.f32 %v14402_v59, %v6159_v52 }
 0xc92   :  { %v6166_v5 = vadd.f32 %v6149_v6, %v6110_v58  ;;  %v14403_v14 = vpop.f32.mrb[18].mxu1 }
 0xc93   :  { %v6113_v20 = vpop.f32.mrb[19].mxu1  ;;  %v6169_v10 = vadd.f32 %v14403_v14, %v6164_v8 }
 0xc94   :  { %v6167_v1 = vadd.f32 %v6154_v62, %v6113_v20  ;;  %6180 = vadd.xlane.f32.xlu1 %v6166_v5 }
 0xc96   :  { %6182 = vadd.xlane.f32.xlu0 %v6167_v1 }
 0xc98   :  { %6186 = vadd.xlane.f32.xlu1 %v6169_v10 }
 0xc9a   :  { %6184 = vadd.xlane.f32.xlu0 %v6168_v56 }
 0xca9   :  { %6231 = vperm.xlu1 %15509, %v13293_v43  }
 0xcad   :  { %6250 = vperm.xlu1 %15509, %v13296_v61  }
 0xcb0   :  { %6226 = vperm.xlu0 %15508, %v13292_v32  }
 0xcb1   :  { %6236 = vperm.xlu1 %15509, %v13294_v16  }
 0xcb4   :  { %6255 = vperm.xlu0 %15508, %v13297_v25  }
 0xcb8   :  { %6241 = vperm.xlu0 %15508, %v13295_v46  }
 0xd21   :  { %v6181_v49 = vpop.xlane.xlu1 %6180 }
 0xd22   :  { %v6188_v9 = vmul.f32 0.0078125, %v6181_v49 }
 0xd23   :  { %v6183_v29 = vpop.xlane.xlu0 %6182 }
 0xd24   :  { %v6189_v35 = vmul.f32 0.0078125, %v6183_v29  ;;  %v6192_v22 = vsub.f32 %v6166_v5, %v6188_v9 }
 0xd25   :  { %v6187_v41 = vpop.xlane.xlu1 %6186 }
 0xd26   :  { %v6191_v39 = vmul.f32 0.0078125, %v6187_v41  ;;  %v6193_v19 = vsub.f32 %v6167_v1, %v6189_v35  ;;  %v6196_v54 = vmul.f32 %v6192_v22, %v6192_v22 }
 0xd27   :  { %v6185_v13 = vpop.xlane.xlu0 %6184 }
 0xd28   :  { %v6195_v0 = vsub.f32 %v6169_v10, %v6191_v39  ;;  %v6190_v23 = vmul.f32 0.0078125, %v6185_v13  ;;  %v6197_v30 = vmul.f32 %v6193_v19, %v6193_v19 }
 0xd29   :  { %v6232_v34 = vpop.permute.xlu1 %6231 }
 0xd2a   :  { %v6194_v63 = vsub.f32 %v6168_v56, %v6190_v23  ;;  %v6199_v17 = vmul.f32 %v6195_v0, %v6195_v0 }
 0xd2c   :  { %6206 = vadd.xlane.f32.xlu1 %v6199_v17  ;;  %v6198_v7 = vmul.f32 %v6194_v63, %v6194_v63 }
 0xd2d   :  { %v6251_v38 = vpop.permute.xlu1 %6250 }
 0xd2e   :  { %6204 = vadd.xlane.f32.xlu0 %v6198_v7 }
 0xd2f   :  { %v6227_v42 = vpop.permute.xlu0 %6226 }
 0xd30   :  { %6202 = vadd.xlane.f32.xlu1 %v6197_v30  ;;  %v15607_v30 = vld [vmem:[%s19334_s14 + $0x10] sm:$0xff]  }
 0xd31   :  { %v6237_v44 = vpop.permute.xlu1 %6236  ;;  %14408 = vmatprep.mubr.msk.bf16.mxu0 %vm5428_vm12, %v15607_v30  ;;  %v15895_v30 = vld [vmem:[%s19332_s2 + $0x8] ss:$0 sm:$0xff] }
 0xd32   :  { %6200 = vadd.xlane.f32.xlu0 %v6196_v54 }
 0xd33   :  { %v6256_v15 = vpop.permute.xlu0 %6255 }
 0xd37   :  { %v6242_v45 = vpop.permute.xlu0 %6241 }
 0xd41   :  { %6260 = vperm.xlu1 %15509, %v13298_v11  }
 0xd48   :  { %6265 = vperm.xlu0 %15508, %v13299_v31   ;;  %v13369_v31 = vld [vmem:[%s19395_s1 + $0x1c8] sm:$0xff] }
 0xdb9   :  { %v6207_v50 = vpop.xlane.xlu1 %6206 }
 0xdba   :  { %v6211_v21 = vmul.f32 0.0078125, %v6207_v50 }
 0xdbb   :  { %v6205_v36 = vpop.xlane.xlu0 %6204 }
 0xdbc   :  { %v6215_v26 = vadd.f32 1e-05, %v6211_v21  ;;  %v6210_v27 = vmul.f32 0.0078125, %v6205_v36 }
 0xdbd   :  { %v6203_v2 = vpop.xlane.xlu1 %6202 }
 0xdbe   :  { %15799 = vrsqrt.f32 %v6215_v26  ;;  %v6214_v37 = vadd.f32 1e-05, %v6210_v27  ;;  %v6209_v18 = vmul.f32 0.0078125, %v6203_v2 }
 0xdbf   :  { %v6201_v55 = vpop.xlane.xlu0 %6200 }
 0xdc0   :  { %15801 = vrsqrt.f32 %v6214_v37  ;;  %v6213_v28 = vadd.f32 1e-05, %v6209_v18  ;;  %v6208_v3 = vmul.f32 0.0078125, %v6201_v55 }
 0xdc1   :  { %v6261_v14 = vpop.permute.xlu1 %6260 }
 0xdc2   :  { %15803 = vrsqrt.f32 %v6213_v28  ;;  %v6212_v47 = vadd.f32 1e-05, %v6208_v3  ;;  %v15892_v3 = vld [vmem:[%s19332_s2 + $0x3] ss:$0 sm:$0xff] }
 0xdc4   :  { %15805 = vrsqrt.f32 %v6212_v47 }
 0xdc7   :  { %v6266_v62 = vpop.permute.xlu0 %6265 }
 0xdc8   :  { %v15800_v33 = vpop.eup %15799 }
 0xdc9   :  { %v6223_v51 = vmul.f32 %v15800_v33, %v6195_v0 }
 0xdca   :  { %v15802_v12 = vpop.eup %15801 }
 0xdcb   :  { %v6222_v57 = vmul.f32 %v15802_v12, %v6194_v63  ;;  %v6247_v4 = vmul.f32 %v6242_v45, %v6223_v51  ;;  %v15891_v45 = vld [vmem:[%s19332_s2 + $0x1] ss:$0 sm:$0xff]  ;;  %v15608_v51 = vld [vmem:[%s19334_s14 + $0x18] sm:$0xff]  }
 0xdcc   :  { %v15804_v48 = vpop.eup %15803 }
 0xdcd   :  { %v6221_v59 = vmul.f32 %v15804_v48, %v6193_v19  ;;  %v6246_v6 = vmul.f32 %v6237_v44, %v6222_v57  ;;  %v6271_v58 = vadd.f32 %v6266_v62, %v6247_v4  ;;  %v15609_v57 = vld [vmem:[%s19334_s14 + $0x30] sm:$0xff]  }
 0xdce   :  { %v15806_v5 = vpop.eup %15805 }
 0xdcf   :  { %v6245_v20 = vmul.f32 %v6232_v34, %v6221_v59  ;;  %v6220_v1 = vmul.f32 %v15806_v5, %v6192_v22  ;;  %v6270_v8 = vadd.f32 %v6261_v14, %v6246_v6  ;;  %v6275_v10 = vmul.f32 0.5, %v6271_v58  ;;  %v13368_v34 = vld [vmem:[%s19395_s1 + $0x1c0] sm:$0xff] }
 0xdd0   :  { %v15893_v14 = vld [vmem:[%s19332_s2 + $0x5] ss:$0 sm:$0xff] }
 0xdd1   :  { %v6269_v52 = vadd.f32 %v6256_v15, %v6245_v20  ;;  %v6244_v56 = vmul.f32 %v6227_v42, %v6220_v1  ;;  %v6274_v43 = vmul.f32 0.5, %v6270_v8  ;;  %15807 = vtanh.f32 %v6275_v10  ;;  %v13371_v42 = vld [vmem:[%s19395_s1 + $0x1d8] sm:$0xff] }
 0xdd3   :  { %v6273_v61 = vmul.f32 0.5, %v6269_v52  ;;  %v6268_v32 = vadd.f32 %v6251_v38, %v6244_v56  ;;  %15809 = vtanh.f32 %v6274_v43  ;;  %v13370_v38 = vld [vmem:[%s19395_s1 + $0x1d0] sm:$0xff] }
 0xdd5   :  { %15811 = vtanh.f32 %v6273_v61  ;;  %v6272_v16 = vmul.f32 0.5, %v6268_v32  ;;  %v15610_v61 = vld [vmem:[%s19334_s14 + $0x38] sm:$0xff]  }
 0xdd7   :  { %15813 = vtanh.f32 %v6272_v16  ;;  %v15611_v16 = vld [vmem:[%s19334_s14 + $0x50] sm:$0xff]  }
 0xddb   :  { %v15808_v25 = vpop.eup %15807 }
 0xddc   :  { %v6283_v46 = vmul.f32 0.5, %v15808_v25 }
 0xddd   :  { %v15810_v49 = vpop.eup %15809 }
 0xdde   :  { %v6282_v29 = vmul.f32 0.5, %v15810_v49  ;;  %v6287_v41 = vadd.f32 0.5, %v6283_v46  ;;  %v15894_v49 = vld [vmem:[%s19332_s2 + $0x7] ss:$0 sm:$0xff] }
 0xddf   :  { %v15812_v35 = vpop.eup %15811 }
 0xde0   :  { %v6281_v39 = vmul.f32 0.5, %v15812_v35  ;;  %v6286_v13 = vadd.f32 0.5, %v6282_v29  ;;  %v6291_v63 = vmul.f32 %v6287_v41, %v6271_v58 }
 0xde1   :  { %v15814_v9 = vpop.eup %15813 }
 0xde2   :  { %v6285_v0 = vadd.f32 0.5, %v6281_v39  ;;  %v6280_v23 = vmul.f32 0.5, %v15814_v9  ;;  %v6290_v19 = vmul.f32 %v6286_v13, %v6270_v8 }
 0xde4   :  { %v6289_v17 = vmul.f32 %v6285_v0, %v6269_v52  ;;  %v6284_v22 = vadd.f32 0.5, %v6280_v23  ;;  %v17906_v7 = vpack.c.bf16 %v6291_v63, %v6290_v19  ;;  %v15612_v0 = vld [vmem:[%s19334_s14 + $0x58] sm:$0xff]  }
 0xde6   :  { %v6288_v54 = vmul.f32 %v6284_v22, %v6268_v32  ;;  %6312 = vrot.lane.b32.xlu0 %v6289_v17, %s15932_s27 }
 0xde8   :  { %6310 = vrot.lane.b32.xlu1 %v6288_v54, %s15932_s27  ;;  %v17914_v11 = vpack.c.bf16 %v6289_v17, %v6288_v54 }
 0xdea   :  { %6316 = vrot.lane.b32.xlu0 %v6291_v63, %s15932_s27 }
 0xdec   :  { %6314 = vrot.lane.b32.xlu1 %v6290_v19, %s15932_s27 }
 0xdee   :  { %6415 = vrot.lane.b32.xlu0 %v6289_v17, %s15924_s23 }
 0xdf0   :  { %6413 = vrot.lane.b32.xlu1 %v6288_v54, %s15924_s23 }
 0xdf2   :  { %6419 = vrot.lane.b32.xlu0 %v6291_v63, %s15924_s23 }
 0xdf4   :  { %6417 = vrot.lane.b32.xlu1 %v6290_v19, %s15924_s23 }
 0xdf6   :  { %6506 = vrot.lane.b32.xlu0 %v6289_v17, %s15925_s9 }
 0xdf8   :  { %6504 = vrot.lane.b32.xlu1 %v6288_v54, %s15925_s9 }
 0xdfa   :  { %6510 = vrot.lane.b32.xlu0 %v6291_v63, %s15925_s9 }
 0xdfc   :  { %6508 = vrot.lane.b32.xlu1 %v6290_v19, %s15925_s9 }
 0xdfe   :  { %6609 = vrot.lane.b32.xlu0 %v6289_v17, %s19385_s8 }
 0xe00   :  { %6607 = vrot.lane.b32.xlu1 %v6288_v54, %s19385_s8 }
 0xe02   :  { %6613 = vrot.lane.b32.xlu0 %v6291_v63, %s19385_s8 }
 0xe04   :  { %6611 = vrot.lane.b32.xlu1 %v6290_v19, %s19385_s8 }
 0xe06   :  { %6693 = vrot.lane.b32.xlu0 %v6289_v17, %s19433_s29 }
 0xe08   :  { %6691 = vrot.lane.b32.xlu1 %v6288_v54, %s19433_s29 }
 0xe0a   :  { %6697 = vrot.lane.b32.xlu0 %v6291_v63, %s19433_s29 }
 0xe0c   :  { %6695 = vrot.lane.b32.xlu1 %v6290_v19, %s19433_s29 }
 0xe0e   :  { %6294 = vrot.lane.b32.xlu0 %v6289_v17, %s19431_s25 }
 0xe10   :  { %6292 = vrot.lane.b32.xlu1 %v6288_v54, %s19431_s25 }
 0xe12   :  { %6298 = vrot.lane.b32.xlu0 %v6291_v63, %s19431_s25 }
 0xe14   :  { %6296 = vrot.lane.b32.xlu1 %v6290_v19, %s19431_s25 }
 0xe16   :  { %6396 = vrot.lane.b32.xlu0 %v6289_v17, %s19432_s30 }
 0xe18   :  { %6394 = vrot.lane.b32.xlu1 %v6288_v54, %s19432_s30 }
 0xe1a   :  { %6400 = vrot.lane.b32.xlu0 %v6291_v63, %s19432_s30 }
 0xe1c   :  { %6398 = vrot.lane.b32.xlu1 %v6290_v19, %s19432_s30 }
 0xe1e   :  { %6590 = vrot.lane.b32.xlu0 %v6289_v17, %s19434_s10 }
 0xe20   :  { %6588 = vrot.lane.b32.xlu1 %v6288_v54, %s19434_s10 }
 0xe22   :  { %6594 = vrot.lane.b32.xlu0 %v6291_v63, %s19434_s10 }
 0xe24   :  { %6592 = vrot.lane.b32.xlu1 %v6290_v19, %s19434_s10  ;;  %v15613_v19 = vld [vmem:[%s19334_s14 + $0x70] sm:$0xff]  }
 0xe26   :  { %7063 = vperm.xlu0 %15508, %v13369_v31  }
 0xe28   :  { %7058 = vperm.xlu1 %15509, %v13368_v34  }
 0xe2a   :  { %7073 = vperm.xlu0 %15508, %v13371_v42  }
 0xe2c   :  { %7068 = vperm.xlu1 %15509, %v13370_v38  }
 0xe58   :  { %v6313_v15 = vpop.permute.xlu0 %6312 }
 0xe59   :  { %v6319_v50 = vmul.f32 %v15891_v45, %v6313_v15 }
 0xe5a   :  { %v6311_v44 = vpop.permute.xlu1 %6310 }
 0xe5b   :  { %v6318_v21 = vmul.f32 %v15891_v45, %v6311_v44  ;;  %v15614_v44 = vld [vmem:[%s19334_s14 + $0x78] sm:$0xff]  }
 0xe5c   :  { %v6317_v36 = vpop.permute.xlu0 %6316 }
 0xe5d   :  { %v6322_v26 = vpack.c.bf16 %v6319_v50, %v6318_v21  ;;  %v6321_v2 = vmul.f32 %v15891_v45, %v6317_v36  ;;  %v15615_v50 = vld [vmem:[%s19334_s14 + $0x80] sm:$0xff]  }
 0xe5e   :  { %v6315_v27 = vpop.permute.xlu1 %6314 }
 0xe5f   :  { %v6320_v37 = vmul.f32 %v15891_v45, %v6315_v27  ;;  %14404 = vmatprep.subr.bf16.mxu0 %v6322_v26  ;;  %v15896_v27 = vld [vmem:[%s19332_s2] ss:$0 sm:$0xff] }
 0xe60   :  { %14405 = vmatpush3.bf16.msra.mxu0 %v6322_v26  ;;  %v6416_v18 = vpop.permute.xlu0 %6415 }
 0xe61   :  { %v6323_v55 = vpack.c.bf16 %v6321_v2, %v6320_v37  ;;  %v6422_v47 = vmul.f32 %v15892_v3, %v6416_v18 }
 0xe62   :  { %v6414_v28 = vpop.permute.xlu1 %6413 }
 0xe63   :  { %v6421_v33 = vmul.f32 %v15892_v3, %v6414_v28  ;;  %14406 = vmatprep.subr.bf16.mxu0 %v6323_v55 }
 0xe64   :  { %14407 = vmatpush3.bf16.msra.mxu0 %v6323_v55  ;;  %v6420_v12 = vpop.permute.xlu0 %6419 }
 0xe65   :  { %v6425_v4 = vpack.c.bf16 %v6422_v47, %v6421_v33  ;;  %v6424_v62 = vmul.f32 %v15892_v3, %v6420_v12  ;;  %v15616_v47 = vld [vmem:[%s19334_s14 + $0x88] sm:$0xff]  }
 0xe66   :  { %v6418_v48 = vpop.permute.xlu1 %6417 }
 0xe67   :  { %v6423_v59 = vmul.f32 %v15892_v3, %v6418_v48  ;;  %14409 = vmatmul.mubr.msk.bf16.vlgmr.msra.gmra.mrb[20].mxu0 %vm5428_vm12, %v15608_v51  ;;  %14412 = vmatprep.subr.bf16.mxu0 %v6425_v4  ;;  %v15617_v51 = vld [vmem:[%s19334_s14] sm:$0xff]  }
 0xe68   :  { %14413 = vmatpush3.bf16.msra.mxu0 %v6425_v4  ;;  %v6507_v6 = vpop.permute.xlu0 %6506  ;;  %14416 = vmatprep.mubr.msk.bf16.mxu0 %vm5428_vm12, %v15609_v57  ;;  %v15897_v48 = vld [vmem:[%s19332_s2 + $0x2] ss:$0 sm:$0xff] }
 0xe69   :  { %v6426_v58 = vpack.c.bf16 %v6424_v62, %v6423_v59  ;;  %v6513_v20 = vmul.f32 %v15893_v14, %v6507_v6 }
 0xe6a   :  { %v6505_v5 = vpop.permute.xlu1 %6504 }
 0xe6b   :  { %v6512_v1 = vmul.f32 %v15893_v14, %v6505_v5  ;;  %14414 = vmatprep.subr.bf16.mxu0 %v6426_v58 }
 0xe6c   :  { %14415 = vmatpush3.bf16.msra.mxu0 %v6426_v58  ;;  %v6511_v8 = vpop.permute.xlu0 %6510 }
 0xe6d   :  { %v6516_v10 = vpack.c.bf16 %v6513_v20, %v6512_v1  ;;  %v6515_v56 = vmul.f32 %v15893_v14, %v6511_v8  ;;  %v15618_v20 = vld [vmem:[%s19334_s14 + $0x8] sm:$0xff]   ;;  %v15619_v1 = vld [vmem:[%s19334_s14 + $0x20] sm:$0xff]  }
 0xe6e   :  { %v6509_v52 = vpop.permute.xlu1 %6508 }
 0xe6f   :  { %v6514_v43 = vmul.f32 %v15893_v14, %v6509_v52  ;;  %14420 = vmatprep.subr.bf16.mxu0 %v6516_v10  ;;  %v15620_v52 = vld [vmem:[%s19334_s14 + $0x28] sm:$0xff]  }
 0xe70   :  { %v6610_v32 = vpop.permute.xlu0 %6609 }
 0xe71   :  { %v6517_v25 = vpack.c.bf16 %v6515_v56, %v6514_v43  ;;  %v6616_v29 = vmul.f32 %v15894_v49, %v6610_v32  ;;  %v15621_v43 = vld [vmem:[%s19334_s14 + $0x40] sm:$0xff]  }
 0xe72   :  { %v6608_v46 = vpop.permute.xlu1 %6607  ;;  %v15898_v32 = vld [vmem:[%s19332_s2 + $0x6] ss:$0 sm:$0xff] }
 0xe73   :  { %v6615_v41 = vmul.f32 %v15894_v49, %v6608_v46  ;;  %14417 = vmatmul.mubr.msk.bf16.vlgmr.msra.gmra.mrb[20].mxu0 %vm5428_vm12, %v15610_v61 }
 0xe74   :  { %14421 = vmatpush3.bf16.msra.mxu0 %v6516_v10  ;;  %14424 = vmatprep.mubr.msk.bf16.mxu0 %vm5428_vm12, %v15611_v16  ;;  %v6614_v13 = vpop.permute.xlu0 %6613 }
 0xe75   :  { %v6619_v35 = vpack.c.bf16 %v6616_v29, %v6615_v41  ;;  %14422 = vmatprep.subr.bf16.mxu0 %v6517_v25  ;;  %v6618_v63 = vmul.f32 %v15894_v49, %v6614_v13 }
 0xe76   :  { %v6612_v39 = vpop.permute.xlu1 %6611 }
 0xe77   :  { %v6617_v9 = vmul.f32 %v15894_v49, %v6612_v39 }
 0xe78   :  { %14423 = vmatpush3.bf16.msra.mxu0 %v6517_v25  ;;  %v6694_v17 = vpop.permute.xlu0 %6693 }
 0xe79   :  { %14428 = vmatprep.subr.bf16.mxu0 %v6619_v35  ;;  %v6620_v22 = vpack.c.bf16 %v6618_v63, %v6617_v9  ;;  %v6700_v31 = vmul.f32 %v15895_v30, %v6694_v17 }
 0xe7a   :  { %v6692_v23 = vpop.permute.xlu1 %6691 }
 0xe7b   :  { %v6699_v54 = vmul.f32 %v15895_v30, %v6692_v23 }
 0xe7c   :  { %v6698_v38 = vpop.permute.xlu0 %6697 }
 0xe7d   :  { %v6703_v42 = vpack.c.bf16 %v6700_v31, %v6699_v54  ;;  %v6702_v21 = vmul.f32 %v15895_v30, %v6698_v38  ;;  %v13373_v38 = vld [vmem:[%s19395_s1 + $0x1e8] sm:$0xff] }
 0xe7e   :  { %v6696_v34 = vpop.permute.xlu1 %6695 }
 0xe7f   :  { %14425 = vmatmul.mubr.msk.bf16.vlgmr.msra.gmra.mrb[20].mxu0 %vm5428_vm12, %v15612_v0  ;;  %v6701_v15 = vmul.f32 %v15895_v30, %v6696_v34 }
 0xe80   :  { %14429 = vmatpush3.bf16.msra.mxu0 %v6619_v35  ;;  %14432 = vmatprep.mubr.msk.bf16.mxu0 %vm5428_vm12, %v15613_v19  ;;  %v6295_v36 = vpop.permute.xlu0 %6294  ;;  %v15622_v35 = vld [vmem:[%s19334_s14 + $0x48] sm:$0xff]  }
 0xe81   :  { %14430 = vmatprep.subr.bf16.mxu0 %v6620_v22  ;;  %v6704_v26 = vpack.c.bf16 %v6702_v21, %v6701_v15  ;;  %v6301_v37 = vmul.f32 %v15896_v27, %v6295_v36  ;;  %v13374_v15 = vld [vmem:[%s19395_s1 + $0x1f0] sm:$0xff]  ;;  %v13377_v21 = vld [vmem:[%s19395_s1 + $0x208] sm:$0xff] }
 0xe82   :  { %v6293_v45 = vpop.permute.xlu1 %6292 }
 0xe83   :  { %v6300_v2 = vmul.f32 %v15896_v27, %v6293_v45  ;;  %v13376_v45 = vld [vmem:[%s19395_s1 + $0x200] sm:$0xff] }
 0xe84   :  { %14431 = vmatpush3.bf16.msra.mxu0 %v6620_v22  ;;  %v6299_v28 = vpop.permute.xlu0 %6298 }
 0xe85   :  { %14436 = vmatprep.subr.bf16.mxu0 %v6703_v42  ;;  %v6304_v55 = vpack.c.bf16 %v6301_v37, %v6300_v2  ;;  %v6303_v12 = vmul.f32 %v15896_v27, %v6299_v28 }
 0xe86   :  { %v6297_v18 = vpop.permute.xlu1 %6296 }
 0xe87   :  { %v6302_v3 = vmul.f32 %v15896_v27, %v6297_v18 }
 0xe88   :  { %v6397_v57 = vpop.permute.xlu0 %6396 }
 0xe89   :  { %v6305_v4 = vpack.c.bf16 %v6303_v12, %v6302_v3  ;;  %v6403_v59 = vmul.f32 %v15897_v48, %v6397_v57 }
 0xe8a   :  { %v6395_v33 = vpop.permute.xlu1 %6394 }
 0xe8b   :  { %14433 = vmatmul.mubr.msk.bf16.vlgmr.msra.gmra.mrb[20].mxu0 %vm5428_vm12, %v15614_v44  ;;  %v6402_v62 = vmul.f32 %v15897_v48, %v6395_v33  ;;  %v13372_v44 = vld [vmem:[%s19395_s1 + $0x1e0] sm:$0xff] }
 0xe8c   :  { %14437 = vmatpush3.bf16.msra.mxu0 %v6703_v42  ;;  %14440 = vmatprep.mubr.msk.bf16.mxu0 %vm5428_vm12, %v15615_v50  ;;  %v6401_v5 = vpop.permute.xlu0 %6400  ;;  %v13375_v50 = vld [vmem:[%s19395_s1 + $0x1f8] sm:$0xff] }
 0xe8d   :  { %14438 = vmatprep.subr.bf16.mxu0 %v6704_v26  ;;  %v6406_v6 = vpack.c.bf16 %v6403_v59, %v6402_v62  ;;  %v6405_v8 = vmul.f32 %v15897_v48, %v6401_v5  ;;  %v13378_v62 = vld [vmem:[%s19395_s1 + $0x210] sm:$0xff]  ;;  %v13524_v59 = vld [vmem:[%s19395_s1 + $0x40] sm:$0xff]  ;;  %v13525_v5 = vld [vmem:[%s19395_s1 + $0x48] sm:$0xff] }
 0xe8e   :  { %v6399_v58 = vpop.permute.xlu1 %6398 }
 0xe8f   :  { %v6404_v14 = vmul.f32 %v15897_v48, %v6399_v58  ;;  %v13526_v58 = vld [vmem:[%s19395_s1 + $0x50] sm:$0xff] }
 0xe90   :  { %14439 = vmatpush3.bf16.msra.mxu0 %v6704_v26  ;;  %v6591_v61 = vpop.permute.xlu0 %6590 }
 0xe91   :  { %14444 = vmatprep.subr.bf16.mxu0 %v6304_v55  ;;  %v6407_v10 = vpack.c.bf16 %v6405_v8, %v6404_v14  ;;  %v6597_v25 = vmul.f32 %v15898_v32, %v6591_v61  ;;  %v13614_v14 = vld [vmem:[%s19395_s1 + $0x220] sm:$0xff]  ;;  %v15628_v61 = vld [vmem:[%s19335_s5 + $0x18] sm:$0xff]  }
 0xe92   :  { %v6589_v56 = vpop.permute.xlu1 %6588  ;;  %v15625_v8 = vld [vmem:[%s19335_s5] sm:$0xff]  }
 0xe93   :  { %v6596_v16 = vmul.f32 %v15898_v32, %v6589_v56  ;;  %14476 = vmatprep.subr.bf16.mxu1 %v15625_v8  ;;  %v15627_v56 = vld [vmem:[%s19335_s5 + $0x10] sm:$0xff]  }
 0xe94   :  { %v6595_v29 = vpop.permute.xlu0 %6594  ;;  %14477 = vmatpush3.bf16.msra.mxu1 %v15625_v8 }
 0xe95   :  { %v6600_v46 = vpack.c.bf16 %v6597_v25, %v6596_v16  ;;  %v6599_v39 = vmul.f32 %v15898_v32, %v6595_v29  ;;  %v15630_v16 = vld [vmem:[%s19335_s5 + $0x28] sm:$0xff]   ;;  %v15631_v25 = vld [vmem:[%s19335_s5 + $0x30] sm:$0xff]   ;;  %v18150_v29 = vld [vmem:[%s19336_s3 + $0x40] sm:$0xff]  }
 0xe96   :  { %v6593_v49 = vpop.permute.xlu1 %6592 }
 0xe97   :  { %14441 = vmatmul.mubr.msk.bf16.vlgmr.msra.gmra.mrb[20].mxu0 %vm5428_vm12, %v15616_v47  ;;  %v6598_v41 = vmul.f32 %v15898_v32, %v6593_v49  ;;  %v15629_v32 = vld [vmem:[%s19335_s5 + $0x20] sm:$0xff]  }
 0xe98   :  { %14445 = vmatpush3.bf16.msra.mxu0 %v6304_v55  ;;  %14448 = vmatprep.mubr.msk.bf16.mxu0 %vm5428_vm12, %v15617_v51  ;;  %v18145_v49 = vld [vmem:[%s19336_s3] sm:$0xff]  }
 0xe99   :  { %14446 = vmatprep.subr.bf16.mxu0 %v6305_v4  ;;  %v6601_v13 = vpack.c.bf16 %v6599_v39, %v6598_v41 }
 0xe9c   :  { %14447 = vmatpush3.bf16.msra.mxu0 %v6305_v4 }
 0xe9d   :  { %14452 = vmatprep.subr.bf16.mxu0 %v6406_v6 }
 0xea3   :  { %14449 = vmatmul.mubr.msk.bf16.vlgmr.msra.gmra.mrb[20].mxu0 %vm5428_vm12, %v15618_v20  ;;  %v13527_v20 = vld [vmem:[%s19395_s1 + $0x58] sm:$0xff] }
 0xea4   :  { %14453 = vmatpush3.bf16.msra.mxu0 %v6406_v6  ;;  %14456 = vmatprep.mubr.msk.bf16.mxu0 %vm5428_vm12, %v15619_v1  ;;  %v13379_v6 = vld [vmem:[%s19395_s1 + $0x218] sm:$0xff]  ;;  %v13616_v1 = vld [vmem:[%s19395_s1 + $0x230] sm:$0xff] }
 0xea5   :  { %14454 = vmatprep.subr.bf16.mxu0 %v6407_v10  ;;  %v7064_v9 = vpop.permute.xlu0 %7063 }
 0xea7   :  { %v7059_v23 = vpop.permute.xlu1 %7058 }
 0xea8   :  { %14455 = vmatpush3.bf16.msra.mxu0 %v6407_v10  ;;  %v13615_v10 = vld [vmem:[%s19395_s1 + $0x228] sm:$0xff] }
 0xea9   :  { %14460 = vmatprep.subr.bf16.mxu0 %v17914_v11  ;;  %v7074_v54 = vpop.permute.xlu0 %7073 }
 0xeab   :  { %v7069_v34 = vpop.permute.xlu1 %7068 }
 0xeaf   :  { %14457 = vmatmul.mubr.msk.bf16.vlgmr.msra.gmra.mrb[20].mxu0 %vm5428_vm12, %v15620_v52  ;;  %v15626_v52 = vld [vmem:[%s19335_s5 + $0x8] sm:$0xff]  }
 0xeb0   :  { %14461 = vmatpush3.bf16.msra.mxu0 %v17914_v11  ;;  %14464 = vmatprep.mubr.msk.bf16.mxu0 %vm5428_vm12, %v15621_v43  ;;  %v15623_v11 = vld [vmem:[%s19334_s14 + $0x60] sm:$0xff]   ;;  %v13617_v43 = vld [vmem:[%s19395_s1 + $0x238] sm:$0xff] }
 0xeb1   :  { %14462 = vmatprep.subr.bf16.mxu0 %v17906_v7  ;;  %14478 = vmatprep.subr.bf16.mxu1 %v15626_v52 }
 0xeb2   :  { %14479 = vmatpush3.bf16.msra.mxu1 %v15626_v52 }
 0xeb3   :  { %14480 = vmatprep.subr.bf16.mxu1 %v15627_v56 }
 0xeb4   :  { %14463 = vmatpush3.bf16.msra.mxu0 %v17906_v7  ;;  %v15624_v7 = vld [vmem:[%s19334_s14 + $0x68] sm:$0xff]  }
 0xeb5   :  { %14468 = vmatprep.subr.bf16.mxu0 %v6600_v46 }
 0xeb6   :  { %14481 = vmatpush3.bf16.msra.mxu1 %v15627_v56 }
 0xeb7   :  { %14482 = vmatprep.subr.bf16.mxu1 %v15628_v61 }
 0xeba   :  { %14483 = vmatpush3.bf16.msra.mxu1 %v15628_v61 }
 0xebb   :  { %14465 = vmatmul.mubr.msk.bf16.vlgmr.msra.gmra.mrb[20].mxu0 %vm5428_vm12, %v15622_v35  ;;  %14484 = vmatprep.subr.bf16.mxu1 %v15629_v32 }
 0xebc   :  { %14469 = vmatpush3.bf16.msra.mxu0 %v6600_v46  ;;  %14472 = vmatprep.mubr.msk.bf16.mxu0 %vm5428_vm12, %v15623_v11  ;;  %v15632_v46 = vld [vmem:[%s19335_s5 + $0x38] sm:$0xff]  }
 0xebd   :  { %14470 = vmatprep.subr.bf16.mxu0 %v6601_v13 }
 0xebe   :  { %14485 = vmatpush3.bf16.msra.mxu1 %v15629_v32 }
 0xebf   :  { %14486 = vmatprep.subr.bf16.mxu1 %v15630_v16 }
 0xec0   :  { %14471 = vmatpush3.bf16.msra.mxu0 %v6601_v13 }
 0xec1   :  { %14544 = vmatprep.subr.bf16.mxu0 %v18150_v29 }
 0xec2   :  { %14487 = vmatpush3.bf16.msra.mxu1 %v15630_v16 }
 0xec3   :  { %14488 = vmatprep.subr.bf16.mxu1 %v15631_v25 }
 0xec6   :  { %14489 = vmatpush3.bf16.msra.mxu1 %v15631_v25 }
 0xec7   :  { %14473 = vmatmul.mubr.msk.bf16.vlgmr.msra.gmra.mrb[20].mxu0 %vm5428_vm12, %v15624_v7  ;;  %14490 = vmatprep.subr.bf16.mxu1 %v15632_v46 }
 0xec8   :  { %14545 = vmatpush3.bf16.msra.mxu0 %v18150_v29 }
 0xeca   :  { %14491 = vmatpush3.bf16.msra.mxu1 %v15632_v46 }
 0xecb   :  { %14496 = vmatprep.subr.bf16.mxu1 %v18145_v49 }
 0xf9a   :  { %v14474_v0 = vpop.f32.mrb[20].mxu0 }
 0xf9b   :  { %v7020_v19 = vpop.f32.mrb[21].mxu0  ;;  %v7078_v42 = vadd.f32 %v14474_v0, %v7069_v34 }
 0xf9c   :  { %v7076_v63 = vadd.f32 %v7059_v23, %v7020_v19  ;;  %v14475_v17 = vpop.f32.mrb[22].mxu0 }
 0xf9d   :  { %v7023_v22 = vpop.f32.mrb[23].mxu0  ;;  %v7079_v31 = vadd.f32 %v14475_v17, %v7074_v54 }
 0xf9e   :  { %v7077_v30 = vadd.f32 %v7064_v9, %v7023_v22  ;;  %7090 = vadd.xlane.f32.xlu1 %v7076_v63 }
 0xfa0   :  { %7092 = vadd.xlane.f32.xlu0 %v7077_v30 }
 0xfa2   :  { %7096 = vadd.xlane.f32.xlu1 %v7079_v31 }
 0xfa4   :  { %7094 = vadd.xlane.f32.xlu0 %v7078_v42 }
 0xfb3   :  { %7141 = vperm.xlu1 %15509, %v13373_v38  }
 0xfb7   :  { %7146 = vperm.xlu1 %15509, %v13374_v15  }
 0xfba   :  { %7136 = vperm.xlu0 %15508, %v13372_v44  }
 0xfbb   :  { %7160 = vperm.xlu1 %15509, %v13376_v45  }
 0xfbe   :  { %7151 = vperm.xlu0 %15508, %v13375_v50  }
 0xfc2   :  { %7165 = vperm.xlu0 %15508, %v13377_v21  }
0x102b   :  { %v7091_v36 = vpop.xlane.xlu1 %7090 }
0x102c   :  { %v7098_v55 = vmul.f32 0.0078125, %v7091_v36 }
0x102d   :  { %v7093_v26 = vpop.xlane.xlu0 %7092 }
0x102e   :  { %v7099_v2 = vmul.f32 0.0078125, %v7093_v26  ;;  %v18080_v12 = vsub.f32 %v7076_v63, %v7098_v55 }
0x102f   :  { %v7097_v27 = vpop.xlane.xlu1 %7096 }
0x1030   :  { %v7101_v37 = vmul.f32 0.0078125, %v7097_v27  ;;  %v18074_v47 = vsub.f32 %v7077_v30, %v7099_v2  ;;  %v7106_v48 = vmul.f32 %v18080_v12, %v18080_v12 }
0x1031   :  { %v7095_v18 = vpop.xlane.xlu0 %7094 }
0x1032   :  { %v18072_v28 = vsub.f32 %v7079_v31, %v7101_v37  ;;  %v7100_v3 = vmul.f32 0.0078125, %v7095_v18  ;;  %v7107_v4 = vmul.f32 %v18074_v47, %v18074_v47 }
0x1033   :  { %v7142_v41 = vpop.permute.xlu1 %7141 }
0x1034   :  { %v18076_v33 = vsub.f32 %v7078_v42, %v7100_v3  ;;  %v7109_v51 = vmul.f32 %v18072_v28, %v18072_v28 }
0x1036   :  { %7116 = vadd.xlane.f32.xlu1 %v7109_v51  ;;  %v7108_v57 = vmul.f32 %v18076_v33, %v18076_v33 }
0x1037   :  { %v7147_v11 = vpop.permute.xlu1 %7146 }
0x1038   :  { %7114 = vadd.xlane.f32.xlu0 %v7108_v57 }
0x1039   :  { %v7137_v35 = vpop.permute.xlu0 %7136 }
0x103a   :  { %7112 = vadd.xlane.f32.xlu1 %v7107_v4 }
0x103b   :  { %v7161_v13 = vpop.permute.xlu1 %7160 }
0x103c   :  { %7110 = vadd.xlane.f32.xlu0 %v7106_v48 }
0x103d   :  { %v7152_v39 = vpop.permute.xlu0 %7151 }
0x1041   :  { %v7166_v7 = vpop.permute.xlu0 %7165 }
0x104b   :  { %7170 = vperm.xlu1 %15509, %v13378_v62  }
0x104f   :  { %8592 = vperm.xlu1 %15509, %v13524_v59  }
0x1052   :  { %7175 = vperm.xlu0 %15508, %v13379_v6  }
0x1053   :  { %8602 = vperm.xlu1 %15509, %v13526_v58  }
0x1056   :  { %8597 = vperm.xlu0 %15508, %v13525_v5  }
0x1057   :  { %9753 = vperm.xlu1 %15509, %v13614_v14  }
0x105a   :  { %8607 = vperm.xlu0 %15508, %v13527_v20  }
0x105b   :  { %9763 = vperm.xlu1 %15509, %v13616_v1  }
0x105e   :  { %9758 = vperm.xlu0 %15508, %v13615_v10  }
0x1062   :  { %9768 = vperm.xlu0 %15508, %v13617_v43  }
0x10c3   :  { %v7117_v9 = vpop.xlane.xlu1 %7116 }
0x10c4   :  { %v7121_v0 = vmul.f32 0.0078125, %v7117_v9 }
0x10c5   :  { %v7115_v23 = vpop.xlane.xlu0 %7114 }
0x10c6   :  { %v7125_v19 = vadd.f32 1e-05, %v7121_v0  ;;  %v7120_v63 = vmul.f32 0.0078125, %v7115_v23 }
0x10c7   :  { %v7113_v17 = vpop.xlane.xlu1 %7112 }
0x10c8   :  { %15815 = vrsqrt.f32 %v7125_v19  ;;  %v7124_v22 = vadd.f32 1e-05, %v7120_v63  ;;  %v7119_v30 = vmul.f32 0.0078125, %v7113_v17  ;;  %v18207_v63 = vld [vmem:[%s19336_s3 + $0x18] sm:$0xff]  }
0x10c9   :  { %v7111_v54 = vpop.xlane.xlu0 %7110  ;;  %v18212_v17 = vld [vmem:[%s19336_s3 + $0x58] sm:$0xff]  }
0x10ca   :  { %15817 = vrsqrt.f32 %v7124_v22  ;;  %v7123_v31 = vadd.f32 1e-05, %v7119_v30  ;;  %v7118_v34 = vmul.f32 0.0078125, %v7111_v54  ;;  %v18229_v22 = vld [vmem:[%s19336_s3 + $0x60] sm:$0xff]   ;;  %v18237_v30 = vld [vmem:[%s19336_s3 + $0x68] sm:$0xff]  }
0x10cb   :  { %v7171_v18 = vpop.permute.xlu1 %7170  ;;  %v18250_v54 = vld [vmem:[%s19336_s3 + $0x80] sm:$0xff]  }
0x10cc   :  { %15819 = vrsqrt.f32 %v7123_v31  ;;  %v7122_v42 = vadd.f32 1e-05, %v7118_v34  ;;  %v18257_v31 = vld [vmem:[%s19336_s3 + $0x88] sm:$0xff]   ;;  %v15645_v34 = vld [vmem:[%s19337_s15 + $0x10] sm:$0xff]  }
0x10ce   :  { %15821 = vrsqrt.f32 %v7122_v42 }
0x10d1   :  { %v7176_v36 = vpop.permute.xlu0 %7175 }
0x10d2   :  { %v15816_v38 = vpop.eup %15815 }
0x10d3   :  { %v7133_v15 = vmul.f32 %v15816_v38, %v18072_v28 }
0x10d4   :  { %v15818_v44 = vpop.eup %15817 }
0x10d5   :  { %v7132_v45 = vmul.f32 %v15818_v44, %v18076_v33  ;;  %v7157_v50 = vmul.f32 %v7152_v39, %v7133_v15  ;;  %v18192_v39 = vld [vmem:[%s19336_s3 + $0x50] sm:$0xff]  }
0x10d6   :  { %v15820_v21 = vpop.eup %15819 }
0x10d7   :  { %v7131_v26 = vmul.f32 %v15820_v21, %v18074_v47  ;;  %v7156_v27 = vmul.f32 %v7147_v11, %v7132_v45  ;;  %v7181_v2 = vadd.f32 %v7176_v36, %v7157_v50  ;;  %v18187_v11 = vld [vmem:[%s19336_s3 + $0x10] sm:$0xff]  }
0x10d8   :  { %v15822_v37 = vpop.eup %15821 }
0x10d9   :  { %v7130_v55 = vmul.f32 %v15822_v37, %v18080_v12  ;;  %v7180_v3 = vadd.f32 %v7171_v18, %v7156_v27  ;;  %v7185_v51 = vadd.f32 %v7181_v2, %v17704_v24  ;;  %v7155_v57 = vmul.f32 %v7142_v41, %v7131_v26  ;;  %v18173_v41 = vld [vmem:[%s19336_s3 + $0x8] sm:$0xff]  }
0x10db   :  { %v7184_v28 = vadd.f32 %v7180_v3, %v17700_v40  ;;  %v7189_v4 = vmul.f32 0.5, %v7185_v51  ;;  %v7154_v48 = vmul.f32 %v7137_v35, %v7130_v55  ;;  %v7179_v33 = vadd.f32 %v7166_v7, %v7155_v57  ;;  %v18178_v35 = vld [vmem:[%s19336_s3 + $0x48] sm:$0xff]  }
0x10dc   :  { %14546 = vmatprep.subr.bf16.mxu0 %v18178_v35 }
0x10dd   :  { %v7188_v62 = vmul.f32 0.5, %v7184_v28  ;;  %v7178_v59 = vadd.f32 %v7161_v13, %v7154_v48  ;;  %v7183_v6 = vadd.f32 %v7179_v33, %v17695_v53  ;;  %15823 = vtanh.f32 %v7189_v4  ;;  %14547 = vmatpush3.bf16.msra.mxu0 %v18178_v35 }
0x10de   :  { %14552 = vmatprep.subr.bf16.mxu0 %v18192_v39 }
0x10df   :  { %15825 = vtanh.f32 %v7188_v62  ;;  %v7182_v47 = vadd.f32 %v7178_v59, %v17690_v60  ;;  %v7187_v58 = vmul.f32 0.5, %v7183_v6 }
0x10e1   :  { %v7186_v5 = vmul.f32 0.5, %v7182_v47  ;;  %15827 = vtanh.f32 %v7187_v58 }
0x10e3   :  { %15829 = vtanh.f32 %v7186_v5 }
0x10e7   :  { %v15824_v12 = vpop.eup %15823 }
0x10e8   :  { %v7197_v40 = vmul.f32 0.5, %v15824_v12  ;;  %v15646_v12 = vld [vmem:[%s19337_s15 + $0x18] sm:$0xff]  }
0x10e9   :  { %v15826_v24 = vpop.eup %15825 }
0x10ea   :  { %v7196_v14 = vmul.f32 0.5, %v15826_v24  ;;  %v7201_v43 = vadd.f32 0.5, %v7197_v40  ;;  %v18301_v40 = vld [vmem:[%s19336_s3 + $0x28] sm:$0xff]  }
0x10eb   :  { %v15828_v20 = vpop.eup %15827 }
0x10ec   :  { %v7195_v1 = vmul.f32 0.5, %v15828_v20  ;;  %v7200_v10 = vadd.f32 0.5, %v7196_v14  ;;  %v7205_v16 = vmul.f32 %v7201_v43, %v7185_v51 }
0x10ed   :  { %v15830_v8 = vpop.eup %15829 }
0x10ee   :  { %v7194_v52 = vmul.f32 0.5, %v15830_v8  ;;  %v7199_v56 = vadd.f32 0.5, %v7195_v1  ;;  %v7204_v61 = vmul.f32 %v7200_v10, %v7184_v28  ;;  %v18313_v8 = vld [vmem:[%s19336_s3 + $0x30] sm:$0xff]  }
0x10f0   :  { %v7198_v53 = vadd.f32 0.5, %v7194_v52  ;;  %v18165_v60 = vmul.f32 %v7199_v56, %v7183_v6  ;;  %v7207_v46 = vpack.c.bf16 %v7205_v16, %v7204_v61  ;;  %v18322_v61 = vld [vmem:[%s19336_s3 + $0x38] sm:$0xff]  }
0x10f2   :  { %v18163_v32 = vmul.f32 %v7198_v53, %v7182_v47  ;;  %v18290_v47 = vld [vmem:[%s19336_s3 + $0x20] sm:$0xff]  }
0x10f4   :  { %v7206_v25 = vpack.c.bf16 %v18165_v60, %v18163_v32 }
0x10f6   :  { %14492 = vmatprep.mubr.bf16.mxu1 %v7206_v25  ;;  %v15651_v25 = vld [vmem:[%s19337_s15 + $0x30] sm:$0xff]  }
0x10f7   :  { %14493 = vmatmul.mubr.bf16.vlgmr.msra.gmra.mrb[20].mxu1 %v7207_v46 }
0x10f8   :  { %14497 = vmatpush3.bf16.msra.mxu1 %v18145_v49 }
0x10f9   :  { %14498 = vmatprep.subr.bf16.mxu1 %v18173_v41 }
0x10fc   :  { %14499 = vmatpush3.bf16.msra.mxu1 %v18173_v41 }
0x10fd   :  { %14504 = vmatprep.subr.bf16.mxu1 %v18187_v11 }
0x11ca   :  { %v14494_v13 = vpop.f32.mrb[20].mxu1 }
0x11cb   :  { %v7306_v7 = vpop.f32.mrb[21].mxu1 }
0x11cc   :  { %v14495_v9 = vpop.f32.mrb[22].mxu1 }
0x11cd   :  { %v18196_v0 = vpack.c.bf16 %v14495_v9, %v14494_v13  ;;  %v7309_v23 = vpop.f32.mrb[23].mxu1 }
0x11ce   :  { %v18198_v19 = vpack.c.bf16 %v7309_v23, %v7306_v7 }
0x11d0   :  { %14500 = vmatprep.mubr.msk.bf16.mxu1 %vm5428_vm12, %v18198_v19  ;;  %14548 = vmatprep.mubr.msk.bf16.mxu0 %vm5428_vm12, %v18198_v19 }
0x11d1   :  { %14501 = vmatmul.mubr.msk.bf16.vlgmr.msra.gmra.mrb[24].mxu1 %vm5428_vm12, %v18196_v0  ;;  %14549 = vmatmul.mubr.msk.bf16.vlgmr.msra.gmra.mrb[24].mxu0 %vm5428_vm12, %v18196_v0 }
0x11d2   :  { %14505 = vmatpush3.bf16.msra.mxu1 %v18187_v11  ;;  %14508 = vmatprep.mubr.msk.bf16.mxu1 %vm5428_vm12, %v18198_v19 }
0x11d3   :  { %14553 = vmatpush3.bf16.msra.mxu0 %v18192_v39  ;;  %14556 = vmatprep.mubr.msk.bf16.mxu0 %vm5428_vm12, %v18198_v19 }
0x11d4   :  { %14506 = vmatprep.subr.bf16.mxu1 %v18207_v63  ;;  %14554 = vmatprep.subr.bf16.mxu0 %v18212_v17 }
0x11d6   :  { %14507 = vmatpush3.bf16.msra.mxu1 %v18207_v63 }
0x11d7   :  { %14555 = vmatpush3.bf16.msra.mxu0 %v18212_v17 }
0x11d8   :  { %14568 = vmatprep.subr.bf16.mxu0 %v18229_v22 }
0x11d9   :  { %14509 = vmatmul.mubr.msk.bf16.vlgmr.msra.gmra.mrb[28].mxu1 %vm5428_vm12, %v18196_v0 }
0x11da   :  { %14557 = vmatmul.mubr.msk.bf16.vlgmr.msra.gmra.mrb[28].mxu0 %vm5428_vm12, %v18196_v0  ;;  %14516 = vmatprep.mubr.msk.bf16.mxu1 %vm5428_vm12, %v15645_v34 }
0x11db   :  { %14569 = vmatpush3.bf16.msra.mxu0 %v18229_v22  ;;  %14572 = vmatprep.mubr.msk.bf16.mxu0 %vm5428_vm12, %v18198_v19 }
0x11dc   :  { %14570 = vmatprep.subr.bf16.mxu0 %v18237_v30 }
0x11df   :  { %14571 = vmatpush3.bf16.msra.mxu0 %v18237_v30 }
0x11e0   :  { %14592 = vmatprep.subr.bf16.mxu0 %v18250_v54 }
0x11e2   :  { %14573 = vmatmul.mubr.msk.bf16.vlgmr.msra.gmra.mrb[32].mxu0 %vm5428_vm12, %v18196_v0 }
0x11e3   :  { %14593 = vmatpush3.bf16.msra.mxu0 %v18250_v54  ;;  %14596 = vmatprep.mubr.msk.bf16.mxu0 %vm5428_vm12, %v18198_v19 }
0x11e4   :  { %14594 = vmatprep.subr.bf16.mxu0 %v18257_v31 }
0x11e7   :  { %14595 = vmatpush3.bf16.msra.mxu0 %v18257_v31 }
0x11e8   :  { %14640 = vmatprep.subr.bf16.mxu0 %v18145_v49 }
0x11ea   :  { %14597 = vmatmul.mubr.msk.bf16.vlgmr.msra.gmra.mrb[36].mxu0 %vm5428_vm12, %v18196_v0 }
0x11eb   :  { %14641 = vmatpush3.bf16.msra.mxu0 %v18145_v49 }
0x11ec   :  { %14642 = vmatprep.subr.bf16.mxu0 %v18173_v41 }
0x11ef   :  { %14643 = vmatpush3.bf16.msra.mxu0 %v18173_v41 }
0x11f0   :  { %14648 = vmatprep.subr.bf16.mxu0 %v18187_v11 }
0x12a4   :  { %v14502_v42 = vpop.f32.mrb[24].mxu1  ;;  %v14550_v38 = vpop.f32.mrb[24].mxu0 }
0x12a5   :  { %v7379_v15 = vpop.f32.mrb[25].mxu1  ;;  %v7800_v44 = vpop.f32.mrb[25].mxu0 }
0x12a6   :  { %v14503_v45 = vpop.f32.mrb[26].mxu1  ;;  %v14551_v50 = vpop.f32.mrb[26].mxu0 }
0x12a7   :  { %v18277_v21 = vpack.c.bf16 %v14503_v45, %v14502_v42  ;;  %v18279_v36 = vpack.c.bf16 %v14551_v50, %v14550_v38  ;;  %v7382_v26 = vpop.f32.mrb[27].mxu1  ;;  %v7803_v27 = vpop.f32.mrb[27].mxu0 }
0x12a8   :  { %v18281_v2 = vpack.c.bf16 %v7382_v26, %v7379_v15  ;;  %v18283_v37 = vpack.c.bf16 %v7803_v27, %v7800_v44  ;;  %v15652_v26 = vld [vmem:[%s19337_s15 + $0x38] sm:$0xff]   ;;  %v15653_v27 = vld [vmem:[%s19337_s15 + $0x50] sm:$0xff]  }
0x12ac   :  { %v14510_v18 = vpop.f32.mrb[28].mxu1 }
0x12ad   :  { %v14558_v55 = vpop.f32.mrb[28].mxu0  ;;  %v7451_v3 = vpop.f32.mrb[29].mxu1 }
0x12ae   :  { %v7873_v51 = vpop.f32.mrb[29].mxu0  ;;  %v14511_v57 = vpop.f32.mrb[30].mxu1 }
0x12af   :  { %v7467_v28 = vpack.c.bf16 %v14511_v57, %v14510_v18  ;;  %v14559_v4 = vpop.f32.mrb[30].mxu0  ;;  %v7454_v48 = vpop.f32.mrb[31].mxu1  ;;  %v18351_v18 = vld [vmem:[%s19336_s3 + $0x70] sm:$0xff]  }
0x12b0   :  { %v18285_v33 = vpack.c.bf16 %v14559_v4, %v14558_v55  ;;  %v7466_v62 = vpack.c.bf16 %v7454_v48, %v7451_v3  ;;  %v7876_v59 = vpop.f32.mrb[31].mxu0  ;;  %v15654_v55 = vld [vmem:[%s19337_s15 + $0x58] sm:$0xff]  }
0x12b1   :  { %v7888_v6 = vpack.c.bf16 %v7876_v59, %v7873_v51  ;;  %v18361_v3 = vld [vmem:[%s19336_s3 + $0x78] sm:$0xff]   ;;  %v15657_v51 = vld [vmem:[%s19337_s15 + $0x70] sm:$0xff]   ;;  %v15660_v59 = vld [vmem:[%s19337_s15 + $0x88] sm:$0xff]  }
0x12b2   :  { %14512 = vmatprep.subr.bf16.mxu1 %v7466_v62 }
0x12b3   :  { %14513 = vmatpush3.bf16.msra.mxu1 %v7466_v62 }
0x12b4   :  { %14514 = vmatprep.subr.bf16.mxu1 %v7467_v28 }
0x12b5   :  { %v14574_v58 = vpop.f32.mrb[32].mxu0 }
0x12b6   :  { %v8011_v5 = vpop.f32.mrb[33].mxu0 }
0x12b7   :  { %v14575_v24 = vpop.f32.mrb[34].mxu0  ;;  %14515 = vmatpush3.bf16.msra.mxu1 %v7467_v28 }
0x12b8   :  { %v18295_v14 = vpack.c.bf16 %v14575_v24, %v14574_v58  ;;  %v8014_v20 = vpop.f32.mrb[35].mxu0  ;;  %14520 = vmatprep.subr.bf16.mxu1 %v18290_v47  ;;  %v15662_v58 = vld [vmem:[%s19337_s15 + $0x8] sm:$0xff]   ;;  %v15667_v24 = vld [vmem:[%s19337_s15 + $0x60] sm:$0xff]  }
0x12b9   :  { %v18303_v1 = vpack.c.bf16 %v8014_v20, %v8011_v5  ;;  %v15663_v5 = vld [vmem:[%s19337_s15 + $0x20] sm:$0xff]   ;;  %v8598_v20 = vpop.permute.xlu0 %8597 }
0x12ba   :  { %14517 = vmatmul.mubr.msk.bf16.vlgmr.msra.gmra.mrb[32].mxu1 %vm5428_vm12, %v15646_v12  ;;  %v15666_v12 = vld [vmem:[%s19337_s15 + $0x48] sm:$0xff]  }
0x12bb   :  { %14521 = vmatpush3.bf16.msra.mxu1 %v18290_v47  ;;  %14524 = vmatprep.mubr.msk.bf16.mxu1 %vm5428_vm12, %v18198_v19 }
0x12bc   :  { %14522 = vmatprep.subr.bf16.mxu1 %v18301_v40 }
0x12bd   :  { %v14598_v10 = vpop.f32.mrb[36].mxu0 }
0x12be   :  { %v8222_v52 = vpop.f32.mrb[37].mxu0 }
0x12bf   :  { %v14599_v56 = vpop.f32.mrb[38].mxu0  ;;  %14523 = vmatpush3.bf16.msra.mxu1 %v18301_v40 }
0x12c0   :  { %v18316_v43 = vpack.c.bf16 %v14599_v56, %v14598_v10  ;;  %v8225_v53 = vpop.f32.mrb[39].mxu0  ;;  %14528 = vmatprep.subr.bf16.mxu1 %v18313_v8  ;;  %v8608_v56 = vpop.permute.xlu0 %8607 }
0x12c1   :  { %v8237_v16 = vpack.c.bf16 %v8225_v53, %v8222_v52 }
0x12c2   :  { %14525 = vmatmul.mubr.msk.bf16.vlgmr.msra.gmra.mrb[36].mxu1 %vm5428_vm12, %v18196_v0 }
0x12c3   :  { %14529 = vmatpush3.bf16.msra.mxu1 %v18313_v8  ;;  %14532 = vmatprep.mubr.msk.bf16.mxu1 %vm5428_vm12, %v18198_v19 }
0x12c4   :  { %14530 = vmatprep.subr.bf16.mxu1 %v18322_v61 }
0x12c7   :  { %14531 = vmatpush3.bf16.msra.mxu1 %v18322_v61 }
0x12ca   :  { %14533 = vmatmul.mubr.msk.bf16.vlgmr.msra.gmra.mrb[40].mxu1 %vm5428_vm12, %v18196_v0 }
0x12cb   :  { %14540 = vmatprep.mubr.msk.bf16.mxu1 %vm5428_vm12, %v15651_v25 }
0x1395   :  { %v14526_v46 = vpop.f32.mrb[36].mxu1 }
0x1396   :  { %v7589_v13 = vpop.f32.mrb[37].mxu1 }
0x1397   :  { %v14527_v7 = vpop.f32.mrb[38].mxu1 }
0x1398   :  { %v18337_v9 = vpack.c.bf16 %v14527_v7, %v14526_v46  ;;  %v7592_v23 = vpop.f32.mrb[39].mxu1 }
0x1399   :  { %v7604_v34 = vpack.c.bf16 %v7592_v23, %v7589_v13 }
0x139d   :  { %v14534_v42 = vpop.f32.mrb[40].mxu1 }
0x139e   :  { %v7662_v38 = vpop.f32.mrb[41].mxu1 }
0x139f   :  { %v14535_v15 = vpop.f32.mrb[42].mxu1 }
0x13a0   :  { %v7678_v44 = vpack.c.bf16 %v14535_v15, %v14534_v42  ;;  %v7665_v45 = vpop.f32.mrb[43].mxu1 }
0x13a1   :  { %v7677_v50 = vpack.c.bf16 %v7665_v45, %v7662_v38 }
0x13a3   :  { %14536 = vmatprep.subr.bf16.mxu1 %v7677_v50 }
0x13a4   :  { %14537 = vmatpush3.bf16.msra.mxu1 %v7677_v50 }
0x13a5   :  { %14538 = vmatprep.subr.bf16.mxu1 %v7678_v44 }
0x13a8   :  { %14539 = vmatpush3.bf16.msra.mxu1 %v7678_v44 }
0x13a9   :  { %14560 = vmatprep.subr.bf16.mxu1 %v7888_v6 }
0x13ab   :  { %14541 = vmatmul.mubr.msk.bf16.vlgmr.msra.gmra.mrb[32].mxu1 %vm5428_vm12, %v15652_v26 }
0x13ac   :  { %14561 = vmatpush3.bf16.msra.mxu1 %v7888_v6  ;;  %14564 = vmatprep.mubr.msk.bf16.mxu1 %vm5428_vm12, %v15653_v27  ;;  %v15661_v6 = vld [vmem:[%s19337_s15] sm:$0xff]  }
0x13ad   :  { %14562 = vmatprep.subr.bf16.mxu1 %v18285_v33 }
0x13b0   :  { %14563 = vmatpush3.bf16.msra.mxu1 %v18285_v33 }
0x13b1   :  { %14576 = vmatprep.subr.bf16.mxu1 %v18351_v18 }
0x13b7   :  { %14565 = vmatmul.mubr.msk.bf16.vlgmr.msra.gmra.mrb[32].mxu1 %vm5428_vm12, %v15654_v55 }
0x13b8   :  { %14577 = vmatpush3.bf16.msra.mxu1 %v18351_v18  ;;  %14580 = vmatprep.mubr.msk.bf16.mxu1 %vm5428_vm12, %v18198_v19  ;;  %v15658_v19 = vld [vmem:[%s19337_s15 + $0x78] sm:$0xff]  }
0x13b9   :  { %14578 = vmatprep.subr.bf16.mxu1 %v18361_v3 }
0x13bc   :  { %14579 = vmatpush3.bf16.msra.mxu1 %v18361_v3 }
0x13bf   :  { %14581 = vmatmul.mubr.msk.bf16.vlgmr.msra.gmra.mrb[44].mxu1 %vm5428_vm12, %v18196_v0  ;;  %v15659_v0 = vld [vmem:[%s19337_s15 + $0x80] sm:$0xff]  }
0x13c0   :  { %14588 = vmatprep.mubr.msk.bf16.mxu1 %vm5428_vm12, %v15657_v51 }
0x1492   :  { %v14582_v57 = vpop.f32.mrb[44].mxu1 }
0x1493   :  { %v8084_v28 = vpop.f32.mrb[45].mxu1 }
0x1494   :  { %v14583_v4 = vpop.f32.mrb[46].mxu1 }
0x1495   :  { %v8100_v48 = vpack.c.bf16 %v14583_v4, %v14582_v57  ;;  %v8087_v33 = vpop.f32.mrb[47].mxu1 }
0x1496   :  { %v8099_v62 = vpack.c.bf16 %v8087_v33, %v8084_v28 }
0x1498   :  { %14584 = vmatprep.subr.bf16.mxu1 %v8099_v62 }
0x1499   :  { %14585 = vmatpush3.bf16.msra.mxu1 %v8099_v62 }
0x149a   :  { %14586 = vmatprep.subr.bf16.mxu1 %v8100_v48 }
0x149d   :  { %14587 = vmatpush3.bf16.msra.mxu1 %v8100_v48 }
0x149e   :  { %14600 = vmatprep.subr.bf16.mxu1 %v8237_v16 }
0x14a0   :  { %14589 = vmatmul.mubr.msk.bf16.vlgmr.msra.gmra.mrb[32].mxu1 %vm5428_vm12, %v15658_v19 }
0x14a1   :  { %14601 = vmatpush3.bf16.msra.mxu1 %v8237_v16  ;;  %14604 = vmatprep.mubr.msk.bf16.mxu1 %vm5428_vm12, %v15659_v0 }
0x14a2   :  { %14602 = vmatprep.subr.bf16.mxu1 %v18316_v43 }
0x14a5   :  { %14603 = vmatpush3.bf16.msra.mxu1 %v18316_v43 }
0x14a6   :  { %14608 = vmatprep.subr.bf16.mxu1 %v18281_v2 }
0x14ac   :  { %14605 = vmatmul.mubr.msk.bf16.vlgmr.msra.gmra.mrb[32].mxu1 %vm5428_vm12, %v15660_v59 }
0x14ad   :  { %14609 = vmatpush3.bf16.msra.mxu1 %v18281_v2  ;;  %14612 = vmatprep.mubr.msk.bf16.mxu1 %vm5428_vm12, %v15661_v6  ;;  %v15665_v2 = vld [vmem:[%s19337_s15 + $0x40] sm:$0xff]  }
0x14ae   :  { %14610 = vmatprep.subr.bf16.mxu1 %v18277_v21 }
0x14b1   :  { %14611 = vmatpush3.bf16.msra.mxu1 %v18277_v21  ;;  %v15664_v21 = vld [vmem:[%s19337_s15 + $0x28] sm:$0xff]  }
0x14b2   :  { %14616 = vmatprep.subr.bf16.mxu1 %v7604_v34 }
0x14b8   :  { %14613 = vmatmul.mubr.msk.bf16.vlgmr.msra.gmra.mrb[32].mxu1 %vm5428_vm12, %v15662_v58 }
0x14b9   :  { %14617 = vmatpush3.bf16.msra.mxu1 %v7604_v34  ;;  %14620 = vmatprep.mubr.msk.bf16.mxu1 %vm5428_vm12, %v15663_v5 }
0x14ba   :  { %14618 = vmatprep.subr.bf16.mxu1 %v18337_v9 }
0x14bd   :  { %14619 = vmatpush3.bf16.msra.mxu1 %v18337_v9 }
0x14be   :  { %14624 = vmatprep.subr.bf16.mxu1 %v18283_v37 }
0x14c4   :  { %14621 = vmatmul.mubr.msk.bf16.vlgmr.msra.gmra.mrb[32].mxu1 %vm5428_vm12, %v15664_v21 }
0x14c5   :  { %14625 = vmatpush3.bf16.msra.mxu1 %v18283_v37  ;;  %14628 = vmatprep.mubr.msk.bf16.mxu1 %vm5428_vm12, %v15665_v2  ;;  %v8593_v37 = vpop.permute.xlu1 %8592 }
0x14c6   :  { %14626 = vmatprep.subr.bf16.mxu1 %v18279_v36 }
0x14c9   :  { %14627 = vmatpush3.bf16.msra.mxu1 %v18279_v36  ;;  %v15668_v36 = vld [vmem:[%s19337_s15 + $0x68] sm:$0xff]  }
0x14ca   :  { %14632 = vmatprep.subr.bf16.mxu1 %v18303_v1 }
0x14d0   :  { %14629 = vmatmul.mubr.msk.bf16.vlgmr.msra.gmra.mrb[32].mxu1 %vm5428_vm12, %v15666_v12 }
0x14d1   :  { %14633 = vmatpush3.bf16.msra.mxu1 %v18303_v1  ;;  %14636 = vmatprep.mubr.msk.bf16.mxu1 %vm5428_vm12, %v15667_v24  ;;  %v8603_v1 = vpop.permute.xlu1 %8602 }
0x14d2   :  { %14634 = vmatprep.subr.bf16.mxu1 %v18295_v14 }
0x14d5   :  { %14635 = vmatpush3.bf16.msra.mxu1 %v18295_v14 }
0x14d6   :  { %14688 = vmatprep.subr.bf16.mxu1 %v18150_v29 }
0x14dc   :  { %14637 = vmatmul.mubr.msk.bf16.vlgmr.msra.gmra.mrb[32].mxu1 %vm5428_vm12, %v15668_v36 }
0x14dd   :  { %14689 = vmatpush3.bf16.msra.mxu1 %v18150_v29 }
0x14de   :  { %14690 = vmatprep.subr.bf16.mxu1 %v18178_v35 }
0x14e1   :  { %14691 = vmatpush3.bf16.msra.mxu1 %v18178_v35 }
0x14e2   :  { %14712 = vmatprep.subr.bf16.mxu1 %v18229_v22 }
0x15af   :  { %v14638_v14 = vpop.f32.mrb[32].mxu1 }
0x15b0   :  { %v8612_v10 = vadd.f32 %v14638_v14, %v8603_v1  ;;  %v8554_v52 = vpop.f32.mrb[33].mxu1 }
0x15b1   :  { %v8610_v43 = vadd.f32 %v8593_v37, %v8554_v52  ;;  %v14639_v53 = vpop.f32.mrb[34].mxu1 }
0x15b2   :  { %v8616_v16 = vmul.f32 0.5, %v8612_v10  ;;  %v8613_v25 = vadd.f32 %v14639_v53, %v8608_v56  ;;  %v8557_v46 = vpop.f32.mrb[35].mxu1  ;;  %v15670_v56 = vld [vmem:[%s19338_s16 + $0x18] sm:$0xff]  }
0x15b3   :  { %v8614_v13 = vmul.f32 0.5, %v8610_v43  ;;  %v8611_v29 = vadd.f32 %v8598_v20, %v8557_v46 }
0x15b4   :  { %15831 = vtanh.f32 %v8616_v16  ;;  %v8617_v7 = vmul.f32 0.5, %v8613_v25 }
0x15b5   :  { %15833 = vtanh.f32 %v8614_v13  ;;  %v8615_v9 = vmul.f32 0.5, %v8611_v29 }
0x15b6   :  { %15835 = vtanh.f32 %v8617_v7 }
0x15b7   :  { %15837 = vtanh.f32 %v8615_v9 }
0x15be   :  { %v15832_v23 = vpop.eup %15831 }
0x15bf   :  { %v15834_v34 = vpop.eup %15833  ;;  %v8624_v42 = vmul.f32 0.5, %v15832_v23 }
0x15c0   :  { %v15836_v38 = vpop.eup %15835  ;;  %v8622_v15 = vmul.f32 0.5, %v15834_v34 }
0x15c1   :  { %v15838_v44 = vpop.eup %15837  ;;  %v8625_v45 = vmul.f32 0.5, %v15836_v38  ;;  %v8628_v27 = vadd.f32 0.5, %v8624_v42 }
0x15c2   :  { %v8626_v50 = vadd.f32 0.5, %v8622_v15  ;;  %v8623_v26 = vmul.f32 0.5, %v15838_v44 }
0x15c3   :  { %v8629_v55 = vadd.f32 0.5, %v8625_v45  ;;  %v18446_v48 = vmul.f32 %v8628_v27, %v8612_v10 }
0x15c4   :  { %v8627_v51 = vadd.f32 0.5, %v8623_v26  ;;  %v18442_v28 = vmul.f32 %v8626_v50, %v8610_v43 }
0x15c5   :  { %v18440_v57 = vmul.f32 %v8629_v55, %v8613_v25  ;;  %v15672_v55 = vld [vmem:[%s19338_s16 + $0x38] sm:$0xff]  }
0x15c6   :  { %v18444_v4 = vmul.f32 %v8627_v51, %v8611_v29  ;;  %v15673_v51 = vld [vmem:[%s19338_s16 + $0x50] sm:$0xff]  }
0x15c7   :  { %v18454_v62 = vpack.c.bf16 %v18440_v57, %v18446_v48 }
0x15c8   :  { %v18450_v33 = vpack.c.bf16 %v18444_v4, %v18442_v28 }
0x15ca   :  { %14644 = vmatprep.mubr.msk.bf16.mxu0 %vm5428_vm12, %v18450_v33  ;;  %14692 = vmatprep.mubr.msk.bf16.mxu1 %vm5428_vm12, %v18450_v33 }
0x15cb   :  { %14645 = vmatmul.mubr.msk.bf16.vlgmr.msra.gmra.mrb[40].mxu0 %vm5428_vm12, %v18454_v62  ;;  %14693 = vmatmul.mubr.msk.bf16.vlgmr.msra.gmra.mrb[48].mxu1 %vm5428_vm12, %v18454_v62 }
0x15cc   :  { %14649 = vmatpush3.bf16.msra.mxu0 %v18187_v11  ;;  %14652 = vmatprep.mubr.msk.bf16.mxu0 %vm5428_vm12, %v18450_v33 }
0x15cd   :  { %14713 = vmatpush3.bf16.msra.mxu1 %v18229_v22  ;;  %14716 = vmatprep.mubr.msk.bf16.mxu1 %vm5428_vm12, %v18450_v33 }
0x15ce   :  { %14650 = vmatprep.subr.bf16.mxu0 %v18207_v63  ;;  %14714 = vmatprep.subr.bf16.mxu1 %v18237_v30 }
0x15d0   :  { %14651 = vmatpush3.bf16.msra.mxu0 %v18207_v63  ;;  %v15669_v63 = vld [vmem:[%s19338_s16 + $0x10] sm:$0xff]  }
0x15d1   :  { %14715 = vmatpush3.bf16.msra.mxu1 %v18237_v30 }
0x15d2   :  { %14720 = vmatprep.subr.bf16.mxu1 %v18351_v18 }
0x15d3   :  { %14653 = vmatmul.mubr.msk.bf16.vlgmr.msra.gmra.mrb[44].mxu0 %vm5428_vm12, %v18454_v62 }
0x15d4   :  { %14717 = vmatmul.mubr.msk.bf16.vlgmr.msra.gmra.mrb[52].mxu1 %vm5428_vm12, %v18454_v62  ;;  %14660 = vmatprep.mubr.msk.bf16.mxu0 %vm5428_vm12, %v15669_v63 }
0x15d5   :  { %14721 = vmatpush3.bf16.msra.mxu1 %v18351_v18  ;;  %14724 = vmatprep.mubr.msk.bf16.mxu1 %vm5428_vm12, %v18450_v33 }
0x15d6   :  { %14722 = vmatprep.subr.bf16.mxu1 %v18361_v3 }
0x15d9   :  { %14723 = vmatpush3.bf16.msra.mxu1 %v18361_v3 }
0x15da   :  { %14736 = vmatprep.subr.bf16.mxu1 %v18250_v54 }
0x15dc   :  { %14725 = vmatmul.mubr.msk.bf16.vlgmr.msra.gmra.mrb[56].mxu1 %vm5428_vm12, %v18454_v62 }
0x15dd   :  { %14737 = vmatpush3.bf16.msra.mxu1 %v18250_v54  ;;  %14740 = vmatprep.mubr.msk.bf16.mxu1 %vm5428_vm12, %v18450_v33 }
0x15de   :  { %14738 = vmatprep.subr.bf16.mxu1 %v18257_v31 }
0x15e1   :  { %14739 = vmatpush3.bf16.msra.mxu1 %v18257_v31 }
0x15e2   :  { %14784 = vmatprep.subr.bf16.mxu1 %v18145_v49 }
0x15e4   :  { %14741 = vmatmul.mubr.msk.bf16.vlgmr.msra.gmra.mrb[60].mxu1 %vm5428_vm12, %v18454_v62 }
0x15e5   :  { %14785 = vmatpush3.bf16.msra.mxu1 %v18145_v49 }
0x15e6   :  { %14786 = vmatprep.subr.bf16.mxu1 %v18173_v41 }
0x15e9   :  { %14787 = vmatpush3.bf16.msra.mxu1 %v18173_v41 }
0x15ea   :  { %14792 = vmatprep.subr.bf16.mxu1 %v18187_v11 }
0x169e   :  { %v14646_v22 = vpop.f32.mrb[40].mxu0  ;;  %v14694_v30 = vpop.f32.mrb[48].mxu1 }
0x169f   :  { %v8676_v54 = vpop.f32.mrb[41].mxu0  ;;  %v9029_v31 = vpop.f32.mrb[49].mxu1 }
0x16a0   :  { %v14647_v18 = vpop.f32.mrb[42].mxu0  ;;  %v14695_v3 = vpop.f32.mrb[50].mxu1 }
0x16a1   :  { %v18503_v19 = vpack.c.bf16 %v14647_v18, %v14646_v22  ;;  %v18505_v49 = vpack.c.bf16 %v14695_v3, %v14694_v30  ;;  %v8679_v0 = vpop.f32.mrb[43].mxu0  ;;  %v9032_v41 = vpop.f32.mrb[51].mxu1  ;;  %v15677_v3 = vld [vmem:[%s19338_s16 + $0x80] sm:$0xff]  }
0x16a2   :  { %v18507_v59 = vpack.c.bf16 %v8679_v0, %v8676_v54  ;;  %v18509_v11 = vpack.c.bf16 %v9032_v41, %v9029_v31  ;;  %v15678_v0 = vld [vmem:[%s19338_s16 + $0x88] sm:$0xff]   ;;  %v15679_v41 = vld [vmem:[%s19338_s16] sm:$0xff]  }
0x16a6   :  { %v14654_v6 = vpop.f32.mrb[44].mxu0 }
0x16a7   :  { %v14718_v58 = vpop.f32.mrb[52].mxu1  ;;  %v8731_v5 = vpop.f32.mrb[45].mxu0 }
0x16a8   :  { %v9206_v21 = vpop.f32.mrb[53].mxu1  ;;  %v14655_v2 = vpop.f32.mrb[46].mxu0 }
0x16a9   :  { %v8747_v12 = vpack.c.bf16 %v14655_v2, %v14654_v6  ;;  %v14719_v24 = vpop.f32.mrb[54].mxu1  ;;  %v8734_v36 = vpop.f32.mrb[47].mxu0  ;;  %v15680_v6 = vld [vmem:[%s19338_s16 + $0x8] sm:$0xff]  }
0x16aa   :  { %v18511_v37 = vpack.c.bf16 %v14719_v24, %v14718_v58  ;;  %v8746_v20 = vpack.c.bf16 %v8734_v36, %v8731_v5  ;;  %v9209_v1 = vpop.f32.mrb[55].mxu1  ;;  %v15681_v58 = vld [vmem:[%s19338_s16 + $0x20] sm:$0xff]   ;;  %v15684_v5 = vld [vmem:[%s19338_s16 + $0x48] sm:$0xff]   ;;  %v9759_v2 = vpop.permute.xlu0 %9758 }
0x16ab   :  { %v18513_v14 = vpack.c.bf16 %v9209_v1, %v9206_v21  ;;  %v15685_v21 = vld [vmem:[%s19338_s16 + $0x60] sm:$0xff]  }
0x16ac   :  { %14656 = vmatprep.subr.bf16.mxu0 %v8746_v20 }
0x16ad   :  { %14657 = vmatpush3.bf16.msra.mxu0 %v8746_v20 }
0x16ae   :  { %14658 = vmatprep.subr.bf16.mxu0 %v8747_v12  ;;  %v9769_v1 = vpop.permute.xlu0 %9768 }
0x16af   :  { %v14726_v10 = vpop.f32.mrb[56].mxu1 }
0x16b0   :  { %v9262_v52 = vpop.f32.mrb[57].mxu1 }
0x16b1   :  { %v14727_v43 = vpop.f32.mrb[58].mxu1  ;;  %14659 = vmatpush3.bf16.msra.mxu0 %v8747_v12  ;;  %v9754_v12 = vpop.permute.xlu1 %9753 }
0x16b2   :  { %v18518_v53 = vpack.c.bf16 %v14727_v43, %v14726_v10  ;;  %v9265_v16 = vpop.f32.mrb[59].mxu1  ;;  %14664 = vmatprep.subr.bf16.mxu0 %v18290_v47 }
0x16b3   :  { %v9277_v25 = vpack.c.bf16 %v9265_v16, %v9262_v52 }
0x16b4   :  { %14661 = vmatmul.mubr.msk.bf16.vlgmr.msra.gmra.mrb[48].mxu0 %vm5428_vm12, %v15670_v56 }
0x16b5   :  { %14665 = vmatpush3.bf16.msra.mxu0 %v18290_v47  ;;  %14668 = vmatprep.mubr.msk.bf16.mxu0 %vm5428_vm12, %v18450_v33  ;;  %v15671_v47 = vld [vmem:[%s19338_s16 + $0x30] sm:$0xff]   ;;  %v9764_v43 = vpop.permute.xlu1 %9763 }
0x16b6   :  { %14666 = vmatprep.subr.bf16.mxu0 %v18301_v40 }
0x16b7   :  { %v14742_v46 = vpop.f32.mrb[60].mxu1 }
0x16b8   :  { %v9383_v13 = vpop.f32.mrb[61].mxu1 }
0x16b9   :  { %v14743_v29 = vpop.f32.mrb[62].mxu1  ;;  %14667 = vmatpush3.bf16.msra.mxu0 %v18301_v40 }
0x16ba   :  { %v9399_v7 = vpack.c.bf16 %v14743_v29, %v14742_v46  ;;  %v9386_v9 = vpop.f32.mrb[63].mxu1  ;;  %14672 = vmatprep.subr.bf16.mxu0 %v18313_v8  ;;  %v13620_v46 = vld [vmem:[%s19395_s1 + $0x250] sm:$0xff]  ;;  %v13622_v29 = vld [vmem:[%s19395_s1 + $0x260] sm:$0xff] }
0x16bb   :  { %v9398_v23 = vpack.c.bf16 %v9386_v9, %v9383_v13  ;;  %v13618_v13 = vld [vmem:[%s19395_s1 + $0x240] sm:$0xff]  ;;  %v13623_v9 = vld [vmem:[%s19395_s1 + $0x268] sm:$0xff] }
0x16bc   :  { %14669 = vmatmul.mubr.msk.bf16.vlgmr.msra.gmra.mrb[52].mxu0 %vm5428_vm12, %v18454_v62 }
0x16bd   :  { %14673 = vmatpush3.bf16.msra.mxu0 %v18313_v8  ;;  %14676 = vmatprep.mubr.msk.bf16.mxu0 %vm5428_vm12, %v18450_v33 }
0x16be   :  { %14674 = vmatprep.subr.bf16.mxu0 %v18322_v61 }
0x16c1   :  { %14675 = vmatpush3.bf16.msra.mxu0 %v18322_v61 }
0x16c4   :  { %14677 = vmatmul.mubr.msk.bf16.vlgmr.msra.gmra.mrb[56].mxu0 %vm5428_vm12, %v18454_v62 }
0x16c5   :  { %14684 = vmatprep.mubr.msk.bf16.mxu0 %vm5428_vm12, %v15671_v47 }
0x178f   :  { %v14670_v40 = vpop.f32.mrb[52].mxu0 }
0x1790   :  { %v8852_v34 = vpop.f32.mrb[53].mxu0 }
0x1791   :  { %v14671_v42 = vpop.f32.mrb[54].mxu0 }
0x1792   :  { %v18541_v8 = vpack.c.bf16 %v14671_v42, %v14670_v40  ;;  %v8855_v38 = vpop.f32.mrb[55].mxu0 }
0x1793   :  { %v8867_v15 = vpack.c.bf16 %v8855_v38, %v8852_v34 }
0x1797   :  { %v14678_v44 = vpop.f32.mrb[56].mxu0 }
0x1798   :  { %v8908_v45 = vpop.f32.mrb[57].mxu0 }
0x1799   :  { %v14679_v50 = vpop.f32.mrb[58].mxu0 }
0x179a   :  { %v8924_v61 = vpack.c.bf16 %v14679_v50, %v14678_v44  ;;  %v8911_v26 = vpop.f32.mrb[59].mxu0 }
0x179b   :  { %v8923_v27 = vpack.c.bf16 %v8911_v26, %v8908_v45 }
0x179d   :  { %14680 = vmatprep.subr.bf16.mxu0 %v8923_v27 }
0x179e   :  { %14681 = vmatpush3.bf16.msra.mxu0 %v8923_v27 }
0x179f   :  { %14682 = vmatprep.subr.bf16.mxu0 %v8924_v61 }
0x17a2   :  { %14683 = vmatpush3.bf16.msra.mxu0 %v8924_v61 }
0x17a3   :  { %14696 = vmatprep.subr.bf16.mxu0 %v18192_v39 }
0x17a5   :  { %14685 = vmatmul.mubr.msk.bf16.vlgmr.msra.gmra.mrb[48].mxu0 %vm5428_vm12, %v15672_v55 }
0x17a6   :  { %14697 = vmatpush3.bf16.msra.mxu0 %v18192_v39  ;;  %14700 = vmatprep.mubr.msk.bf16.mxu0 %vm5428_vm12, %v18450_v33  ;;  %v15675_v33 = vld [vmem:[%s19338_s16 + $0x70] sm:$0xff]  }
0x17a7   :  { %14698 = vmatprep.subr.bf16.mxu0 %v18212_v17 }
0x17aa   :  { %14699 = vmatpush3.bf16.msra.mxu0 %v18212_v17  ;;  %v15674_v17 = vld [vmem:[%s19338_s16 + $0x58] sm:$0xff]  }
0x17ad   :  { %14701 = vmatmul.mubr.msk.bf16.vlgmr.msra.gmra.mrb[60].mxu0 %vm5428_vm12, %v18454_v62  ;;  %v15676_v62 = vld [vmem:[%s19338_s16 + $0x78] sm:$0xff]  }
0x17ae   :  { %14708 = vmatprep.mubr.msk.bf16.mxu0 %vm5428_vm12, %v15673_v51 }
0x1880   :  { %v14702_v63 = vpop.f32.mrb[60].mxu0 }
0x1881   :  { %v9085_v22 = vpop.f32.mrb[61].mxu0 }
0x1882   :  { %v14703_v30 = vpop.f32.mrb[62].mxu0 }
0x1883   :  { %v9101_v54 = vpack.c.bf16 %v14703_v30, %v14702_v63  ;;  %v9088_v31 = vpop.f32.mrb[63].mxu0 }
0x1884   :  { %v9100_v18 = vpack.c.bf16 %v9088_v31, %v9085_v22  ;;  %v13624_v31 = vld [vmem:[%s19395_s1 + $0x270] sm:$0xff] }
0x1886   :  { %14704 = vmatprep.subr.bf16.mxu0 %v9100_v18 }
0x1887   :  { %14705 = vmatpush3.bf16.msra.mxu0 %v9100_v18  ;;  %v13712_v18 = vld [vmem:[%s19395_s1 + $0x280] sm:$0xff] }
0x1888   :  { %14706 = vmatprep.subr.bf16.mxu0 %v9101_v54 }
0x188b   :  { %14707 = vmatpush3.bf16.msra.mxu0 %v9101_v54 }
0x188c   :  { %14728 = vmatprep.subr.bf16.mxu0 %v9277_v25 }
0x188e   :  { %14709 = vmatmul.mubr.msk.bf16.vlgmr.msra.gmra.mrb[48].mxu0 %vm5428_vm12, %v15674_v17  ;;  %v13625_v17 = vld [vmem:[%s19395_s1 + $0x278] sm:$0xff] }
0x188f   :  { %14729 = vmatpush3.bf16.msra.mxu0 %v9277_v25  ;;  %14732 = vmatprep.mubr.msk.bf16.mxu0 %vm5428_vm12, %v15675_v33  ;;  %v13619_v25 = vld [vmem:[%s19395_s1 + $0x248] sm:$0xff]  ;;  %v13714_v33 = vld [vmem:[%s19395_s1 + $0x290] sm:$0xff] }
0x1890   :  { %14730 = vmatprep.subr.bf16.mxu0 %v18518_v53 }
0x1893   :  { %14731 = vmatpush3.bf16.msra.mxu0 %v18518_v53 }
0x1894   :  { %14744 = vmatprep.subr.bf16.mxu0 %v9398_v23 }
0x189a   :  { %14733 = vmatmul.mubr.msk.bf16.vlgmr.msra.gmra.mrb[48].mxu0 %vm5428_vm12, %v15676_v62  ;;  %v13713_v62 = vld [vmem:[%s19395_s1 + $0x288] sm:$0xff] }
0x189b   :  { %14745 = vmatpush3.bf16.msra.mxu0 %v9398_v23  ;;  %14748 = vmatprep.mubr.msk.bf16.mxu0 %vm5428_vm12, %v15677_v3  ;;  %v13715_v3 = vld [vmem:[%s19395_s1 + $0x298] sm:$0xff] }
0x189c   :  { %14746 = vmatprep.subr.bf16.mxu0 %v9399_v7 }
0x189f   :  { %14747 = vmatpush3.bf16.msra.mxu0 %v9399_v7  ;;  %v13621_v7 = vld [vmem:[%s19395_s1 + $0x258] sm:$0xff] }
0x18a0   :  { %14752 = vmatprep.subr.bf16.mxu0 %v18507_v59 }
0x18a6   :  { %14749 = vmatmul.mubr.msk.bf16.vlgmr.msra.gmra.mrb[48].mxu0 %vm5428_vm12, %v15678_v0 }
0x18a7   :  { %14753 = vmatpush3.bf16.msra.mxu0 %v18507_v59  ;;  %14756 = vmatprep.mubr.msk.bf16.mxu0 %vm5428_vm12, %v15679_v41  ;;  %v15683_v59 = vld [vmem:[%s19338_s16 + $0x40] sm:$0xff]  }
0x18a8   :  { %14754 = vmatprep.subr.bf16.mxu0 %v18503_v19 }
0x18ab   :  { %14755 = vmatpush3.bf16.msra.mxu0 %v18503_v19  ;;  %v15682_v19 = vld [vmem:[%s19338_s16 + $0x28] sm:$0xff]  }
0x18ac   :  { %14760 = vmatprep.subr.bf16.mxu0 %v8867_v15 }
0x18b2   :  { %14757 = vmatmul.mubr.msk.bf16.vlgmr.msra.gmra.mrb[48].mxu0 %vm5428_vm12, %v15680_v6 }
0x18b3   :  { %14761 = vmatpush3.bf16.msra.mxu0 %v8867_v15  ;;  %14764 = vmatprep.mubr.msk.bf16.mxu0 %vm5428_vm12, %v15681_v58 }
0x18b4   :  { %14762 = vmatprep.subr.bf16.mxu0 %v18541_v8 }
0x18b7   :  { %14763 = vmatpush3.bf16.msra.mxu0 %v18541_v8 }
0x18b8   :  { %14768 = vmatprep.subr.bf16.mxu0 %v18509_v11 }
0x18be   :  { %14765 = vmatmul.mubr.msk.bf16.vlgmr.msra.gmra.mrb[48].mxu0 %vm5428_vm12, %v15682_v19 }
0x18bf   :  { %14769 = vmatpush3.bf16.msra.mxu0 %v18509_v11  ;;  %14772 = vmatprep.mubr.msk.bf16.mxu0 %vm5428_vm12, %v15683_v59  ;;  %v15686_v11 = vld [vmem:[%s19338_s16 + $0x68] sm:$0xff]  }
0x18c0   :  { %14770 = vmatprep.subr.bf16.mxu0 %v18505_v49 }
0x18c3   :  { %14771 = vmatpush3.bf16.msra.mxu0 %v18505_v49  ;;  %v15899_v49 = vld [vmem:[%s19336_s3 + $0x40] sm:$0xff]  }
0x18c4   :  { %14776 = vmatprep.subr.bf16.mxu0 %v18513_v14 }
0x18ca   :  { %14773 = vmatmul.mubr.msk.bf16.vlgmr.msra.gmra.mrb[48].mxu0 %vm5428_vm12, %v15684_v5 }
0x18cb   :  { %14777 = vmatpush3.bf16.msra.mxu0 %v18513_v14  ;;  %14780 = vmatprep.mubr.msk.bf16.mxu0 %vm5428_vm12, %v15685_v21 }
0x18cc   :  { %14778 = vmatprep.subr.bf16.mxu0 %v18511_v37 }
0x18cf   :  { %14779 = vmatpush3.bf16.msra.mxu0 %v18511_v37 }
0x18d0   :  { %14832 = vmatprep.subr.bf16.mxu0 %v15899_v49 }
0x18d6   :  { %14781 = vmatmul.mubr.msk.bf16.vlgmr.msra.gmra.mrb[48].mxu0 %vm5428_vm12, %v15686_v11 }
0x18d7   :  { %14833 = vmatpush3.bf16.msra.mxu0 %v15899_v49 }
0x18d8   :  { %14834 = vmatprep.subr.bf16.mxu0 %v18178_v35 }
0x18db   :  { %14835 = vmatpush3.bf16.msra.mxu0 %v18178_v35 }
0x18dc   :  { %14840 = vmatprep.subr.bf16.mxu0 %v18192_v39 }
0x19a9   :  { %v14782_v24 = vpop.f32.mrb[48].mxu0 }
0x19aa   :  { %v9715_v36 = vpop.f32.mrb[49].mxu0  ;;  %v9773_v53 = vadd.f32 %v14782_v24, %v9764_v43 }
0x19ab   :  { %v9771_v37 = vadd.f32 %v9754_v12, %v9715_v36  ;;  %v14783_v20 = vpop.f32.mrb[50].mxu0 }
0x19ac   :  { %v9718_v14 = vpop.f32.mrb[51].mxu0  ;;  %v9774_v10 = vadd.f32 %v14783_v20, %v9769_v1  ;;  %v9791_v39 = vsel %vm5428_vm12, %v9773_v53, 0.0 }
0x19ad   :  { %v9772_v52 = vadd.f32 %v9759_v2, %v9718_v14  ;;  %v9785_v56 = vsel %vm5428_vm12, %v9771_v37, 0.0 }
0x19ae   :  { %9786 = vadd.xlane.f32.xlu1 %v9785_v56  ;;  %v9794_v35 = vsel %vm5428_vm12, %v9774_v10, 0.0 }
0x19af   :  { %v9788_v16 = vsel %vm5428_vm12, %v9772_v52, 0.0 }
0x19b0   :  { %9789 = vadd.xlane.f32.xlu0 %v9788_v16 }
0x19b2   :  { %9795 = vadd.xlane.f32.xlu1 %v9794_v35 }
0x19b4   :  { %9792 = vadd.xlane.f32.xlu0 %v9791_v39 }
0x19c3   :  { %9844 = vperm.xlu1 %15509, %v13619_v25  }
0x19c7   :  { %9849 = vperm.xlu1 %15509, %v13620_v46  }
0x19ca   :  { %9839 = vperm.xlu0 %15508, %v13618_v13  }
0x19cb   :  { %9863 = vperm.xlu1 %15509, %v13622_v29  }
0x19ce   :  { %9854 = vperm.xlu0 %15508, %v13621_v7  }
0x19d2   :  { %9868 = vperm.xlu0 %15508, %v13623_v9  }
0x1a3b   :  { %v9787_v23 = vpop.xlane.xlu1 %9786 }
0x1a3c   :  { %v9797_v42 = vmul.f32 0.03125, %v9787_v23 }
0x1a3d   :  { %v9790_v47 = vpop.xlane.xlu0 %9789 }
0x1a3e   :  { %v9798_v40 = vmul.f32 0.03125, %v9790_v47  ;;  %v9801_v50 = vsub.f32 %v9771_v37, %v9797_v42 }
0x1a3f   :  { %v9796_v34 = vpop.xlane.xlu1 %9795 }
0x1a40   :  { %v9800_v8 = vmul.f32 0.03125, %v9796_v34  ;;  %v9802_v15 = vsub.f32 %v9772_v52, %v9798_v40  ;;  %v9805_v22 = vmul.f32 %v9801_v50, %v9801_v50 }
0x1a41   :  { %v9793_v38 = vpop.xlane.xlu0 %9792 }
0x1a42   :  { %v9804_v44 = vsub.f32 %v9774_v10, %v9800_v8  ;;  %v9799_v45 = vmul.f32 0.03125, %v9793_v38  ;;  %v9806_v51 = vmul.f32 %v9802_v15, %v9802_v15  ;;  %v9809_v54 = vsel %vm5428_vm12, %v9805_v22, 0.0 }
0x1a43   :  { %v9845_v0 = vpop.permute.xlu1 %9844 }
0x1a44   :  { %v9803_v61 = vsub.f32 %v9773_v53, %v9799_v45  ;;  %v9808_v26 = vmul.f32 %v9804_v44, %v9804_v44  ;;  %v9812_v30 = vsel %vm5428_vm12, %v9806_v51, 0.0 }
0x1a46   :  { %v9818_v27 = vsel %vm5428_vm12, %v9808_v26, 0.0  ;;  %v9807_v55 = vmul.f32 %v9803_v61, %v9803_v61 }
0x1a47   :  { %9819 = vadd.xlane.f32.xlu1 %v9818_v27  ;;  %v9850_v6 = vpop.permute.xlu1 %9849 }
0x1a48   :  { %v9815_v63 = vsel %vm5428_vm12, %v9807_v55, 0.0 }
0x1a49   :  { %9816 = vadd.xlane.f32.xlu0 %v9815_v63  ;;  %v9840_v41 = vpop.permute.xlu0 %9839 }
0x1a4b   :  { %9813 = vadd.xlane.f32.xlu1 %v9812_v30  ;;  %v9864_v19 = vpop.permute.xlu1 %9863 }
0x1a4d   :  { %9810 = vadd.xlane.f32.xlu0 %v9809_v54  ;;  %v9855_v58 = vpop.permute.xlu0 %9854 }
0x1a51   :  { %v9869_v59 = vpop.permute.xlu0 %9868 }
0x1a5c   :  { %9873 = vperm.xlu1 %15509, %v13624_v31  }
0x1a60   :  { %11024 = vperm.xlu1 %15509, %v13712_v18  }
0x1a63   :  { %9878 = vperm.xlu0 %15508, %v13625_v17  }
0x1a64   :  { %11034 = vperm.xlu1 %15509, %v13714_v33  }
0x1a67   :  { %11029 = vperm.xlu0 %15508, %v13713_v62  }
0x1a6b   :  { %11039 = vperm.xlu0 %15508, %v13715_v3  }
0x1ad4   :  { %v9820_v5 = vpop.xlane.xlu1 %9819 }
0x1ad5   :  { %v9824_v21 = vmul.f32 0.03125, %v9820_v5  ;;  %v15906_v5 = vld [vmem:[%s19336_s3 + $0x80] sm:$0xff]  }
0x1ad6   :  { %v9817_v49 = vpop.xlane.xlu0 %9816 }
0x1ad7   :  { %v9828_v11 = vadd.f32 1e-05, %v9824_v21  ;;  %v9823_v2 = vmul.f32 0.03125, %v9817_v49  ;;  %v15907_v21 = vld [vmem:[%s19336_s3 + $0x88] sm:$0xff]   ;;  %v15687_v49 = vld [vmem:[%s19339_s17 + $0x10] sm:$0xff]  }
0x1ad8   :  { %v9814_v12 = vpop.xlane.xlu1 %9813 }
0x1ad9   :  { %15839 = vrsqrt.f32 %v9828_v11  ;;  %v9827_v24 = vadd.f32 1e-05, %v9823_v2  ;;  %v9822_v36 = vmul.f32 0.03125, %v9814_v12 }
0x1ada   :  { %v9811_v37 = vpop.xlane.xlu0 %9810 }
0x1adb   :  { %15841 = vrsqrt.f32 %v9827_v24  ;;  %v9826_v20 = vadd.f32 1e-05, %v9822_v36  ;;  %v9821_v1 = vmul.f32 0.03125, %v9811_v37 }
0x1adc   :  { %v9874_v29 = vpop.permute.xlu1 %9873 }
0x1add   :  { %15843 = vrsqrt.f32 %v9826_v20  ;;  %v9825_v14 = vadd.f32 1e-05, %v9821_v1 }
0x1adf   :  { %15845 = vrsqrt.f32 %v9825_v14 }
0x1ae2   :  { %v9879_v35 = vpop.permute.xlu0 %9878 }
0x1ae3   :  { %v15840_v10 = vpop.eup %15839 }
0x1ae4   :  { %v9836_v52 = vmul.f32 %v15840_v10, %v9804_v44 }
0x1ae5   :  { %v15842_v56 = vpop.eup %15841 }
0x1ae6   :  { %v9835_v43 = vmul.f32 %v15842_v56, %v9803_v61  ;;  %v9860_v53 = vmul.f32 %v9855_v58, %v9836_v52  ;;  %v15903_v58 = vld [vmem:[%s19336_s3 + $0x58] sm:$0xff]  }
0x1ae7   :  { %v15844_v16 = vpop.eup %15843 }
0x1ae8   :  { %v9834_v39 = vmul.f32 %v15844_v16, %v9802_v15  ;;  %v9859_v25 = vmul.f32 %v9850_v6, %v9835_v43  ;;  %v9884_v46 = vadd.f32 %v9879_v35, %v9860_v53  ;;  %v15902_v6 = vld [vmem:[%s19336_s3 + $0x18] sm:$0xff]  }
0x1ae9   :  { %v15846_v13 = vpop.eup %15845 }
0x1aea   :  { %v9858_v7 = vmul.f32 %v9845_v0, %v9834_v39  ;;  %v9833_v9 = vmul.f32 %v15846_v13, %v9801_v50  ;;  %v9883_v23 = vadd.f32 %v9874_v29, %v9859_v25  ;;  %v9888_v47 = vmul.f32 0.5, %v9884_v46  ;;  %v15900_v0 = vld [vmem:[%s19336_s3 + $0x10] sm:$0xff]  }
0x1aec   :  { %v9882_v40 = vadd.f32 %v9869_v59, %v9858_v7  ;;  %v9857_v34 = vmul.f32 %v9840_v41, %v9833_v9  ;;  %v9887_v42 = vmul.f32 0.5, %v9883_v23  ;;  %15847 = vtanh.f32 %v9888_v47  ;;  %v15901_v41 = vld [vmem:[%s19336_s3 + $0x50] sm:$0xff]   ;;  %v15905_v59 = vld [vmem:[%s19336_s3 + $0x68] sm:$0xff]  }
0x1aee   :  { %v9886_v8 = vmul.f32 0.5, %v9882_v40  ;;  %v9881_v38 = vadd.f32 %v9864_v19, %v9857_v34  ;;  %15849 = vtanh.f32 %v9887_v42  ;;  %v15904_v19 = vld [vmem:[%s19336_s3 + $0x60] sm:$0xff]   ;;  %v15688_v34 = vld [vmem:[%s19339_s17 + $0x18] sm:$0xff]  }
0x1af0   :  { %15851 = vtanh.f32 %v9886_v8  ;;  %v9885_v44 = vmul.f32 0.5, %v9881_v38 }
0x1af2   :  { %15853 = vtanh.f32 %v9885_v44  ;;  %v15908_v44 = vld [vmem:[%s19336_s3 + $0x20] sm:$0xff]  }
0x1af6   :  { %v15848_v45 = vpop.eup %15847 }
0x1af7   :  { %v9896_v27 = vmul.f32 0.5, %v15848_v45 }
0x1af8   :  { %v15850_v15 = vpop.eup %15849 }
0x1af9   :  { %v9895_v61 = vmul.f32 0.5, %v15850_v15  ;;  %v9900_v30 = vadd.f32 0.5, %v9896_v27  ;;  %v15909_v15 = vld [vmem:[%s19336_s3 + $0x28] sm:$0xff]  }
0x1afa   :  { %v15852_v26 = vpop.eup %15851 }
0x1afb   :  { %v9894_v55 = vmul.f32 0.5, %v15852_v26  ;;  %v9899_v50 = vadd.f32 0.5, %v9895_v61  ;;  %v9904_v33 = vmul.f32 %v9900_v30, %v9884_v46  ;;  %v15689_v30 = vld [vmem:[%s19339_s17 + $0x30] sm:$0xff]  }
0x1afc   :  { %v15854_v51 = vpop.eup %15853 }
0x1afd   :  { %v9898_v63 = vadd.f32 0.5, %v9894_v55  ;;  %v9893_v22 = vmul.f32 0.5, %v15854_v51  ;;  %v9903_v31 = vmul.f32 %v9899_v50, %v9883_v23  ;;  %v15910_v50 = vld [vmem:[%s19336_s3 + $0x30] sm:$0xff]  }
0x1aff   :  { %v9897_v54 = vadd.f32 0.5, %v9893_v22  ;;  %v9902_v18 = vmul.f32 %v9898_v63, %v9882_v40  ;;  %v18679_v3 = vpack.c.bf16 %v9904_v33, %v9903_v31  ;;  %v15911_v22 = vld [vmem:[%s19336_s3 + $0x38] sm:$0xff]  }
0x1b01   :  { %v9901_v17 = vmul.f32 %v9897_v54, %v9881_v38 }
0x1b03   :  { %v18677_v62 = vpack.c.bf16 %v9902_v18, %v9901_v17 }
0x1b05   :  { %14788 = vmatprep.mubr.msk.bf16.mxu1 %vm5428_vm12, %v18677_v62  ;;  %14836 = vmatprep.mubr.msk.bf16.mxu0 %vm5428_vm12, %v18677_v62 }
0x1b06   :  { %14789 = vmatmul.mubr.msk.bf16.vlgmr.msra.gmra.mrb[64].mxu1 %vm5428_vm12, %v18679_v3  ;;  %14837 = vmatmul.mubr.msk.bf16.vlgmr.msra.gmra.mrb[64].mxu0 %vm5428_vm12, %v18679_v3 }
0x1b07   :  { %14793 = vmatpush3.bf16.msra.mxu1 %v15900_v0  ;;  %14796 = vmatprep.mubr.msk.bf16.mxu1 %vm5428_vm12, %v18677_v62 }
0x1b08   :  { %14841 = vmatpush3.bf16.msra.mxu0 %v15901_v41  ;;  %14844 = vmatprep.mubr.msk.bf16.mxu0 %vm5428_vm12, %v18677_v62 }
0x1b09   :  { %14794 = vmatprep.subr.bf16.mxu1 %v15902_v6  ;;  %14842 = vmatprep.subr.bf16.mxu0 %v15903_v58 }
0x1b0b   :  { %14795 = vmatpush3.bf16.msra.mxu1 %v15902_v6 }
0x1b0c   :  { %14843 = vmatpush3.bf16.msra.mxu0 %v15903_v58 }
0x1b0d   :  { %14856 = vmatprep.subr.bf16.mxu0 %v15904_v19 }
0x1b0e   :  { %14797 = vmatmul.mubr.msk.bf16.vlgmr.msra.gmra.mrb[68].mxu1 %vm5428_vm12, %v18679_v3 }
0x1b0f   :  { %14845 = vmatmul.mubr.msk.bf16.vlgmr.msra.gmra.mrb[68].mxu0 %vm5428_vm12, %v18679_v3  ;;  %14804 = vmatprep.mubr.msk.bf16.mxu1 %vm5428_vm12, %v15687_v49  ;;  %v15691_v49 = vld [vmem:[%s19339_s17 + $0x50] sm:$0xff]  }
0x1b10   :  { %14857 = vmatpush3.bf16.msra.mxu0 %v15904_v19  ;;  %14860 = vmatprep.mubr.msk.bf16.mxu0 %vm5428_vm12, %v18677_v62 }
0x1b11   :  { %14858 = vmatprep.subr.bf16.mxu0 %v15905_v59 }
0x1b14   :  { %14859 = vmatpush3.bf16.msra.mxu0 %v15905_v59 }
0x1b15   :  { %14880 = vmatprep.subr.bf16.mxu0 %v15906_v5 }
0x1b17   :  { %14861 = vmatmul.mubr.msk.bf16.vlgmr.msra.gmra.mrb[72].mxu0 %vm5428_vm12, %v18679_v3 }
0x1b18   :  { %14881 = vmatpush3.bf16.msra.mxu0 %v15906_v5  ;;  %14884 = vmatprep.mubr.msk.bf16.mxu0 %vm5428_vm12, %v18677_v62 }
0x1b19   :  { %14882 = vmatprep.subr.bf16.mxu0 %v15907_v21 }
0x1b1c   :  { %14883 = vmatpush3.bf16.msra.mxu0 %v15907_v21  ;;  %v15690_v21 = vld [vmem:[%s19339_s17 + $0x38] sm:$0xff]  }
0x1b1f   :  { %14885 = vmatmul.mubr.msk.bf16.vlgmr.msra.gmra.mrb[76].mxu0 %vm5428_vm12, %v18679_v3 }
0x1bd9   :  { %v14790_v11 = vpop.f32.mrb[64].mxu1  ;;  %v14838_v2 = vpop.f32.mrb[64].mxu0 }
0x1bda   :  { %v9947_v12 = vpop.f32.mrb[65].mxu1  ;;  %v10300_v24 = vpop.f32.mrb[65].mxu0 }
0x1bdb   :  { %v14791_v36 = vpop.f32.mrb[66].mxu1  ;;  %v14839_v37 = vpop.f32.mrb[66].mxu0 }
0x1bdc   :  { %v18733_v20 = vpack.c.bf16 %v14791_v36, %v14790_v11  ;;  %v18735_v1 = vpack.c.bf16 %v14839_v37, %v14838_v2  ;;  %v9950_v14 = vpop.f32.mrb[67].mxu1  ;;  %v10303_v10 = vpop.f32.mrb[67].mxu0  ;;  %v15912_v11 = vld [vmem:[%s19336_s3 + $0x70] sm:$0xff]   ;;  %v15692_v2 = vld [vmem:[%s19339_s17 + $0x58] sm:$0xff]  }
0x1bdd   :  { %v18737_v52 = vpack.c.bf16 %v9950_v14, %v9947_v12  ;;  %v18739_v56 = vpack.c.bf16 %v10303_v10, %v10300_v24  ;;  %v15913_v12 = vld [vmem:[%s19336_s3 + $0x78] sm:$0xff]   ;;  %v15693_v24 = vld [vmem:[%s19339_s17 + $0x70] sm:$0xff]  }
0x1be1   :  { %v14798_v43 = vpop.f32.mrb[68].mxu1 }
0x1be2   :  { %v14846_v53 = vpop.f32.mrb[68].mxu0  ;;  %v10002_v16 = vpop.f32.mrb[69].mxu1 }
0x1be3   :  { %v10356_v35 = vpop.f32.mrb[69].mxu0  ;;  %v14799_v39 = vpop.f32.mrb[70].mxu1 }
0x1be4   :  { %v10018_v25 = vpack.c.bf16 %v14799_v39, %v14798_v43  ;;  %v14847_v46 = vpop.f32.mrb[70].mxu0  ;;  %v10005_v13 = vpop.f32.mrb[71].mxu1  ;;  %v15698_v39 = vld [vmem:[%s19339_s17 + $0x8] sm:$0xff]  }
0x1be5   :  { %v10372_v29 = vpack.c.bf16 %v14847_v46, %v14846_v53  ;;  %v10017_v7 = vpack.c.bf16 %v10005_v13, %v10002_v16  ;;  %v10359_v9 = vpop.f32.mrb[71].mxu0  ;;  %v15694_v53 = vld [vmem:[%s19339_s17 + $0x78] sm:$0xff]   ;;  %v15696_v16 = vld [vmem:[%s19339_s17 + $0x88] sm:$0xff]   ;;  %v15703_v13 = vld [vmem:[%s19339_s17 + $0x60] sm:$0xff]  }
0x1be6   :  { %v10371_v23 = vpack.c.bf16 %v10359_v9, %v10356_v35  ;;  %v15697_v35 = vld [vmem:[%s19339_s17] sm:$0xff]   ;;  %v15702_v46 = vld [vmem:[%s19339_s17 + $0x48] sm:$0xff]  }
0x1be7   :  { %14800 = vmatprep.subr.bf16.mxu1 %v10017_v7 }
0x1be8   :  { %14801 = vmatpush3.bf16.msra.mxu1 %v10017_v7 }
0x1be9   :  { %14802 = vmatprep.subr.bf16.mxu1 %v10018_v25 }
0x1bea   :  { %v14862_v47 = vpop.f32.mrb[72].mxu0 }
0x1beb   :  { %v10477_v40 = vpop.f32.mrb[73].mxu0 }
0x1bec   :  { %v14863_v42 = vpop.f32.mrb[74].mxu0  ;;  %14803 = vmatpush3.bf16.msra.mxu1 %v10018_v25  ;;  %v15699_v25 = vld [vmem:[%s19339_s17 + $0x20] sm:$0xff]  }
0x1bed   :  { %v18744_v8 = vpack.c.bf16 %v14863_v42, %v14862_v47  ;;  %v10480_v38 = vpop.f32.mrb[75].mxu0  ;;  %14808 = vmatprep.subr.bf16.mxu1 %v15908_v44 }
0x1bee   :  { %v18749_v45 = vpack.c.bf16 %v10480_v38, %v10477_v40 }
0x1bef   :  { %14805 = vmatmul.mubr.msk.bf16.vlgmr.msra.gmra.mrb[72].mxu1 %vm5428_vm12, %v15688_v34 }
0x1bf0   :  { %14809 = vmatpush3.bf16.msra.mxu1 %v15908_v44  ;;  %14812 = vmatprep.mubr.msk.bf16.mxu1 %vm5428_vm12, %v18677_v62 }
0x1bf1   :  { %14810 = vmatprep.subr.bf16.mxu1 %v15909_v15 }
0x1bf2   :  { %v14886_v61 = vpop.f32.mrb[76].mxu0 }
0x1bf3   :  { %v10654_v26 = vpop.f32.mrb[77].mxu0 }
0x1bf4   :  { %v14887_v27 = vpop.f32.mrb[78].mxu0  ;;  %14811 = vmatpush3.bf16.msra.mxu1 %v15909_v15 }
0x1bf5   :  { %v18757_v55 = vpack.c.bf16 %v14887_v27, %v14886_v61  ;;  %v10657_v51 = vpop.f32.mrb[79].mxu0  ;;  %14816 = vmatprep.subr.bf16.mxu1 %v15910_v50  ;;  %v13717_v27 = vld [vmem:[%s19395_s1 + $0x2a8] sm:$0xff] }
0x1bf6   :  { %v10669_v63 = vpack.c.bf16 %v10657_v51, %v10654_v26  ;;  %v13716_v51 = vld [vmem:[%s19395_s1 + $0x2a0] sm:$0xff] }
0x1bf7   :  { %14813 = vmatmul.mubr.msk.bf16.vlgmr.msra.gmra.mrb[76].mxu1 %vm5428_vm12, %v18679_v3 }
0x1bf8   :  { %14817 = vmatpush3.bf16.msra.mxu1 %v15910_v50  ;;  %14820 = vmatprep.mubr.msk.bf16.mxu1 %vm5428_vm12, %v18677_v62  ;;  %v13718_v50 = vld [vmem:[%s19395_s1 + $0x2b0] sm:$0xff] }
0x1bf9   :  { %14818 = vmatprep.subr.bf16.mxu1 %v15911_v22 }
0x1bfc   :  { %14819 = vmatpush3.bf16.msra.mxu1 %v15911_v22  ;;  %v13719_v22 = vld [vmem:[%s19395_s1 + $0x2b8] sm:$0xff] }
0x1bff   :  { %14821 = vmatmul.mubr.msk.bf16.vlgmr.msra.gmra.mrb[80].mxu1 %vm5428_vm12, %v18679_v3 }
0x1c00   :  { %14828 = vmatprep.mubr.msk.bf16.mxu1 %vm5428_vm12, %v15689_v30 }
0x1cca   :  { %v14814_v54 = vpop.f32.mrb[76].mxu1 }
0x1ccb   :  { %v10123_v31 = vpop.f32.mrb[77].mxu1 }
0x1ccc   :  { %v14815_v18 = vpop.f32.mrb[78].mxu1 }
0x1ccd   :  { %v18775_v17 = vpack.c.bf16 %v14815_v18, %v14814_v54  ;;  %v10126_v33 = vpop.f32.mrb[79].mxu1 }
0x1cce   :  { %v10138_v0 = vpack.c.bf16 %v10126_v33, %v10123_v31 }
0x1cd2   :  { %v14822_v41 = vpop.f32.mrb[80].mxu1 }
0x1cd3   :  { %v10179_v6 = vpop.f32.mrb[81].mxu1 }
0x1cd4   :  { %v14823_v58 = vpop.f32.mrb[82].mxu1 }
0x1cd5   :  { %v10195_v19 = vpack.c.bf16 %v14823_v58, %v14822_v41  ;;  %v10182_v59 = vpop.f32.mrb[83].mxu1 }
0x1cd6   :  { %v10194_v5 = vpack.c.bf16 %v10182_v59, %v10179_v6 }
0x1cd8   :  { %14824 = vmatprep.subr.bf16.mxu1 %v10194_v5 }
0x1cd9   :  { %14825 = vmatpush3.bf16.msra.mxu1 %v10194_v5 }
0x1cda   :  { %14826 = vmatprep.subr.bf16.mxu1 %v10195_v19 }
0x1cdd   :  { %14827 = vmatpush3.bf16.msra.mxu1 %v10195_v19 }
0x1cde   :  { %14848 = vmatprep.subr.bf16.mxu1 %v10371_v23 }
0x1ce0   :  { %14829 = vmatmul.mubr.msk.bf16.vlgmr.msra.gmra.mrb[72].mxu1 %vm5428_vm12, %v15690_v21 }
0x1ce1   :  { %14849 = vmatpush3.bf16.msra.mxu1 %v10371_v23  ;;  %14852 = vmatprep.mubr.msk.bf16.mxu1 %vm5428_vm12, %v15691_v49 }
0x1ce2   :  { %14850 = vmatprep.subr.bf16.mxu1 %v10372_v29 }
0x1ce5   :  { %14851 = vmatpush3.bf16.msra.mxu1 %v10372_v29  ;;  %v11025_v29 = vpop.permute.xlu1 %11024 }
0x1ce6   :  { %14864 = vmatprep.subr.bf16.mxu1 %v15912_v11 }
0x1cec   :  { %14853 = vmatmul.mubr.msk.bf16.vlgmr.msra.gmra.mrb[72].mxu1 %vm5428_vm12, %v15692_v2 }
0x1ced   :  { %14865 = vmatpush3.bf16.msra.mxu1 %v15912_v11  ;;  %14868 = vmatprep.mubr.msk.bf16.mxu1 %vm5428_vm12, %v18677_v62 }
0x1cee   :  { %14866 = vmatprep.subr.bf16.mxu1 %v15913_v12 }
0x1cf1   :  { %14867 = vmatpush3.bf16.msra.mxu1 %v15913_v12 }
0x1cf4   :  { %14869 = vmatmul.mubr.msk.bf16.vlgmr.msra.gmra.mrb[84].mxu1 %vm5428_vm12, %v18679_v3  ;;  %v15695_v3 = vld [vmem:[%s19339_s17 + $0x80] sm:$0xff]  }
0x1cf5   :  { %14876 = vmatprep.mubr.msk.bf16.mxu1 %vm5428_vm12, %v15693_v24 }
0x1dc7   :  { %v14870_v36 = vpop.f32.mrb[84].mxu1 }
0x1dc8   :  { %v10533_v37 = vpop.f32.mrb[85].mxu1 }
0x1dc9   :  { %v14871_v14 = vpop.f32.mrb[86].mxu1 }
0x1dca   :  { %v10549_v10 = vpack.c.bf16 %v14871_v14, %v14870_v36  ;;  %v10536_v62 = vpop.f32.mrb[87].mxu1  ;;  %v13763_v14 = vld [vmem:[%s19395_s1 + $0x60] sm:$0xff] }
0x1dcb   :  { %v10548_v43 = vpack.c.bf16 %v10536_v62, %v10533_v37  ;;  %v13722_v37 = vld [vmem:[%s19395_s1 + $0x2d0] sm:$0xff]  ;;  %v13764_v62 = vld [vmem:[%s19395_s1 + $0x68] sm:$0xff] }
0x1dcd   :  { %14872 = vmatprep.subr.bf16.mxu1 %v10548_v43 }
0x1dce   :  { %14873 = vmatpush3.bf16.msra.mxu1 %v10548_v43  ;;  %v15938_v43 = vmov 0.0  }
0x1dcf   :  { %14874 = vmatprep.subr.bf16.mxu1 %v10549_v10  ;;  %14928 = vmatprep.subr.bf16.mxu0 %v15938_v43 }
0x1dd0   :  { %14932 = vmatprep.mubr.msk.bf16.mxu0 %vm15939_vm13, %v15938_v43 }
0x1dd2   :  { %14875 = vmatpush3.bf16.msra.mxu1 %v10549_v10  ;;  %v13723_v10 = vld [vmem:[%s19395_s1 + $0x2d8] sm:$0xff] }
0x1dd3   :  { %14888 = vmatprep.subr.bf16.mxu1 %v10669_v63 }
0x1dd5   :  { %14877 = vmatmul.mubr.msk.bf16.vlgmr.msra.gmra.mrb[72].mxu1 %vm5428_vm12, %v15694_v53  ;;  %v15707_v53 = vld [vmem:[%s19341_s6] sm:$0xff]  }
0x1dd6   :  { %14889 = vmatpush3.bf16.msra.mxu1 %v10669_v63  ;;  %14892 = vmatprep.mubr.msk.bf16.mxu1 %vm5428_vm12, %v15695_v3  ;;  %v13721_v63 = vld [vmem:[%s19395_s1 + $0x2c8] sm:$0xff] }
0x1dd7   :  { %14890 = vmatprep.subr.bf16.mxu1 %v18757_v55 }
0x1dda   :  { %14891 = vmatpush3.bf16.msra.mxu1 %v18757_v55  ;;  %v13720_v55 = vld [vmem:[%s19395_s1 + $0x2c0] sm:$0xff] }
0x1ddb   :  { %14896 = vmatprep.subr.bf16.mxu1 %v18737_v52 }
0x1de1   :  { %14893 = vmatmul.mubr.msk.bf16.vlgmr.msra.gmra.mrb[72].mxu1 %vm5428_vm12, %v15696_v16 }
0x1de2   :  { %14897 = vmatpush3.bf16.msra.mxu1 %v18737_v52  ;;  %14900 = vmatprep.mubr.msk.bf16.mxu1 %vm5428_vm12, %v15697_v35  ;;  %v15701_v52 = vld [vmem:[%s19339_s17 + $0x40] sm:$0xff]  }
0x1de3   :  { %14898 = vmatprep.subr.bf16.mxu1 %v18733_v20 }
0x1de6   :  { %14899 = vmatpush3.bf16.msra.mxu1 %v18733_v20  ;;  %v15700_v20 = vld [vmem:[%s19339_s17 + $0x28] sm:$0xff]  }
0x1de7   :  { %14904 = vmatprep.subr.bf16.mxu1 %v10138_v0 }
0x1ded   :  { %14901 = vmatmul.mubr.msk.bf16.vlgmr.msra.gmra.mrb[72].mxu1 %vm5428_vm12, %v15698_v39 }
0x1dee   :  { %14905 = vmatpush3.bf16.msra.mxu1 %v10138_v0  ;;  %14908 = vmatprep.mubr.msk.bf16.mxu1 %vm5428_vm12, %v15699_v25 }
0x1def   :  { %14906 = vmatprep.subr.bf16.mxu1 %v18775_v17 }
0x1df2   :  { %14907 = vmatpush3.bf16.msra.mxu1 %v18775_v17 }
0x1df3   :  { %14912 = vmatprep.subr.bf16.mxu1 %v18739_v56 }
0x1df9   :  { %14909 = vmatmul.mubr.msk.bf16.vlgmr.msra.gmra.mrb[72].mxu1 %vm5428_vm12, %v15700_v20 }
0x1dfa   :  { %14913 = vmatpush3.bf16.msra.mxu1 %v18739_v56  ;;  %14916 = vmatprep.mubr.msk.bf16.mxu1 %vm5428_vm12, %v15701_v52  ;;  %v11030_v56 = vpop.permute.xlu0 %11029 }
0x1dfb   :  { %14914 = vmatprep.subr.bf16.mxu1 %v18735_v1 }
0x1dfe   :  { %14915 = vmatpush3.bf16.msra.mxu1 %v18735_v1  ;;  %v15704_v1 = vld [vmem:[%s19339_s17 + $0x68] sm:$0xff]   ;;  %v11040_v40 = vpop.permute.xlu0 %11039 }
0x1dff   :  { %14920 = vmatprep.subr.bf16.mxu1 %v18749_v45 }
0x1e05   :  { %14917 = vmatmul.mubr.msk.bf16.vlgmr.msra.gmra.mrb[72].mxu1 %vm5428_vm12, %v15702_v46 }
0x1e06   :  { %14921 = vmatpush3.bf16.msra.mxu1 %v18749_v45  ;;  %14924 = vmatprep.mubr.msk.bf16.mxu1 %vm5428_vm12, %v15703_v13  ;;  %v11035_v45 = vpop.permute.xlu1 %11034 }
0x1e07   :  { %14922 = vmatprep.subr.bf16.mxu1 %v18744_v8 }
0x1e0a   :  { %14923 = vmatpush3.bf16.msra.mxu1 %v18744_v8 }
0x1e0b   :  { %14976 = vmatprep.subr.bf16.mxu1 %v15938_v43 }
0x1e11   :  { %14925 = vmatmul.mubr.msk.bf16.vlgmr.msra.gmra.mrb[72].mxu1 %vm5428_vm12, %v15704_v1 }
0x1e12   :  { %14980 = vmatprep.mubr.msk.bf16.mxu1 %vm15939_vm13, %v15938_v43  ;;  %14977 = vmatpush3.bf16.msra.mxu1 %v15707_v53 }
0x1e13   :  { %14978 = vmatprep.subr.bf16.mxu1 %v15938_v43 }
0x1ee4   :  { %v14926_v7 = vpop.f32.mrb[72].mxu1 }
0x1ee5   :  { %v10986_v9 = vpop.f32.mrb[73].mxu1  ;;  %v11044_v8 = vadd.f32 %v14926_v7, %v11035_v45 }
0x1ee6   :  { %v11042_v23 = vadd.f32 %v11025_v29, %v10986_v9  ;;  %v14927_v47 = vpop.f32.mrb[74].mxu1 }
0x1ee7   :  { %v10989_v34 = vpop.f32.mrb[75].mxu1  ;;  %v11045_v42 = vadd.f32 %v14927_v47, %v11040_v40  ;;  %v11062_v26 = vsel %vm5428_vm12, %v11044_v8, 0.0 }
0x1ee8   :  { %v11043_v38 = vadd.f32 %v11030_v56, %v10989_v34  ;;  %v11056_v44 = vsel %vm5428_vm12, %v11042_v23, 0.0 }
0x1ee9   :  { %11057 = vadd.xlane.f32.xlu1 %v11056_v44  ;;  %v11065_v61 = vsel %vm5428_vm12, %v11045_v42, 0.0 }
0x1eea   :  { %v11059_v15 = vsel %vm5428_vm12, %v11043_v38, 0.0 }
0x1eeb   :  { %11060 = vadd.xlane.f32.xlu0 %v11059_v15 }
0x1eed   :  { %11066 = vadd.xlane.f32.xlu1 %v11065_v61 }
0x1eef   :  { %11063 = vadd.xlane.f32.xlu0 %v11062_v26 }
0x1efe   :  { %11115 = vperm.xlu1 %15509, %v13717_v27  }
0x1f02   :  { %11134 = vperm.xlu1 %15509, %v13720_v55  }
0x1f05   :  { %11110 = vperm.xlu0 %15508, %v13716_v51  }
0x1f06   :  { %11120 = vperm.xlu1 %15509, %v13718_v50  }
0x1f09   :  { %11139 = vperm.xlu0 %15508, %v13721_v63  }
0x1f0d   :  { %11125 = vperm.xlu0 %15508, %v13719_v22  }
0x1f76   :  { %v11058_v30 = vpop.xlane.xlu1 %11057 }
0x1f77   :  { %v11068_v17 = vmul.f32 0.03125, %v11058_v30 }
0x1f78   :  { %v11061_v54 = vpop.xlane.xlu0 %11060 }
0x1f79   :  { %v11069_v31 = vmul.f32 0.03125, %v11061_v54  ;;  %v18887_v19 = vsub.f32 %v11042_v23, %v11068_v17 }
0x1f7a   :  { %v11067_v18 = vpop.xlane.xlu1 %11066 }
0x1f7b   :  { %v11071_v33 = vmul.f32 0.03125, %v11067_v18  ;;  %v18885_v41 = vsub.f32 %v11043_v38, %v11069_v31  ;;  %v11076_v12 = vmul.f32 %v18887_v19, %v18887_v19 }
0x1f7c   :  { %v11064_v0 = vpop.xlane.xlu0 %11063 }
0x1f7d   :  { %v11075_v6 = vsub.f32 %v11045_v42, %v11071_v33  ;;  %v11070_v58 = vmul.f32 0.03125, %v11064_v0  ;;  %v11077_v11 = vmul.f32 %v18885_v41, %v18885_v41  ;;  %v11080_v36 = vsel %vm5428_vm12, %v11076_v12, 0.0 }
0x1f7e   :  { %v11116_v3 = vpop.permute.xlu1 %11115 }
0x1f7f   :  { %v11074_v59 = vsub.f32 %v11044_v8, %v11070_v58  ;;  %v11079_v5 = vmul.f32 %v11075_v6, %v11075_v6  ;;  %v11083_v24 = vsel %vm5428_vm12, %v11077_v11, 0.0 }
0x1f81   :  { %v11089_v21 = vsel %vm5428_vm12, %v11079_v5, 0.0  ;;  %v11078_v49 = vmul.f32 %v11074_v59, %v11074_v59 }
0x1f82   :  { %11090 = vadd.xlane.f32.xlu1 %v11089_v21  ;;  %v11135_v35 = vpop.permute.xlu1 %11134 }
0x1f83   :  { %v11086_v2 = vsel %vm5428_vm12, %v11078_v49, 0.0 }
0x1f84   :  { %11087 = vadd.xlane.f32.xlu0 %v11086_v2  ;;  %v11111_v16 = vpop.permute.xlu0 %11110 }
0x1f86   :  { %11084 = vadd.xlane.f32.xlu1 %v11083_v24  ;;  %v11121_v25 = vpop.permute.xlu1 %11120 }
0x1f88   :  { %11081 = vadd.xlane.f32.xlu0 %v11080_v36  ;;  %v11140_v39 = vpop.permute.xlu0 %11139 }
0x1f8c   :  { %v11126_v20 = vpop.permute.xlu0 %11125 }
0x1f97   :  { %11144 = vperm.xlu1 %15509, %v13722_v37  }
0x1f9b   :  { %11654 = vperm.xlu1 %15509, %v13763_v14  }
0x1f9e   :  { %11149 = vperm.xlu0 %15508, %v13723_v10  }
0x1fa2   :  { %11659 = vperm.xlu0 %15508, %v13764_v62  }
0x200f   :  { %v11091_v52 = vpop.xlane.xlu1 %11090 }
0x2010   :  { %v11095_v46 = vmul.f32 0.03125, %v11091_v52  ;;  %v15705_v52 = vld [vmem:[%s19340_s20] sm:$0xff]  }
0x2011   :  { %v11088_v13 = vpop.xlane.xlu0 %11087 }
0x2012   :  { %v11099_v1 = vadd.f32 1e-05, %v11095_v46  ;;  %v11094_v56 = vmul.f32 0.03125, %v11088_v13  ;;  %v15706_v46 = vld [vmem:[%s19340_s20 + $0x8] sm:$0xff]  }
0x2013   :  { %v11085_v29 = vpop.xlane.xlu1 %11084  ;;  %v15708_v13 = vld [vmem:[%s19341_s6 + $0x8] sm:$0xff]  }
0x2014   :  { %15855 = vrsqrt.f32 %v11099_v1  ;;  %v11098_v7 = vadd.f32 1e-05, %v11094_v56  ;;  %v11093_v9 = vmul.f32 0.03125, %v11085_v29  ;;  %14979 = vmatpush3.bf16.msra.mxu1 %v15708_v13  ;;  %v15709_v1 = vld [vmem:[%s19341_s6 + $0x10] sm:$0xff]   ;;  %v15710_v56 = vld [vmem:[%s19341_s6 + $0x18] sm:$0xff]  }
0x2015   :  { %v11082_v23 = vpop.xlane.xlu0 %11081  ;;  %14992 = vmatprep.subr.bf16.mxu1 %v15938_v43 }
0x2016   :  { %15857 = vrsqrt.f32 %v11098_v7  ;;  %v11097_v47 = vadd.f32 1e-05, %v11093_v9  ;;  %v11092_v40 = vmul.f32 0.03125, %v11082_v23 }
0x2017   :  { %v11145_v50 = vpop.permute.xlu1 %11144 }
0x2018   :  { %15859 = vrsqrt.f32 %v11097_v47  ;;  %v11096_v34 = vadd.f32 1e-05, %v11092_v40 }
0x201a   :  { %15861 = vrsqrt.f32 %v11096_v34 }
0x201d   :  { %v11150_v61 = vpop.permute.xlu0 %11149 }
0x201e   :  { %v15856_v42 = vpop.eup %15855 }
0x201f   :  { %v11107_v38 = vmul.f32 %v15856_v42, %v11075_v6 }
0x2020   :  { %v15858_v44 = vpop.eup %15857 }
0x2021   :  { %v11106_v45 = vmul.f32 %v15858_v44, %v11074_v59  ;;  %v11131_v8 = vmul.f32 %v11126_v20, %v11107_v38 }
0x2022   :  { %v15860_v15 = vpop.eup %15859 }
0x2023   :  { %v11105_v26 = vmul.f32 %v15860_v15, %v18885_v41  ;;  %v11130_v27 = vmul.f32 %v11121_v25, %v11106_v45  ;;  %v11155_v55 = vadd.f32 %v11150_v61, %v11131_v8  ;;  %v15711_v45 = vld [vmem:[%s19340_s20 + $0x10] sm:$0xff]   ;;  %v15712_v8 = vld [vmem:[%s19340_s20 + $0x18] sm:$0xff]  }
0x2024   :  { %v15862_v51 = vpop.eup %15861  ;;  %v15713_v15 = vld [vmem:[%s19341_s6 + $0x30] sm:$0xff]   ;;  %v15714_v61 = vld [vmem:[%s19341_s6 + $0x38] sm:$0xff]  }
0x2025   :  { %v11129_v63 = vmul.f32 %v11116_v3, %v11105_v26  ;;  %v11104_v22 = vmul.f32 %v15862_v51, %v18887_v19  ;;  %v11154_v30 = vadd.f32 %v11145_v50, %v11130_v27  ;;  %v11159_v54 = vadd.f32 %v11155_v55, %v18440_v57 }
0x2027   :  { %v11128_v31 = vmul.f32 %v11111_v16, %v11104_v22  ;;  %v11158_v18 = vadd.f32 %v11154_v30, %v18446_v48  ;;  %v11163_v17 = vmul.f32 0.5, %v11159_v54  ;;  %v11153_v33 = vadd.f32 %v11140_v39, %v11129_v63 }
0x2029   :  { %v11162_v0 = vmul.f32 0.5, %v11158_v18  ;;  %v11152_v6 = vadd.f32 %v11135_v35, %v11128_v31  ;;  %v11157_v58 = vadd.f32 %v11153_v33, %v18444_v4  ;;  %15863 = vtanh.f32 %v11163_v17 }
0x202b   :  { %15865 = vtanh.f32 %v11162_v0  ;;  %v11156_v41 = vadd.f32 %v11152_v6, %v18442_v28  ;;  %v11161_v59 = vmul.f32 0.5, %v11157_v58  ;;  %v13724_v28 = vld [vmem:[%s19342_s7] ss:$0 sm:$0xff] }
0x202d   :  { %v11160_v5 = vmul.f32 0.5, %v11156_v41  ;;  %15867 = vtanh.f32 %v11161_v59 }
0x202f   :  { %15869 = vtanh.f32 %v11160_v5  ;;  %v15715_v5 = vld [vmem:[%s19341_s6 + $0x20] sm:$0xff]  }
0x2033   :  { %v15864_v19 = vpop.eup %15863 }
0x2034   :  { %v11171_v11 = vmul.f32 0.5, %v15864_v19 }
0x2035   :  { %v15866_v21 = vpop.eup %15865 }
0x2036   :  { %v11170_v57 = vmul.f32 0.5, %v15866_v21  ;;  %v11175_v37 = vadd.f32 0.5, %v11171_v11 }
0x2037   :  { %v15868_v49 = vpop.eup %15867 }
0x2038   :  { %v11169_v48 = vmul.f32 0.5, %v15868_v49  ;;  %v11174_v12 = vadd.f32 0.5, %v11170_v57  ;;  %v11179_v53 = vmul.f32 %v11175_v37, %v11159_v54  ;;  %v15716_v57 = vld [vmem:[%s19341_s6 + $0x28] sm:$0xff]   ;;  %s19435_s6 = smov 120  }
0x2039   :  { %v15870_v2 = vpop.eup %15869 }
0x203a   :  { %v11168_v24 = vmul.f32 0.5, %v15870_v2  ;;  %v11173_v36 = vadd.f32 0.5, %v11169_v48  ;;  %v11178_v10 = vmul.f32 %v11174_v12, %v11158_v18  ;;  %v11190_v25 = vadd.f32 %v13724_v28, %v11179_v53 }
0x203c   :  { %v11172_v4 = vadd.f32 0.5, %v11168_v24  ;;  %v11177_v14 = vmul.f32 %v11173_v36, %v11157_v58  ;;  %v11189_v35 = vadd.f32 %v13724_v28, %v11178_v10 }
0x203e   :  { %v11176_v62 = vmul.f32 %v11172_v4, %v11156_v41  ;;  %v11188_v16 = vadd.f32 %v13724_v28, %v11177_v14  ;;  %v11192_v20 = vpack.c.bf16 %v11190_v25, %v11189_v35 }
0x2040   :  { %v11187_v3 = vadd.f32 %v13724_v28, %v11176_v62  ;;  %v11655_v62 = vpop.permute.xlu1 %11654 }
0x2042   :  { %v11191_v39 = vpack.c.bf16 %v11188_v16, %v11187_v3  ;;  %v11660_v3 = vpop.permute.xlu0 %11659 }
0x2044   :  { %14929 = vmatpush3.bf16.msra.mxu0 %v11191_v39 }
0x2045   :  { %14930 = vmatprep.subr.bf16.mxu0 %v15938_v43 }
0x2048   :  { %14931 = vmatpush3.bf16.msra.mxu0 %v11192_v20 }
0x2049   :  { %14936 = vmatprep.subr.bf16.mxu0 %v15938_v43 }
0x204b   :  { %14933 = vmatmul.mubr.msk.bf16.vlgmr.msra.gmra.mrb[80].mxu0 %vm5428_vm12, %v15705_v52 }
0x204c   :  { %14937 = vmatpush3.bf16.msra.mxu0 %v11191_v39  ;;  %14940 = vmatprep.mubr.msk.bf16.mxu0 %vm15939_vm13, %v15938_v43 }
0x204d   :  { %14938 = vmatprep.subr.bf16.mxu0 %v15938_v43 }
0x2050   :  { %14939 = vmatpush3.bf16.msra.mxu0 %v11192_v20 }
0x2051   :  { %14944 = vmatprep.subr.bf16.mxu0 %v15938_v43 }
0x2053   :  { %14941 = vmatmul.mubr.msk.bf16.vlgmr.msra.gmra.mrb[84].mxu0 %vm5428_vm12, %v15706_v46 }
0x2054   :  { %14948 = vmatprep.mubr.msk.bf16.mxu0 %vm15939_vm13, %v15938_v43  ;;  %14945 = vmatpush3.bf16.msra.mxu0 %v15709_v1 }
0x2055   :  { %14946 = vmatprep.subr.bf16.mxu0 %v15938_v43 }
0x2058   :  { %14947 = vmatpush3.bf16.msra.mxu0 %v15710_v56 }
0x2059   :  { %14952 = vmatprep.subr.bf16.mxu0 %v15938_v43 }
0x211e   :  { %v11237_v29 = vpop.f32.mrb[80].mxu0 }
0x211f   :  { %v14934_v7 = vpop.f32.mrb[81].mxu0 }
0x2120   :  { %v11240_v9 = vpop.f32.mrb[82].mxu0  ;;  %v13799_v7 = vld [vmem:[%s19395_s1 + $0x2e0] sm:$0xff] }
0x2121   :  { %v11244_v23 = vpack.c.bf16 %v11240_v9, %v11237_v29  ;;  %v14935_v47 = vpop.f32.mrb[83].mxu0  ;;  %v13800_v9 = vld [vmem:[%s19395_s1 + $0x2e8] sm:$0xff] }
0x2123   :  { %14981 = vmatmul.mubr.msk.bf16.vlgmr.msra.gmra.mrb[88].mxu1 %vm5428_vm12, %v11244_v23 }
0x2124   :  { %14994 = vmatprep.mubr.msk.bf16.mxu1 %vm15939_vm13, %v15938_v43 }
0x2126   :  { %v11294_v40 = vpop.f32.mrb[84].mxu0 }
0x2127   :  { %v14942_v34 = vpop.f32.mrb[85].mxu0 }
0x2128   :  { %v11297_v42 = vpop.f32.mrb[86].mxu0 }
0x2129   :  { %v11301_v38 = vpack.c.bf16 %v11297_v42, %v11294_v40  ;;  %v14943_v44 = vpop.f32.mrb[87].mxu0  ;;  %v19045_v40 = vld [vmem:[%s19332_s2 + $0x1] ss:$0 sm:$0xff] }
0x212b   :  { %14949 = vmatmul.mubr.msk.bf16.vlgmr.msra.gmra.mrb[88].mxu0 %vm5428_vm12, %v11301_v38 }
0x212c   :  { %14953 = vmatpush3.bf16.msra.mxu0 %v11191_v39  ;;  %14956 = vmatprep.mubr.msk.bf16.mxu0 %vm15939_vm13, %v15938_v43 }
0x212d   :  { %14954 = vmatprep.subr.bf16.mxu0 %v15938_v43 }
0x2130   :  { %14955 = vmatpush3.bf16.msra.mxu0 %v11192_v20 }
0x2131   :  { %14960 = vmatprep.subr.bf16.mxu0 %v15938_v43 }
0x2133   :  { %14957 = vmatmul.mubr.msk.bf16.vlgmr.msra.gmra.mrb[92].mxu0 %vm5428_vm12, %v15711_v45 }
0x2134   :  { %14961 = vmatpush3.bf16.msra.mxu0 %v11191_v39  ;;  %14964 = vmatprep.mubr.msk.bf16.mxu0 %vm15939_vm13, %v15938_v43 }
0x2135   :  { %14962 = vmatprep.subr.bf16.mxu0 %v15938_v43 }
0x2138   :  { %14963 = vmatpush3.bf16.msra.mxu0 %v11192_v20 }
0x2139   :  { %14968 = vmatprep.subr.bf16.mxu0 %v15938_v43 }
0x213b   :  { %14965 = vmatmul.mubr.msk.bf16.vlgmr.msra.gmra.mrb[96].mxu0 %vm5428_vm12, %v15712_v8  ;;  %v15717_v8 = vld [vmem:[%s19343_s18 + $0x8] sm:$0xff]  }
0x213c   :  { %14972 = vmatprep.mubr.msk.bf16.mxu0 %vm15939_vm13, %v15938_v43  ;;  %14969 = vmatpush3.bf16.msra.mxu0 %v15713_v15  ;;  %v19055_v15 = vld [vmem:[%s19332_s2 + $0x3] ss:$0 sm:$0xff] }
0x213d   :  { %14970 = vmatprep.subr.bf16.mxu0 %v15938_v43 }
0x2140   :  { %14971 = vmatpush3.bf16.msra.mxu0 %v15714_v61 }
0x2141   :  { %14984 = vmatprep.subr.bf16.mxu0 %v15938_v43 }
0x21f6   :  { %v11584_v26 = vpop.f32.mrb[88].mxu1 }
0x21f7   :  { %v14982_v27 = vpop.f32.mrb[89].mxu1 }
0x21f8   :  { %v11587_v55 = vpop.f32.mrb[90].mxu1 }
0x21f9   :  { %v14983_v51 = vpop.f32.mrb[91].mxu1 }
0x21fe   :  { %v11356_v50 = vpop.f32.mrb[88].mxu0 }
0x21ff   :  { %v11585_v63 = vadd.f32 %v11584_v26, %v11356_v50  ;;  %v14950_v22 = vpop.f32.mrb[89].mxu0  ;;  %v15718_v50 = vld [vmem:[%s19343_s18 + $0x18] sm:$0xff]  }
0x2200   :  { %v11359_v30 = vpop.f32.mrb[90].mxu0 }
0x2201   :  { %v11588_v54 = vadd.f32 %v11587_v55, %v11359_v30  ;;  %v14951_v31 = vpop.f32.mrb[91].mxu0 }
0x2206   :  { %v11408_v18 = vpop.f32.mrb[92].mxu0 }
0x2207   :  { %v14958_v17 = vpop.f32.mrb[93].mxu0 }
0x2208   :  { %v11411_v33 = vpop.f32.mrb[94].mxu0  ;;  %v15719_v17 = vld [vmem:[%s19343_s18 + $0x28] sm:$0xff]  }
0x2209   :  { %v11415_v0 = vpack.c.bf16 %v11411_v33, %v11408_v18  ;;  %v14959_v6 = vpop.f32.mrb[95].mxu0  ;;  %v19081_v33 = vld [vmem:[%s19332_s2 + $0x7] ss:$0 sm:$0xff] }
0x220e   :  { %v11466_v58 = vpop.f32.mrb[96].mxu0 }
0x220f   :  { %v14966_v41 = vpop.f32.mrb[97].mxu0 }
0x2210   :  { %v11469_v59 = vpop.f32.mrb[98].mxu0 }
0x2211   :  { %v11473_v19 = vpack.c.bf16 %v11469_v59, %v11466_v58  ;;  %v14967_v21 = vpop.f32.mrb[99].mxu0 }
0x2213   :  { %14973 = vmatmul.mubr.msk.bf16.vlgmr.msra.gmra.mrb[100].mxu0 %vm5428_vm12, %v11473_v19  ;;  %v19095_v19 = vld [vmem:[%s19332_s2 + $0x8] ss:$0 sm:$0xff] }
0x2214   :  { %14985 = vmatpush3.bf16.msra.mxu0 %v15715_v5  ;;  %14988 = vmatprep.mubr.msk.bf16.mxu0 %vm15939_vm13, %v15938_v43  ;;  %v15720_v5 = vld [vmem:[%s19343_s18 + $0x38] sm:$0xff]  }
0x2215   :  { %14986 = vmatprep.subr.bf16.mxu0 %v15938_v43 }
0x2218   :  { %14987 = vmatpush3.bf16.msra.mxu0 %v15716_v57 }
0x2219   :  { %14998 = vmatprep.subr.bf16.mxu0 %v15938_v43 }
0x221b   :  { %14989 = vmatmul.mubr.msk.bf16.vlgmr.msra.gmra.mrb[104].mxu0 %vm5428_vm12, %v11415_v0 }
0x221c   :  { %15000 = vmatprep.mubr.msk.bf16.mxu0 %vm15939_vm13, %v15938_v43 }
0x22e6   :  { %v11528_v49 = vpop.f32.mrb[100].mxu0 }
0x22e7   :  { %v14974_v11 = vpop.f32.mrb[101].mxu0 }
0x22e8   :  { %v11531_v48 = vpop.f32.mrb[102].mxu0 }
0x22e9   :  { %v14975_v2 = vpop.f32.mrb[103].mxu0 }
0x22ea   :  { %v15721_v2 = vld [vmem:[%s19343_s18 + $0x40] sm:$0xff]  }
0x22ee   :  { %v11640_v12 = vpop.f32.mrb[104].mxu0 }
0x22ef   :  { %v11641_v24 = vadd.f32 %v11640_v12, %v11528_v49  ;;  %v14990_v36 = vpop.f32.mrb[105].mxu0  ;;  %v19109_v12 = vld [vmem:[%s19332_s2] ss:$0 sm:$0xff] }
0x22f0   :  { %v11643_v37 = vpop.f32.mrb[106].mxu0 }
0x22f1   :  { %v11647_v4 = vadd.f32 %v11641_v24, %v11585_v63  ;;  %v11644_v14 = vadd.f32 %v11643_v37, %v11531_v48  ;;  %v14991_v10 = vpop.f32.mrb[107].mxu0  ;;  %v19067_v63 = vld [vmem:[%s19332_s2 + $0x5] ss:$0 sm:$0xff] }
0x22f2   :  { %v15722_v10 = vld [vmem:[%s19343_s18] sm:$0xff]  }
0x22f3   :  { %v11662_v28 = vadd.f32 %v11655_v62, %v11647_v4  ;;  %v11648_v53 = vadd.f32 %v11644_v14, %v11588_v54  ;;  %v19123_v62 = vld [vmem:[%s19332_s2 + $0x2] ss:$0 sm:$0xff] }
0x22f5   :  { %v11664_v16 = vmul.f32 0.5, %v11662_v28  ;;  %v11663_v35 = vadd.f32 %v11660_v3, %v11648_v53 }
0x22f7   :  { %15871 = vtanh.f32 %v11664_v16  ;;  %v11665_v39 = vmul.f32 0.5, %v11663_v35 }
0x22f9   :  { %15873 = vtanh.f32 %v11665_v39 }
0x2301   :  { %v15872_v25 = vpop.eup %15871 }
0x2302   :  { %v11668_v20 = vmul.f32 0.5, %v15872_v25  ;;  %v15723_v25 = vld [vmem:[%s19343_s18 + $0x10] sm:$0xff]  }
0x2303   :  { %v15874_v52 = vpop.eup %15873 }
0x2304   :  { %v11670_v46 = vadd.f32 0.5, %v11668_v20  ;;  %v11669_v13 = vmul.f32 0.5, %v15874_v52  ;;  %v19139_v20 = vld [vmem:[%s19332_s2 + $0x6] ss:$0 sm:$0xff] }
0x2306   :  { %v19000_v1 = vmul.f32 %v11670_v46, %v11662_v28  ;;  %v11671_v56 = vadd.f32 0.5, %v11669_v13 }
0x2308   :  { %v19002_v29 = vmul.f32 %v11671_v56, %v11663_v35  ;;  %11683 = vrot.lane.b32.xlu1 %v19000_v1, %s15932_s27  ;;  %v15724_v56 = vld [vmem:[%s19343_s18 + $0x20] sm:$0xff]  }
0x230a   :  { %11685 = vrot.lane.b32.xlu0 %v19002_v29, %s15932_s27  ;;  %v11811_v35 = vpack.c.bf16 %v19002_v29, %v19000_v1 }
0x230c   :  { %11752 = vrot.lane.b32.xlu1 %v19000_v1, %s15924_s23 }
0x230e   :  { %11754 = vrot.lane.b32.xlu0 %v19002_v29, %s15924_s23 }
0x2310   :  { %11815 = vrot.lane.b32.xlu1 %v19000_v1, %s15925_s9 }
0x2312   :  { %11817 = vrot.lane.b32.xlu0 %v19002_v29, %s15925_s9 }
0x2314   :  { %11884 = vrot.lane.b32.xlu1 %v19000_v1, %s19435_s6 }
0x2316   :  { %11886 = vrot.lane.b32.xlu0 %v19002_v29, %s19435_s6 }
0x2318   :  { %11943 = vrot.lane.b32.xlu1 %v19000_v1, %s19433_s29 }
0x231a   :  { %11945 = vrot.lane.b32.xlu0 %v19002_v29, %s19433_s29 }
0x231c   :  { %11674 = vrot.lane.b32.xlu1 %v19000_v1, %s19431_s25 }
0x231e   :  { %11676 = vrot.lane.b32.xlu0 %v19002_v29, %s19431_s25 }
0x2320   :  { %11742 = vrot.lane.b32.xlu1 %v19000_v1, %s19432_s30 }
0x2322   :  { %11744 = vrot.lane.b32.xlu0 %v19002_v29, %s19432_s30 }
0x2324   :  { %11874 = vrot.lane.b32.xlu1 %v19000_v1, %s19434_s10 }
0x2326   :  { %11876 = vrot.lane.b32.xlu0 %v19002_v29, %s19434_s10 }
0x2328   :  { %12211 = vperm.xlu1 %15509, %v13799_v7   ;;  %v15725_v7 = vld [vmem:[%s19343_s18 + $0x30] sm:$0xff]  }
0x232a   :  { %12216 = vperm.xlu0 %15508, %v13800_v9  }
0x237a   :  { %v11684_v23 = vpop.permute.xlu1 %11683 }
0x237b   :  { %v11687_v34 = vmul.f32 %v19045_v40, %v11684_v23 }
0x237c   :  { %v11686_v47 = vpop.permute.xlu0 %11685 }
0x237d   :  { %v11688_v42 = vmul.f32 %v19045_v40, %v11686_v47 }
0x237e   :  { %v11753_v38 = vpop.permute.xlu1 %11752 }
0x237f   :  { %v11689_v44 = vpack.c.bf16 %v11688_v42, %v11687_v34  ;;  %v11756_v61 = vmul.f32 %v19055_v15, %v11753_v38 }
0x2380   :  { %v11755_v45 = vpop.permute.xlu0 %11754 }
0x2381   :  { %v11757_v26 = vmul.f32 %v19055_v15, %v11755_v45  ;;  %14993 = vmatpush3.bf16.msra.mxu1 %v11689_v44 }
0x2382   :  { %v11816_v27 = vpop.permute.xlu1 %11815  ;;  %15004 = vmatprep.subr.bf16.mxu1 %v15938_v43 }
0x2383   :  { %v11758_v55 = vpack.c.bf16 %v11757_v26, %v11756_v61  ;;  %v11819_v22 = vmul.f32 %v19067_v63, %v11816_v27 }
0x2384   :  { %14995 = vmatmul.mubr.msk.bf16.vlgmr.msra.gmra.mrb[92].mxu1 %vm1596_vm11, %v15717_v8  ;;  %v11818_v51 = vpop.permute.xlu0 %11817 }
0x2385   :  { %v11820_v30 = vmul.f32 %v19067_v63, %v11818_v51  ;;  %14999 = vmatpush3.bf16.msra.mxu0 %v11758_v55  ;;  %15006 = vmatprep.mubr.msk.bf16.mxu1 %vm15939_vm13, %v15938_v43 }
0x2386   :  { %v11885_v54 = vpop.permute.xlu1 %11884  ;;  %15010 = vmatprep.subr.bf16.mxu0 %v15938_v43 }
0x2387   :  { %v11821_v31 = vpack.c.bf16 %v11820_v30, %v11819_v22  ;;  %v11888_v0 = vmul.f32 %v19081_v33, %v11885_v54 }
0x2388   :  { %15001 = vmatmul.mubr.msk.bf16.vlgmr.msra.gmra.mrb[108].mxu0 %vm1596_vm11, %v15718_v50  ;;  %v11887_v18 = vpop.permute.xlu0 %11886 }
0x2389   :  { %v11889_v6 = vmul.f32 %v19081_v33, %v11887_v18  ;;  %15005 = vmatpush3.bf16.msra.mxu1 %v11821_v31  ;;  %15012 = vmatprep.mubr.msk.bf16.mxu0 %vm15939_vm13, %v15938_v43 }
0x238a   :  { %v11944_v58 = vpop.permute.xlu1 %11943  ;;  %15016 = vmatprep.subr.bf16.mxu1 %v15938_v43 }
0x238b   :  { %v11890_v41 = vpack.c.bf16 %v11889_v6, %v11888_v0  ;;  %v11947_v21 = vmul.f32 %v19095_v19, %v11944_v58 }
0x238c   :  { %15007 = vmatmul.mubr.msk.bf16.vlgmr.msra.gmra.mrb[96].mxu1 %vm1596_vm11, %v15719_v17  ;;  %v11946_v59 = vpop.permute.xlu0 %11945 }
0x238d   :  { %v11948_v57 = vmul.f32 %v19095_v19, %v11946_v59  ;;  %15011 = vmatpush3.bf16.msra.mxu0 %v11890_v41  ;;  %15018 = vmatprep.mubr.msk.bf16.mxu1 %vm15939_vm13, %v15938_v43 }
0x238e   :  { %v11675_v49 = vpop.permute.xlu1 %11674  ;;  %15022 = vmatprep.subr.bf16.mxu0 %v15938_v43 }
0x238f   :  { %v11949_v11 = vpack.c.bf16 %v11948_v57, %v11947_v21  ;;  %v11678_v24 = vmul.f32 %v19109_v12, %v11675_v49 }
0x2390   :  { %15013 = vmatmul.mubr.msk.bf16.vlgmr.msra.gmra.mrb[112].mxu0 %vm1596_vm11, %v15720_v5  ;;  %v11677_v48 = vpop.permute.xlu0 %11676 }
0x2391   :  { %v11679_v36 = vmul.f32 %v19109_v12, %v11677_v48  ;;  %15017 = vmatpush3.bf16.msra.mxu1 %v11949_v11  ;;  %15024 = vmatprep.mubr.msk.bf16.mxu0 %vm15939_vm13, %v15938_v43 }
0x2392   :  { %v11743_v37 = vpop.permute.xlu1 %11742  ;;  %15028 = vmatprep.subr.bf16.mxu1 %v15938_v43 }
0x2393   :  { %v11680_v4 = vpack.c.bf16 %v11679_v36, %v11678_v24  ;;  %v11746_v28 = vmul.f32 %v19123_v62, %v11743_v37 }
0x2394   :  { %15019 = vmatmul.mubr.msk.bf16.vlgmr.msra.gmra.mrb[100].mxu1 %vm1596_vm11, %v15721_v2  ;;  %v11745_v14 = vpop.permute.xlu0 %11744 }
0x2395   :  { %v11747_v53 = vmul.f32 %v19123_v62, %v11745_v14  ;;  %15023 = vmatpush3.bf16.msra.mxu0 %v11680_v4  ;;  %15030 = vmatprep.mubr.msk.bf16.mxu1 %vm15939_vm13, %v15938_v43 }
0x2396   :  { %v11875_v3 = vpop.permute.xlu1 %11874  ;;  %15034 = vmatprep.subr.bf16.mxu0 %v15938_v43 }
0x2397   :  { %v11748_v16 = vpack.c.bf16 %v11747_v53, %v11746_v28  ;;  %v11878_v52 = vmul.f32 %v19139_v20, %v11875_v3 }
0x2398   :  { %15025 = vmatmul.mubr.msk.bf16.vlgmr.msra.gmra.mrb[116].mxu0 %vm1596_vm11, %v15722_v10  ;;  %v11877_v39 = vpop.permute.xlu0 %11876 }
0x2399   :  { %v11879_v46 = vmul.f32 %v19139_v20, %v11877_v39  ;;  %15029 = vmatpush3.bf16.msra.mxu1 %v11748_v16  ;;  %15035 = vmatpush3.bf16.msra.mxu0 %v11811_v35 }
0x239a   :  { %15040 = vmatprep.subr.bf16.mxu1 %v15938_v43  ;;  %15036 = vmatprep.mubr.msk.bf16.mxu0 %vm15939_vm13, %v15938_v43 }
0x239b   :  { %v11880_v13 = vpack.c.bf16 %v11879_v46, %v11878_v52  ;;  %15046 = vmatprep.subr.bf16.mxu0 %v15938_v43 }
0x239c   :  { %15031 = vmatmul.mubr.msk.bf16.vlgmr.msra.gmra.mrb[104].mxu1 %vm1596_vm11, %v15723_v25 }
0x239d   :  { %15041 = vmatpush3.bf16.msra.mxu1 %v11880_v13  ;;  %15042 = vmatprep.mubr.msk.bf16.mxu1 %vm15939_vm13, %v15938_v43 }
0x239e   :  { %15052 = vmatprep.subr.bf16.mxu1 %v15938_v43 }
0x23a0   :  { %15037 = vmatmul.mubr.msk.bf16.vlgmr.msra.gmra.mrb[120].mxu0 %vm1596_vm11, %v15724_v56 }
0x23a1   :  { %15048 = vmatprep.mubr.msk.bf16.mxu0 %vm15939_vm13, %v15938_v43 }
0x23a4   :  { %15043 = vmatmul.mubr.msk.bf16.vlgmr.msra.gmra.mrb[108].mxu1 %vm1596_vm11, %v15725_v7 }
0x23a5   :  { %15054 = vmatprep.mubr.msk.bf16.mxu1 %vm15939_vm13, %v15938_v43 }
0x2457   :  { %v11735_v9 = vpop.f32.mrb[92].mxu1 }
0x2458   :  { %v14996_v23 = vpop.f32.mrb[93].mxu1 }
0x2459   :  { %v11738_v47 = vpop.f32.mrb[94].mxu1 }
0x245a   :  { %v14997_v34 = vpop.f32.mrb[95].mxu1 }
0x245b   :  { %v11804_v42 = vpop.f32.mrb[108].mxu0  ;;  %v12217_v34 = vpop.permute.xlu0 %12216 }
0x245c   :  { %v15002_v38 = vpop.f32.mrb[109].mxu0 }
0x245d   :  { %v11807_v44 = vpop.f32.mrb[110].mxu0  ;;  %v13802_v38 = vld [vmem:[%s19395_s1 + $0x308] sm:$0xff] }
0x245e   :  { %v15003_v45 = vpop.f32.mrb[111].mxu0 }
0x245f   :  { %v11867_v8 = vpop.f32.mrb[96].mxu1 }
0x2460   :  { %v15008_v61 = vpop.f32.mrb[97].mxu1 }
0x2461   :  { %v11870_v26 = vpop.f32.mrb[98].mxu1 }
0x2462   :  { %v15009_v27 = vpop.f32.mrb[99].mxu1 }
0x2463   :  { %v11936_v55 = vpop.f32.mrb[112].mxu0 }
0x2464   :  { %v15014_v51 = vpop.f32.mrb[113].mxu0 }
0x2465   :  { %v11939_v50 = vpop.f32.mrb[114].mxu0 }
0x2466   :  { %v15015_v22 = vpop.f32.mrb[115].mxu0 }
0x2467   :  { %v11995_v30 = vpop.f32.mrb[100].mxu1  ;;  %v13803_v22 = vld [vmem:[%s19395_s1 + $0x320] sm:$0xff] }
0x2468   :  { %v15020_v54 = vpop.f32.mrb[101].mxu1 }
0x2469   :  { %v11998_v31 = vpop.f32.mrb[102].mxu1 }
0x246a   :  { %v15021_v18 = vpop.f32.mrb[103].mxu1 }
0x246b   :  { %v12044_v17 = vpop.f32.mrb[116].mxu0 }
0x246c   :  { %v12045_v0 = vadd.f32 %v12044_v17, %v11735_v9  ;;  %v15026_v6 = vpop.f32.mrb[117].mxu0  ;;  %v12212_v9 = vpop.permute.xlu1 %12211 }
0x246d   :  { %v12047_v58 = vpop.f32.mrb[118].mxu0 }
0x246e   :  { %v12048_v41 = vadd.f32 %v12047_v58, %v11738_v47  ;;  %v15027_v59 = vpop.f32.mrb[119].mxu0 }
0x246f   :  { %v12093_v5 = vpop.f32.mrb[104].mxu1 }
0x2470   :  { %v12094_v21 = vadd.f32 %v12093_v5, %v11804_v42  ;;  %v15032_v57 = vpop.f32.mrb[105].mxu1 }
0x2471   :  { %v12096_v49 = vpop.f32.mrb[106].mxu1 }
0x2472   :  { %v12198_v11 = vadd.f32 %v12094_v21, %v12045_v0  ;;  %v12097_v48 = vadd.f32 %v12096_v49, %v11807_v44  ;;  %v15033_v2 = vpop.f32.mrb[107].mxu1  ;;  %v13801_v44 = vld [vmem:[%s19395_s1 + $0x300] sm:$0xff] }
0x2473   :  { %v12142_v24 = vpop.f32.mrb[120].mxu0 }
0x2474   :  { %v12199_v36 = vadd.f32 %v12097_v48, %v12048_v41  ;;  %v12143_v37 = vadd.f32 %v12142_v24, %v11867_v8  ;;  %v15038_v4 = vpop.f32.mrb[121].mxu0 }
0x2475   :  { %v12145_v14 = vpop.f32.mrb[122].mxu0 }
0x2476   :  { %v12146_v10 = vadd.f32 %v12145_v14, %v11870_v26  ;;  %v15039_v28 = vpop.f32.mrb[123].mxu0 }
0x2477   :  { %v12191_v53 = vpop.f32.mrb[108].mxu1 }
0x2478   :  { %v12192_v3 = vadd.f32 %v12191_v53, %v11936_v55  ;;  %v15044_v16 = vpop.f32.mrb[109].mxu1 }
0x2479   :  { %v12194_v35 = vpop.f32.mrb[110].mxu1 }
0x247a   :  { %v12200_v39 = vadd.f32 %v12192_v3, %v12143_v37  ;;  %v12195_v25 = vadd.f32 %v12194_v35, %v11939_v50  ;;  %v15045_v52 = vpop.f32.mrb[111].mxu1 }
0x247b   :  { %v13839_v52 = vld [vmem:[%s19395_s1 + $0x340] sm:$0xff] }
0x247c   :  { %v12202_v46 = vadd.f32 %v12200_v39, %v12198_v11  ;;  %v12201_v13 = vadd.f32 %v12195_v25, %v12146_v10 }
0x247e   :  { %v12203_v56 = vadd.f32 %v12201_v13, %v12199_v36  ;;  %v12204_v7 = vadd.f32 %v12202_v46, %v11995_v30  ;;  %v13804_v30 = vld [vmem:[%s19395_s1 + $0x328] sm:$0xff] }
0x247f   :  { %v13840_v46 = vld [vmem:[%s19395_s1 + $0x348] sm:$0xff] }
0x2480   :  { %v12219_v23 = vadd.f32 %v12212_v9, %v12204_v7  ;;  %v12205_v47 = vadd.f32 %v12203_v56, %v11998_v31 }
0x2482   :  { %12227 = vadd.xlane.f32.xlu1 %v12219_v23  ;;  %v12220_v42 = vadd.f32 %v12217_v34, %v12205_v47 }
0x2484   :  { %12229 = vadd.xlane.f32.xlu0 %v12220_v42 }
0x2493   :  { %12256 = vperm.xlu1 %15509, %v13802_v38  }
0x249a   :  { %12251 = vperm.xlu0 %15508, %v13801_v44  }
0x250f   :  { %v12228_v45 = vpop.xlane.xlu1 %12227 }
0x2510   :  { %v12231_v8 = vmul.f32 0.0078125, %v12228_v45 }
0x2511   :  { %v12230_v61 = vpop.xlane.xlu0 %12229 }
0x2512   :  { %v12233_v26 = vsub.f32 %v12219_v23, %v12231_v8  ;;  %v12232_v27 = vmul.f32 0.0078125, %v12230_v61 }
0x2513   :  { %v12257_v31 = vpop.permute.xlu1 %12256 }
0x2514   :  { %v12234_v55 = vsub.f32 %v12220_v42, %v12232_v27  ;;  %v12235_v51 = vmul.f32 %v12233_v26, %v12233_v26  ;;  %v15726_v42 = vld [vmem:[%s19344_s19 + $0x8] sm:$0xff]  }
0x2516   :  { %12237 = vadd.xlane.f32.xlu0 %v12235_v51  ;;  %v12236_v50 = vmul.f32 %v12234_v55, %v12234_v55 }
0x2518   :  { %12239 = vadd.xlane.f32.xlu1 %v12236_v50  ;;  %v15728_v50 = vld [vmem:[%s19344_s19 + $0x28] sm:$0xff]  }
0x2519   :  { %v12252_v54 = vpop.permute.xlu0 %12251 }
0x2529   :  { %12263 = vperm.xlu1 %15509, %v13803_v22  }
0x252c   :  { %12268 = vperm.xlu0 %15508, %v13804_v30  }
0x25a3   :  { %v12238_v18 = vpop.xlane.xlu0 %12237 }
0x25a4   :  { %v12241_v17 = vmul.f32 0.0078125, %v12238_v18  ;;  %v15729_v18 = vld [vmem:[%s19344_s19 + $0x38] sm:$0xff]  }
0x25a5   :  { %v12240_v0 = vpop.xlane.xlu1 %12239 }
0x25a6   :  { %v12243_v6 = vadd.f32 1e-05, %v12241_v17  ;;  %v12242_v58 = vmul.f32 0.0078125, %v12240_v0 }
0x25a8   :  { %15875 = vrsqrt.f32 %v12243_v6  ;;  %v12244_v41 = vadd.f32 1e-05, %v12242_v58 }
0x25a9   :  { %v12264_v11 = vpop.permute.xlu1 %12263 }
0x25aa   :  { %15877 = vrsqrt.f32 %v12244_v41  ;;  %v15730_v41 = vld [vmem:[%s19344_s19 + $0x40] sm:$0xff]  }
0x25ab   :  { %v12269_v24 = vpop.permute.xlu0 %12268 }
0x25b2   :  { %v15876_v59 = vpop.eup %15875 }
0x25b3   :  { %v12247_v5 = vmul.f32 %v15876_v59, %v12233_v26 }
0x25b4   :  { %v15878_v21 = vpop.eup %15877 }
0x25b5   :  { %v12259_v57 = vmul.f32 %v12252_v54, %v12247_v5  ;;  %v12248_v49 = vmul.f32 %v15878_v21, %v12234_v55 }
0x25b7   :  { %v12271_v48 = vadd.f32 %v12264_v11, %v12259_v57  ;;  %v12260_v2 = vmul.f32 %v12257_v31, %v12248_v49  ;;  %v15731_v49 = vld [vmem:[%s19344_s19] sm:$0xff]  }
0x25b9   :  { %v12273_v36 = vmul.f32 0.5, %v12271_v48  ;;  %v12272_v37 = vadd.f32 %v12269_v24, %v12260_v2 }
0x25bb   :  { %15879 = vtanh.f32 %v12273_v36  ;;  %v12274_v4 = vmul.f32 0.5, %v12272_v37  ;;  %v15732_v36 = vld [vmem:[%s19344_s19 + $0x10] sm:$0xff]  }
0x25bd   :  { %15881 = vtanh.f32 %v12274_v4 }
0x25c5   :  { %v15880_v14 = vpop.eup %15879 }
0x25c6   :  { %v12277_v10 = vmul.f32 0.5, %v15880_v14  ;;  %v15733_v14 = vld [vmem:[%s19344_s19 + $0x20] sm:$0xff]  }
0x25c7   :  { %v15882_v28 = vpop.eup %15881 }
0x25c8   :  { %v12279_v53 = vadd.f32 0.5, %v12277_v10  ;;  %v12278_v3 = vmul.f32 0.5, %v15882_v28 }
0x25ca   :  { %v19175_v16 = vmul.f32 %v12279_v53, %v12271_v48  ;;  %v12280_v35 = vadd.f32 0.5, %v12278_v3 }
0x25cc   :  { %v19177_v39 = vmul.f32 %v12280_v35, %v12272_v37  ;;  %12292 = vrot.lane.b32.xlu1 %v19175_v16, %s15932_s27 }
0x25ce   :  { %12294 = vrot.lane.b32.xlu0 %v19177_v39, %s15932_s27  ;;  %v12420_v25 = vpack.c.bf16 %v19177_v39, %v19175_v16 }
0x25d0   :  { %12361 = vrot.lane.b32.xlu1 %v19175_v16, %s15924_s23 }
0x25d2   :  { %12363 = vrot.lane.b32.xlu0 %v19177_v39, %s15924_s23 }
0x25d4   :  { %12424 = vrot.lane.b32.xlu1 %v19175_v16, %s15925_s9 }
0x25d6   :  { %12426 = vrot.lane.b32.xlu0 %v19177_v39, %s15925_s9 }
0x25d8   :  { %12493 = vrot.lane.b32.xlu1 %v19175_v16, %s19435_s6 }
0x25da   :  { %12495 = vrot.lane.b32.xlu0 %v19177_v39, %s19435_s6 }
0x25dc   :  { %12552 = vrot.lane.b32.xlu1 %v19175_v16, %s19433_s29 }
0x25de   :  { %12554 = vrot.lane.b32.xlu0 %v19177_v39, %s19433_s29 }
0x25e0   :  { %12283 = vrot.lane.b32.xlu1 %v19175_v16, %s19431_s25 }
0x25e2   :  { %12285 = vrot.lane.b32.xlu0 %v19177_v39, %s19431_s25 }
0x25e4   :  { %12351 = vrot.lane.b32.xlu1 %v19175_v16, %s19432_s30 }
0x25e6   :  { %12353 = vrot.lane.b32.xlu0 %v19177_v39, %s19432_s30 }
0x25e8   :  { %12483 = vrot.lane.b32.xlu1 %v19175_v16, %s19434_s10 }
0x25ea   :  { %12485 = vrot.lane.b32.xlu0 %v19177_v39, %s19434_s10 }
0x25ec   :  { %12820 = vperm.xlu1 %15509, %v13839_v52  }
0x25ee   :  { %12825 = vperm.xlu0 %15508, %v13840_v46  }
0x263e   :  { %v12293_v13 = vpop.permute.xlu1 %12292 }
0x263f   :  { %v12296_v7 = vmul.f32 %v19045_v40, %v12293_v13 }
0x2640   :  { %v12295_v56 = vpop.permute.xlu0 %12294 }
0x2641   :  { %v12297_v9 = vmul.f32 %v19045_v40, %v12295_v56  ;;  %v15727_v40 = vld [vmem:[%s19344_s19 + $0x18] sm:$0xff]  }
0x2642   :  { %v12362_v23 = vpop.permute.xlu1 %12361 }
0x2643   :  { %v12298_v47 = vpack.c.bf16 %v12297_v9, %v12296_v7  ;;  %v12365_v38 = vmul.f32 %v19055_v15, %v12362_v23 }
0x2644   :  { %v12364_v34 = vpop.permute.xlu0 %12363 }
0x2645   :  { %v12366_v44 = vmul.f32 %v19055_v15, %v12364_v34  ;;  %15047 = vmatpush3.bf16.msra.mxu0 %v12298_v47 }
0x2646   :  { %v12425_v45 = vpop.permute.xlu1 %12424  ;;  %15058 = vmatprep.subr.bf16.mxu0 %v15938_v43 }
0x2647   :  { %v12367_v8 = vpack.c.bf16 %v12366_v44, %v12365_v38  ;;  %v12428_v26 = vmul.f32 %v19067_v63, %v12425_v45 }
0x2648   :  { %15049 = vmatmul.mubr.msk.bf16.vlgmr.msra.gmra.mrb[124].mxu0 %vm1596_vm11, %v15726_v42  ;;  %v12427_v61 = vpop.permute.xlu0 %12426 }
0x2649   :  { %v12429_v27 = vmul.f32 %v19067_v63, %v12427_v61  ;;  %15053 = vmatpush3.bf16.msra.mxu1 %v12367_v8  ;;  %15060 = vmatprep.mubr.msk.bf16.mxu0 %vm15939_vm13, %v15938_v43 }
0x264a   :  { %v12494_v15 = vpop.permute.xlu1 %12493  ;;  %15064 = vmatprep.subr.bf16.mxu1 %v15938_v43 }
0x264b   :  { %v12430_v55 = vpack.c.bf16 %v12429_v27, %v12428_v26  ;;  %v12497_v22 = vmul.f32 %v19081_v33, %v12494_v15 }
0x264c   :  { %15055 = vmatmul.mubr.msk.bf16.vlgmr.msra.gmra.mrb[112].mxu1 %vm1596_vm11, %v15727_v40  ;;  %v12496_v51 = vpop.permute.xlu0 %12495 }
0x264d   :  { %v12498_v30 = vmul.f32 %v19081_v33, %v12496_v51  ;;  %15059 = vmatpush3.bf16.msra.mxu0 %v12430_v55  ;;  %15066 = vmatprep.mubr.msk.bf16.mxu1 %vm15939_vm13, %v15938_v43 }
0x264e   :  { %v12553_v63 = vpop.permute.xlu1 %12552  ;;  %15070 = vmatprep.subr.bf16.mxu0 %v15938_v43 }
0x264f   :  { %v12499_v54 = vpack.c.bf16 %v12498_v30, %v12497_v22  ;;  %v12556_v17 = vmul.f32 %v19095_v19, %v12553_v63 }
0x2650   :  { %15061 = vmatmul.mubr.msk.bf16.vlgmr.msra.gmra.mrb[128].mxu0 %vm1596_vm11, %v15728_v50  ;;  %v12555_v31 = vpop.permute.xlu0 %12554 }
0x2651   :  { %v12557_v0 = vmul.f32 %v19095_v19, %v12555_v31  ;;  %15065 = vmatpush3.bf16.msra.mxu1 %v12499_v54  ;;  %15072 = vmatprep.mubr.msk.bf16.mxu0 %vm15939_vm13, %v15938_v43 }
0x2652   :  { %v12284_v33 = vpop.permute.xlu1 %12283  ;;  %15076 = vmatprep.subr.bf16.mxu1 %v15938_v43 }
0x2653   :  { %v12558_v6 = vpack.c.bf16 %v12557_v0, %v12556_v17  ;;  %v12287_v59 = vmul.f32 %v19109_v12, %v12284_v33 }
0x2654   :  { %15067 = vmatmul.mubr.msk.bf16.vlgmr.msra.gmra.mrb[116].mxu1 %vm1596_vm11, %v15729_v18  ;;  %v12286_v58 = vpop.permute.xlu0 %12285 }
0x2655   :  { %v12288_v5 = vmul.f32 %v19109_v12, %v12286_v58  ;;  %15071 = vmatpush3.bf16.msra.mxu0 %v12558_v6  ;;  %15078 = vmatprep.mubr.msk.bf16.mxu1 %vm15939_vm13, %v15938_v43 }
0x2656   :  { %v12352_v19 = vpop.permute.xlu1 %12351  ;;  %15082 = vmatprep.subr.bf16.mxu0 %v15938_v43 }
0x2657   :  { %v12289_v21 = vpack.c.bf16 %v12288_v5, %v12287_v59  ;;  %v12355_v11 = vmul.f32 %v19123_v62, %v12352_v19 }
0x2658   :  { %15073 = vmatmul.mubr.msk.bf16.vlgmr.msra.gmra.mrb[132].mxu0 %vm1596_vm11, %v15730_v41  ;;  %v12354_v57 = vpop.permute.xlu0 %12353 }
0x2659   :  { %v12356_v48 = vmul.f32 %v19123_v62, %v12354_v57  ;;  %15077 = vmatpush3.bf16.msra.mxu1 %v12289_v21  ;;  %15084 = vmatprep.mubr.msk.bf16.mxu0 %vm15939_vm13, %v15938_v43 }
0x265a   :  { %v12484_v12 = vpop.permute.xlu1 %12483  ;;  %15088 = vmatprep.subr.bf16.mxu1 %v15938_v43 }
0x265b   :  { %v12357_v2 = vpack.c.bf16 %v12356_v48, %v12355_v11  ;;  %v12487_v37 = vmul.f32 %v19139_v20, %v12484_v12 }
0x265c   :  { %15079 = vmatmul.mubr.msk.bf16.vlgmr.msra.gmra.mrb[120].mxu1 %vm1596_vm11, %v15731_v49  ;;  %v12486_v24 = vpop.permute.xlu0 %12485 }
0x265d   :  { %v12488_v4 = vmul.f32 %v19139_v20, %v12486_v24  ;;  %15083 = vmatpush3.bf16.msra.mxu0 %v12357_v2  ;;  %15089 = vmatpush3.bf16.msra.mxu1 %v12420_v25  ;;  %v15734_v20 = vld [vmem:[%s19344_s19 + $0x30] sm:$0xff]  }
0x265e   :  { %15094 = vmatprep.subr.bf16.mxu0 %v15938_v43  ;;  %15090 = vmatprep.mubr.msk.bf16.mxu1 %vm15939_vm13, %v15938_v43 }
0x265f   :  { %v12489_v62 = vpack.c.bf16 %v12488_v4, %v12487_v37  ;;  %15100 = vmatprep.subr.bf16.mxu1 %v15938_v43  ;;  %v13842_v4 = vld [vmem:[%s19395_s1 + $0x368] sm:$0xff] }
0x2660   :  { %15085 = vmatmul.mubr.msk.bf16.vlgmr.msra.gmra.mrb[136].mxu0 %vm1596_vm11, %v15732_v36 }
0x2661   :  { %15095 = vmatpush3.bf16.msra.mxu0 %v12489_v62  ;;  %15096 = vmatprep.mubr.msk.bf16.mxu0 %vm15939_vm13, %v15938_v43  ;;  %v13841_v62 = vld [vmem:[%s19395_s1 + $0x360] sm:$0xff] }
0x2664   :  { %15091 = vmatmul.mubr.msk.bf16.vlgmr.msra.gmra.mrb[124].mxu1 %vm1596_vm11, %v15733_v14 }
0x2665   :  { %15102 = vmatprep.mubr.msk.bf16.mxu1 %vm15939_vm13, %v15938_v43 }
0x2668   :  { %15097 = vmatmul.mubr.msk.bf16.vlgmr.msra.gmra.mrb[140].mxu0 %vm1596_vm11, %v15734_v20 }
0x266b   :  { %v12821_v12 = vpop.permute.xlu1 %12820 }
0x266d   :  { %v12826_v36 = vpop.permute.xlu0 %12825 }
0x271b   :  { %v12344_v10 = vpop.f32.mrb[124].mxu0 }
0x271c   :  { %v15050_v28 = vpop.f32.mrb[125].mxu0 }
0x271d   :  { %v12347_v53 = vpop.f32.mrb[126].mxu0 }
0x271e   :  { %v15051_v3 = vpop.f32.mrb[127].mxu0 }
0x271f   :  { %v12413_v16 = vpop.f32.mrb[112].mxu1 }
0x2720   :  { %v15056_v35 = vpop.f32.mrb[113].mxu1 }
0x2721   :  { %v12416_v39 = vpop.f32.mrb[114].mxu1 }
0x2722   :  { %v15057_v25 = vpop.f32.mrb[115].mxu1 }
0x2723   :  { %v12476_v52 = vpop.f32.mrb[128].mxu0  ;;  %v13844_v25 = vld [vmem:[%s19395_s1 + $0x388] sm:$0xff] }
0x2724   :  { %v15062_v46 = vpop.f32.mrb[129].mxu0 }
0x2725   :  { %v12479_v13 = vpop.f32.mrb[130].mxu0 }
0x2726   :  { %v15063_v56 = vpop.f32.mrb[131].mxu0 }
0x2727   :  { %v12545_v7 = vpop.f32.mrb[116].mxu1 }
0x2728   :  { %v15068_v9 = vpop.f32.mrb[117].mxu1 }
0x2729   :  { %v12548_v23 = vpop.f32.mrb[118].mxu1 }
0x272a   :  { %v15069_v47 = vpop.f32.mrb[119].mxu1 }
0x272b   :  { %v12604_v34 = vpop.f32.mrb[132].mxu0 }
0x272c   :  { %v15074_v43 = vpop.f32.mrb[133].mxu0 }
0x272d   :  { %v12607_v42 = vpop.f32.mrb[134].mxu0 }
0x272e   :  { %v15075_v38 = vpop.f32.mrb[135].mxu0 }
0x272f   :  { %v12653_v44 = vpop.f32.mrb[120].mxu1 }
0x2730   :  { %v12654_v45 = vadd.f32 %v12653_v44, %v12344_v10  ;;  %v15080_v8 = vpop.f32.mrb[121].mxu1 }
0x2731   :  { %v12656_v61 = vpop.f32.mrb[122].mxu1 }
0x2732   :  { %v12657_v40 = vadd.f32 %v12656_v61, %v12347_v53  ;;  %v15081_v26 = vpop.f32.mrb[123].mxu1 }
0x2733   :  { %v12702_v27 = vpop.f32.mrb[136].mxu0 }
0x2734   :  { %v12703_v15 = vadd.f32 %v12702_v27, %v12413_v16  ;;  %v15086_v55 = vpop.f32.mrb[137].mxu0 }
0x2735   :  { %v12705_v51 = vpop.f32.mrb[138].mxu0 }
0x2736   :  { %v12807_v50 = vadd.f32 %v12703_v15, %v12654_v45  ;;  %v12706_v22 = vadd.f32 %v12705_v51, %v12416_v39  ;;  %v15087_v30 = vpop.f32.mrb[139].mxu0  ;;  %v13843_v39 = vld [vmem:[%s19395_s1 + $0x380] sm:$0xff] }
0x2737   :  { %v12751_v63 = vpop.f32.mrb[124].mxu1 }
0x2738   :  { %v12808_v54 = vadd.f32 %v12706_v22, %v12657_v40  ;;  %v12752_v31 = vadd.f32 %v12751_v63, %v12476_v52  ;;  %v15092_v18 = vpop.f32.mrb[125].mxu1  ;;  %v13845_v52 = vld [vmem:[%s19395_s1 + $0x80] sm:$0xff] }
0x2739   :  { %v12754_v17 = vpop.f32.mrb[126].mxu1 }
0x273a   :  { %v12755_v0 = vadd.f32 %v12754_v17, %v12479_v13  ;;  %v15093_v33 = vpop.f32.mrb[127].mxu1 }
0x273b   :  { %v12800_v6 = vpop.f32.mrb[140].mxu0 }
0x273c   :  { %v12801_v58 = vadd.f32 %v12800_v6, %v12545_v7  ;;  %v15098_v41 = vpop.f32.mrb[141].mxu0 }
0x273d   :  { %v12803_v59 = vpop.f32.mrb[142].mxu0 }
0x273e   :  { %v12809_v5 = vadd.f32 %v12801_v58, %v12752_v31  ;;  %v12804_v19 = vadd.f32 %v12803_v59, %v12548_v23  ;;  %v15099_v21 = vpop.f32.mrb[143].mxu0 }
0x2740   :  { %v12811_v57 = vadd.f32 %v12809_v5, %v12807_v50  ;;  %v12810_v49 = vadd.f32 %v12804_v19, %v12755_v0 }
0x2742   :  { %v12812_v11 = vadd.f32 %v12810_v49, %v12808_v54  ;;  %v12813_v48 = vadd.f32 %v12811_v57, %v12604_v34 }
0x2744   :  { %v12828_v2 = vadd.f32 %v12821_v12, %v12813_v48  ;;  %v12814_v24 = vadd.f32 %v12812_v11, %v12607_v42 }
0x2746   :  { %12836 = vadd.xlane.f32.xlu1 %v12828_v2  ;;  %v12829_v37 = vadd.f32 %v12826_v36, %v12814_v24 }
0x2748   :  { %12838 = vadd.xlane.f32.xlu0 %v12829_v37 }
0x2757   :  { %12865 = vperm.xlu1 %15509, %v13842_v4  }
0x275e   :  { %12860 = vperm.xlu0 %15508, %v13841_v62  }
0x27d3   :  { %v12837_v14 = vpop.xlane.xlu1 %12836 }
0x27d4   :  { %v12840_v20 = vmul.f32 0.0078125, %v12837_v14 }
0x27d5   :  { %v12839_v10 = vpop.xlane.xlu0 %12838 }
0x27d6   :  { %v12842_v28 = vsub.f32 %v12828_v2, %v12840_v20  ;;  %v12841_v53 = vmul.f32 0.0078125, %v12839_v10 }
0x27d7   :  { %v12866_v13 = vpop.permute.xlu1 %12865 }
0x27d8   :  { %v12843_v3 = vsub.f32 %v12829_v37, %v12841_v53  ;;  %v12844_v16 = vmul.f32 %v12842_v28, %v12842_v28 }
0x27da   :  { %12846 = vadd.xlane.f32.xlu0 %v12844_v16  ;;  %v12845_v35 = vmul.f32 %v12843_v3, %v12843_v3 }
0x27dc   :  { %12848 = vadd.xlane.f32.xlu1 %v12845_v35 }
0x27dd   :  { %v12861_v46 = vpop.permute.xlu0 %12860 }
0x27ed   :  { %12872 = vperm.xlu1 %15509, %v13843_v39  }
0x27f0   :  { %12877 = vperm.xlu0 %15508, %v13844_v25  }
0x27f1   :  { %12902 = vperm.xlu1 %15509, %v13845_v52  }
0x2867   :  { %v12847_v56 = vpop.xlane.xlu0 %12846 }
0x2868   :  { %v12850_v7 = vmul.f32 0.0078125, %v12847_v56 }
0x2869   :  { %v12849_v9 = vpop.xlane.xlu1 %12848 }
0x286a   :  { %v12852_v23 = vadd.f32 1e-05, %v12850_v7  ;;  %v12851_v47 = vmul.f32 0.0078125, %v12849_v9 }
0x286c   :  { %15883 = vrsqrt.f32 %v12852_v23  ;;  %v12853_v34 = vadd.f32 1e-05, %v12851_v47 }
0x286d   :  { %v12873_v8 = vpop.permute.xlu1 %12872 }
0x286e   :  { %15885 = vrsqrt.f32 %v12853_v34 }
0x286f   :  { %v12878_v26 = vpop.permute.xlu0 %12877 }
0x2871   :  { %v12903_v58 = vpop.permute.xlu1 %12902 }
0x2876   :  { %v15884_v43 = vpop.eup %15883 }
0x2877   :  { %v12856_v42 = vmul.f32 %v15884_v43, %v12842_v28 }
0x2878   :  { %v15886_v38 = vpop.eup %15885 }
0x2879   :  { %v12868_v44 = vmul.f32 %v12861_v46, %v12856_v42  ;;  %v12857_v45 = vmul.f32 %v15886_v38, %v12843_v3 }
0x287b   :  { %v12880_v61 = vadd.f32 %v12873_v8, %v12868_v44  ;;  %v12869_v40 = vmul.f32 %v12866_v13, %v12857_v45 }
0x287d   :  { %v12882_v27 = vadd.f32 %v12880_v61, %v19000_v1  ;;  %v12881_v15 = vadd.f32 %v12878_v26, %v12869_v40 }
0x287f   :  { %v12884_v55 = vmul.f32 0.5, %v12882_v27  ;;  %v12883_v51 = vadd.f32 %v12881_v15, %v19002_v29  ;;  %v12896_v29 = vld [vmem:[%s19345_s21] sm:$0xf] }
0x2881   :  { %15887 = vtanh.f32 %v12884_v55  ;;  %v12885_v50 = vmul.f32 0.5, %v12883_v51 }
0x2883   :  { %15889 = vtanh.f32 %v12885_v50 }
0x288b   :  { %v15888_v22 = vpop.eup %15887 }
0x288c   :  { %v12888_v30 = vmul.f32 0.5, %v15888_v22 }
0x288d   :  { %v15890_v63 = vpop.eup %15889 }
0x288e   :  { %v12890_v54 = vadd.f32 0.5, %v12888_v30  ;;  %v12889_v31 = vmul.f32 0.5, %v15890_v63 }
0x2890   :  { %v12892_v18 = vmul.f32 %v12890_v54, %v12882_v27  ;;  %v12891_v17 = vadd.f32 0.5, %v12889_v31 }
0x2892   :  { %v12893_v0 = vmul.f32 %v12891_v17, %v12883_v51  ;;  %v12894_v33 = vadd.f32 %v12892_v18, %v18163_v32 }
0x2894   :  { %v12895_v6 = vadd.f32 %v12893_v0, %v18165_v60 }
0x2896   :  { %v12897_v1 = vpack.c.bf16 %v12895_v6, %v12894_v33 }
0x2898   :  { %15101 = vmatpush3.bf16.msra.mxu1 %v12897_v1 }
0x289b   :  { %15103 = vmatmul.mubr.msk.bf16.vlgmr.msra.gmra.mrb[128].mxu1 %vm1596_vm11, %v12896_v29 }
0x296e   :  { %v12942_v41 = vpop.f32.mrb[128].mxu1 }
0x296f   :  { %v12943_v59 = vadd.f32 %v12942_v41, %v12903_v58  ;;  %v15104_v5 = vpop.f32.mrb[129].mxu1 }
0x2970   :  { %v12945_v19 = vpop.f32.mrb[130].mxu1 }
0x2971   :  { %12948 = vst [vmem:[%s19346_s22] sm:$0xff] %v12943_v59  ;;  %v15105_v32 = vpop.f32.mrb[131].mxu1 }

</bundles_post_ra>
